<compile_context>
chip_gen: v6e
topology: v6e:2x2x1
jax: 0.10.0
libtpu: 0.0.40
codegen_flags: <defaults>
</compile_context>

<pallas_src>
import functools

import jax
import jax.numpy as jnp
from jax.experimental import pallas as pl
from jax.experimental.pallas import tpu as pltpu

_EPS = 1e-5
_K, _STRIDE = 5, 2
_C1, _C2, _C3 = 32, 64, 64


# ------------------------------ static geometry ------------------------------ #

def _conv2d_size_out(size, kernel_size=_K, stride=_STRIDE):
    return (size - (kernel_size - 1) - 1) // stride + 1


def _round_up(x, m):
    return (x + m - 1) // m * m


def _geometry(h, w):
    """Row geometry of the flattened 'stride-1 conv with junk columns' scheme.

    Activations live on the flat conv1 grid (row = h1*Wo1 + w1).  A stride-2
    conv becomes a stride-1 conv over that flat grid (tap offset kh*Wo1 + kw),
    whose output is only *valid* at rows that never wrap a scan line; the rows
    that feed the next layer are always valid by construction.
    """
    ho1, wo1 = _conv2d_size_out(h), _conv2d_size_out(w)
    ho2, wo2 = _conv2d_size_out(ho1), _conv2d_size_out(wo1)
    ho3, wo3 = _conv2d_size_out(ho2), _conv2d_size_out(wo2)
    # true conv3 outputs sit at flat rows 4*h3*Wo1 + 4*w3 of the conv3 junk grid
    head_rows = tuple(4 * h3 * wo1 + 4 * w3
                      for h3 in range(ho3) for w3 in range(wo3))
    max_off2 = (_K - 1) * wo1 + (_K - 1)          # last conv2 tap offset
    max_off3 = 2 * max_off2                       # last conv3 tap offset
    m3 = _round_up(head_rows[-1] + 8, 8)          # conv3 junk-grid rows computed
    m2 = _round_up(max_off3 + m3, 8)              # conv2 junk-grid rows computed
    m1 = _round_up(max(ho1 * wo1, max_off2 + m2), 8)   # conv1 rows (zero padded)
    k1 = _round_up(_K * _K * 6, 128)              # conv1 im2col K, lane padded
    return dict(ho1=ho1, wo1=wo1, ho2=ho2, wo2=wo2, ho3=ho3, wo3=wo3,
                head_rows=head_rows, m1=m1, m2=m2, m3=m3, k1=k1)


# ------------------------------- Pallas kernel ------------------------------- #

def _make_dqn_kernel(geo):
    wo1 = geo["wo1"]
    m2, m3 = geo["m2"], geo["m3"]
    head_rows = geo["head_rows"]

    def kernel(p_ref, w1_ref, b1_ref, w2_ref, b2_ref, w3_ref, b3_ref,
               wh_ref, bh_ref, o_ref, x2_ref, x3_ref, xh_ref):
        f32, bf16 = jnp.float32, jnp.bfloat16

        # ---- conv1 + bn1 + relu : one GEMM over the wrapper-built patches ----
        a1 = jnp.dot(p_ref[0], w1_ref[...], preferred_element_type=f32)
        a1 = jnp.maximum(a1 + b1_ref[...], 0.0)                    # (m1, 32) f32

        # ---- conv2 + bn2 + relu ----
        # stride-1 conv over the flat conv1 grid: each tap is a unit-stride row
        # slab of a1 written into its own 32-lane window of the VMEM scratch.
        for kh in range(_K):
            for kw in range(_K):
                t = kh * _K + kw
                off = kh * wo1 + kw
                x2_ref[:, t * _C1:(t + 1) * _C1] = (
                    a1[off:off + m2, :].astype(bf16))
        a2 = jnp.dot(x2_ref[...], w2_ref[...], preferred_element_type=f32)
        a2 = jnp.maximum(a2 + b2_ref[...], 0.0)                    # (m2, 64) f32

        # ---- conv3 + bn3 + relu ----
        # true conv2 outputs live at even/even flat rows, so tap offsets double.
        for kh in range(_K):
            for kw in range(_K):
                t = kh * _K + kw
                off = 2 * (kh * wo1 + kw)
                x3_ref[:, t * _C2:(t + 1) * _C2] = (
                    a2[off:off + m3, :].astype(bf16))
        a3 = jnp.dot(x3_ref[...], w3_ref[...], preferred_element_type=f32)
        a3 = jnp.maximum(a3 + b3_ref[...], 0.0)                    # (m3, 64) f32

        # ---- linear head : single (8, P*64) x (P*64, 128) GEMM ----
        # Row 0 of each 8-row slab is the true conv3 feature; rows 1..7 are
        # computed-but-unused filler that keeps the GEMM sublane aligned.
        for p, r in enumerate(head_rows):
            xh_ref[:, p * _C3:(p + 1) * _C3] = a3[r:r + 8, :].astype(bf16)
        res = jnp.dot(xh_ref[...], wh_ref[...], preferred_element_type=f32)
        o_ref[0] = res[0:1, :] + bh_ref[...]

    return kernel


# -------------------------------- JAX wrapper -------------------------------- #

def _im2col(x_nhwc, k, stride):
    """(N,H,W,C) -> (N, Ho*Wo, k*k*C), patch feature order (kh, kw, cin)."""
    n, hh, ww, c = x_nhwc.shape
    ho = (hh - k) // stride + 1
    wo = (ww - k) // stride + 1
    cols = []
    for kh in range(k):
        for kw in range(k):
            cols.append(
                x_nhwc[:, kh:kh + stride * ho:stride, kw:kw + stride * wo:stride, :])
    return jnp.concatenate(cols, axis=-1).reshape(n, ho * wo, k * k * c)


@functools.partial(jax.jit, static_argnames=("h", "w", "outputs"))
def dqn_forward(x_nchw, ops, *, h, w, outputs):
    geo = _geometry(h, w)
    m1, m2, m3, k1 = geo["m1"], geo["m2"], geo["m3"], geo["k1"]
    p_head = len(geo["head_rows"])
    n = x_nchw.shape[0]

    x = jnp.transpose(x_nchw, (0, 2, 3, 1))                        # NCHW -> NHWC
    patches = _im2col(x, _K, _STRIDE)                              # (n, 324, 150)
    patches = jnp.pad(patches, ((0, 0),
                                (0, m1 - patches.shape[1]),
                                (0, k1 - patches.shape[2])))
    patches = patches.astype(jnp.bfloat16)

    out_pad = ops["wh"].shape[-1]
    flops = 2 * n * (m1 * k1 * _C1
                     + m2 * (_K * _K * _C1) * _C2
                     + m3 * (_K * _K * _C2) * _C3
                     + 8 * (p_head * _C3) * out_pad)
    bytes_accessed = (patches.size * 2
                      + sum(v.size * v.dtype.itemsize for v in ops.values())
                      + n * out_pad * 4)

    const = lambda b: (0, 0)
    out = pl.pallas_call(
        _make_dqn_kernel(geo),
        out_shape=jax.ShapeDtypeStruct((n, 1, out_pad), jnp.float32),
        grid=(n,),
        in_specs=[
            pl.BlockSpec((1, m1, k1), lambda b: (b, 0, 0)),        # per-sample patches
            pl.BlockSpec(ops["w1"].shape, const),
            pl.BlockSpec(ops["b1"].shape, const),
            pl.BlockSpec(ops["w2"].shape, const),
            pl.BlockSpec(ops["b2"].shape, const),
            pl.BlockSpec(ops["w3"].shape, const),
            pl.BlockSpec(ops["b3"].shape, const),
            pl.BlockSpec(ops["wh"].shape, const),
            pl.BlockSpec(ops["bh"].shape, const),
        ],
        out_specs=pl.BlockSpec((1, 1, out_pad), lambda b: (b, 0, 0)),
        scratch_shapes=[
            pltpu.VMEM((m2, _K * _K * _C1), jnp.bfloat16),         # conv2 im2col
            pltpu.VMEM((m3, _K * _K * _C2), jnp.bfloat16),         # conv3 im2col
            pltpu.VMEM((8, p_head * _C3), jnp.bfloat16),           # head features
        ],
        compiler_params=pltpu.CompilerParams(
            dimension_semantics=("parallel",)),
        cost_estimate=pl.CostEstimate(flops=flops, transcendentals=0,
                                      bytes_accessed=bytes_accessed),
    )(patches, ops["w1"], ops["b1"], ops["w2"], ops["b2"],
      ops["w3"], ops["b3"], ops["wh"], ops["bh"])
    return out[:, 0, :outputs]


# --------------------------- parameter preparation --------------------------- #

def prepare_operands(params, h, w, outputs):
    """Fold eval-mode BN into weights/bias, flatten/pad to the kernel layout.

    Operands are batch-independent (the previous version baked the batch size
    into its gather matrices; that hazard is gone).
    """
    bf16, f32 = jnp.bfloat16, jnp.float32
    geo = _geometry(h, w)

    def fold(p):
        scale = p["bn_gamma"] / jnp.sqrt(p["bn_var"] + _EPS)
        bias = (p["b"] - p["bn_mean"]) * scale + p["bn_beta"]
        return scale, bias

    # conv1: single GEMM over the im2col patch matrix; K padded to 256 lanes.
    pc1 = params["conv1"]
    s1, b1 = fold(pc1)
    cin1 = pc1["w"].shape[2]
    k1 = _K * _K * cin1
    w1 = (pc1["w"] * s1).reshape(k1, _C1)
    w1 = jnp.pad(w1, ((0, geo["k1"] - k1), (0, 0)))

    # conv2 / conv3: K flattened in (kh, kw, cin) order to match the in-kernel
    # tap-slab lane order; BN scale folded into the output channels.
    def fold_conv(p):
        scale, bias = fold(p)
        wk = p["w"] * scale
        return wk.reshape(-1, wk.shape[3]), bias

    w2, b2 = fold_conv(params["conv2"])
    w3, b3 = fold_conv(params["conv3"])

    # head: rows reordered from PyTorch's (c, h, w) flatten order to the
    # kernel's (h, w, c) gather order; output lanes padded to 128.
    ho3, wo3 = geo["ho3"], geo["wo3"]
    out_pad = _round_up(outputs, 128)
    wh = params["head"]["w"].reshape(_C3, ho3, wo3, outputs)
    wh = jnp.transpose(wh, (1, 2, 0, 3)).reshape(ho3 * wo3 * _C3, outputs)
    wh = jnp.pad(wh, ((0, 0), (0, out_pad - outputs)))
    bh = jnp.zeros((1, out_pad), f32).at[0, :outputs].set(params["head"]["b"])

    return dict(
        w1=w1.astype(bf16), b1=b1.reshape(1, -1).astype(f32),
        w2=w2.astype(bf16), b2=b2.reshape(1, -1).astype(f32),
        w3=w3.astype(bf16), b3=b3.reshape(1, -1).astype(f32),
        wh=wh.astype(bf16), bh=bh,
    )


# ----------------------------- parameter creation ---------------------------- #

def init_params(key, h, w, outputs):
    keys = jax.random.split(key, 16)

    def conv_p(kw_key, kb_key, km_key, cin, cout, ksz=_K):
        fan_in = ksz * ksz * cin
        return dict(
            w=jax.random.normal(kw_key, (ksz, ksz, cin, cout), jnp.float32)
              * (2.0 / fan_in) ** 0.5,
            b=jax.random.normal(kb_key, (cout,), jnp.float32) * 0.01,
            bn_gamma=jnp.ones((cout,), jnp.float32),
            bn_beta=jnp.zeros((cout,), jnp.float32),
            bn_mean=jax.random.normal(km_key, (cout,), jnp.float32) * 0.01,
            bn_var=jnp.ones((cout,), jnp.float32),
        )

    convw = _conv2d_size_out(_conv2d_size_out(_conv2d_size_out(w)))
    convh = _conv2d_size_out(_conv2d_size_out(_conv2d_size_out(h)))
    lin_in = convw * convh * _C3

    return dict(
        conv1=conv_p(keys[0], keys[1], keys[2], 6, _C1),
        conv2=conv_p(keys[3], keys[4], keys[5], _C1, _C2),
        conv3=conv_p(keys[6], keys[7], keys[8], _C2, _C3),
        head=dict(
            w=jax.random.normal(keys[9], (lin_in, outputs), jnp.float32)
              * (1.0 / lin_in) ** 0.5,
            b=jax.random.normal(keys[10], (outputs,), jnp.float32) * 0.01,
        ),
    )


# ------------------------------ pure-JAX reference --------------------------- #

def reference_forward(x_nchw, params):
    x = jnp.transpose(x_nchw, (0, 2, 3, 1))
    for name in ("conv1", "conv2", "conv3"):
        p = params[name]
        y = jax.lax.conv_general_dilated(
            x, p["w"], window_strides=(2, 2), padding="VALID",
            dimension_numbers=("NHWC", "HWIO", "NHWC"))
        y = y + p["b"]
        y = (y - p["bn_mean"]) / jnp.sqrt(p["bn_var"] + _EPS) \
            * p["bn_gamma"] + p["bn_beta"]
        x = jnp.maximum(y, 0.0)
    feat = jnp.transpose(x, (0, 3, 1, 2)).reshape(x.shape[0], -1)
    return feat @ params["head"]["w"] + params["head"]["b"]


# ------------------------------------ main ----------------------------------- #

if __name__ == "__main__":
    batch, h, w, outputs = 2, 40, 40, 2
    key = jax.random.PRNGKey(0)
    k_x, k_p = jax.random.split(key)

    x = jax.random.normal(k_x, (batch, 6, h, w), jnp.float32)   # NCHW, like PyTorch
    params = init_params(k_p, h, w, outputs)
    ops = prepare_operands(params, h, w, outputs)

    out = jax.block_until_ready(dqn_forward(x, ops, h=h, w=w, outputs=outputs))
    ref = jax.block_until_ready(reference_forward(x, params))

    assert out.shape == (batch, outputs), out.shape
    # bf16 GEMM operands with f32 accumulation vs. an all-f32 reference.
    assert jnp.allclose(out, ref, rtol=5e-2, atol=5e-2), (out, ref)

    print("KERNEL_OK")
</pallas_src>

<mosaic_0001>
module attributes {stable_mosaic.version = 11 : i64} {
  func.func @kernel(%arg0: i32, %arg1: memref<1x328x256xbf16, #tpu.memory_space<vmem>>, %arg2: memref<256x32xbf16, #tpu.memory_space<vmem>>, %arg3: memref<1x32xf32, #tpu.memory_space<vmem>>, %arg4: memref<800x64xbf16, #tpu.memory_space<vmem>>, %arg5: memref<1x64xf32, #tpu.memory_space<vmem>>, %arg6: memref<1600x64xbf16, #tpu.memory_space<vmem>>, %arg7: memref<1x64xf32, #tpu.memory_space<vmem>>, %arg8: memref<256x128xbf16, #tpu.memory_space<vmem>>, %arg9: memref<1x128xf32, #tpu.memory_space<vmem>>, %arg10: memref<1x1x128xf32, #tpu.memory_space<vmem>>, %arg11: memref<240x800xbf16, #tpu.memory_space<vmem>>, %arg12: memref<88x1600xbf16, #tpu.memory_space<vmem>>, %arg13: memref<8x256xbf16, #tpu.memory_space<vmem>>) attributes {dimension_semantics = [#tpu.dimension_semantics<parallel>], iteration_bounds = array<i64: 2>, scalar_prefetch = 0 : i64, scratch_operands = 3 : i64, tpu.core_type = #tpu.core_type<tc>, window_params = [{transform_indices = @transform_0, window_bounds = array<i64: 1, 328, 256>}, {pipeline_mode = #tpu.pipeline_mode<synchronous>, transform_indices = @transform_1, window_bounds = array<i64: 256, 32>}, {pipeline_mode = #tpu.pipeline_mode<synchronous>, transform_indices = @transform_2, window_bounds = array<i64: 1, 32>}, {pipeline_mode = #tpu.pipeline_mode<synchronous>, transform_indices = @transform_3, window_bounds = array<i64: 800, 64>}, {pipeline_mode = #tpu.pipeline_mode<synchronous>, transform_indices = @transform_4, window_bounds = array<i64: 1, 64>}, {pipeline_mode = #tpu.pipeline_mode<synchronous>, transform_indices = @transform_5, window_bounds = array<i64: 1600, 64>}, {pipeline_mode = #tpu.pipeline_mode<synchronous>, transform_indices = @transform_6, window_bounds = array<i64: 1, 64>}, {pipeline_mode = #tpu.pipeline_mode<synchronous>, transform_indices = @transform_7, window_bounds = array<i64: 256, 128>}, {pipeline_mode = #tpu.pipeline_mode<synchronous>, transform_indices = @transform_8, window_bounds = array<i64: 1, 128>}, {transform_indices = @transform_9, window_bounds = array<i64: 1, 1, 128>}]} {
    %c0 = arith.constant 0 : index
    %c0_0 = arith.constant 0 : index
    %c0_1 = arith.constant 0 : index
    %0 = vector.load %arg1[%c0, %c0_0, %c0_1] : memref<1x328x256xbf16, #tpu.memory_space<vmem>>, vector<1x328x256xbf16>
    %1 = vector.shape_cast %0 : vector<1x328x256xbf16> to vector<328x256xbf16>
    %c0_2 = arith.constant 0 : index
    %c0_3 = arith.constant 0 : index
    %2 = vector.load %arg2[%c0_2, %c0_3] : memref<256x32xbf16, #tpu.memory_space<vmem>>, vector<256x32xbf16>
    %cst = arith.constant dense<0.000000e+00> : vector<328x32xf32>
    %3 = tpu.matmul %1, %2, %cst {dimension_numbers = #tpu.dot_dimension_numbers<[1], [0], [0], [1], [0, 0, 1, 1], [], []>} : vector<328x256xbf16>, vector<256x32xbf16>, vector<328x32xf32> -> vector<328x32xf32>
    %c0_4 = arith.constant 0 : index
    %c0_5 = arith.constant 0 : index
    %4 = vector.load %arg3[%c0_4, %c0_5] : memref<1x32xf32, #tpu.memory_space<vmem>>, vector<1x32xf32>
    %5 = vector.broadcast %4 : vector<1x32xf32> to vector<328x32xf32>
    %6 = arith.addf %3, %5 : vector<328x32xf32>
    %cst_6 = arith.constant 0.000000e+00 : f32
    %7 = vector.broadcast %cst_6 : f32 to vector<328x32xf32>
    %8 = arith.maximumf %6, %7 : vector<328x32xf32>
    %9 = vector.extract_strided_slice %8 {offsets = [0, 0], sizes = [240, 32], strides = [1, 1]} : vector<328x32xf32> to vector<240x32xf32>
    %10 = arith.truncf %9 : vector<240x32xf32> to vector<240x32xbf16>
    %c0_7 = arith.constant 0 : index
    %c0_8 = arith.constant 0 : index
    %11 = vector.load %arg11[%c0_7, %c0_8] : memref<240x800xbf16, #tpu.memory_space<vmem>>, vector<240x32xbf16>
    tpu.vector_store %arg11[%c0_7, %c0_8], %10 {strides = array<i32>} : memref<240x800xbf16, #tpu.memory_space<vmem>>, vector<240x32xbf16>,
    %12 = vector.extract_strided_slice %8 {offsets = [1, 0], sizes = [240, 32], strides = [1, 1]} : vector<328x32xf32> to vector<240x32xf32>
    %13 = arith.truncf %12 : vector<240x32xf32> to vector<240x32xbf16>
    %c0_9 = arith.constant 0 : index
    %c32 = arith.constant 32 : index
    %14 = vector.load %arg11[%c0_9, %c32] : memref<240x800xbf16, #tpu.memory_space<vmem>>, vector<240x32xbf16>
    tpu.vector_store %arg11[%c0_9, %c32], %13 {strides = array<i32>} : memref<240x800xbf16, #tpu.memory_space<vmem>>, vector<240x32xbf16>,
    %15 = vector.extract_strided_slice %8 {offsets = [2, 0], sizes = [240, 32], strides = [1, 1]} : vector<328x32xf32> to vector<240x32xf32>
    %16 = arith.truncf %15 : vector<240x32xf32> to vector<240x32xbf16>
    %c0_10 = arith.constant 0 : index
    %c64 = arith.constant 64 : index
    %17 = vector.load %arg11[%c0_10, %c64] : memref<240x800xbf16, #tpu.memory_space<vmem>>, vector<240x32xbf16>
    tpu.vector_store %arg11[%c0_10, %c64], %16 {strides = array<i32>} : memref<240x800xbf16, #tpu.memory_space<vmem>>, vector<240x32xbf16>,
    %18 = vector.extract_strided_slice %8 {offsets = [3, 0], sizes = [240, 32], strides = [1, 1]} : vector<328x32xf32> to vector<240x32xf32>
    %19 = arith.truncf %18 : vector<240x32xf32> to vector<240x32xbf16>
    %c0_11 = arith.constant 0 : index
    %c96 = arith.constant 96 : index
    %20 = vector.load %arg11[%c0_11, %c96] : memref<240x800xbf16, #tpu.memory_space<vmem>>, vector<240x32xbf16>
    tpu.vector_store %arg11[%c0_11, %c96], %19 {strides = array<i32>} : memref<240x800xbf16, #tpu.memory_space<vmem>>, vector<240x32xbf16>,
    %21 = vector.extract_strided_slice %8 {offsets = [4, 0], sizes = [240, 32], strides = [1, 1]} : vector<328x32xf32> to vector<240x32xf32>
    %22 = arith.truncf %21 : vector<240x32xf32> to vector<240x32xbf16>
    %c0_12 = arith.constant 0 : index
    %c128 = arith.constant 128 : index
    %23 = vector.load %arg11[%c0_12, %c128] : memref<240x800xbf16, #tpu.memory_space<vmem>>, vector<240x32xbf16>
    tpu.vector_store %arg11[%c0_12, %c128], %22 {strides = array<i32>} : memref<240x800xbf16, #tpu.memory_space<vmem>>, vector<240x32xbf16>,
    %24 = vector.extract_strided_slice %8 {offsets = [18, 0], sizes = [240, 32], strides = [1, 1]} : vector<328x32xf32> to vector<240x32xf32>
    %25 = arith.truncf %24 : vector<240x32xf32> to vector<240x32xbf16>
    %c0_13 = arith.constant 0 : index
    %c160 = arith.constant 160 : index
    %26 = vector.load %arg11[%c0_13, %c160] : memref<240x800xbf16, #tpu.memory_space<vmem>>, vector<240x32xbf16>
    tpu.vector_store %arg11[%c0_13, %c160], %25 {strides = array<i32>} : memref<240x800xbf16, #tpu.memory_space<vmem>>, vector<240x32xbf16>,
    %27 = vector.extract_strided_slice %8 {offsets = [19, 0], sizes = [240, 32], strides = [1, 1]} : vector<328x32xf32> to vector<240x32xf32>
    %28 = arith.truncf %27 : vector<240x32xf32> to vector<240x32xbf16>
    %c0_14 = arith.constant 0 : index
    %c192 = arith.constant 192 : index
    %29 = vector.load %arg11[%c0_14, %c192] : memref<240x800xbf16, #tpu.memory_space<vmem>>, vector<240x32xbf16>
    tpu.vector_store %arg11[%c0_14, %c192], %28 {strides = array<i32>} : memref<240x800xbf16, #tpu.memory_space<vmem>>, vector<240x32xbf16>,
    %30 = vector.extract_strided_slice %8 {offsets = [20, 0], sizes = [240, 32], strides = [1, 1]} : vector<328x32xf32> to vector<240x32xf32>
    %31 = arith.truncf %30 : vector<240x32xf32> to vector<240x32xbf16>
    %c0_15 = arith.constant 0 : index
    %c224 = arith.constant 224 : index
    %32 = vector.load %arg11[%c0_15, %c224] : memref<240x800xbf16, #tpu.memory_space<vmem>>, vector<240x32xbf16>
    tpu.vector_store %arg11[%c0_15, %c224], %31 {strides = array<i32>} : memref<240x800xbf16, #tpu.memory_space<vmem>>, vector<240x32xbf16>,
    %33 = vector.extract_strided_slice %8 {offsets = [21, 0], sizes = [240, 32], strides = [1, 1]} : vector<328x32xf32> to vector<240x32xf32>
    %34 = arith.truncf %33 : vector<240x32xf32> to vector<240x32xbf16>
    %c0_16 = arith.constant 0 : index
    %c256 = arith.constant 256 : index
    %35 = vector.load %arg11[%c0_16, %c256] : memref<240x800xbf16, #tpu.memory_space<vmem>>, vector<240x32xbf16>
    tpu.vector_store %arg11[%c0_16, %c256], %34 {strides = array<i32>} : memref<240x800xbf16, #tpu.memory_space<vmem>>, vector<240x32xbf16>,
    %36 = vector.extract_strided_slice %8 {offsets = [22, 0], sizes = [240, 32], strides = [1, 1]} : vector<328x32xf32> to vector<240x32xf32>
    %37 = arith.truncf %36 : vector<240x32xf32> to vector<240x32xbf16>
    %c0_17 = arith.constant 0 : index
    %c288 = arith.constant 288 : index
    %38 = vector.load %arg11[%c0_17, %c288] : memref<240x800xbf16, #tpu.memory_space<vmem>>, vector<240x32xbf16>
    tpu.vector_store %arg11[%c0_17, %c288], %37 {strides = array<i32>} : memref<240x800xbf16, #tpu.memory_space<vmem>>, vector<240x32xbf16>,
    %39 = vector.extract_strided_slice %8 {offsets = [36, 0], sizes = [240, 32], strides = [1, 1]} : vector<328x32xf32> to vector<240x32xf32>
    %40 = arith.truncf %39 : vector<240x32xf32> to vector<240x32xbf16>
    %c0_18 = arith.constant 0 : index
    %c320 = arith.constant 320 : index
    %41 = vector.load %arg11[%c0_18, %c320] : memref<240x800xbf16, #tpu.memory_space<vmem>>, vector<240x32xbf16>
    tpu.vector_store %arg11[%c0_18, %c320], %40 {strides = array<i32>} : memref<240x800xbf16, #tpu.memory_space<vmem>>, vector<240x32xbf16>,
    %42 = vector.extract_strided_slice %8 {offsets = [37, 0], sizes = [240, 32], strides = [1, 1]} : vector<328x32xf32> to vector<240x32xf32>
    %43 = arith.truncf %42 : vector<240x32xf32> to vector<240x32xbf16>
    %c0_19 = arith.constant 0 : index
    %c352 = arith.constant 352 : index
    %44 = vector.load %arg11[%c0_19, %c352] : memref<240x800xbf16, #tpu.memory_space<vmem>>, vector<240x32xbf16>
    tpu.vector_store %arg11[%c0_19, %c352], %43 {strides = array<i32>} : memref<240x800xbf16, #tpu.memory_space<vmem>>, vector<240x32xbf16>,
    %45 = vector.extract_strided_slice %8 {offsets = [38, 0], sizes = [240, 32], strides = [1, 1]} : vector<328x32xf32> to vector<240x32xf32>
    %46 = arith.truncf %45 : vector<240x32xf32> to vector<240x32xbf16>
    %c0_20 = arith.constant 0 : index
    %c384 = arith.constant 384 : index
    %47 = vector.load %arg11[%c0_20, %c384] : memref<240x800xbf16, #tpu.memory_space<vmem>>, vector<240x32xbf16>
    tpu.vector_store %arg11[%c0_20, %c384], %46 {strides = array<i32>} : memref<240x800xbf16, #tpu.memory_space<vmem>>, vector<240x32xbf16>,
    %48 = vector.extract_strided_slice %8 {offsets = [39, 0], sizes = [240, 32], strides = [1, 1]} : vector<328x32xf32> to vector<240x32xf32>
    %49 = arith.truncf %48 : vector<240x32xf32> to vector<240x32xbf16>
    %c0_21 = arith.constant 0 : index
    %c416 = arith.constant 416 : index
    %50 = vector.load %arg11[%c0_21, %c416] : memref<240x800xbf16, #tpu.memory_space<vmem>>, vector<240x32xbf16>
    tpu.vector_store %arg11[%c0_21, %c416], %49 {strides = array<i32>} : memref<240x800xbf16, #tpu.memory_space<vmem>>, vector<240x32xbf16>,
    %51 = vector.extract_strided_slice %8 {offsets = [40, 0], sizes = [240, 32], strides = [1, 1]} : vector<328x32xf32> to vector<240x32xf32>
    %52 = arith.truncf %51 : vector<240x32xf32> to vector<240x32xbf16>
    %c0_22 = arith.constant 0 : index
    %c448 = arith.constant 448 : index
    %53 = vector.load %arg11[%c0_22, %c448] : memref<240x800xbf16, #tpu.memory_space<vmem>>, vector<240x32xbf16>
    tpu.vector_store %arg11[%c0_22, %c448], %52 {strides = array<i32>} : memref<240x800xbf16, #tpu.memory_space<vmem>>, vector<240x32xbf16>,
    %54 = vector.extract_strided_slice %8 {offsets = [54, 0], sizes = [240, 32], strides = [1, 1]} : vector<328x32xf32> to vector<240x32xf32>
    %55 = arith.truncf %54 : vector<240x32xf32> to vector<240x32xbf16>
    %c0_23 = arith.constant 0 : index
    %c480 = arith.constant 480 : index
    %56 = vector.load %arg11[%c0_23, %c480] : memref<240x800xbf16, #tpu.memory_space<vmem>>, vector<240x32xbf16>
    tpu.vector_store %arg11[%c0_23, %c480], %55 {strides = array<i32>} : memref<240x800xbf16, #tpu.memory_space<vmem>>, vector<240x32xbf16>,
    %57 = vector.extract_strided_slice %8 {offsets = [55, 0], sizes = [240, 32], strides = [1, 1]} : vector<328x32xf32> to vector<240x32xf32>
    %58 = arith.truncf %57 : vector<240x32xf32> to vector<240x32xbf16>
    %c0_24 = arith.constant 0 : index
    %c512 = arith.constant 512 : index
    %59 = vector.load %arg11[%c0_24, %c512] : memref<240x800xbf16, #tpu.memory_space<vmem>>, vector<240x32xbf16>
    tpu.vector_store %arg11[%c0_24, %c512], %58 {strides = array<i32>} : memref<240x800xbf16, #tpu.memory_space<vmem>>, vector<240x32xbf16>,
    %60 = vector.extract_strided_slice %8 {offsets = [56, 0], sizes = [240, 32], strides = [1, 1]} : vector<328x32xf32> to vector<240x32xf32>
    %61 = arith.truncf %60 : vector<240x32xf32> to vector<240x32xbf16>
    %c0_25 = arith.constant 0 : index
    %c544 = arith.constant 544 : index
    %62 = vector.load %arg11[%c0_25, %c544] : memref<240x800xbf16, #tpu.memory_space<vmem>>, vector<240x32xbf16>
    tpu.vector_store %arg11[%c0_25, %c544], %61 {strides = array<i32>} : memref<240x800xbf16, #tpu.memory_space<vmem>>, vector<240x32xbf16>,
    %63 = vector.extract_strided_slice %8 {offsets = [57, 0], sizes = [240, 32], strides = [1, 1]} : vector<328x32xf32> to vector<240x32xf32>
    %64 = arith.truncf %63 : vector<240x32xf32> to vector<240x32xbf16>
    %c0_26 = arith.constant 0 : index
    %c576 = arith.constant 576 : index
    %65 = vector.load %arg11[%c0_26, %c576] : memref<240x800xbf16, #tpu.memory_space<vmem>>, vector<240x32xbf16>
    tpu.vector_store %arg11[%c0_26, %c576], %64 {strides = array<i32>} : memref<240x800xbf16, #tpu.memory_space<vmem>>, vector<240x32xbf16>,
    %66 = vector.extract_strided_slice %8 {offsets = [58, 0], sizes = [240, 32], strides = [1, 1]} : vector<328x32xf32> to vector<240x32xf32>
    %67 = arith.truncf %66 : vector<240x32xf32> to vector<240x32xbf16>
    %c0_27 = arith.constant 0 : index
    %c608 = arith.constant 608 : index
    %68 = vector.load %arg11[%c0_27, %c608] : memref<240x800xbf16, #tpu.memory_space<vmem>>, vector<240x32xbf16>
    tpu.vector_store %arg11[%c0_27, %c608], %67 {strides = array<i32>} : memref<240x800xbf16, #tpu.memory_space<vmem>>, vector<240x32xbf16>,
    %69 = vector.extract_strided_slice %8 {offsets = [72, 0], sizes = [240, 32], strides = [1, 1]} : vector<328x32xf32> to vector<240x32xf32>
    %70 = arith.truncf %69 : vector<240x32xf32> to vector<240x32xbf16>
    %c0_28 = arith.constant 0 : index
    %c640 = arith.constant 640 : index
    %71 = vector.load %arg11[%c0_28, %c640] : memref<240x800xbf16, #tpu.memory_space<vmem>>, vector<240x32xbf16>
    tpu.vector_store %arg11[%c0_28, %c640], %70 {strides = array<i32>} : memref<240x800xbf16, #tpu.memory_space<vmem>>, vector<240x32xbf16>,
    %72 = vector.extract_strided_slice %8 {offsets = [73, 0], sizes = [240, 32], strides = [1, 1]} : vector<328x32xf32> to vector<240x32xf32>
    %73 = arith.truncf %72 : vector<240x32xf32> to vector<240x32xbf16>
    %c0_29 = arith.constant 0 : index
    %c672 = arith.constant 672 : index
    %74 = vector.load %arg11[%c0_29, %c672] : memref<240x800xbf16, #tpu.memory_space<vmem>>, vector<240x32xbf16>
    tpu.vector_store %arg11[%c0_29, %c672], %73 {strides = array<i32>} : memref<240x800xbf16, #tpu.memory_space<vmem>>, vector<240x32xbf16>,
    %75 = vector.extract_strided_slice %8 {offsets = [74, 0], sizes = [240, 32], strides = [1, 1]} : vector<328x32xf32> to vector<240x32xf32>
    %76 = arith.truncf %75 : vector<240x32xf32> to vector<240x32xbf16>
    %c0_30 = arith.constant 0 : index
    %c704 = arith.constant 704 : index
    %77 = vector.load %arg11[%c0_30, %c704] : memref<240x800xbf16, #tpu.memory_space<vmem>>, vector<240x32xbf16>
    tpu.vector_store %arg11[%c0_30, %c704], %76 {strides = array<i32>} : memref<240x800xbf16, #tpu.memory_space<vmem>>, vector<240x32xbf16>,
    %78 = vector.extract_strided_slice %8 {offsets = [75, 0], sizes = [240, 32], strides = [1, 1]} : vector<328x32xf32> to vector<240x32xf32>
    %79 = arith.truncf %78 : vector<240x32xf32> to vector<240x32xbf16>
    %c0_31 = arith.constant 0 : index
    %c736 = arith.constant 736 : index
    %80 = vector.load %arg11[%c0_31, %c736] : memref<240x800xbf16, #tpu.memory_space<vmem>>, vector<240x32xbf16>
    tpu.vector_store %arg11[%c0_31, %c736], %79 {strides = array<i32>} : memref<240x800xbf16, #tpu.memory_space<vmem>>, vector<240x32xbf16>,
    %81 = vector.extract_strided_slice %8 {offsets = [76, 0], sizes = [240, 32], strides = [1, 1]} : vector<328x32xf32> to vector<240x32xf32>
    %82 = arith.truncf %81 : vector<240x32xf32> to vector<240x32xbf16>
    %c0_32 = arith.constant 0 : index
    %c768 = arith.constant 768 : index
    %83 = vector.load %arg11[%c0_32, %c768] : memref<240x800xbf16, #tpu.memory_space<vmem>>, vector<240x32xbf16>
    tpu.vector_store %arg11[%c0_32, %c768], %82 {strides = array<i32>} : memref<240x800xbf16, #tpu.memory_space<vmem>>, vector<240x32xbf16>,
    %c0_33 = arith.constant 0 : index
    %c0_34 = arith.constant 0 : index
    %84 = vector.load %arg11[%c0_33, %c0_34] : memref<240x800xbf16, #tpu.memory_space<vmem>>, vector<240x800xbf16>
    %c0_35 = arith.constant 0 : index
    %c0_36 = arith.constant 0 : index
    %85 = vector.load %arg4[%c0_35, %c0_36] : memref<800x64xbf16, #tpu.memory_space<vmem>>, vector<800x64xbf16>
    %cst_37 = arith.constant dense<0.000000e+00> : vector<240x64xf32>
    %86 = tpu.matmul %84, %85, %cst_37 {dimension_numbers = #tpu.dot_dimension_numbers<[1], [0], [0], [1], [0, 0, 1, 1], [], []>} : vector<240x800xbf16>, vector<800x64xbf16>, vector<240x64xf32> -> vector<240x64xf32>
    %c0_38 = arith.constant 0 : index
    %c0_39 = arith.constant 0 : index
    %87 = vector.load %arg5[%c0_38, %c0_39] : memref<1x64xf32, #tpu.memory_space<vmem>>, vector<1x64xf32>
    %88 = vector.broadcast %87 : vector<1x64xf32> to vector<240x64xf32>
    %89 = arith.addf %86, %88 : vector<240x64xf32>
    %cst_40 = arith.constant 0.000000e+00 : f32
    %90 = vector.broadcast %cst_40 : f32 to vector<240x64xf32>
    %91 = arith.maximumf %89, %90 : vector<240x64xf32>
    %92 = vector.extract_strided_slice %91 {offsets = [0, 0], sizes = [88, 64], strides = [1, 1]} : vector<240x64xf32> to vector<88x64xf32>
    %93 = arith.truncf %92 : vector<88x64xf32> to vector<88x64xbf16>
    %c0_41 = arith.constant 0 : index
    %c0_42 = arith.constant 0 : index
    %94 = vector.load %arg12[%c0_41, %c0_42] : memref<88x1600xbf16, #tpu.memory_space<vmem>>, vector<88x64xbf16>
    tpu.vector_store %arg12[%c0_41, %c0_42], %93 {strides = array<i32>} : memref<88x1600xbf16, #tpu.memory_space<vmem>>, vector<88x64xbf16>,
    %95 = vector.extract_strided_slice %91 {offsets = [2, 0], sizes = [88, 64], strides = [1, 1]} : vector<240x64xf32> to vector<88x64xf32>
    %96 = arith.truncf %95 : vector<88x64xf32> to vector<88x64xbf16>
    %c0_43 = arith.constant 0 : index
    %c64_44 = arith.constant 64 : index
    %97 = vector.load %arg12[%c0_43, %c64_44] : memref<88x1600xbf16, #tpu.memory_space<vmem>>, vector<88x64xbf16>
    tpu.vector_store %arg12[%c0_43, %c64_44], %96 {strides = array<i32>} : memref<88x1600xbf16, #tpu.memory_space<vmem>>, vector<88x64xbf16>,
    %98 = vector.extract_strided_slice %91 {offsets = [4, 0], sizes = [88, 64], strides = [1, 1]} : vector<240x64xf32> to vector<88x64xf32>
    %99 = arith.truncf %98 : vector<88x64xf32> to vector<88x64xbf16>
    %c0_45 = arith.constant 0 : index
    %c128_46 = arith.constant 128 : index
    %100 = vector.load %arg12[%c0_45, %c128_46] : memref<88x1600xbf16, #tpu.memory_space<vmem>>, vector<88x64xbf16>
    tpu.vector_store %arg12[%c0_45, %c128_46], %99 {strides = array<i32>} : memref<88x1600xbf16, #tpu.memory_space<vmem>>, vector<88x64xbf16>,
    %101 = vector.extract_strided_slice %91 {offsets = [6, 0], sizes = [88, 64], strides = [1, 1]} : vector<240x64xf32> to vector<88x64xf32>
    %102 = arith.truncf %101 : vector<88x64xf32> to vector<88x64xbf16>
    %c0_47 = arith.constant 0 : index
    %c192_48 = arith.constant 192 : index
    %103 = vector.load %arg12[%c0_47, %c192_48] : memref<88x1600xbf16, #tpu.memory_space<vmem>>, vector<88x64xbf16>
    tpu.vector_store %arg12[%c0_47, %c192_48], %102 {strides = array<i32>} : memref<88x1600xbf16, #tpu.memory_space<vmem>>, vector<88x64xbf16>,
    %104 = vector.extract_strided_slice %91 {offsets = [8, 0], sizes = [88, 64], strides = [1, 1]} : vector<240x64xf32> to vector<88x64xf32>
    %105 = arith.truncf %104 : vector<88x64xf32> to vector<88x64xbf16>
    %c0_49 = arith.constant 0 : index
    %c256_50 = arith.constant 256 : index
    %106 = vector.load %arg12[%c0_49, %c256_50] : memref<88x1600xbf16, #tpu.memory_space<vmem>>, vector<88x64xbf16>
    tpu.vector_store %arg12[%c0_49, %c256_50], %105 {strides = array<i32>} : memref<88x1600xbf16, #tpu.memory_space<vmem>>, vector<88x64xbf16>,
    %107 = vector.extract_strided_slice %91 {offsets = [36, 0], sizes = [88, 64], strides = [1, 1]} : vector<240x64xf32> to vector<88x64xf32>
    %108 = arith.truncf %107 : vector<88x64xf32> to vector<88x64xbf16>
    %c0_51 = arith.constant 0 : index
    %c320_52 = arith.constant 320 : index
    %109 = vector.load %arg12[%c0_51, %c320_52] : memref<88x1600xbf16, #tpu.memory_space<vmem>>, vector<88x64xbf16>
    tpu.vector_store %arg12[%c0_51, %c320_52], %108 {strides = array<i32>} : memref<88x1600xbf16, #tpu.memory_space<vmem>>, vector<88x64xbf16>,
    %110 = vector.extract_strided_slice %91 {offsets = [38, 0], sizes = [88, 64], strides = [1, 1]} : vector<240x64xf32> to vector<88x64xf32>
    %111 = arith.truncf %110 : vector<88x64xf32> to vector<88x64xbf16>
    %c0_53 = arith.constant 0 : index
    %c384_54 = arith.constant 384 : index
    %112 = vector.load %arg12[%c0_53, %c384_54] : memref<88x1600xbf16, #tpu.memory_space<vmem>>, vector<88x64xbf16>
    tpu.vector_store %arg12[%c0_53, %c384_54], %111 {strides = array<i32>} : memref<88x1600xbf16, #tpu.memory_space<vmem>>, vector<88x64xbf16>,
    %113 = vector.extract_strided_slice %91 {offsets = [40, 0], sizes = [88, 64], strides = [1, 1]} : vector<240x64xf32> to vector<88x64xf32>
    %114 = arith.truncf %113 : vector<88x64xf32> to vector<88x64xbf16>
    %c0_55 = arith.constant 0 : index
    %c448_56 = arith.constant 448 : index
    %115 = vector.load %arg12[%c0_55, %c448_56] : memref<88x1600xbf16, #tpu.memory_space<vmem>>, vector<88x64xbf16>
    tpu.vector_store %arg12[%c0_55, %c448_56], %114 {strides = array<i32>} : memref<88x1600xbf16, #tpu.memory_space<vmem>>, vector<88x64xbf16>,
    %116 = vector.extract_strided_slice %91 {offsets = [42, 0], sizes = [88, 64], strides = [1, 1]} : vector<240x64xf32> to vector<88x64xf32>
    %117 = arith.truncf %116 : vector<88x64xf32> to vector<88x64xbf16>
    %c0_57 = arith.constant 0 : index
    %c512_58 = arith.constant 512 : index
    %118 = vector.load %arg12[%c0_57, %c512_58] : memref<88x1600xbf16, #tpu.memory_space<vmem>>, vector<88x64xbf16>
    tpu.vector_store %arg12[%c0_57, %c512_58], %117 {strides = array<i32>} : memref<88x1600xbf16, #tpu.memory_space<vmem>>, vector<88x64xbf16>,
    %119 = vector.extract_strided_slice %91 {offsets = [44, 0], sizes = [88, 64], strides = [1, 1]} : vector<240x64xf32> to vector<88x64xf32>
    %120 = arith.truncf %119 : vector<88x64xf32> to vector<88x64xbf16>
    %c0_59 = arith.constant 0 : index
    %c576_60 = arith.constant 576 : index
    %121 = vector.load %arg12[%c0_59, %c576_60] : memref<88x1600xbf16, #tpu.memory_space<vmem>>, vector<88x64xbf16>
    tpu.vector_store %arg12[%c0_59, %c576_60], %120 {strides = array<i32>} : memref<88x1600xbf16, #tpu.memory_space<vmem>>, vector<88x64xbf16>,
    %122 = vector.extract_strided_slice %91 {offsets = [72, 0], sizes = [88, 64], strides = [1, 1]} : vector<240x64xf32> to vector<88x64xf32>
    %123 = arith.truncf %122 : vector<88x64xf32> to vector<88x64xbf16>
    %c0_61 = arith.constant 0 : index
    %c640_62 = arith.constant 640 : index
    %124 = vector.load %arg12[%c0_61, %c640_62] : memref<88x1600xbf16, #tpu.memory_space<vmem>>, vector<88x64xbf16>
    tpu.vector_store %arg12[%c0_61, %c640_62], %123 {strides = array<i32>} : memref<88x1600xbf16, #tpu.memory_space<vmem>>, vector<88x64xbf16>,
    %125 = vector.extract_strided_slice %91 {offsets = [74, 0], sizes = [88, 64], strides = [1, 1]} : vector<240x64xf32> to vector<88x64xf32>
    %126 = arith.truncf %125 : vector<88x64xf32> to vector<88x64xbf16>
    %c0_63 = arith.constant 0 : index
    %c704_64 = arith.constant 704 : index
    %127 = vector.load %arg12[%c0_63, %c704_64] : memref<88x1600xbf16, #tpu.memory_space<vmem>>, vector<88x64xbf16>
    tpu.vector_store %arg12[%c0_63, %c704_64], %126 {strides = array<i32>} : memref<88x1600xbf16, #tpu.memory_space<vmem>>, vector<88x64xbf16>,
    %128 = vector.extract_strided_slice %91 {offsets = [76, 0], sizes = [88, 64], strides = [1, 1]} : vector<240x64xf32> to vector<88x64xf32>
    %129 = arith.truncf %128 : vector<88x64xf32> to vector<88x64xbf16>
    %c0_65 = arith.constant 0 : index
    %c768_66 = arith.constant 768 : index
    %130 = vector.load %arg12[%c0_65, %c768_66] : memref<88x1600xbf16, #tpu.memory_space<vmem>>, vector<88x64xbf16>
    tpu.vector_store %arg12[%c0_65, %c768_66], %129 {strides = array<i32>} : memref<88x1600xbf16, #tpu.memory_space<vmem>>, vector<88x64xbf16>,
    %131 = vector.extract_strided_slice %91 {offsets = [78, 0], sizes = [88, 64], strides = [1, 1]} : vector<240x64xf32> to vector<88x64xf32>
    %132 = arith.truncf %131 : vector<88x64xf32> to vector<88x64xbf16>
    %c0_67 = arith.constant 0 : index
    %c832 = arith.constant 832 : index
    %133 = vector.load %arg12[%c0_67, %c832] : memref<88x1600xbf16, #tpu.memory_space<vmem>>, vector<88x64xbf16>
    tpu.vector_store %arg12[%c0_67, %c832], %132 {strides = array<i32>} : memref<88x1600xbf16, #tpu.memory_space<vmem>>, vector<88x64xbf16>,
    %134 = vector.extract_strided_slice %91 {offsets = [80, 0], sizes = [88, 64], strides = [1, 1]} : vector<240x64xf32> to vector<88x64xf32>
    %135 = arith.truncf %134 : vector<88x64xf32> to vector<88x64xbf16>
    %c0_68 = arith.constant 0 : index
    %c896 = arith.constant 896 : index
    %136 = vector.load %arg12[%c0_68, %c896] : memref<88x1600xbf16, #tpu.memory_space<vmem>>, vector<88x64xbf16>
    tpu.vector_store %arg12[%c0_68, %c896], %135 {strides = array<i32>} : memref<88x1600xbf16, #tpu.memory_space<vmem>>, vector<88x64xbf16>,
    %137 = vector.extract_strided_slice %91 {offsets = [108, 0], sizes = [88, 64], strides = [1, 1]} : vector<240x64xf32> to vector<88x64xf32>
    %138 = arith.truncf %137 : vector<88x64xf32> to vector<88x64xbf16>
    %c0_69 = arith.constant 0 : index
    %c960 = arith.constant 960 : index
    %139 = vector.load %arg12[%c0_69, %c960] : memref<88x1600xbf16, #tpu.memory_space<vmem>>, vector<88x64xbf16>
    tpu.vector_store %arg12[%c0_69, %c960], %138 {strides = array<i32>} : memref<88x1600xbf16, #tpu.memory_space<vmem>>, vector<88x64xbf16>,
    %140 = vector.extract_strided_slice %91 {offsets = [110, 0], sizes = [88, 64], strides = [1, 1]} : vector<240x64xf32> to vector<88x64xf32>
    %141 = arith.truncf %140 : vector<88x64xf32> to vector<88x64xbf16>
    %c0_70 = arith.constant 0 : index
    %c1024 = arith.constant 1024 : index
    %142 = vector.load %arg12[%c0_70, %c1024] : memref<88x1600xbf16, #tpu.memory_space<vmem>>, vector<88x64xbf16>
    tpu.vector_store %arg12[%c0_70, %c1024], %141 {strides = array<i32>} : memref<88x1600xbf16, #tpu.memory_space<vmem>>, vector<88x64xbf16>,
    %143 = vector.extract_strided_slice %91 {offsets = [112, 0], sizes = [88, 64], strides = [1, 1]} : vector<240x64xf32> to vector<88x64xf32>
    %144 = arith.truncf %143 : vector<88x64xf32> to vector<88x64xbf16>
    %c0_71 = arith.constant 0 : index
    %c1088 = arith.constant 1088 : index
    %145 = vector.load %arg12[%c0_71, %c1088] : memref<88x1600xbf16, #tpu.memory_space<vmem>>, vector<88x64xbf16>
    tpu.vector_store %arg12[%c0_71, %c1088], %144 {strides = array<i32>} : memref<88x1600xbf16, #tpu.memory_space<vmem>>, vector<88x64xbf16>,
    %146 = vector.extract_strided_slice %91 {offsets = [114, 0], sizes = [88, 64], strides = [1, 1]} : vector<240x64xf32> to vector<88x64xf32>
    %147 = arith.truncf %146 : vector<88x64xf32> to vector<88x64xbf16>
    %c0_72 = arith.constant 0 : index
    %c1152 = arith.constant 1152 : index
    %148 = vector.load %arg12[%c0_72, %c1152] : memref<88x1600xbf16, #tpu.memory_space<vmem>>, vector<88x64xbf16>
    tpu.vector_store %arg12[%c0_72, %c1152], %147 {strides = array<i32>} : memref<88x1600xbf16, #tpu.memory_space<vmem>>, vector<88x64xbf16>,
    %149 = vector.extract_strided_slice %91 {offsets = [116, 0], sizes = [88, 64], strides = [1, 1]} : vector<240x64xf32> to vector<88x64xf32>
    %150 = arith.truncf %149 : vector<88x64xf32> to vector<88x64xbf16>
    %c0_73 = arith.constant 0 : index
    %c1216 = arith.constant 1216 : index
    %151 = vector.load %arg12[%c0_73, %c1216] : memref<88x1600xbf16, #tpu.memory_space<vmem>>, vector<88x64xbf16>
    tpu.vector_store %arg12[%c0_73, %c1216], %150 {strides = array<i32>} : memref<88x1600xbf16, #tpu.memory_space<vmem>>, vector<88x64xbf16>,
    %152 = vector.extract_strided_slice %91 {offsets = [144, 0], sizes = [88, 64], strides = [1, 1]} : vector<240x64xf32> to vector<88x64xf32>
    %153 = arith.truncf %152 : vector<88x64xf32> to vector<88x64xbf16>
    %c0_74 = arith.constant 0 : index
    %c1280 = arith.constant 1280 : index
    %154 = vector.load %arg12[%c0_74, %c1280] : memref<88x1600xbf16, #tpu.memory_space<vmem>>, vector<88x64xbf16>
    tpu.vector_store %arg12[%c0_74, %c1280], %153 {strides = array<i32>} : memref<88x1600xbf16, #tpu.memory_space<vmem>>, vector<88x64xbf16>,
    %155 = vector.extract_strided_slice %91 {offsets = [146, 0], sizes = [88, 64], strides = [1, 1]} : vector<240x64xf32> to vector<88x64xf32>
    %156 = arith.truncf %155 : vector<88x64xf32> to vector<88x64xbf16>
    %c0_75 = arith.constant 0 : index
    %c1344 = arith.constant 1344 : index
    %157 = vector.load %arg12[%c0_75, %c1344] : memref<88x1600xbf16, #tpu.memory_space<vmem>>, vector<88x64xbf16>
    tpu.vector_store %arg12[%c0_75, %c1344], %156 {strides = array<i32>} : memref<88x1600xbf16, #tpu.memory_space<vmem>>, vector<88x64xbf16>,
    %158 = vector.extract_strided_slice %91 {offsets = [148, 0], sizes = [88, 64], strides = [1, 1]} : vector<240x64xf32> to vector<88x64xf32>
    %159 = arith.truncf %158 : vector<88x64xf32> to vector<88x64xbf16>
    %c0_76 = arith.constant 0 : index
    %c1408 = arith.constant 1408 : index
    %160 = vector.load %arg12[%c0_76, %c1408] : memref<88x1600xbf16, #tpu.memory_space<vmem>>, vector<88x64xbf16>
    tpu.vector_store %arg12[%c0_76, %c1408], %159 {strides = array<i32>} : memref<88x1600xbf16, #tpu.memory_space<vmem>>, vector<88x64xbf16>,
    %161 = vector.extract_strided_slice %91 {offsets = [150, 0], sizes = [88, 64], strides = [1, 1]} : vector<240x64xf32> to vector<88x64xf32>
    %162 = arith.truncf %161 : vector<88x64xf32> to vector<88x64xbf16>
    %c0_77 = arith.constant 0 : index
    %c1472 = arith.constant 1472 : index
    %163 = vector.load %arg12[%c0_77, %c1472] : memref<88x1600xbf16, #tpu.memory_space<vmem>>, vector<88x64xbf16>
    tpu.vector_store %arg12[%c0_77, %c1472], %162 {strides = array<i32>} : memref<88x1600xbf16, #tpu.memory_space<vmem>>, vector<88x64xbf16>,
    %164 = vector.extract_strided_slice %91 {offsets = [152, 0], sizes = [88, 64], strides = [1, 1]} : vector<240x64xf32> to vector<88x64xf32>
    %165 = arith.truncf %164 : vector<88x64xf32> to vector<88x64xbf16>
    %c0_78 = arith.constant 0 : index
    %c1536 = arith.constant 1536 : index
    %166 = vector.load %arg12[%c0_78, %c1536] : memref<88x1600xbf16, #tpu.memory_space<vmem>>, vector<88x64xbf16>
    tpu.vector_store %arg12[%c0_78, %c1536], %165 {strides = array<i32>} : memref<88x1600xbf16, #tpu.memory_space<vmem>>, vector<88x64xbf16>,
    %c0_79 = arith.constant 0 : index
    %c0_80 = arith.constant 0 : index
    %167 = vector.load %arg12[%c0_79, %c0_80] : memref<88x1600xbf16, #tpu.memory_space<vmem>>, vector<88x1600xbf16>
    %c0_81 = arith.constant 0 : index
    %c0_82 = arith.constant 0 : index
    %168 = vector.load %arg6[%c0_81, %c0_82] : memref<1600x64xbf16, #tpu.memory_space<vmem>>, vector<1600x64xbf16>
    %cst_83 = arith.constant dense<0.000000e+00> : vector<88x64xf32>
    %169 = tpu.matmul %167, %168, %cst_83 {dimension_numbers = #tpu.dot_dimension_numbers<[1], [0], [0], [1], [0, 0, 1, 1], [], []>} : vector<88x1600xbf16>, vector<1600x64xbf16>, vector<88x64xf32> -> vector<88x64xf32>
    %c0_84 = arith.constant 0 : index
    %c0_85 = arith.constant 0 : index
    %170 = vector.load %arg7[%c0_84, %c0_85] : memref<1x64xf32, #tpu.memory_space<vmem>>, vector<1x64xf32>
    %171 = vector.broadcast %170 : vector<1x64xf32> to vector<88x64xf32>
    %172 = arith.addf %169, %171 : vector<88x64xf32>
    %cst_86 = arith.constant 0.000000e+00 : f32
    %173 = vector.broadcast %cst_86 : f32 to vector<88x64xf32>
    %174 = arith.maximumf %172, %173 : vector<88x64xf32>
    %175 = vector.extract_strided_slice %174 {offsets = [0, 0], sizes = [8, 64], strides = [1, 1]} : vector<88x64xf32> to vector<8x64xf32>
    %176 = arith.truncf %175 : vector<8x64xf32> to vector<8x64xbf16>
    %c0_87 = arith.constant 0 : index
    %c0_88 = arith.constant 0 : index
    %177 = vector.load %arg13[%c0_87, %c0_88] : memref<8x256xbf16, #tpu.memory_space<vmem>>, vector<8x64xbf16>
    tpu.vector_store %arg13[%c0_87, %c0_88], %176 {strides = array<i32>} : memref<8x256xbf16, #tpu.memory_space<vmem>>, vector<8x64xbf16>,
    %178 = vector.extract_strided_slice %174 {offsets = [4, 0], sizes = [8, 64], strides = [1, 1]} : vector<88x64xf32> to vector<8x64xf32>
    %179 = arith.truncf %178 : vector<8x64xf32> to vector<8x64xbf16>
    %c0_89 = arith.constant 0 : index
    %c64_90 = arith.constant 64 : index
    %180 = vector.load %arg13[%c0_89, %c64_90] : memref<8x256xbf16, #tpu.memory_space<vmem>>, vector<8x64xbf16>
    tpu.vector_store %arg13[%c0_89, %c64_90], %179 {strides = array<i32>} : memref<8x256xbf16, #tpu.memory_space<vmem>>, vector<8x64xbf16>,
    %181 = vector.extract_strided_slice %174 {offsets = [72, 0], sizes = [8, 64], strides = [1, 1]} : vector<88x64xf32> to vector<8x64xf32>
    %182 = arith.truncf %181 : vector<8x64xf32> to vector<8x64xbf16>
    %c0_91 = arith.constant 0 : index
    %c128_92 = arith.constant 128 : index
    %183 = vector.load %arg13[%c0_91, %c128_92] : memref<8x256xbf16, #tpu.memory_space<vmem>>, vector<8x64xbf16>
    tpu.vector_store %arg13[%c0_91, %c128_92], %182 {strides = array<i32>} : memref<8x256xbf16, #tpu.memory_space<vmem>>, vector<8x64xbf16>,
    %184 = vector.extract_strided_slice %174 {offsets = [76, 0], sizes = [8, 64], strides = [1, 1]} : vector<88x64xf32> to vector<8x64xf32>
    %185 = arith.truncf %184 : vector<8x64xf32> to vector<8x64xbf16>
    %c0_93 = arith.constant 0 : index
    %c192_94 = arith.constant 192 : index
    %186 = vector.load %arg13[%c0_93, %c192_94] : memref<8x256xbf16, #tpu.memory_space<vmem>>, vector<8x64xbf16>
    tpu.vector_store %arg13[%c0_93, %c192_94], %185 {strides = array<i32>} : memref<8x256xbf16, #tpu.memory_space<vmem>>, vector<8x64xbf16>,
    %c0_95 = arith.constant 0 : index
    %c0_96 = arith.constant 0 : index
    %187 = vector.load %arg13[%c0_95, %c0_96] : memref<8x256xbf16, #tpu.memory_space<vmem>>, vector<8x256xbf16>
    %c0_97 = arith.constant 0 : index
    %c0_98 = arith.constant 0 : index
    %188 = vector.load %arg8[%c0_97, %c0_98] : memref<256x128xbf16, #tpu.memory_space<vmem>>, vector<256x128xbf16>
    %cst_99 = arith.constant dense<0.000000e+00> : vector<8x128xf32>
    %189 = tpu.matmul %187, %188, %cst_99 {dimension_numbers = #tpu.dot_dimension_numbers<[1], [0], [0], [1], [0, 0, 1, 1], [], []>} : vector<8x256xbf16>, vector<256x128xbf16>, vector<8x128xf32> -> vector<8x128xf32>
    %190 = vector.extract_strided_slice %189 {offsets = [0, 0], sizes = [1, 128], strides = [1, 1]} : vector<8x128xf32> to vector<1x128xf32>
    %c0_100 = arith.constant 0 : index
    %c0_101 = arith.constant 0 : index
    %191 = vector.load %arg9[%c0_100, %c0_101] : memref<1x128xf32, #tpu.memory_space<vmem>>, vector<1x128xf32>
    %192 = arith.addf %190, %191 : vector<1x128xf32>
    %c0_102 = arith.constant 0 : index
    %c0_103 = arith.constant 0 : index
    %c0_104 = arith.constant 0 : index
    %193 = vector.load %arg10[%c0_102, %c0_103, %c0_104] : memref<1x1x128xf32, #tpu.memory_space<vmem>>, vector<1x1x128xf32>
    %194 = vector.shape_cast %193 : vector<1x1x128xf32> to vector<1x128xf32>
    %195 = vector.shape_cast %192 : vector<1x128xf32> to vector<1x1x128xf32>
    tpu.vector_store %arg10[%c0_102, %c0_103, %c0_104], %195 {strides = array<i32>} : memref<1x1x128xf32, #tpu.memory_space<vmem>>, vector<1x1x128xf32>,
    return
  }
  func.func @transform_0(%arg0: i32) -> (i32, i32, i32) {
    %c0_i32 = arith.constant 0 : i32
    %c0_i32_0 = arith.constant 0 : i32
    %c0_i32_1 = arith.constant 0 : i32
    return %arg0, %c0_i32, %c0_i32_0 : i32, i32, i32
  }
  func.func @transform_1(%arg0: i32) -> (i32, i32) {
    %c0_i32 = arith.constant 0 : i32
    %c0_i32_0 = arith.constant 0 : i32
    %c0_i32_1 = arith.constant 0 : i32
    return %c0_i32, %c0_i32_0 : i32, i32
  }
  func.func @transform_2(%arg0: i32) -> (i32, i32) {
    %c0_i32 = arith.constant 0 : i32
    %c0_i32_0 = arith.constant 0 : i32
    %c0_i32_1 = arith.constant 0 : i32
    return %c0_i32, %c0_i32_0 : i32, i32
  }
  func.func @transform_3(%arg0: i32) -> (i32, i32) {
    %c0_i32 = arith.constant 0 : i32
    %c0_i32_0 = arith.constant 0 : i32
    %c0_i32_1 = arith.constant 0 : i32
    return %c0_i32, %c0_i32_0 : i32, i32
  }
  func.func @transform_4(%arg0: i32) -> (i32, i32) {
    %c0_i32 = arith.constant 0 : i32
    %c0_i32_0 = arith.constant 0 : i32
    %c0_i32_1 = arith.constant 0 : i32
    return %c0_i32, %c0_i32_0 : i32, i32
  }
  func.func @transform_5(%arg0: i32) -> (i32, i32) {
    %c0_i32 = arith.constant 0 : i32
    %c0_i32_0 = arith.constant 0 : i32
    %c0_i32_1 = arith.constant 0 : i32
    return %c0_i32, %c0_i32_0 : i32, i32
  }
  func.func @transform_6(%arg0: i32) -> (i32, i32) {
    %c0_i32 = arith.constant 0 : i32
    %c0_i32_0 = arith.constant 0 : i32
    %c0_i32_1 = arith.constant 0 : i32
    return %c0_i32, %c0_i32_0 : i32, i32
  }
  func.func @transform_7(%arg0: i32) -> (i32, i32) {
    %c0_i32 = arith.constant 0 : i32
    %c0_i32_0 = arith.constant 0 : i32
    %c0_i32_1 = arith.constant 0 : i32
    return %c0_i32, %c0_i32_0 : i32, i32
  }
  func.func @transform_8(%arg0: i32) -> (i32, i32) {
    %c0_i32 = arith.constant 0 : i32
    %c0_i32_0 = arith.constant 0 : i32
    %c0_i32_1 = arith.constant 0 : i32
    return %c0_i32, %c0_i32_0 : i32, i32
  }
  func.func @transform_9(%arg0: i32) -> (i32, i32, i32) {
    %c0_i32 = arith.constant 0 : i32
    %c0_i32_0 = arith.constant 0 : i32
    %c0_i32_1 = arith.constant 0 : i32
    return %arg0, %c0_i32, %c0_i32_0 : i32, i32, i32
  }
}

</mosaic_0001>

<bundles_post_ra>
// kernel: dqn_forward.1
= control target key start
LH: loop header
LB: loop body
LE: loop exit
PB: predicated region body
PF: predicated region fallthrough
CT: control target
= control target key end

     0   :  { %14 = vsyncpa [#allocation6], 0  ;;  %s19499_s0 = inlined_call_operand.vmem [shape: bf16[2,328,256], index: 0, kind: input, shape index: {}]   ;;  %s19500_s1 = inlined_call_operand.vmem [shape: bf16[256,32], index: 1, kind: input, shape index: {}]   ;;  %s19501_s2 = inlined_call_operand.vmem [shape: f32[1,32], index: 2, kind: input, shape index: {}]   ;;  %s19502_s3 = inlined_call_operand.vmem [shape: bf16[800,64], index: 3, kind: input, shape index: {}]   ;;  %s19503_s4 = inlined_call_operand.vmem [shape: f32[1,64], index: 4, kind: input, shape index: {}]   ;;  %s19504_s5 = inlined_call_operand.vmem [shape: bf16[1600,64], index: 5, kind: input, shape index: {}]   ;;  %s19505_s6 = inlined_call_operand.vmem [shape: f32[1,64], index: 6, kind: input, shape index: {}]   ;;  %s19506_s7 = inlined_call_operand.vmem [shape: bf16[256,128], index: 7, kind: input, shape index: {}]   ;;  %s19507_s8 = inlined_call_operand.vmem [shape: f32[1,128], index: 8, kind: input, shape index: {}]   ;;  %s19508_s9 = inlined_call_operand.hbm [shape: f32[2,1,128], index: 9, kind: output, shape index: {}]  }
   0x1   :  { %16 = vsyncpa [#allocation6 + $0x1], 0  ;;  %s12973_s30 = smov 0   ;;  %s12975_s10 = smov 0  }
   0x2   :  { %s12977_s11 = smov 0   ;;  %s12979_s12 = smov 0  }
   0x3 LB: > { %s12994_s13 = sadd.s32 4294967295, %s12914_s12   ;;  %s10807_s14 = sadd.s32 4294967294, %s12914_s12   ;;  %s12914_s12 = sphi %s12979_s12, %s20501_s12   ;;  %s12910_s11 = sphi %s12977_s11, %s20500_s11   ;;  %s12906_s10 = sphi %s12975_s10, %s20499_s10   ;;  %s12902_s30 = sphi %s12973_s30, %s20498_s30  }
   0x4   : > { %s12998_s15 = sadd.s32 1, %s12914_s12   ;;  %s223_s16 = sadd.s32 1, %s12910_s11 }
   0x5   : > { %s220_s17 = ssub.s32 %s12914_s12, %s12998_s15  ;;  %p233_p0 = scmp.ne.s32.totalorder %s12910_s11, %s12906_s10 }
   0x6   : > { %p221_p1 = scmp.eq.s32.totalorder %s220_s17, 0  ;;  %p234_p2 = scmp.eq.s32.totalorder %s12994_s13, 1 }
   0x7   : > { %p239_p3 = scmp.ne.s32.totalorder %s12906_s10, %s12902_s30  ;;  %p240_p4 = scmp.eq.s32.totalorder %s10807_s14, 1 }
   0x8   : > { %s13009_s18 = scalar_select %p221_p1, %s12910_s11, %s223_s16  }
   0x9   : > { %p13011_p5 = por %p234_p2, %p233_p0  ;;  %p13015_p6 = por %p240_p4, %p239_p3 }
   0xa   : > { %p10810_p7 = scmp.ge.s32.totalorder %s12914_s12, 1  ;;  %p290_p8 = scmp.lt.s32.totalorder %s12914_s12, 3 }
   0xc   : > { %p291_p9 = pnand %p10810_p7, %p290_p8 }
   0xe   : > { %294 = sbr.rel (%p291_p9) target bundleno = 2414 (0x96e), region = 56 }
  0x13   : > { %v12365_v0 = vld [vmem:[%s19500_s1 + $0x38] sm:$0xff]   ;;  %v12916_v1 = vmov 0   ;;  %v12366_v2 = vld [vmem:[%s19500_s1 + $0x30] sm:$0xff]   ;;  %p325_p10 = scmp.lt.s32.totalorder %s12994_s13, 1  ;;  %v12367_v3 = vld [vmem:[%s19500_s1 + $0x28] sm:$0xff]   ;;  %vm1073_vm0 = vcmask 257024  }
  0x14   : > { %714 = vmatprep.subr.bf16.mxu0 %v12916_v1  ;;  %v12368_v4 = vld [vmem:[%s19500_s1 + $0x20] sm:$0xff]   ;;  %v12369_v5 = vld [vmem:[%s19500_s1 + $0x18] sm:$0xff]   ;;  %v12370_v7 = vld [vmem:[%s19500_s1 + $0x10] sm:$0xff]   ;;  %vm1536_vm1 = vcmask 1042432   ;;  %vm1537_vm2 = vcmask 1046532   ;;  %v19872_v63 = vmov 0 }
  0x15   : > { %715 = vmatpush1.bf16.msra.mxu0 %v12365_v0  ;;  %s326_s27 = scalar_select %p325_p10, %s12994_s13, 1  ;;  %v12371_v8 = vld [vmem:[%s19500_s1 + $0x8] sm:$0xff]   ;;  %v12372_v9 = vld [vmem:[%s19500_s1] sm:$0xff]   ;;  %v12373_v10 = vld [vmem:[%s19500_s1 + $0x78] sm:$0xff]   ;;  %vm1108_vm3 = vsmask.f32 3328 }
  0x16   : > { %716 = vmatprep.subr.bf16.mxu0 %v12916_v1  ;;  %v12374_v11 = vld [vmem:[%s19500_s1 + $0x70] sm:$0xff]   ;;  %v12375_v12 = vld [vmem:[%s19500_s1 + $0x68] sm:$0xff]   ;;  %v12376_v13 = vld [vmem:[%s19500_s1 + $0x60] sm:$0xff]   ;;  %vm1109_vm4 = vsmask.f32 7440  ;;  %vm2030_vm8 = vcmask 1041408  }
  0x17   : > { %s12319_s14 = smul.u32 328, %s326_s27  ;;  %v12377_v14 = vld [vmem:[%s19500_s1 + $0x58] sm:$0xff]   ;;  %v12378_v15 = vld [vmem:[%s19500_s1 + $0x50] sm:$0xff]   ;;  %v12379_v16 = vld [vmem:[%s19500_s1 + $0x48] sm:$0xff]   ;;  %vm1751_vm6 = vsmask.f32 2304 }
  0x18   : > { %v12380_v17 = vld [vmem:[%s19500_s1 + $0x40] sm:$0xff]   ;;  %vm13120_vm5 = vmor %vm1536_vm1, %vm1537_vm2  ;;  %vm1752_vm7 = vsmask.f32 6416  ;;  %s12917_s26 = smov 64   ;;  %vm2031_vm10 = vcmask 1045508   ;;  %s12918_s27 = smov 32  }
  0x19   : > { %717 = vmatpush1.bf16.msra.mxu0 %v12366_v2  ;;  %s13041_s23 = scalar_lea.vmem %s19499_s0, %s12319_s14  ;;  %v13107_v45 = vld [vmem:[%s19501_s2] ss:$0 sm:$0xff]  ;;  %v19873_v63 = vsel %vm13120_vm5, 4294967295, %v19872_v63  ;;  %vm13140_vm9 = vmor %vm1108_vm3, %vm1109_vm4  ;;  %s12919_s28 = smov 96   ;;  %vm2815_vm13 = vcmask 1040384   ;;  %vm2816_vm14 = vcmask 1044484  }
  0x1a   : > { %718 = vmatprep.subr.bf16.mxu0 %v12916_v1  ;;  %v12383_v6 = vld [vmem:[%s13041_s23 + $0x4] ss:$8 sps:$4 sm:$0xff]   ;;  %v12381_v18 = vld [vmem:[%s13041_s23] ss:$8 sps:$4 sm:$0xff]   ;;  %v12384_v19 = vld [vmem:[%s13041_s23 + $0x14] ss:$8 sps:$4 sm:$0xff]  }
  0x1b   : > { %746 = vmatprep.mubr.bf16.mxu0 %v12383_v6  ;;  %v12386_v20 = vld [vmem:[%s13041_s23 + $0x10] ss:$8 sps:$4 sm:$0xff]   ;;  %v12387_v21 = vld [vmem:[%s13041_s23 + $0x24] ss:$8 sps:$4 sm:$0xff]   ;;  %v12389_v22 = vld [vmem:[%s13041_s23 + $0x20] ss:$8 sps:$4 sm:$0xff]  }
  0x1c   : > { %v12390_v23 = vld [vmem:[%s13041_s23 + $0x34] ss:$8 sps:$4 sm:$0xff]   ;;  %v12392_v24 = vld [vmem:[%s13041_s23 + $0x30] ss:$8 sps:$4 sm:$0xff]   ;;  %v12393_v25 = vld [vmem:[%s13041_s23 + $0x44] ss:$8 sps:$4 sm:$0xff]  }
  0x1d   : > { %719 = vmatpush1.bf16.msra.mxu0 %v12367_v3  ;;  %v12395_v26 = vld [vmem:[%s13041_s23 + $0x40] ss:$8 sps:$4 sm:$0xff]   ;;  %v12396_v27 = vld [vmem:[%s13041_s23 + $0x54] ss:$8 sps:$4 sm:$0xff]   ;;  %v12398_v28 = vld [vmem:[%s13041_s23 + $0x50] ss:$8 sps:$4 sm:$0xff]  }
  0x1e   : > { %720 = vmatprep.subr.bf16.mxu0 %v12916_v1  ;;  %v12399_v29 = vld [vmem:[%s13041_s23 + $0x64] ss:$8 sps:$4 sm:$0xff]   ;;  %v12401_v30 = vld [vmem:[%s13041_s23 + $0x60] ss:$8 sps:$4 sm:$0xff]   ;;  %v12402_v31 = vld [vmem:[%s13041_s23 + $0x74] ss:$8 sps:$4 sm:$0xff]  }
  0x1f   : > { %v12404_v32 = vld [vmem:[%s13041_s23 + $0x70] ss:$8 sps:$4 sm:$0xff]   ;;  %v12405_v33 = vld [vmem:[%s13041_s23 + $0x84] ss:$8 sps:$4 sm:$0xff]   ;;  %v12407_v34 = vld [vmem:[%s13041_s23 + $0x80] ss:$8 sps:$4 sm:$0xff]  }
  0x20   : > { %v12408_v35 = vld [vmem:[%s13041_s23 + $0x94] ss:$8 sps:$4 sm:$0xff]   ;;  %v12410_v36 = vld [vmem:[%s13041_s23 + $0x90] ss:$8 sps:$4 sm:$0xff]   ;;  %v12411_v37 = vld [vmem:[%s13041_s23 + $0xa4] ss:$8 sps:$4 sm:$0xff]  }
  0x21   : > { %721 = vmatpush1.bf16.msra.mxu0 %v12368_v4  ;;  %v12413_v38 = vld [vmem:[%s13041_s23 + $0xa0] ss:$8 sps:$4 sm:$0xff]   ;;  %v12414_v39 = vld [vmem:[%s13041_s23 + $0xb4] ss:$8 sps:$4 sm:$0xff]   ;;  %v12416_v40 = vld [vmem:[%s13041_s23 + $0xb0] ss:$8 sps:$4 sm:$0xff]  }
  0x22   : > { %722 = vmatprep.subr.bf16.mxu0 %v12916_v1  ;;  %v12417_v41 = vld [vmem:[%s13041_s23 + $0xc4] ss:$8 sps:$4 sm:$0xff]   ;;  %v12419_v42 = vld [vmem:[%s13041_s23 + $0xc0] ss:$8 sps:$4 sm:$0xff]   ;;  %v12420_v43 = vld [vmem:[%s13041_s23 + $0xd4] ss:$8 sps:$4 sm:$0xff]  }
  0x23   : > { %v12422_v44 = vld [vmem:[%s13041_s23 + $0xd0] ss:$8 sps:$4 sm:$0xff]   ;;  %19874 = vst [vmem:[#allocation8_spill] sm:$0xff] %v19873_v63  ;;  %vm13161_vm11 = vmor %vm1751_vm6, %vm1752_vm7  ;;  %vm2599_vm1 = vsmask.f32 1280  ;;  %s323_s29 = sand.u32 1, %s12906_s10  }
  0x24   : > { %vm13183_vm12 = vmor %vm2030_vm8, %vm2031_vm10  ;;  %vm2600_vm2 = vsmask.f32 5392  ;;  %vm3384_vm4 = vsmask.f32 256  ;;  %vm3385_vm6 = vsmask.f32 4368 }
  0x25   : > { %723 = vmatpush1.bf16.msra.mxu0 %v12369_v5  ;;  %vm13261_vm15 = vmor %vm2815_vm13, %vm2816_vm14  ;;  %vm1505_vm8 = vcmask 519424   ;;  %vm1720_vm10 = vcmask 781824   ;;  %vm1999_vm13 = vcmask 1044224   ;;  %vm6648_vm14 = vcmask 261120   ;;  %s324_s17 = scalar_lea.vmem [#allocation5], %s323_s29 }
  0x26   : > { %724 = vmatprep.subr.bf16.mxu0 %v12916_v1  ;;  %vm13402_vm3 = vmor %vm2599_vm1, %vm2600_vm2  ;;  %s10752_s21 = sshll.u32 %s324_s17, 4  ;;  %s10753_s21 = int_to_ptr.vmem [resolvable:$true] %s10752_s21 }
  0x27   : > { %vm13539_vm7 = vmor %vm3384_vm4, %vm3385_vm6  ;;  %s12854_s25 = scalar_lea.vmem %s10753_s21, 16 }
  0x28   : > { %p12855_p11 = scmp.ne.s32.totalorder %s10753_s21, %s12854_s25 }
  0x29   : > { %725 = vmatpush1.bf16.msra.mxu0 %v12370_v7  ;;  %v359_v7 = vld [vmem:[%s13041_s23 + $0xe0] sm:$0xff] }
  0x2a   : > { %726 = vmatprep.subr.bf16.mxu0 %v12916_v1  ;;  %p12856_p12 = pnand %p12855_p11, %p13011_p5 }
  0x2c   : > { %p12857_p13 = pneg %p12856_p12 }
  0x2d   : > { %727 = vmatpush1.bf16.msra.mxu0 %v12371_v8  ;;  %v360_v8 = vld [vmem:[%s13041_s23 + $0xe8] sm:$0xff] }
  0x2e   : > { %728 = vmatprep.subr.bf16.mxu0 %v12916_v1 }
  0x31   : > { %729 = vmatpush1.bf16.msra.mxu0 %v12372_v9 }
  0x32   : > { %730 = vmatprep.subr.bf16.mxu0 %v12916_v1 }
  0x35   : > { %731 = vmatpush2.bf16.msra.mxu0 %v12373_v10 }
  0x36   : > { %732 = vmatprep.subr.bf16.mxu0 %v12916_v1 }
  0x39   : > { %733 = vmatpush2.bf16.msra.mxu0 %v12374_v11  ;;  %v12423_v11 = vld [vmem:[%s13041_s23 + $0xe4] ss:$8 sps:$4 sm:$0xff]  }
  0x3a   : > { %734 = vmatprep.subr.bf16.mxu0 %v12916_v1 }
  0x3d   : > { %735 = vmatpush2.bf16.msra.mxu0 %v12375_v12  ;;  %v10841_v12 = vcombine.low %v359_v7, %v360_v8 }
  0x3e   : > { %736 = vmatprep.subr.bf16.mxu0 %v12916_v1 }
  0x41   : > { %737 = vmatpush2.bf16.msra.mxu0 %v12376_v13 }
  0x42   : > { %738 = vmatprep.subr.bf16.mxu0 %v12916_v1 }
  0x45   : > { %739 = vmatpush2.bf16.msra.mxu0 %v12377_v14 }
  0x46   : > { %740 = vmatprep.subr.bf16.mxu0 %v12916_v1 }
  0x49   : > { %741 = vmatpush2.bf16.msra.mxu0 %v12378_v15 }
  0x4a   : > { %742 = vmatprep.subr.bf16.mxu0 %v12916_v1 }
  0x4d   : > { %743 = vmatpush2.bf16.msra.mxu0 %v12379_v16 }
  0x4e   : > { %744 = vmatprep.subr.bf16.mxu0 %v12916_v1 }
  0x51   : > { %745 = vmatpush2.bf16.msra.mxu0 %v12380_v17 }
  0x54   : > { %747 = vmatmul.mubr.bf16.vlgmr.msra.gmra.mxu0 %v12381_v18 }
  0x55   : > { %754 = vmatprep.mubr.bf16.mxu0 %v12384_v19 }
  0x5c   : > { %755 = vmatmul.mubr.bf16.gmra.mxu0 %v12386_v20 }
  0x5d   : > { %762 = vmatprep.mubr.bf16.mxu0 %v12387_v21 }
  0x64   : > { %763 = vmatmul.mubr.bf16.gmra.mxu0 %v12389_v22 }
  0x65   : > { %770 = vmatprep.mubr.bf16.mxu0 %v12390_v23 }
  0x6c   : > { %771 = vmatmul.mubr.bf16.gmra.mxu0 %v12392_v24 }
  0x6d   : > { %778 = vmatprep.mubr.bf16.mxu0 %v12393_v25 }
  0x74   : > { %779 = vmatmul.mubr.bf16.gmra.mxu0 %v12395_v26 }
  0x75   : > { %786 = vmatprep.mubr.bf16.mxu0 %v12396_v27 }
  0x7c   : > { %787 = vmatmul.mubr.bf16.gmra.mxu0 %v12398_v28 }
  0x7d   : > { %794 = vmatprep.mubr.bf16.mxu0 %v12399_v29 }
  0x84   : > { %795 = vmatmul.mubr.bf16.gmra.mxu0 %v12401_v30 }
  0x85   : > { %802 = vmatprep.mubr.bf16.mxu0 %v12402_v31 }
  0x8c   : > { %803 = vmatmul.mubr.bf16.gmra.mxu0 %v12404_v32 }
  0x8d   : > { %810 = vmatprep.mubr.bf16.mxu0 %v12405_v33 }
  0x94   : > { %811 = vmatmul.mubr.bf16.gmra.mxu0 %v12407_v34  ;;  %v10736_v34 = vld [vmem:[%s19507_s8] sm:$0x1] }
  0x95   : > { %818 = vmatprep.mubr.bf16.mxu0 %v12408_v35 }
  0x9c   : > { %819 = vmatmul.mubr.bf16.gmra.mxu0 %v12410_v36 }
  0x9d   : > { %826 = vmatprep.mubr.bf16.mxu0 %v12411_v37 }
  0xa4   : > { %827 = vmatmul.mubr.bf16.gmra.mxu0 %v12413_v38 }
  0xa5   : > { %834 = vmatprep.mubr.bf16.mxu0 %v12414_v39 }
  0xac   : > { %835 = vmatmul.mubr.bf16.gmra.mxu0 %v12416_v40 }
  0xad   : > { %842 = vmatprep.mubr.bf16.mxu0 %v12417_v41 }
  0xb4   : > { %843 = vmatmul.mubr.bf16.gmra.mxu0 %v12419_v42 }
  0xb5   : > { %850 = vmatprep.mubr.bf16.mxu0 %v12420_v43 }
  0xbc   : > { %851 = vmatmul.mubr.bf16.gmra.mxu0 %v12422_v44 }
  0xbd   : > { %858 = vmatprep.mubr.bf16.mxu0 %v12423_v11 }
  0xc4   : > { %859 = vmatmul.mubr.bf16.gmra.mxu0 %v10841_v12 }
 0x114   : > { %v748_v46 = vpop.f32.mrf.mxu0 }
 0x115   : > { %v749_v47 = vadd.f32 %v13107_v45, %v748_v46 }
 0x116   : > { %v750_v48 = vpop.f32.mrf.mxu0 }
 0x117   : > { %v913_v49 = vmax.f32 %v749_v47, 0.0  ;;  %v19879_v48 = vmov 0 }
 0x118   : > { %v751_v50 = vpop.f32.mrf.mxu0  ;;  %v19880_v48 = vsel %vm13183_vm12, 4294967295, %v19879_v48 }
 0x119   : > { %v13110_v51 = vpack.c.bf16 %v913_v49, %v913_v49  ;;  %v752_v52 = vadd.f32 %v13107_v45, %v751_v50  ;;  %19881 = vst [vmem:[#allocation9_spill] sm:$0xff] %v19880_v48 }
 0x11a   : > { %v753_v53 = vpop.f32.mrf.mxu0 }
 0x11b   : > { %v914_v54 = vmax.f32 %v752_v52, 0.0  ;;  %v1112_v55 = vshrl.u32 %v13110_v51, 16  ;;  %v1115_v56 = vshll.u32 %v13110_v51, 16  ;;  %1074 = vst.msk [vmem:[#allocation2] sm:$0xf] %vm1073_vm0, %v13110_v51  ;;  %v10902_v0 = vrot.slane %v13110_v51, 9 }
 0x11c   : > { %v756_v57 = vpop.f32.mrf.mxu0 }
 0x11d   : > { %v13117_v58 = vpack.c.bf16 %v914_v54, %v914_v54  ;;  %v757_v59 = vadd.f32 %v13107_v45, %v756_v57  ;;  %v1114_v60 = vrot.slane %v1112_v55, 4  ;;  %v1117_v61 = vrot.slane %v1115_v56, 5 }
 0x11e   : > { %v758_v62 = vpop.f32.mrf.mxu0  ;;  %v1754_v1 = vrot.slane %v1112_v55, 5  ;;  %v1755_v2 = vrot.slane %v1115_v56, 6 }
 0x11f   : > { %v915_v3 = vmax.f32 %v757_v59, 0.0  ;;  %v1541_v4 = vrot.slane %v13117_v58, 5  ;;  %v1118_v5 = vor.u32 %v1117_v61, %v1114_v60  ;;  %v1121_v6 = vshll.u32 %v13117_v58, 16  ;;  %1075 = vst.msk [vmem:[#allocation2 + $0x1c] sm:$0xf] %vm1073_vm0, %v13117_v58  ;;  %v12425_v60 = vld [vmem:[%s19502_s3 + $0x78] sm:$0xff]  }
 0x120   : > { %v759_v9 = vpop.f32.mrf.mxu0  ;;  %v1125_v10 = vshrl.u32 %v13117_v58, 16  ;;  %v1756_v17 = vor.u32 %v1755_v2, %v1754_v1  ;;  %v12426_v61 = vld [vmem:[%s19502_s3 + $0x38] sm:$0xff]   ;;  %11556 = vmatprep.subr.bf16.mxu1 %v12425_v60 }
 0x121   : > { %v13133_v13 = vpack.c.bf16 %v915_v3, %v915_v3  ;;  %v760_v14 = vadd.f32 %v13107_v45, %v759_v9  ;;  %v1542_v15 = vsel %vm13120_vm5, %v10902_v0, %v1541_v4  ;;  %v1543_v19 = vrot.slane %v1541_v4, 4  ;;  %11557 = vmatpush3.bf16.msra.mxu1 %v12426_v61  ;;  %v12427_v9 = vld [vmem:[%s19502_s3 + $0x70] sm:$0xff]  }
 0x122   : > { %v761_v18 = vpop.f32.mrf.mxu0  ;;  %1630 = vrot.lane.b32.xlu0 %v1542_v15, %s12917_s26  ;;  %v1119_v20 = vrot.slane %v1118_v5, 4  ;;  %v1123_v21 = vrot.slane %v1121_v6, 5  ;;  %v1758_v22 = vrot.slane %v1125_v10, 5  ;;  %v1759_v25 = vrot.slane %v1121_v6, 6  ;;  %11558 = vmatprep.subr.bf16.mxu1 %v12427_v9  ;;  %v12436_v9 = vld [vmem:[%s19502_s3 + $0x18] sm:$0xff]  }
 0x123   : > { %v916_v23 = vmax.f32 %v760_v14, 0.0  ;;  %v1544_v24 = vrot.slane %v13133_v13, 5  ;;  %v1127_v26 = vrot.slane %v1125_v10, 4  ;;  %1076 = vst.msk [vmem:[#allocation2 + $0x38] sm:$0xf] %vm1073_vm0, %v13133_v13  ;;  %v13151_v29 = vshll.u32 %v13133_v13, 16 }
 0x124   : > { %v764_v27 = vpop.f32.mrf.mxu0  ;;  %v1124_v28 = vsel %vm13140_vm9, %v1119_v20, %v1123_v21  ;;  %v19511_v30 = vrot.slane %v13133_v13, 6  ;;  %v13165_v35 = vor.u32 %v1759_v25, %v1758_v22  ;;  %v1757_v37 = vrot.slane %v1756_v17, 4  ;;  %v12428_v10 = vld [vmem:[%s19502_s3 + $0x30] sm:$0xff]  }
 0x125   : > { %v13154_v31 = vpack.c.bf16 %v916_v23, %v916_v23  ;;  %v765_v32 = vadd.f32 %v13107_v45, %v764_v27  ;;  %v1545_v33 = vsel %vm13120_vm5, %v1543_v19, %v1544_v24  ;;  %v1128_v38 = vor.u32 %v1127_v26, %v1123_v21  ;;  %11559 = vmatpush3.bf16.msra.mxu1 %v12428_v10  ;;  %v12429_v26 = vld [vmem:[%s19502_s3 + $0x68] sm:$0xff]  }
 0x126   : > { %1632 = vrot.lane.b32.xlu1 %v1545_v33, %s12917_s26  ;;  %1415 = vrot.lane.b32.xlu0 %v1124_v28, %s12918_s27  ;;  %v766_v36 = vpop.f32.mrf.mxu0  ;;  %v1133_v39 = vrot.slane %v13151_v29, 5  ;;  %v13171_v40 = vshrl.u32 %v13133_v13, 16  ;;  %v2040_v42 = vrot.slane %v19511_v30, 4  ;;  %v1761_v44 = vsel %vm13161_vm11, %v1757_v37, %v13165_v35  ;;  %v12430_v27 = vld [vmem:[%s19502_s3 + $0x28] sm:$0xff]  }
 0x127   : > { %v917_v41 = vmax.f32 %v765_v32, 0.0  ;;  %v2041_v43 = vrot.slane %v13154_v31, 6  ;;  %1077 = vst.msk [vmem:[#allocation2 + $0x54] sm:$0xf] %vm1073_vm0, %v13154_v31  ;;  %v1129_v46 = vrot.slane %v1128_v38, 4  ;;  %v1547_v52 = vrot.slane %v13154_v31, 5  ;;  %11560 = vmatprep.subr.bf16.mxu1 %v12429_v26 }
 0x128   : > { %v767_v47 = vpop.f32.mrf.mxu0  ;;  %v1763_v56 = vrot.slane %v13171_v40, 5  ;;  %v1764_v57 = vrot.slane %v13151_v29, 6  ;;  %v1137_v59 = vrot.slane %v13171_v40, 4  ;;  %v1546_v0 = vrot.slane %v1544_v24, 4 }
 0x129   : > { %v13187_v49 = vpack.c.bf16 %v917_v41, %v917_v41  ;;  %v768_v50 = vadd.f32 %v13107_v45, %v767_v47  ;;  %v2042_v53 = vsel %vm13183_vm12, %v2040_v42, %v2041_v43  ;;  %v1134_v54 = vsel %vm13140_vm9, %v1129_v46, %v1133_v39  ;;  %11561 = vmatpush3.bf16.msra.mxu1 %v12430_v27  ;;  %v12433_v47 = vld [vmem:[%s19502_s3 + $0x60] sm:$0xff]  }
 0x12a   : > { %1909 = vrot.lane.b32.xlu1 %v1761_v44, %s12919_s28  ;;  %v769_v55 = vpop.f32.mrf.mxu0  ;;  %2156 = vst.msk [vmem:[#allocation2 + $0x3c] sm:$0xf] %vm1073_vm0, %v2042_v53  ;;  %1417 = vrot.lane.b32.xlu0 %v1134_v54, %s12918_s27  ;;  %v1138_v2 = vor.u32 %v1137_v59, %v1133_v39  ;;  %v13210_v3 = vshll.u32 %v13154_v31, 16  ;;  %v1548_v5 = vsel %vm13120_vm5, %v1546_v0, %v1547_v52  ;;  %v2043_v12 = vrot.slane %v2041_v43, 4 }
 0x12b   : > { %v918_v62 = vmax.f32 %v768_v50, 0.0  ;;  %1078 = vst.msk [vmem:[#allocation2 + $0x70] sm:$0xf] %vm1073_vm0, %v13187_v49  ;;  %v13220_v7 = vor.u32 %v1764_v57, %v1763_v56  ;;  %v2044_v14 = vrot.slane %v13187_v49, 6  ;;  %v1762_v15 = vrot.slane %v13165_v35, 4  ;;  %v12434_v57 = vld [vmem:[%s19502_s3 + $0x20] sm:$0xff]   ;;  %11562 = vmatprep.subr.bf16.mxu1 %v12433_v47 }
 0x12c   : > { %v772_v1 = vpop.f32.mrf.mxu0  ;;  %v1139_v17 = vrot.slane %v1138_v2, 4  ;;  %v1143_v18 = vrot.slane %v13210_v3, 5  ;;  %v13235_v19 = vshrl.u32 %v13154_v31, 16  ;;  %v2820_v24 = vrot.slane %v13154_v31, 7  ;;  %v12431_v56 = vld [vmem:[%s13041_s23 + $0xf4] ss:$8 sps:$4 sm:$0xff]  }
 0x12d   : > { %v13212_v4 = vpack.c.bf16 %v918_v62, %v918_v62  ;;  %v773_v6 = vadd.f32 %v13107_v45, %v772_v1  ;;  %v13241_v22 = vsel %vm13183_vm12, %v2043_v12, %v2044_v14  ;;  %v1766_v23 = vsel %vm13161_vm11, %v1762_v15, %v13220_v7  ;;  %866 = vmatprep.mubr.bf16.mxu0 %v12431_v56 }
 0x12e   : > { %2202 = vrot.lane.b32.xlu1 %v1548_v5, %s12918_s27  ;;  %v774_v8 = vpop.f32.mrf.mxu0  ;;  %1634 = vrot.lane.b32.xlu0 %v1548_v5, %s12917_s26  ;;  %2157 = vst.msk [vmem:[#allocation2 + $0x58] sm:$0xf] %vm1073_vm0, %v13241_v22  ;;  %v19882_v28 = vmov 0  ;;  %v10907_v32 = vrot.slane %v13133_v13, 11  ;;  %v1550_v33 = vrot.slane %v13187_v49, 5  ;;  %v1144_v36 = vsel %vm13140_vm9, %v1139_v17, %v1143_v18 }
 0x12f   : > { %v919_v11 = vmax.f32 %v773_v6, 0.0  ;;  %1079 = vst.msk [vmem:[#allocation2 + $0x8c] sm:$0xf] %vm1073_vm0, %v13212_v4  ;;  %v19883_v28 = vsel %vm13261_vm15, 4294967295, %v19882_v28  ;;  %v1768_v37 = vrot.slane %v13235_v19, 5  ;;  %v1769_v38 = vrot.slane %v13210_v3, 6  ;;  %11563 = vmatpush3.bf16.msra.mxu1 %v12434_v57 }
 0x130   : > { %v775_v20 = vpop.f32.mrf.mxu0  ;;  %19884 = vst [vmem:[#allocation10_spill] sm:$0xff] %v19883_v28  ;;  %v2823_v39 = vrot.slane %v13187_v49, 7  ;;  %v2046_v44 = vrot.slane %v2044_v14, 4  ;;  %v2047_v46 = vrot.slane %v13212_v4, 6  ;;  %v2821_v50 = vsel %vm13261_vm15, %v10907_v32, %v2820_v24  ;;  %v12435_v8 = vld [vmem:[%s19502_s3 + $0x58] sm:$0xff]  }
 0x131   : > { %v13237_v21 = vpack.c.bf16 %v919_v11, %v919_v11  ;;  %v776_v35 = vadd.f32 %v13107_v45, %v775_v20  ;;  %v2826_v54 = vrot.slane %v13212_v4, 7  ;;  %v1549_v59 = vrot.slane %v1547_v52, 4  ;;  %11564 = vmatprep.subr.bf16.mxu1 %v12435_v8 }
 0x132   : > { %2479 = vrot.lane.b32.xlu1 %v2042_v53, %s12919_s28  ;;  %v777_v25 = vpop.f32.mrf.mxu0  ;;  %1911 = vrot.lane.b32.xlu0 %v1766_v23, %s12919_s28  ;;  %v2825_v53 = vrot.slane %v2823_v39, 4  ;;  %v13299_v62 = vsel %vm13183_vm12, %v2046_v44, %v2047_v46  ;;  %v13311_v2 = vor.u32 %v1769_v38, %v1768_v37  ;;  %v13314_v5 = vshrl.u32 %v13187_v49, 16  ;;  %v12438_v44 = vld [vmem:[%s19502_s3 + $0x10] sm:$0xff]  }
 0x133   : > { %1080 = vst.msk [vmem:[#allocation2 + $0xa8] sm:$0xf] %vm1073_vm0, %v13237_v21  ;;  %v920_v42 = vmax.f32 %v776_v35, 0.0  ;;  %2158 = vst.msk [vmem:[#allocation2 + $0x74] sm:$0xf] %vm1073_vm0, %v13299_v62  ;;  %v1551_v52 = vsel %vm13120_vm5, %v1549_v59, %v1550_v33  ;;  %v13330_v10 = vshll.u32 %v13187_v49, 16  ;;  %11565 = vmatpush3.bf16.msra.mxu1 %v12436_v9 }
 0x134   : > { %v780_v41 = vpop.f32.mrf.mxu0  ;;  %v13305_v0 = vsel %vm13261_vm15, %v2825_v53, %v2826_v54  ;;  %v13333_v11 = vshll.u32 %v13212_v4, 16  ;;  %v2049_v12 = vrot.slane %v2047_v46, 4  ;;  %v2050_v14 = vrot.slane %v13237_v21, 6 }
 0x135   : > { %v781_v43 = vadd.f32 %v13107_v45, %v780_v41  ;;  %v13295_v60 = vpack.c.bf16 %v920_v42, %v920_v42  ;;  %3354 = vst.msk [vmem:[#allocation2 + $0xc] sm:$0xf] %vm1073_vm0, %v13305_v0  ;;  %v1767_v17 = vrot.slane %v13220_v7, 4  ;;  %v13341_v20 = vshrl.u32 %v13212_v4, 16 }
 0x136   : > { %1419 = vrot.lane.b32.xlu1 %v1144_v36, %s12918_s27  ;;  %v782_v55 = vpop.f32.mrf.mxu0  ;;  %2909 = vrot.lane.b32.xlu0 %v2821_v50, %s12918_s27  ;;  %v13345_v23 = vsel %vm13183_vm12, %v2049_v12, %v2050_v14  ;;  %v2828_v25 = vrot.slane %v2826_v54, 4  ;;  %v1147_v32 = vrot.slane %v13235_v19, 4  ;;  %v2829_v7 = vrot.slane %v13237_v21, 7 }
 0x137   : > { %19885 = vst [vmem:[#allocation11_spill] sm:$0xff] %v13295_v60  ;;  %v921_v61 = vmax.f32 %v781_v43, 0.0  ;;  %1081 = vst.msk [vmem:[#allocation2 + $0xc4] sm:$0xf] %vm1073_vm0, %v13295_v60  ;;  %v1771_v27 = vsel %vm13161_vm11, %v1767_v17, %v13311_v2  ;;  %v2611_v35 = vrot.slane %v13314_v5, 6  ;;  %v2612_v36 = vrot.slane %v13330_v10, 7 }
 0x138   : > { %v783_v1 = vpop.f32.mrf.mxu0  ;;  %2159 = vst.msk [vmem:[#allocation2 + $0x90] sm:$0xf] %vm1073_vm0, %v13345_v23  ;;  %v2616_v37 = vrot.slane %v13341_v20, 6  ;;  %v2617_v38 = vrot.slane %v13333_v11, 7  ;;  %v13365_v42 = vsel %vm13261_vm15, %v2828_v25, %v2829_v7  ;;  %v12437_v43 = vld [vmem:[%s19502_s3 + $0x50] sm:$0xff]   ;;  %v2822_v46 = vrot.slane %v2820_v24, 4 }
 0x139   : > { %v13318_v6 = vpack.c.bf16 %v921_v61, %v921_v61  ;;  %3355 = vst.msk [vmem:[#allocation2 + $0x28] sm:$0xf] %vm1073_vm0, %v13365_v42  ;;  %v13379_v47 = vor.u32 %v2612_v36, %v2611_v35  ;;  %v1553_v54 = vrot.slane %v13212_v4, 5  ;;  %v1148_v55 = vor.u32 %v1147_v32, %v1143_v18  ;;  %11566 = vmatprep.subr.bf16.mxu1 %v12437_v43  ;;  %v12439_v18 = vld [vmem:[%s19502_s3 + $0x48] sm:$0xff]  }
 0x13a   : > { %1636 = vrot.lane.b32.xlu1 %v1551_v52, %s12917_s26  ;;  %v785_v15 = vpop.f32.mrf.mxu0  ;;  %2204 = vrot.lane.b32.xlu0 %v1551_v52, %s12918_s27  ;;  %v13381_v50 = vor.u32 %v2617_v38, %v2616_v37  ;;  %v1773_v56 = vrot.slane %v13314_v5, 5  ;;  %v784_v31 = vadd.f32 %v13107_v45, %v783_v1  ;;  %v1774_v24 = vrot.slane %v13330_v10, 6  ;;  %v12440_v1 = vld [vmem:[%s19502_s3 + $0x8] sm:$0xff]  }
 0x13b   : > { %19886 = vst [vmem:[#allocation12_spill] sm:$0xff] %v13318_v6  ;;  %1082 = vst.msk [vmem:[#allocation2 + $0xe0] sm:$0xf] %vm1073_vm0, %v13318_v6  ;;  %v2052_v57 = vrot.slane %v2050_v14, 4  ;;  %v2053_v59 = vrot.slane %v13295_v60, 6  ;;  %11567 = vmatpush3.bf16.msra.mxu1 %v12438_v44  ;;  %v13407_v8 = vshll.u32 %v13237_v21, 16  ;;  %v2824_v12 = vsel %vm13261_vm15, %v2822_v46, %v2823_v39 }
 0x13c   : > { %v788_v26 = vpop.f32.mrf.mxu0  ;;  %v922_v9 = vmax.f32 %v784_v31, 0.0  ;;  %v1153_v14 = vrot.slane %v13330_v10, 5  ;;  %11568 = vmatprep.subr.bf16.mxu1 %v12439_v18  ;;  %v13432_v39 = vshrl.u32 %v13237_v21, 16  ;;  %v13440_v36 = vor.u32 %v1774_v24, %v1773_v56 }
 0x13d   : > { %v13421_v17 = vsel %vm13183_vm12, %v2052_v57, %v2053_v59  ;;  %v789_v32 = vadd.f32 %v13107_v45, %v788_v26  ;;  %v12442_v26 = vld [vmem:[%s19502_s3] sm:$0xff]   ;;  %v2620_v44 = vrot.slane %v13381_v50, 4  ;;  %v2831_v56 = vrot.slane %v2829_v7, 4 }
 0x13e   : > { %2351 = vrot.lane.b32.xlu1 %v1771_v27, %s12917_s26  ;;  %v790_v41 = vpop.f32.mrf.mxu0  ;;  %2481 = vrot.lane.b32.xlu0 %v13241_v22, %s12919_s28  ;;  %v1552_v22 = vrot.slane %v1550_v33, 4  ;;  %v2615_v33 = vrot.slane %v13379_v47, 4  ;;  %v13427_v49 = vpack.c.bf16 %v922_v9, %v922_v9  ;;  %2160 = vst.msk [vmem:[#allocation2 + $0xac] sm:$0xf] %vm1073_vm0, %v13421_v17  ;;  %v2621_v46 = vrot.slane %v13432_v39, 6 }
 0x13f   : > { %11569 = vmatpush3.bf16.msra.mxu1 %v12440_v1  ;;  %v12441_v41 = vld [vmem:[%s19502_s3 + $0x40] sm:$0xff]   ;;  %v923_v43 = vmax.f32 %v789_v32, 0.0  ;;  %v2832_v31 = vrot.slane %v13295_v60, 7  ;;  %v13492_v9 = vshrl.u32 %v13295_v60, 16  ;;  %v10903_v10 = vrot.slane %v13110_v51, 10 }
 0x140   : > { %v791_v53 = vpop.f32.mrf.mxu0  ;;  %v13417_v15 = vsel %vm13402_vm3, %v2615_v33, %v13381_v50  ;;  %19889 = vst [vmem:[#allocation13_spill] sm:$0xff] %v13427_v49  ;;  %v1554_v35 = vsel %vm13120_vm5, %v1552_v22, %v1553_v54  ;;  %1083 = vst.msk [vmem:[#allocation2 + $0xfc] sm:$0xf] %vm1073_vm0, %v13427_v49  ;;  %v2622_v22 = vrot.slane %v13407_v8, 7  ;;  %11570 = vmatprep.subr.bf16.mxu1 %v12441_v41  ;;  %v13506_v41 = vshll.u32 %v13295_v60, 16 }
 0x141   : > { %2787 = vst.msk [vmem:[#allocation2 + $0x40] sm:$0xf] %vm1073_vm0, %v13417_v15  ;;  %v792_v37 = vadd.f32 %v13107_v45, %v791_v53  ;;  %4863 = vst.msk [vmem:[#allocation2 + $0x14] sm:$0xf] %vm1073_vm0, %v13427_v49  ;;  %v1772_v53 = vrot.slane %v13311_v2, 4  ;;  %v13465_v50 = vpack.c.bf16 %v923_v43, %v923_v43  ;;  %v2834_v43 = vrot.slane %v2832_v31, 4 }
 0x142   : > { %1913 = vrot.lane.b32.xlu1 %v1771_v27, %s12919_s28  ;;  %v793_v61 = vpop.f32.mrf.mxu0  ;;  %3718 = vrot.lane.b32.xlu0 %v13212_v4, %s12917_s26  ;;  %v1149_v27 = vrot.slane %v1148_v55, 4  ;;  %v13467_v57 = vor.u32 %v2622_v22, %v2621_v46  ;;  %v13557_v51 = vshrl.u32 %v13318_v6, 16 }
 0x143   : > { %v924_v55 = vmax.f32 %v792_v37, 0.0  ;;  %19890 = vst [vmem:[#allocation14_spill] sm:$0xff] %v13465_v50  ;;  %v1776_v2 = vsel %vm13161_vm11, %v1772_v53, %v13440_v36  ;;  %v13477_v61 = vsel %vm13261_vm15, %v2831_v56, %v2832_v31  ;;  %11571 = vmatpush3.bf16.msra.mxu1 %v12442_v26  ;;  %1084 = vst.msk [vmem:[#allocation2 + $0x118] sm:$0xf] %vm1073_vm0, %v13465_v50  ;;  %v1157_v37 = vrot.slane %v13314_v5, 4 }
 0x144   : > { %v13423_v25 = vpop.f32.mrf.mxu0  ;;  %v1154_v33 = vsel %vm13140_vm9, %v1149_v27, %v1153_v14  ;;  %19892 = vst [vmem:[#allocation16_spill] sm:$0xff] %v13477_v61  ;;  %4864 = vst.msk [vmem:[#allocation2 + $0x30] sm:$0xf] %vm1073_vm0, %v13465_v50  ;;  %v13487_v1 = vsel %vm13402_vm3, %v2620_v44, %v13467_v57  ;;  %v2056_v27 = vrot.slane %v13318_v6, 6  ;;  %v2035_v53 = vrot.slane %v13117_v58, 6 }
 0x145   : > { %v13473_v7 = vpack.c.bf16 %v924_v55, %v924_v55  ;;  %3356 = vst.msk [vmem:[#allocation2 + $0x44] sm:$0xf] %vm1073_vm0, %v13477_v61  ;;  %2788 = vst.msk [vmem:[#allocation2 + $0x5c] sm:$0xf] %vm1073_vm0, %v13487_v1  ;;  %v1158_v56 = vor.u32 %v1157_v37, %v1153_v14 }
 0x146   : > { %2911 = vrot.lane.b32.xlu1 %v2824_v12, %s12918_s27  ;;  %v798_v38 = vpop.f32.mrf.mxu0  ;;  %1638 = vrot.lane.b32.xlu0 %v1554_v35, %s12917_s26  ;;  %v2055_v12 = vrot.slane %v2053_v59, 4  ;;  %v19509_v59 = vrot.slane %v13318_v6, 7 }
 0x147   : > { %19891 = vst [vmem:[#allocation15_spill] sm:$0xff] %v13473_v7  ;;  %1085 = vst.msk [vmem:[#allocation2 + $0x134] sm:$0xf] %vm1073_vm0, %v13473_v7  ;;  %v19510_v38 = vrot.slane %v13432_v39, 7 }
 0x148   : > { %v799_v24 = vpop.f32.mrf.mxu0  ;;  %4865 = vst.msk [vmem:[#allocation2 + $0x4c] sm:$0xf] %vm1073_vm0, %v13473_v7  ;;  %v13511_v26 = vsel %vm13183_vm12, %v2055_v12, %v2056_v27  ;;  %v13524_v22 = vsel %vm13261_vm15, %v2834_v43, %v19509_v59  ;;  %v1779_v12 = vrot.slane %v13333_v11, 6  ;;  %v2058_v43 = vrot.slane %v2056_v27, 4 }
 0x149   : > { %2161 = vst.msk [vmem:[#allocation2 + $0xc8] sm:$0xf] %vm1073_vm0, %v13511_v26  ;;  %v3396_v46 = vrot.slane %v19510_v38, 4  ;;  %19893 = vst [vmem:[#allocation17_spill] sm:$0xff] %v13524_v22  ;;  %v800_v37 = vadd.f32 %v13107_v45, %v799_v24  ;;  %v13570_v59 = vshll.u32 %v13318_v6, 16  ;;  %v1777_v27 = vrot.slane %v13440_v36, 4 }
 0x14a   : > { %1421 = vrot.lane.b32.xlu1 %v1154_v33, %s12918_s27  ;;  %v801_v18 = vpop.f32.mrf.mxu0  ;;  %2353 = vrot.lane.b32.xlu0 %v1776_v2, %s12917_s26  ;;  %3357 = vst.msk [vmem:[#allocation2 + $0x60] sm:$0xf] %vm1073_vm0, %v13524_v22  ;;  %v1555_v33 = vrot.slane %v1553_v54, 4  ;;  %v797_v54 = vadd.f32 %v13107_v45, %v13423_v25  ;;  %v2059_v25 = vrot.slane %v13427_v49, 6 }
 0x14b   : > { %v1778_v18 = vrot.slane %v13341_v20, 5 }
 0x14c   : > { %v13501_v32 = vpop.f32.mrf.mxu0 }
 0x14e   : > { %2206 = vrot.lane.b32.xlu1 %v1554_v35, %s12918_s27  ;;  %v806_v44 = vpop.f32.mrf.mxu0  ;;  %1915 = vrot.lane.b32.xlu0 %v1776_v2, %s12919_s28  ;;  %v3397_v35 = vrot.slane %v13492_v9, 7  ;;  %v19512_v2 = vrot.slane %v13237_v21, 5 }
 0x150   : > { %v13527_v55 = vpop.f32.mrf.mxu0  ;;  %v3398_v31 = vor.u32 %v3397_v35, %v13506_v41  ;;  %v1557_v24 = vsel %vm13120_vm5, %v1555_v33, %v19512_v2  ;;  %v1167_v33 = vrot.slane %v13341_v20, 4 }
 0x152   : > { %2483 = vrot.lane.b32.xlu1 %v13299_v62, %s12919_s28  ;;  %v809_v14 = vpop.f32.mrf.mxu0  ;;  %3047 = vrot.lane.b32.xlu0 %v13299_v62, %s12917_s26  ;;  %v13550_v4 = vsel %vm13539_vm7, %v3396_v46, %v3398_v31  ;;  %v2036_v62 = vsel %vm13183_vm12, %v10903_v10, %v2035_v53  ;;  %v1163_v46 = vrot.slane %v13333_v11, 5  ;;  %v925_v31 = vmax.f32 %v797_v54, 0.0 }
 0x153   : > { %19896 = vst [vmem:[#allocation18_spill] sm:$0xff] %v13550_v4  ;;  %4032 = vst.msk [vmem:[#allocation2 + $0x10] sm:$0xf] %vm1073_vm0, %v13550_v4  ;;  %v1159_v14 = vrot.slane %v1158_v56, 4  ;;  %v926_v10 = vmax.f32 %v800_v37, 0.0  ;;  %v13583_v54 = vsel %vm13183_vm12, %v2058_v43, %v2059_v25  ;;  %v2606_v43 = vrot.slane %v13235_v19, 6 }
 0x154   : > { %v13562_v44 = vpop.f32.mrf.mxu0  ;;  %2154 = vst.msk [vmem:[#allocation2 + $0x4] sm:$0xf] %vm1073_vm0, %v2036_v62  ;;  %v13579_v56 = vpack.c.bf16 %v925_v31, %v925_v31  ;;  %19898 = vst [vmem:[#allocation20_spill] sm:$0xff] %v13583_v54  ;;  %v13585_v62 = vor.u32 %v1779_v12, %v1778_v18  ;;  %v2602_v18 = vrot.slane %v13171_v40, 6  ;;  %v2603_v12 = vrot.slane %v13151_v29, 7 }
 0x155   : > { %v13587_v37 = vpack.c.bf16 %v926_v10, %v926_v10  ;;  %2162 = vst.msk [vmem:[#allocation2 + $0xe4] sm:$0xf] %vm1073_vm0, %v13583_v54  ;;  %v1164_v36 = vsel %vm13140_vm9, %v1159_v14, %v1163_v46  ;;  %v2607_v14 = vrot.slane %v13210_v3, 7  ;;  %v2061_v40 = vrot.slane %v2059_v25, 4 }
 0x156   : > { %3720 = vrot.lane.b32.xlu1 %v13237_v21, %s12917_s26  ;;  %v814_v38 = vpop.f32.mrf.mxu0  ;;  %2913 = vrot.lane.b32.xlu0 %v13305_v0, %s12918_s27  ;;  %19897 = vst [vmem:[#allocation19_spill] sm:$0xff] %v13579_v56  ;;  %v3400_v0 = vrot.slane %v3397_v35, 4  ;;  %1086 = vst.msk [vmem:[#allocation2 + $0x150] sm:$0xf] %vm1073_vm0, %v13579_v56  ;;  %v2604_v31 = vor.u32 %v2603_v12, %v2602_v18  ;;  %v13615_v10 = vrot.slane %v13465_v50, 6  ;;  %v2037_v19 = vrot.slane %v2035_v53, 4 }
 0x157   : > { %19899 = vst [vmem:[#allocation21_spill] sm:$0xff] %v13587_v37  ;;  %v19515_v38 = vrot.slane %v13557_v51, 7  ;;  %4866 = vst.msk [vmem:[#allocation2 + $0x68] sm:$0xf] %vm1073_vm0, %v13579_v56  ;;  %v2608_v54 = vor.u32 %v2607_v14, %v2606_v43  ;;  %v1781_v3 = vsel %vm13161_vm11, %v1777_v27, %v13585_v62  ;;  %v3389_v25 = vrot.slane %v13341_v20, 7  ;;  %v361_v18 = vld [vmem:[%s13041_s23 + $0xf0] sm:$0xff] }
 0x158   : > { %v13592_v30 = vpop.f32.mrf.mxu0  ;;  %1087 = vst.msk [vmem:[#allocation2 + $0x16c] sm:$0xf] %vm1073_vm0, %v13587_v37  ;;  %4867 = vst.msk [vmem:[#allocation2 + $0x84] sm:$0xf] %vm1073_vm0, %v13587_v37  ;;  %v362_v12 = vld [vmem:[%s13041_s23 + $0xf8] sm:$0xff]  ;;  %v13636_v53 = vor.u32 %v1167_v33, %v1163_v46  ;;  %v19902_v27 = vrot.slane %v13133_v13, 6 }
 0x159   : > { %v3402_v35 = vor.u32 %v19515_v38, %v13570_v59  ;;  %v10952_v38 = vrot.slane %v13427_v49, 10  ;;  %v10911_v43 = vrot.slane %v13314_v5, 11  ;;  %v1177_v14 = vrot.slane %v13432_v39, 4 }
 0x15a   : > { %1640 = vrot.lane.b32.xlu1 %v1557_v24, %s12917_s26  ;;  %v817_v29 = vpop.f32.mrf.mxu0  ;;  %1423 = vrot.lane.b32.xlu0 %v1164_v36, %s12918_s27  ;;  %v2605_v36 = vrot.slane %v2604_v31, 4  ;;  %v1783_v33 = vrot.slane %v13432_v39, 5  ;;  %v1784_v13 = vrot.slane %v13407_v8, 6  ;;  %v10843_v5 = vcombine.low %v361_v18, %v362_v12 }
 0x15b   : > { %v13619_v2 = vsel %vm13539_vm7, %v3400_v0, %v3402_v35  ;;  %v13631_v0 = vsel %vm13183_vm12, %v2061_v40, %v13615_v10  ;;  %v5448_v20 = vsel %vm13183_vm12, %v10952_v38, %v13615_v10  ;;  %v2039_v35 = vsel %vm13183_vm12, %v2037_v19, %v19902_v27  ;;  %v12446_v38 = vld [vmem:[%s13041_s23 + $0x104] ss:$8 sps:$4 sm:$0xff]  }
 0x15c   : > { %19900 = vst [vmem:[#allocation22_spill] sm:$0xff] %v13619_v2  ;;  %4033 = vst.msk [vmem:[#allocation2 + $0x2c] sm:$0xf] %vm1073_vm0, %v13619_v2  ;;  %v2609_v46 = vsel %vm13402_vm3, %v2605_v36, %v2608_v54  ;;  %v3390_v40 = vor.u32 %v3389_v25, %v13333_v11  ;;  %v1173_v29 = vrot.slane %v13407_v8, 5  ;;  %v19903_v31 = vrot.slane %v13237_v21, 5  ;;  %867 = vmatmul.mubr.bf16.gmra.mxu0 %v10843_v5  ;;  %v13701_v5 = vpop.f32.mrf.mxu0 }
 0x15d   : > { %19901 = vst [vmem:[#allocation23_spill] sm:$0xff] %v13631_v0  ;;  %2163 = vst.msk [vmem:[#allocation2 + $0x100] sm:$0xf] %vm1073_vm0, %v13631_v0  ;;  %v1559_v36 = vrot.slane %v13295_v60, 5  ;;  %v1782_v27 = vrot.slane %v13585_v62, 4  ;;  %v1789_v21 = vrot.slane %v13506_v41, 6  ;;  %v808_v18 = vadd.f32 %v13107_v45, %v13527_v55  ;;  %874 = vmatprep.mubr.bf16.mxu0 %v12446_v38 }
 0x15e   : > { %2355 = vrot.lane.b32.xlu1 %v1781_v3, %s12917_s26  ;;  %2208 = vrot.lane.b32.xlu0 %v1557_v24, %s12918_s27  ;;  %5566 = vst.msk [vmem:[#allocation2 + $0x18] sm:$0xf] %vm1073_vm0, %v5448_v20  ;;  %2155 = vst.msk [vmem:[#allocation2 + $0x20] sm:$0xf] %vm1073_vm0, %v2039_v35  ;;  %v805_v24 = vadd.f32 %v13107_v45, %v13501_v32  ;;  %v1558_v19 = vrot.slane %v19903_v31, 4  ;;  %v1169_v20 = vrot.slane %v13636_v53, 4 }
 0x15f   : > { %2785 = vst.msk [vmem:[#allocation2 + $0x8] sm:$0xf] %vm1073_vm0, %v2609_v46  ;;  %v2610_v46 = vrot.slane %v2608_v54, 4  ;;  %v1178_v11 = vor.u32 %v1177_v14, %v1173_v29  ;;  %v1788_v32 = vrot.slane %v13492_v9, 5  ;;  %v13674_v12 = vrot.slane %v3389_v25, 4 }
 0x160   : > { %v927_v35 = vmax.f32 %v805_v24, 0.0  ;;  %v1561_v53 = vrot.slane %v1559_v36, 4  ;;  %v13682_v14 = vrot.slane %v13318_v6, 5  ;;  %v928_v24 = vmax.f32 %v808_v18, 0.0 }
 0x161   : > { %v2614_v54 = vsel %vm13402_vm3, %v2610_v46, %v13379_v47  ;;  %v2064_v55 = vrot.slane %v13615_v10, 4  ;;  %v3391_v25 = vsel %vm13539_vm7, %v10911_v43, %v3390_v40  ;;  %v19906_v38 = vrot.slane %v13432_v39, 7  ;;  %v12449_v40 = vld [vmem:[%s13041_s23 + $0x114] ss:$8 sps:$4 sm:$0xff]  }
 0x162   : > { %1917 = vrot.lane.b32.xlu1 %v1781_v3, %s12919_s28  ;;  %2485 = vrot.lane.b32.xlu0 %v13345_v23, %s12919_s28  ;;  %v1785_v3 = vor.u32 %v1784_v13, %v1783_v33  ;;  %v13676_v62 = vpack.c.bf16 %v927_v35, %v927_v35  ;;  %19905 = vst [vmem:[#allocation25_spill] sm:$0xff] %v13682_v14  ;;  %2786 = vst.msk [vmem:[#allocation2 + $0x24] sm:$0xf] %vm1073_vm0, %v2614_v54  ;;  %v2065_v10 = vrot.slane %v13473_v7, 6  ;;  %v12448_v13 = vld [vmem:[%s13041_s23 + $0x100] ss:$8 sps:$4 sm:$0xff]   ;;  %v822_v54 = vpop.f32.mrf.mxu0 }
 0x163   : > { %v13693_v47 = vor.u32 %v19906_v38, %v13407_v8  ;;  %v1183_v43 = vrot.slane %v13506_v41, 5  ;;  %v13705_v39 = vor.u32 %v1789_v21, %v1788_v32  ;;  %v13707_v8 = vpack.c.bf16 %v928_v24, %v928_v24 }
 0x164   : > { %19904 = vst [vmem:[#allocation24_spill] sm:$0xff] %v13676_v62  ;;  %v1787_v33 = vrot.slane %v1785_v3, 4  ;;  %1088 = vst.msk [vmem:[#allocation2 + $0x188] sm:$0xf] %vm1073_vm0, %v13676_v62  ;;  %v1187_v31 = vrot.slane %v13492_v9, 4  ;;  %v13713_v35 = vsel %vm13183_vm12, %v2064_v55, %v2065_v10  ;;  %v2067_v46 = vrot.slane %v2065_v10, 4  ;;  %875 = vmatmul.mubr.bf16.gmra.mxu0 %v12448_v13 }
 0x165   : > { %4868 = vst.msk [vmem:[#allocation2 + $0xa0] sm:$0xf] %vm1073_vm0, %v13676_v62  ;;  %19907 = vst [vmem:[#allocation26_spill] sm:$0xff] %v13707_v8  ;;  %v2068_v18 = vrot.slane %v13579_v56, 6  ;;  %v19516_v32 = vrot.slane %v13427_v49, 5  ;;  %882 = vmatprep.mubr.bf16.mxu0 %v12449_v40  ;;  %v816_v55 = vadd.f32 %v13107_v45, %v13592_v30  ;;  %v1197_v38 = vrot.slane %v13557_v51, 4 }
 0x166   : > { %3049 = vrot.lane.b32.xlu1 %v13345_v23, %s12917_s26  ;;  %3508 = vrot.lane.b32.xlu0 %v3391_v25, %s12918_s27  ;;  %v1179_v23 = vrot.slane %v1178_v11, 4  ;;  %19908 = vst [vmem:[#allocation27_spill] sm:$0xff] %v13713_v35  ;;  %v1560_v11 = vsel %vm13120_vm5, %v1558_v19, %v1559_v36  ;;  %v1564_v25 = vrot.slane %v13682_v14, 4  ;;  %1089 = vst.msk [vmem:[#allocation2 + $0x1a4] sm:$0xf] %vm1073_vm0, %v13707_v8  ;;  %v13779_v10 = vshrl.u32 %v13427_v49, 16 }
 0x167   : > { %4869 = vst.msk [vmem:[#allocation2 + $0xbc] sm:$0xf] %vm1073_vm0, %v13707_v8  ;;  %5567 = vst.msk [vmem:[#allocation2 + $0x34] sm:$0xf] %vm1073_vm0, %v13713_v35  ;;  %v1174_v19 = vsel %vm13140_vm9, %v1169_v20, %v1173_v29  ;;  %v13734_v36 = vsel %vm13161_vm11, %v1782_v27, %v1785_v3  ;;  %v13738_v21 = vsel %vm13183_vm12, %v2067_v46, %v2068_v18  ;;  %v13752_v20 = vshll.u32 %v13427_v49, 16  ;;  %v823_v27 = vpop.f32.mrf.mxu0 }
 0x168   : > { %2164 = vst.msk [vmem:[#allocation2 + $0x11c] sm:$0xf] %vm1073_vm0, %v13713_v35  ;;  %19909 = vst [vmem:[#allocation28_spill] sm:$0xff] %v13738_v21  ;;  %v13749_v29 = vsel %vm13120_vm5, %v1561_v53, %v13682_v14  ;;  %v13762_v3 = vsel %vm13140_vm9, %v1179_v23, %v1183_v43  ;;  %v13767_v53 = vsel %vm13161_vm11, %v1787_v33, %v13705_v39  ;;  %v1193_v33 = vrot.slane %v13570_v59, 5  ;;  %v12451_v40 = vld [vmem:[%s13041_s23 + $0x110] ss:$8 sps:$4 sm:$0xff]  }
 0x169   : > { %5568 = vst.msk [vmem:[#allocation2 + $0x50] sm:$0xf] %vm1073_vm0, %v13738_v21  ;;  %2165 = vst.msk [vmem:[#allocation2 + $0x138] sm:$0xf] %vm1073_vm0, %v13738_v21  ;;  %v1188_v24 = vor.u32 %v1187_v31, %v1183_v43  ;;  %v825_v23 = vpop.f32.mrf.mxu0  ;;  %v1793_v43 = vrot.slane %v13557_v51, 5  ;;  %v930_v30 = vmax.f32 %v816_v55, 0.0 }
 0x16a   : > { %2915 = vrot.lane.b32.xlu1 %v13365_v42, %s12918_s27  ;;  %3196 = vrot.lane.b32.xlu0 %v13417_v15, %s12919_s28  ;;  %v813_v15 = vadd.f32 %v13107_v45, %v13562_v44  ;;  %v13775_v44 = vsel %vm13120_vm5, %v1564_v25, %v19516_v32  ;;  %v1794_v45 = vrot.slane %v13570_v59, 6  ;;  %v1798_v31 = vrot.slane %v13779_v10, 5 }
 0x16b   : > { %19910 = vst [vmem:[#allocation29_spill] sm:$0xff] %v13775_v44  ;;  %v1799_v46 = vrot.slane %v13752_v20, 6  ;;  %v13791_v54 = vshll.u32 %v13465_v50, 16  ;;  %v2070_v23 = vrot.slane %v2068_v18, 4  ;;  %v2071_v42 = vrot.slane %v13587_v37, 6 }
 0x16c   : > { %v929_v13 = vmax.f32 %v813_v15, 0.0  ;;  %v13795_v15 = vpack.c.bf16 %v930_v30, %v930_v30  ;;  %v1198_v55 = vor.u32 %v1197_v38, %v1193_v33  ;;  %v1203_v32 = vrot.slane %v13752_v20, 5  ;;  %883 = vmatmul.mubr.bf16.gmra.mxu0 %v12451_v40 }
 0x16d   : > { %v13800_v14 = vshrl.u32 %v13465_v50, 16  ;;  %v13814_v18 = vsel %vm13183_vm12, %v2070_v23, %v2071_v42  ;;  %v2073_v38 = vrot.slane %v2071_v42, 4  ;;  %v1568_v30 = vrot.slane %v13465_v50, 5 }
 0x16e   : > { %1425 = vrot.lane.b32.xlu1 %v1174_v19, %s12918_s27  ;;  %3722 = vrot.lane.b32.xlu0 %v13295_v60, %s12917_s26  ;;  %v13793_v25 = vpack.c.bf16 %v929_v13, %v929_v13  ;;  %v1189_v19 = vrot.slane %v1188_v24, 4  ;;  %19912 = vst [vmem:[#allocation31_spill] sm:$0xff] %v13795_v15  ;;  %v1207_v60 = vrot.slane %v13779_v10, 4  ;;  %v1795_v24 = vor.u32 %v1794_v45, %v1793_v43 }
 0x16f   : > { %1091 = vst.msk [vmem:[#allocation2 + $0x1dc] sm:$0xf] %vm1073_vm0, %v13795_v15  ;;  %4871 = vst.msk [vmem:[#allocation2 + $0xf4] sm:$0xf] %vm1073_vm0, %v13795_v15  ;;  %v2074_v13 = vrot.slane %v13676_v62, 6  ;;  %v1800_v21 = vor.u32 %v1799_v46, %v1798_v31  ;;  %v1803_v43 = vrot.slane %v13800_v14, 5 }
 0x170   : > { %19911 = vst [vmem:[#allocation30_spill] sm:$0xff] %v13793_v25  ;;  %1090 = vst.msk [vmem:[#allocation2 + $0x1c0] sm:$0xf] %vm1073_vm0, %v13793_v25  ;;  %v1804_v45 = vrot.slane %v13791_v54, 6  ;;  %v13827_v42 = vsel %vm13140_vm9, %v1189_v19, %v1193_v33  ;;  %v1792_v40 = vrot.slane %v13705_v39, 4  ;;  %v1199_v46 = vrot.slane %v1198_v55, 4 }
 0x171   : > { %4870 = vst.msk [vmem:[#allocation2 + $0xd8] sm:$0xf] %vm1073_vm0, %v13793_v25  ;;  %19913 = vst [vmem:[#allocation32_spill] sm:$0xff] %v13814_v18  ;;  %v13834_v31 = vsel %vm13183_vm12, %v2073_v38, %v2074_v13  ;;  %v1797_v35 = vrot.slane %v1795_v24, 4  ;;  %v1570_v0 = vrot.slane %v1568_v30, 4  ;;  %v1208_v2 = vor.u32 %v1207_v60, %v1203_v32 }
 0x172   : > { %2210 = vrot.lane.b32.xlu1 %v1560_v11, %s12918_s27  ;;  %1642 = vrot.lane.b32.xlu0 %v1560_v11, %s12917_s26  ;;  %5569 = vst.msk [vmem:[#allocation2 + $0x6c] sm:$0xf] %vm1073_vm0, %v13814_v18  ;;  %2166 = vst.msk [vmem:[#allocation2 + $0x154] sm:$0xf] %vm1073_vm0, %v13814_v18  ;;  %v19915_v11 = vrot.slane %v13427_v49, 5  ;;  %v13843_v39 = vshll.u32 %v13676_v62, 16 }
 0x173   : > { %19914 = vst [vmem:[#allocation33_spill] sm:$0xff] %v13827_v42  ;;  %19916 = vst [vmem:[#allocation34_spill] sm:$0xff] %v13834_v31  ;;  %v13846_v33 = vshrl.u32 %v13676_v62, 16  ;;  %v13851_v19 = vld [vmem:[%s19501_s2] ss:$0 sm:$0xff]  ;;  %v1571_v38 = vrot.slane %v13473_v7, 5 }
 0x174   : > { %v1567_v23 = vrot.slane %v19915_v11, 4  ;;  %5570 = vst.msk [vmem:[#allocation2 + $0x88] sm:$0xf] %vm1073_vm0, %v13834_v31  ;;  %2167 = vst.msk [vmem:[#allocation2 + $0x170] sm:$0xf] %vm1073_vm0, %v13834_v31  ;;  %v821_v60 = vadd.f32 %v13851_v19, %v13701_v5  ;;  %v824_v55 = vadd.f32 %v13851_v19, %v823_v27  ;;  %v1802_v11 = vrot.slane %v1800_v21, 4 }
 0x175   : > { %19917 = vst [vmem:[#allocation35_spill] sm:$0xff] %v13843_v39  ;;  %v13859_v31 = vor.u32 %v1804_v45, %v1803_v43  ;;  %v1217_v18 = vrot.slane %v13800_v14, 4  ;;  %v19538_v37 = vrot.slane %v13843_v39, 5  ;;  %v1257_v42 = vrot.slane %v13846_v33, 4 }
 0x176   : > { %2487 = vrot.lane.b32.xlu1 %v13421_v17, %s12919_s28  ;;  %2357 = vrot.lane.b32.xlu0 %v13734_v36, %s12917_s26  ;;  %v931_v62 = vmax.f32 %v821_v60, 0.0  ;;  %v932_v44 = vmax.f32 %v824_v55, 0.0  ;;  %v13866_v5 = vsel %vm13161_vm11, %v1792_v40, %v1795_v24  ;;  %v13870_v27 = vsel %vm13140_vm9, %v1199_v46, %v1203_v32 }
 0x177   : > { %19918 = vst [vmem:[#allocation36_spill] sm:$0xff] %v13870_v27  ;;  %v1209_v4 = vrot.slane %v1208_v2, 4  ;;  %v1213_v43 = vrot.slane %v13791_v54, 5  ;;  %v19919_v45 = vsel %vm13539_vm7, %v13674_v12, %v13693_v47  ;;  %v13883_v24 = vor.u32 %v1257_v42, %v19538_v37 }
 0x178   : > { %v13879_v60 = vpack.c.bf16 %v931_v62, %v931_v62  ;;  %v13885_v40 = vpack.c.bf16 %v932_v44, %v932_v44  ;;  %v13888_v32 = vshll.u32 %v13707_v8, 16  ;;  %v13895_v46 = vshll.u32 %v13473_v7, 16 }
 0x179   : > { %19921 = vst [vmem:[#allocation38_spill] sm:$0xff] %v13883_v24  ;;  %v13892_v2 = vor.u32 %v1217_v18, %v1213_v43  ;;  %v2076_v12 = vrot.slane %v2074_v13, 4  ;;  %v2077_v62 = vrot.slane %v13707_v8, 6  ;;  %v13900_v47 = vsel %vm13120_vm5, %v1567_v23, %v1568_v30 }
 0x17a   : > { %3510 = vrot.lane.b32.xlu1 %v19919_v45, %s12918_s27  ;;  %19920 = vst [vmem:[#allocation37_spill] sm:$0xff] %v13879_v60  ;;  %19922 = vst [vmem:[#allocation39_spill] sm:$0xff] %v13885_v40  ;;  %1919 = vrot.lane.b32.xlu0 %v13734_v36, %s12919_s28  ;;  %v13904_v44 = vsel %vm13161_vm11, %v1797_v35, %v1800_v21  ;;  %v13908_v42 = vsel %vm13120_vm5, %v1570_v0, %v1571_v38  ;;  %v2080_v21 = vrot.slane %v13793_v25, 6 }
 0x17b   : > { %19923 = vst [vmem:[#allocation40_spill] sm:$0xff] %v13888_v32  ;;  %19924 = vst [vmem:[#allocation41_spill] sm:$0xff] %v13900_v47  ;;  %v13913_v36 = vsel %vm13161_vm11, %v1802_v11, %v13859_v31  ;;  %v13925_v0 = vsel %vm13183_vm12, %v2076_v12, %v2077_v62  ;;  %v2079_v35 = vrot.slane %v2077_v62, 4  ;;  %v13929_v18 = vshrl.u32 %v13707_v8, 16  ;;  %v828_v11 = vpop.f32.mrf.mxu0 }
 0x17c   : > { %19925 = vst [vmem:[#allocation42_spill] sm:$0xff] %v13908_v42  ;;  %19926 = vst [vmem:[#allocation43_spill] sm:$0xff] %v13913_v36  ;;  %v13935_v13 = vsel %vm13140_vm9, %v1209_v4, %v1213_v43  ;;  %v13937_v30 = vrot.slane %v1571_v38, 4  ;;  %v1829_v55 = vrot.slane %v13888_v32, 6  ;;  %v13959_v45 = vshll.u32 %v13793_v25, 16 }
 0x17d   : > { %1092 = vst.msk [vmem:[#allocation2 + $0x1f8] sm:$0xf] %vm1073_vm0, %v13879_v60  ;;  %4872 = vst.msk [vmem:[#allocation2 + $0x110] sm:$0xf] %vm1073_vm0, %v13879_v60  ;;  %v13951_v38 = vsel %vm13183_vm12, %v2079_v35, %v2080_v21  ;;  %v1828_v43 = vrot.slane %v13929_v18, 5  ;;  %v13962_v12 = vshrl.u32 %v13793_v25, 16  ;;  %v830_v35 = vpop.f32.mrf.mxu0 }
 0x17e   : > { %1093 = vst.msk [vmem:[#allocation2 + $0x214] sm:$0xf] %vm1073_vm0, %v13885_v40  ;;  %4873 = vst.msk [vmem:[#allocation2 + $0x12c] sm:$0xf] %vm1073_vm0, %v13885_v40  ;;  %3198 = vrot.lane.b32.xlu1 %v13487_v1, %s12919_s28  ;;  %3856 = vrot.lane.b32.xlu0 %v13477_v61, %s12919_s28  ;;  %v1219_v1 = vrot.slane %v13892_v2, 4  ;;  %v829_v2 = vadd.f32 %v13851_v19, %v828_v11  ;;  %v1267_v62 = vrot.slane %v13929_v18, 4 }
 0x17f   : > { %19927 = vst [vmem:[#allocation44_spill] sm:$0xff] %v13925_v0  ;;  %19928 = vst [vmem:[#allocation45_spill] sm:$0xff] %v13935_v13  ;;  %v13967_v4 = vor.u32 %v1829_v55, %v1828_v43  ;;  %v2626_v23 = vrot.slane %v13492_v9, 6  ;;  %v2627_v61 = vrot.slane %v13506_v41, 7  ;;  %v19932_v11 = vrot.slane %v13888_v32, 5  ;;  %v831_v35 = vpop.f32.mrf.mxu0 }
 0x180   : > { %19929 = vst [vmem:[#allocation46_spill] sm:$0xff] %v13937_v30  ;;  %5571 = vst.msk [vmem:[#allocation2 + $0xa4] sm:$0xf] %vm1073_vm0, %v13925_v0  ;;  %v933_v24 = vmax.f32 %v829_v2, 0.0  ;;  %v13980_v55 = vshrl.u32 %v13473_v7, 16  ;;  %v1273_v41 = vrot.slane %v13959_v45, 5  ;;  %v832_v43 = vadd.f32 %v13851_v19, %v831_v35 }
 0x181   : > { %2168 = vst.msk [vmem:[#allocation2 + $0x18c] sm:$0xf] %vm1073_vm0, %v13925_v0  ;;  %19930 = vst [vmem:[#allocation47_spill] sm:$0xff] %v13951_v38  ;;  %v1834_v0 = vrot.slane %v13959_v45, 6  ;;  %v1268_v63 = vor.u32 %v1267_v62, %v19932_v11  ;;  %v1832_v9 = vrot.slane %v13967_v4, 4  ;;  %v1277_v62 = vrot.slane %v13962_v12, 4  ;;  %v833_v11 = vpop.f32.mrf.mxu0 }
 0x182   : > { %5572 = vst.msk [vmem:[#allocation2 + $0xc0] sm:$0xf] %vm1073_vm0, %v13951_v38  ;;  %2169 = vst.msk [vmem:[#allocation2 + $0x1a8] sm:$0xf] %vm1073_vm0, %v13951_v38  ;;  %3724 = vrot.lane.b32.xlu1 %v13318_v6, %s12917_s26  ;;  %v1833_v38 = vrot.slane %v13962_v12, 5  ;;  %3051 = vrot.lane.b32.xlu0 %v13421_v17, %s12917_s26  ;;  %v13987_v30 = vpack.c.bf16 %v933_v24, %v933_v24  ;;  %v934_v13 = vmax.f32 %v832_v43, 0.0 }
 0x183   : > { %19931 = vst [vmem:[#allocation48_spill] sm:$0xff] %v13967_v4  ;;  %v1269_v2 = vrot.slane %v1268_v63, 4  ;;  %v13991_v17 = vshll.u32 %v13795_v15, 16  ;;  %v2628_v36 = vor.u32 %v2627_v61, %v2626_v23  ;;  %v2631_v42 = vrot.slane %v13557_v51, 6 }
 0x184   : > { %v13985_v37 = vor.u32 %v1834_v0, %v1833_v38  ;;  %19933 = vst [vmem:[#allocation49_spill] sm:$0xff] %v13987_v30  ;;  %1094 = vst.msk [vmem:[#allocation2 + $0x230] sm:$0xf] %vm1073_vm0, %v13987_v30  ;;  %v1278_v61 = vor.u32 %v1277_v62, %v1273_v41  ;;  %v2632_v24 = vrot.slane %v13570_v59, 7  ;;  %v14012_v23 = vpack.c.bf16 %v934_v13, %v934_v13 }
 0x185   : > { %4874 = vst.msk [vmem:[#allocation2 + $0x148] sm:$0xf] %vm1073_vm0, %v13987_v30  ;;  %v14007_v63 = vsel %vm13140_vm9, %v1269_v2, %v1273_v41  ;;  %v19550_v38 = vrot.slane %v13991_v17, 5  ;;  %v2082_v35 = vrot.slane %v2080_v21, 4  ;;  %v19937_v43 = vrot.slane %v13895_v46, 5 }
 0x186   : > { %1644 = vrot.lane.b32.xlu1 %v13749_v29, %s12917_s26  ;;  %v13999_v0 = vsel %vm13161_vm11, %v1832_v9, %v13985_v37  ;;  %19935 = vst [vmem:[#allocation51_spill] sm:$0xff] %v14007_v63  ;;  %1427 = vrot.lane.b32.xlu0 %v13762_v3, %s12918_s27  ;;  %19936 = vst [vmem:[#allocation52_spill] sm:$0xff] %v14012_v23  ;;  %v2083_v9 = vrot.slane %v13795_v15, 6  ;;  %v1279_v2 = vrot.slane %v1278_v61, 4  ;;  %v2630_v59 = vrot.slane %v2628_v36, 4 }
 0x187   : > { %19934 = vst [vmem:[#allocation50_spill] sm:$0xff] %v13999_v0  ;;  %v14020_v11 = vsel %vm13140_vm9, %v1219_v1, %v19937_v43  ;;  %1095 = vst.msk [vmem:[#allocation2 + $0x24c] sm:$0xf] %vm1073_vm0, %v14012_v23  ;;  %v2633_v21 = vor.u32 %v2632_v24, %v2631_v42  ;;  %v2625_v13 = vrot.slane %v13467_v57, 4  ;;  %v19940_v1 = vrot.slane %v13318_v6, 7 }
 0x188   : > { %19938 = vst [vmem:[#allocation53_spill] sm:$0xff] %v14020_v11  ;;  %4875 = vst.msk [vmem:[#allocation2 + $0x164] sm:$0xf] %vm1073_vm0, %v14012_v23  ;;  %v14029_v3 = vsel %vm13183_vm12, %v2082_v35, %v2083_v9  ;;  %v14041_v43 = vsel %vm13140_vm9, %v1279_v2, %v19550_v38  ;;  %v2085_v57 = vrot.slane %v2083_v9, 4  ;;  %v19549_v42 = vrot.slane %v13879_v60, 6 }
 0x189   : > { %19939 = vst [vmem:[#allocation54_spill] sm:$0xff] %v14029_v3  ;;  %v2837_v62 = vrot.slane %v19940_v1, 4  ;;  %19941 = vst [vmem:[#allocation55_spill] sm:$0xff] %v14041_v43  ;;  %v14052_v24 = vsel %vm13402_vm3, %v2630_v59, %v2633_v21  ;;  %v14056_v35 = vsel %vm13402_vm3, %v2625_v13, %v2628_v36  ;;  %v2838_v2 = vrot.slane %v13427_v49, 7 }
 0x18a   : > { %2359 = vrot.lane.b32.xlu1 %v13767_v53, %s12917_s26  ;;  %5573 = vst.msk [vmem:[#allocation2 + $0xdc] sm:$0xf] %vm1073_vm0, %v14029_v3  ;;  %2170 = vst.msk [vmem:[#allocation2 + $0x1c4] sm:$0xf] %vm1073_vm0, %v14029_v3  ;;  %2212 = vrot.lane.b32.xlu0 %v13749_v29, %s12918_s27  ;;  %v2841_v1 = vrot.slane %v13465_v50, 7  ;;  %v14064_v9 = vsel %vm13183_vm12, %v2085_v57, %v19549_v42  ;;  %v19945_v29 = vrot.slane %v13557_v51, 7 }
 0x18b   : > { %19942 = vst [vmem:[#allocation56_spill] sm:$0xff] %v14052_v24  ;;  %19943 = vst [vmem:[#allocation57_spill] sm:$0xff] %v14056_v35  ;;  %v3405_v59 = vrot.slane %v13779_v10, 7  ;;  %v3409_v13 = vrot.slane %v13800_v14, 7  ;;  %v14081_v57 = vsel %vm13261_vm15, %v2837_v62, %v2838_v2  ;;  %v2840_v61 = vrot.slane %v2838_v2, 4 }
 0x18c   : > { %19944 = vst [vmem:[#allocation58_spill] sm:$0xff] %v14064_v9  ;;  %2790 = vst.msk [vmem:[#allocation2 + $0x94] sm:$0xf] %vm1073_vm0, %v14052_v24  ;;  %v3404_v36 = vrot.slane %v19945_v29, 4  ;;  %v2636_v51 = vrot.slane %v13779_v10, 6  ;;  %v2637_v38 = vrot.slane %v13752_v20, 7 }
 0x18d   : > { %2789 = vst.msk [vmem:[#allocation2 + $0x78] sm:$0xf] %vm1073_vm0, %v14056_v35  ;;  %5574 = vst.msk [vmem:[#allocation2 + $0xf8] sm:$0xf] %vm1073_vm0, %v14064_v9  ;;  %v3406_v29 = vor.u32 %v3405_v59, %v13752_v20  ;;  %v3408_v41 = vrot.slane %v3405_v59, 4  ;;  %v3410_v42 = vor.u32 %v3409_v13, %v13791_v54  ;;  %v14094_v10 = vshll.u32 %v13579_v56, 16 }
 0x18e   : > { %2171 = vst.msk [vmem:[#allocation2 + $0x1e0] sm:$0xf] %vm1073_vm0, %v14064_v9  ;;  %19946 = vst [vmem:[#allocation59_spill] sm:$0xff] %v14081_v57  ;;  %1921 = vrot.lane.b32.xlu1 %v13767_v53, %s12919_s28  ;;  %2489 = vrot.lane.b32.xlu0 %v13511_v26, %s12919_s28  ;;  %v14097_v53 = vshrl.u32 %v13795_v15, 16  ;;  %v1839_v62 = vrot.slane %v13991_v17, 6  ;;  %v2635_v2 = vrot.slane %v2633_v21, 4  ;;  %v14103_v59 = vsel %vm13261_vm15, %v2840_v61, %v2841_v1 }
 0x18f   : > { %3358 = vst.msk [vmem:[#allocation2 + $0x7c] sm:$0xf] %vm1073_vm0, %v14081_v57  ;;  %v1837_v6 = vrot.slane %v13985_v37, 4  ;;  %19947 = vst [vmem:[#allocation60_spill] sm:$0xff] %v14103_v59  ;;  %v14107_v20 = vsel %vm13539_vm7, %v3404_v36, %v3406_v29  ;;  %v14111_v50 = vsel %vm13539_vm7, %v3408_v41, %v3410_v42  ;;  %v2638_v37 = vor.u32 %v2637_v38, %v2636_v51  ;;  %v19950_v38 = vld [vmem:[#allocation18_spill] sm:$0xff] }
 0x190   : > { %19948 = vst [vmem:[#allocation61_spill] sm:$0xff] %v14107_v20  ;;  %19949 = vst [vmem:[#allocation62_spill] sm:$0xff] %v14111_v50  ;;  %v1838_v49 = vrot.slane %v14097_v53, 5  ;;  %v2641_v21 = vrot.slane %v13800_v14, 6  ;;  %v2642_v61 = vrot.slane %v13791_v54, 7  ;;  %v14125_v41 = vshrl.u32 %v13579_v56, 16 }
 0x191   : > { %3359 = vst.msk [vmem:[#allocation2 + $0x98] sm:$0xf] %vm1073_vm0, %v14103_v59  ;;  %4034 = vst.msk [vmem:[#allocation2 + $0x48] sm:$0xf] %vm1073_vm0, %v14107_v20  ;;  %v14128_v42 = vshll.u32 %v13879_v60, 16  ;;  %v14131_v36 = vshrl.u32 %v13879_v60, 16  ;;  %v14137_v54 = vsel %vm13402_vm3, %v2635_v2, %v2638_v37 }
 0x192   : > { %4035 = vst.msk [vmem:[#allocation2 + $0x64] sm:$0xf] %vm1073_vm0, %v14111_v50  ;;  %3858 = vrot.lane.b32.xlu1 %v13524_v22, %s12919_s28  ;;  %v2843_v29 = vrot.slane %v2841_v1, 4  ;;  %3512 = vrot.lane.b32.xlu0 %v19950_v38, %s12918_s27  ;;  %v1840_v14 = vor.u32 %v1839_v62, %v1838_v49  ;;  %19951 = vst [vmem:[#allocation18_spill] sm:$0xff] %v14137_v54  ;;  %v2640_v51 = vrot.slane %v2638_v37, 4  ;;  %v2844_v1 = vrot.slane %v13473_v7, 7 }
 0x193   : > { %v14139_v50 = vor.u32 %v2642_v61, %v2641_v21  ;;  %v1843_v22 = vrot.slane %v14131_v36, 5  ;;  %v1844_v59 = vrot.slane %v14128_v42, 6  ;;  %2791 = vst.msk [vmem:[#allocation2 + $0xb0] sm:$0xf] %vm1073_vm0, %v14137_v54  ;;  %v3412_v37 = vrot.slane %v3409_v13, 4  ;;  %v19955_v38 = vld [vmem:[#allocation29_spill] sm:$0xff] }
 0x194   : > { %v1631_v20 = vpop.permute.xlu0 %1630  ;;  %v14149_v49 = vsel %vm13161_vm11, %v1837_v6, %v1840_v14  ;;  %v1842_v62 = vrot.slane %v1840_v14, 4  ;;  %v14164_v61 = vsel %vm13261_vm15, %v2843_v29, %v2844_v1  ;;  %v2846_v6 = vrot.slane %v2844_v1, 4 }
 0x195   : > { %19952 = vst [vmem:[#allocation63_spill] sm:$0xff] %v14149_v49  ;;  %v14154_v2 = vsel %vm13402_vm3, %v2640_v51, %v14139_v50  ;;  %v14158_v21 = vor.u32 %v1844_v59, %v1843_v22  ;;  %19954 = vst [vmem:[#allocation65_spill] sm:$0xff] %v14164_v61  ;;  %v3413_v14 = vrot.slane %v13980_v55, 7  ;;  %v836_v51 = vpop.f32.mrf.mxu0  ;;  %v1287_v13 = vrot.slane %v14097_v53, 4 }
 0x196   : > { %19953 = vst [vmem:[#allocation64_spill] sm:$0xff] %v14154_v2  ;;  %3053 = vrot.lane.b32.xlu1 %v13511_v26, %s12917_s26  ;;  %2792 = vst.msk [vmem:[#allocation2 + $0xcc] sm:$0xf] %vm1073_vm0, %v14154_v2  ;;  %1646 = vrot.lane.b32.xlu0 %v19955_v38, %s12917_s26  ;;  %v1293_v26 = vrot.slane %v14128_v42, 5  ;;  %v2645_v59 = vrot.slane %v14139_v50, 4  ;;  %v837_v2 = vadd.f32 %v13851_v19, %v836_v51  ;;  %v19957_v54 = vrot.slane %v13579_v56, 7 }
 0x197   : > { %3360 = vst.msk [vmem:[#allocation2 + $0xb4] sm:$0xf] %vm1073_vm0, %v14164_v61  ;;  %v14178_v1 = vsel %vm13161_vm11, %v1842_v62, %v14158_v21  ;;  %v3414_v61 = vor.u32 %v3413_v14, %v13895_v46  ;;  %v19959_v50 = vrot.slane %v13991_v17, 5  ;;  %v838_v35 = vpop.f32.mrf.mxu0  ;;  %v3416_v62 = vrot.slane %v3413_v14, 4 }
 0x198   : > { %v1633_v29 = vpop.permute.xlu1 %1632  ;;  %v1416_v7 = vpop.permute.xlu0 %1415  ;;  %19956 = vst [vmem:[#allocation66_spill] sm:$0xff] %v14178_v1  ;;  %v14185_v57 = vsel %vm13261_vm15, %v2846_v6, %v19957_v54  ;;  %v19960_v51 = vrot.slane %v14125_v41, 7  ;;  %v2646_v1 = vrot.slane %v13980_v55, 6  ;;  %v19961_v54 = vld [vmem:[#allocation33_spill] sm:$0xff]  ;;  %v1297_v6 = vrot.slane %v14131_v36, 4 }
 0x199   : > { %19958 = vst [vmem:[#allocation67_spill] sm:$0xff] %v14185_v57  ;;  %1506 = vst.msk [vmem:[#allocation2] sm:$0xf] %vm1505_vm8, %v1416_v7  ;;  %v1288_v22 = vor.u32 %v1287_v13, %v19959_v50  ;;  %v935_v7 = vmax.f32 %v837_v2, 0.0  ;;  %v14202_v35 = vshll.u32 %v13885_v40, 16  ;;  %v14206_v14 = vsel %vm13539_vm7, %v3412_v37, %v3414_v61  ;;  %v839_v50 = vpop.f32.mrf.mxu0 }
 0x19a   : > { %3361 = vst.msk [vmem:[#allocation2 + $0xd0] sm:$0xf] %vm1073_vm0, %v14185_v57  ;;  %v3418_v24 = vor.u32 %v19960_v51, %v14094_v10  ;;  %1429 = vrot.lane.b32.xlu1 %v19961_v54, %s12918_s27  ;;  %19962 = vst [vmem:[#allocation68_spill] sm:$0xff] %v14206_v14  ;;  %2361 = vrot.lane.b32.xlu0 %v13866_v5, %s12917_s26  ;;  %v2647_v2 = vrot.slane %v13895_v46, 7  ;;  %v2651_v51 = vrot.slane %v14125_v41, 6  ;;  %v2856_v63 = vrot.slane %v13707_v8, 7 }
 0x19b   : > { %1721 = vst.msk [vmem:[#allocation2] sm:$0xf] %vm1720_vm10, %v1631_v20  ;;  %v1289_v13 = vrot.slane %v1288_v22, 4  ;;  %v14218_v57 = vpack.c.bf16 %v935_v7, %v935_v7  ;;  %v840_v37 = vadd.f32 %v13851_v19, %v839_v50  ;;  %v1298_v61 = vor.u32 %v1297_v6, %v1293_v26  ;;  %v841_v9 = vpop.f32.mrf.mxu0  ;;  %v19968_v22 = vld [vmem:[#allocation21_spill] sm:$0xff] }
 0x19c   : > { %4036 = vst.msk [vmem:[#allocation2 + $0x80] sm:$0xf] %vm1073_vm0, %v14206_v14  ;;  %v14214_v20 = vsel %vm13539_vm7, %v3416_v62, %v3418_v24  ;;  %v1910_v54 = vpop.permute.xlu1 %1909  ;;  %v1418_v14 = vpop.permute.xlu0 %1417  ;;  %v19966_v62 = vrot.slane %v13879_v60, 6  ;;  %v2089_v7 = vrot.slane %v13885_v40, 6  ;;  %v2648_v50 = vor.u32 %v2647_v2, %v2646_v1 }
 0x19d   : > { %19963 = vst [vmem:[#allocation69_spill] sm:$0xff] %v14214_v20  ;;  %19964 = vst [vmem:[#allocation70_spill] sm:$0xff] %v14218_v57  ;;  %v14227_v24 = vsel %vm13140_vm9, %v1289_v13, %v1293_v26  ;;  %v19967_v6 = vrot.slane %v13579_v56, 5  ;;  %v936_v9 = vmax.f32 %v840_v37, 0.0  ;;  %v1299_v26 = vrot.slane %v1298_v61, 4 }
 0x19e   : > { %4037 = vst.msk [vmem:[#allocation2 + $0x9c] sm:$0xf] %vm1073_vm0, %v14214_v20  ;;  %19965 = vst [vmem:[#allocation71_spill] sm:$0xff] %v14227_v24  ;;  %v2088_v49 = vrot.slane %v19966_v62, 4  ;;  %2214 = vrot.lane.b32.xlu1 %v19955_v38, %s12918_s27  ;;  %v14240_v20 = vshrl.u32 %v19968_v22, 16  ;;  %1923 = vrot.lane.b32.xlu0 %v13866_v5, %s12919_s28  ;;  %v2650_v13 = vrot.slane %v2648_v50, 4 }
 0x19f   : > { %2000 = vst.msk [vmem:[#allocation2] sm:$0xf] %vm1999_vm13, %v1910_v54  ;;  %v14237_v54 = vrot.slane %v19967_v6, 4  ;;  %v2652_v2 = vrot.slane %v14094_v10, 7  ;;  %v14259_v37 = vshll.u32 %v19968_v22, 16  ;;  %v14261_v61 = vpack.c.bf16 %v936_v9, %v936_v9  ;;  %v19976_v24 = vld [vmem:[#allocation20_spill] sm:$0xff] }
 0x1a0   : > { %1507 = vst.msk [vmem:[#allocation2 + $0x1c] sm:$0xf] %vm1505_vm8, %v1418_v14  ;;  %v14251_v1 = vsel %vm13183_vm12, %v2088_v49, %v2089_v7  ;;  %v14255_v14 = vsel %vm13402_vm3, %v2645_v59, %v2648_v50  ;;  %v2203_v62 = vpop.permute.xlu1 %2202  ;;  %v19973_v49 = vrot.slane %v13579_v56, 7  ;;  %v1635_v50 = vpop.permute.xlu0 %1634  ;;  %v2850_v9 = vrot.slane %v19968_v22, 7 }
 0x1a1   : > { %1096 = vst.msk [vmem:[#allocation2 + $0x268] sm:$0xf] %vm1073_vm0, %v14218_v57  ;;  %4876 = vst.msk [vmem:[#allocation2 + $0x180] sm:$0xf] %vm1073_vm0, %v14218_v57  ;;  %v2653_v6 = vor.u32 %v2652_v2, %v2651_v51  ;;  %v19975_v38 = vrot.slane %v14125_v41, 7  ;;  %v3421_v51 = vrot.slane %v14240_v20, 7 }
 0x1a2   : > { %1722 = vst.msk [vmem:[#allocation2 + $0x1c] sm:$0xf] %vm1720_vm10, %v1633_v29  ;;  %19969 = vst [vmem:[#allocation72_spill] sm:$0xff] %v14251_v1  ;;  %v19971_v29 = vrot.slane %v14202_v35, 5  ;;  %v2849_v59 = vrot.slane %v19973_v49, 4  ;;  %2491 = vrot.lane.b32.xlu1 %v19976_v24, %s12919_s28  ;;  %v2091_v49 = vrot.slane %v2089_v7, 4  ;;  %1431 = vrot.lane.b32.xlu0 %v13870_v27, %s12918_s27 }
 0x1a3   : > { %19970 = vst [vmem:[#allocation73_spill] sm:$0xff] %v14255_v14  ;;  %5575 = vst.msk [vmem:[#allocation2 + $0x114] sm:$0xf] %vm1073_vm0, %v14251_v1  ;;  %v3425_v2 = vrot.slane %v13846_v33, 7  ;;  %v2852_v24 = vrot.slane %v2850_v9, 4  ;;  %v2657_v27 = vrot.slane %v14259_v37, 7 }
 0x1a4   : > { %v14267_v5 = vsel %vm13140_vm9, %v1299_v26, %v19971_v29  ;;  %2172 = vst.msk [vmem:[#allocation2 + $0x1fc] sm:$0xf] %vm1073_vm0, %v14251_v1  ;;  %2793 = vst.msk [vmem:[#allocation2 + $0xe8] sm:$0xf] %vm1073_vm0, %v14255_v14  ;;  %v19974_v26 = vld [vmem:[#allocation24_spill] sm:$0xff]  ;;  %v14299_v14 = vsel %vm13261_vm15, %v2849_v59, %v2850_v9  ;;  %v2655_v1 = vrot.slane %v2653_v6, 4  ;;  %v14301_v7 = vpop.permute.xlu1 %2479 }
 0x1a5   : > { %19972 = vst [vmem:[#allocation74_spill] sm:$0xff] %v14267_v5  ;;  %2292 = vst.msk [vmem:[#allocation2 + $0x4] sm:$0xf] %vm1505_vm8, %v2203_v62  ;;  %v2853_v29 = vrot.slane %v19974_v26, 7  ;;  %v3420_v5 = vrot.slane %v19975_v38, 4  ;;  %v19587_v62 = vrot.slane %v13987_v30, 6  ;;  %v14295_v38 = vsel %vm13402_vm3, %v2650_v13, %v2653_v6  ;;  %v1912_v6 = vpop.permute.xlu0 %1911 }
 0x1a6   : > { %1097 = vst.msk [vmem:[#allocation2 + $0x284] sm:$0xf] %vm1073_vm0, %v14261_v61  ;;  %4877 = vst.msk [vmem:[#allocation2 + $0x19c] sm:$0xf] %vm1073_vm0, %v14261_v61  ;;  %v3422_v13 = vor.u32 %v3421_v51, %v14259_v37  ;;  %v3424_v59 = vrot.slane %v3421_v51, 4  ;;  %v3426_v9 = vor.u32 %v3425_v2, %v13843_v39  ;;  %v19981_v51 = vld [vmem:[#allocation22_spill] sm:$0xff]  ;;  %2216 = vrot.lane.b32.xlu0 %v13900_v47, %s12918_s27 }
 0x1a7   : > { %19977 = vst [vmem:[#allocation75_spill] sm:$0xff] %v14295_v38  ;;  %19978 = vst [vmem:[#allocation76_spill] sm:$0xff] %v14299_v14  ;;  %v14307_v3 = vsel %vm13183_vm12, %v2091_v49, %v19587_v62  ;;  %v14321_v49 = vsel %vm13261_vm15, %v2852_v24, %v2853_v29  ;;  %v2656_v62 = vrot.slane %v14240_v20, 6  ;;  %3514 = vrot.lane.b32.xlu1 %v19981_v51, %s12918_s27  ;;  %v2855_v43 = vrot.slane %v2853_v29, 4 }
 0x1a8   : > { %19979 = vst [vmem:[#allocation77_spill] sm:$0xff] %v14307_v3  ;;  %2794 = vst.msk [vmem:[#allocation2 + $0x104] sm:$0xf] %vm1073_vm0, %v14295_v38  ;;  %v14333_v38 = vsel %vm13539_vm7, %v3420_v5, %v3422_v13  ;;  %v14337_v24 = vsel %vm13539_vm7, %v3424_v59, %v3426_v9  ;;  %v1849_v5 = vrot.slane %v14202_v35, 6  ;;  %v1420_v13 = vpop.permute.xlu1 %1419  ;;  %v19984_v29 = vrot.slane %v13980_v55, 5 }
 0x1a9   : > { %3362 = vst.msk [vmem:[#allocation2 + $0xec] sm:$0xf] %vm1073_vm0, %v14299_v14  ;;  %5576 = vst.msk [vmem:[#allocation2 + $0x130] sm:$0xf] %vm1073_vm0, %v14307_v3  ;;  %v2661_v14 = vrot.slane %v13846_v33, 6  ;;  %v19985_v59 = vrot.slane %v13895_v46, 6  ;;  %v2910_v0 = vpop.permute.xlu0 %2909 }
 0x1aa   : > { %2173 = vst.msk [vmem:[#allocation2 + $0x218] sm:$0xf] %vm1073_vm0, %v14307_v3  ;;  %19980 = vst [vmem:[#allocation78_spill] sm:$0xff] %v14321_v49  ;;  %v2662_v3 = vrot.slane %v13843_v39, 7  ;;  %v3429_v39 = vrot.slane %v13929_v18, 7 }
 0x1ab   : > { %2001 = vst.msk [vmem:[#allocation2 + $0x1c] sm:$0xf] %vm1999_vm13, %v1912_v6  ;;  %19982 = vst [vmem:[#allocation22_spill] sm:$0xff] %v14333_v38  ;;  %v14356_v9 = vor.u32 %v19985_v59, %v19984_v29  ;;  %v2658_v6 = vor.u32 %v2657_v27, %v2656_v62  ;;  %1648 = vrot.lane.b32.xlu1 %v13900_v47, %s12917_s26  ;;  %v19988_v62 = vld [vmem:[#allocation23_spill] sm:$0xff] }
 0x1ac   : > { %3363 = vst.msk [vmem:[#allocation2 + $0x108] sm:$0xf] %vm1073_vm0, %v14321_v49  ;;  %19983 = vst [vmem:[#allocation79_spill] sm:$0xff] %v14337_v24  ;;  %v14345_v49 = vshrl.u32 %v13885_v40, 16  ;;  %v14358_v51 = vor.u32 %v2662_v3, %v2661_v14  ;;  %v3428_v14 = vrot.slane %v3425_v2, 4  ;;  %2493 = vrot.lane.b32.xlu0 %v19988_v62, %s12919_s28 }
 0x1ad   : > { %4038 = vst.msk [vmem:[#allocation2 + $0xb8] sm:$0xf] %vm1073_vm0, %v14333_v38  ;;  %4039 = vst.msk [vmem:[#allocation2 + $0xd4] sm:$0xf] %vm1073_vm0, %v14337_v24  ;;  %v1847_v38 = vrot.slane %v14158_v21, 4  ;;  %v2859_v24 = vrot.slane %v13793_v25, 7  ;;  %v14372_v27 = vsel %vm13402_vm3, %v2655_v1, %v2658_v6  ;;  %v14376_v21 = vsel %vm13261_vm15, %v2855_v43, %v2856_v63  ;;  %v14390_v43 = vpop.permute.xlu1 %1636  ;;  %v2205_v29 = vpop.permute.xlu0 %2204 }
 0x1ae   : > { %1508 = vst.msk [vmem:[#allocation2 + $0x38] sm:$0xf] %vm1505_vm8, %v1420_v13  ;;  %v1848_v4 = vrot.slane %v14345_v49, 5  ;;  %2999 = vst.msk [vmem:[#allocation2 + $0x8] sm:$0xf] %vm1505_vm8, %v2910_v0  ;;  %v2660_v3 = vrot.slane %v2658_v6, 4 }
 0x1af   : > { %1723 = vst.msk [vmem:[#allocation2 + $0x38] sm:$0xf] %vm1720_vm10, %v1635_v50  ;;  %19986 = vst [vmem:[#allocation80_spill] sm:$0xff] %v14372_v27  ;;  %v14381_v50 = vshll.u32 %v13987_v30, 16  ;;  %v14384_v0 = vshrl.u32 %v13987_v30, 16  ;;  %v2858_v1 = vrot.slane %v2856_v63, 4  ;;  %2363 = vrot.lane.b32.xlu1 %v13904_v44, %s12917_s26 }
 0x1b0   : > { %19987 = vst [vmem:[#allocation81_spill] sm:$0xff] %v14376_v21  ;;  %v1850_v13 = vor.u32 %v1849_v5, %v1848_v4  ;;  %2795 = vst.msk [vmem:[#allocation2 + $0x120] sm:$0xf] %vm1073_vm0, %v14372_v27  ;;  %v14395_v2 = vsel %vm13402_vm3, %v2660_v3, %v14358_v51  ;;  %v3430_v4 = vor.u32 %v3429_v39, %v13888_v32  ;;  %v3432_v6 = vrot.slane %v3429_v39, 4  ;;  %v844_v27 = vpop.f32.mrf.mxu0 }
 0x1b1   : > { %3364 = vst.msk [vmem:[#allocation2 + $0x124] sm:$0xf] %vm1073_vm0, %v14376_v21  ;;  %19989 = vst [vmem:[#allocation82_spill] sm:$0xff] %v14395_v2  ;;  %v19610_v5 = vrot.slane %v13962_v12, 7  ;;  %v1853_v63 = vrot.slane %v14384_v0, 5  ;;  %v1854_v21 = vrot.slane %v14381_v50, 6  ;;  %v14412_v39 = vsel %vm13261_vm15, %v2858_v1, %v2859_v24 }
 0x1b2   : > { %v14401_v59 = vsel %vm13161_vm11, %v1847_v38, %v1850_v13  ;;  %v1852_v47 = vrot.slane %v1850_v13, 4  ;;  %2796 = vst.msk [vmem:[#allocation2 + $0x13c] sm:$0xf] %vm1073_vm0, %v14395_v2  ;;  %19991 = vst [vmem:[#allocation84_spill] sm:$0xff] %v14412_v39  ;;  %v14416_v38 = vsel %vm13539_vm7, %v3428_v14, %v3430_v4  ;;  %v2665_v13 = vrot.slane %v14358_v51, 4  ;;  %v19993_v2 = vld [vmem:[#allocation42_spill] sm:$0xff]  ;;  %v2352_v4 = vpop.permute.xlu1 %2351 }
 0x1b3   : > { %19990 = vst [vmem:[#allocation83_spill] sm:$0xff] %v14401_v59  ;;  %2293 = vst.msk [vmem:[#allocation2 + $0x20] sm:$0xf] %vm1505_vm8, %v2205_v29  ;;  %v3434_v3 = vor.u32 %v19610_v5, %v13959_v45  ;;  %1650 = vrot.lane.b32.xlu0 %v19993_v2, %s12917_s26  ;;  %v14424_v29 = vor.u32 %v1854_v21, %v1853_v63  ;;  %v1307_v62 = vrot.slane %v14345_v49, 4  ;;  %v1313_v1 = vrot.slane %v14381_v50, 5  ;;  %v14441_v59 = vpop.permute.xlu0 %2481 }
 0x1b4   : > { %19992 = vst [vmem:[#allocation85_spill] sm:$0xff] %v14416_v38  ;;  %3365 = vst.msk [vmem:[#allocation2 + $0x140] sm:$0xf] %vm1073_vm0, %v14412_v39  ;;  %v2666_v14 = vrot.slane %v13929_v18, 6  ;;  %v845_v51 = vadd.f32 %v13851_v19, %v844_v27  ;;  %v2667_v63 = vrot.slane %v13888_v32, 7  ;;  %v2671_v5 = vrot.slane %v13962_v12, 6  ;;  %v846_v39 = vpop.f32.mrf.mxu0  ;;  %1925 = vrot.lane.b32.xlu1 %v13904_v44, %s12919_s28 }
 0x1b5   : > { %4040 = vst.msk [vmem:[#allocation2 + $0xf0] sm:$0xf] %vm1073_vm0, %v14416_v38  ;;  %v14436_v21 = vsel %vm13539_vm7, %v3432_v6, %v3434_v3  ;;  %v14446_v38 = vsel %vm13161_vm11, %v1852_v47, %v14424_v29  ;;  %v19996_v18 = vrot.slane %v14202_v35, 5  ;;  %v2672_v6 = vrot.slane %v13959_v45, 7  ;;  %v19997_v39 = vld [vmem:[#allocation43_spill] sm:$0xff] }
 0x1b6   : > { %19994 = vst [vmem:[#allocation86_spill] sm:$0xff] %v14436_v21  ;;  %2441 = vst.msk [vmem:[#allocation2 + $0x4] sm:$0xf] %vm1720_vm10, %v2352_v4  ;;  %v2861_v3 = vrot.slane %v2859_v24, 4  ;;  %v937_v4 = vmax.f32 %v845_v51, 0.0  ;;  %v1317_v47 = vrot.slane %v14384_v0, 4  ;;  %v1914_v32 = vpop.permute.xlu1 %1913 }
 0x1b7   : > { %19995 = vst [vmem:[#allocation87_spill] sm:$0xff] %v14446_v38  ;;  %v1308_v27 = vor.u32 %v1307_v62, %v19996_v18  ;;  %4041 = vst.msk [vmem:[#allocation2 + $0x10c] sm:$0xf] %vm1073_vm0, %v14436_v21  ;;  %v14459_v38 = vshll.u32 %v14012_v23, 16  ;;  %v2668_v62 = vor.u32 %v2667_v63, %v2666_v14  ;;  %2365 = vrot.lane.b32.xlu0 %v19997_v39, %s12917_s26  ;;  %v847_v21 = vpop.f32.mrf.mxu0  ;;  %v2862_v24 = vrot.slane %v13795_v15, 7  ;;  %v14472_v14 = vpop.permute.xlu0 %3718 }
 0x1b8   : > { %2569 = vst.msk [vmem:[#allocation2 + $0x4] sm:$0xf] %vm1999_vm13, %v14301_v7  ;;  %v14463_v45 = vor.u32 %v2672_v6, %v2671_v5  ;;  %v14467_v44 = vpack.c.bf16 %v937_v4, %v937_v4  ;;  %v848_v51 = vadd.f32 %v13851_v19, %v847_v21  ;;  %v1318_v25 = vor.u32 %v1317_v47, %v1313_v1  ;;  %v20002_v47 = vld [vmem:[#allocation45_spill] sm:$0xff] }
 0x1b9   : > { %v1309_v18 = vrot.slane %v1308_v27, 4  ;;  %2002 = vst.msk [vmem:[#allocation2 + $0x38] sm:$0xf] %vm1999_vm13, %v1914_v32  ;;  %v20000_v63 = vrot.slane %v13987_v30, 6  ;;  %v2095_v6 = vrot.slane %v14012_v23, 6  ;;  %v849_v4 = vpop.f32.mrf.mxu0  ;;  %v14483_v21 = vsel %vm13402_vm3, %v2665_v13, %v2668_v62  ;;  %1433 = vrot.lane.b32.xlu1 %v20002_v47, %s12918_s27 }
 0x1ba   : > { %19998 = vst [vmem:[#allocation88_spill] sm:$0xff] %v14467_v44  ;;  %20001 = vst [vmem:[#allocation90_spill] sm:$0xff] %v14483_v21  ;;  %v1813_v32 = vrot.slane %v14125_v41, 5  ;;  %v1814_v7 = vrot.slane %v14094_v10, 6  ;;  %v14503_v4 = vsel %vm13261_vm15, %v2861_v3, %v2862_v24  ;;  %v2864_v8 = vrot.slane %v2862_v24, 4  ;;  %v2912_v47 = vpop.permute.xlu1 %2911 }
 0x1bb   : > { %v14476_v5 = vsel %vm13140_vm9, %v1309_v18, %v1313_v1  ;;  %v2094_v27 = vrot.slane %v20000_v63, 4  ;;  %1098 = vst.msk [vmem:[#allocation2 + $0x2a0] sm:$0xf] %vm1073_vm0, %v14467_v44  ;;  %4878 = vst.msk [vmem:[#allocation2 + $0x1b8] sm:$0xf] %vm1073_vm0, %v14467_v44  ;;  %v938_v1 = vmax.f32 %v848_v51, 0.0  ;;  %1927 = vrot.lane.b32.xlu0 %v19997_v39, %s12919_s28  ;;  %v14528_v3 = vpop.permute.xlu0 %1638 }
 0x1bc   : > { %19999 = vst [vmem:[#allocation89_spill] sm:$0xff] %v14476_v5  ;;  %v1319_v18 = vrot.slane %v1318_v25, 4  ;;  %2797 = vst.msk [vmem:[#allocation2 + $0x158] sm:$0xf] %vm1073_vm0, %v14483_v21  ;;  %v2670_v63 = vrot.slane %v2668_v62, 4  ;;  %v20004_v51 = vrot.slane %v13895_v46, 5 }
 0x1bd   : > { %v14499_v13 = vsel %vm13183_vm12, %v2094_v27, %v2095_v6  ;;  %20003 = vst [vmem:[#allocation91_spill] sm:$0xff] %v14503_v4  ;;  %v20005_v25 = vrot.slane %v13980_v55, 4  ;;  %v14511_v21 = vpack.c.bf16 %v938_v1, %v938_v1  ;;  %v20007_v39 = vrot.slane %v14459_v38, 5  ;;  %3366 = vst.msk [vmem:[#allocation2 + $0x15c] sm:$0xf] %vm1073_vm0, %v14503_v4  ;;  %2218 = vrot.lane.b32.xlu1 %v19993_v2, %s12918_s27 }
 0x1be   : > { %5577 = vst.msk [vmem:[#allocation2 + $0x14c] sm:$0xf] %vm1073_vm0, %v14499_v13  ;;  %2174 = vst.msk [vmem:[#allocation2 + $0x234] sm:$0xf] %vm1073_vm0, %v14499_v13  ;;  %v20009_v46 = vrot.slane %v13962_v12, 7  ;;  %v14533_v62 = vsel %vm13402_vm3, %v2670_v63, %v14463_v45  ;;  %v3437_v1 = vrot.slane %v14097_v53, 7  ;;  %v14573_v4 = vor.u32 %v1814_v7, %v1813_v32 }
 0x1bf   : > { %v14509_v5 = vor.u32 %v20005_v25, %v20004_v51  ;;  %20006 = vst [vmem:[#allocation92_spill] sm:$0xff] %v14511_v21  ;;  %v14517_v27 = vsel %vm13140_vm9, %v1319_v18, %v20007_v39  ;;  %3000 = vst.msk [vmem:[#allocation2 + $0x24] sm:$0xf] %vm1505_vm8, %v2912_v47  ;;  %v20011_v39 = vrot.slane %v13879_v60, 7  ;;  %v3441_v12 = vrot.slane %v14131_v36, 7  ;;  %1435 = vrot.lane.b32.xlu0 %v14020_v11, %s12918_s27  ;;  %v20015_v7 = vld [vmem:[#allocation27_spill] sm:$0xff] }
 0x1c0   : > { %20008 = vst [vmem:[#allocation93_spill] sm:$0xff] %v14517_v27  ;;  %v3436_v55 = vrot.slane %v20009_v46, 4  ;;  %20010 = vst [vmem:[#allocation94_spill] sm:$0xff] %v14533_v62  ;;  %v1812_v47 = vrot.slane %v14356_v9, 4  ;;  %v2097_v18 = vrot.slane %v2095_v6, 4  ;;  %v19632_v63 = vrot.slane %v14218_v57, 6 }
 0x1c1   : > { %v14539_v24 = vsel %vm13261_vm15, %v2864_v8, %v20011_v39  ;;  %1099 = vst.msk [vmem:[#allocation2 + $0x2bc] sm:$0xf] %vm1073_vm0, %v14511_v21  ;;  %4879 = vst.msk [vmem:[#allocation2 + $0x1d4] sm:$0xf] %vm1073_vm0, %v14511_v21  ;;  %v2676_v8 = vrot.slane %v14097_v53, 6  ;;  %v3438_v51 = vor.u32 %v3437_v1, %v13991_v17  ;;  %v3440_v25 = vrot.slane %v3437_v1, 4  ;;  %v1422_v39 = vpop.permute.xlu1 %1421  ;;  %v2354_v1 = vpop.permute.xlu0 %2353  ;;  %2495 = vrot.lane.b32.xlu1 %v20015_v7, %s12919_s28 }
 0x1c2   : > { %20012 = vst [vmem:[#allocation95_spill] sm:$0xff] %v14539_v24  ;;  %2798 = vst.msk [vmem:[#allocation2 + $0x174] sm:$0xf] %vm1073_vm0, %v14533_v62  ;;  %v3442_v6 = vor.u32 %v3441_v12, %v14128_v42  ;;  %v2677_v46 = vrot.slane %v13991_v17, 7  ;;  %v14567_v2 = vsel %vm13183_vm12, %v2097_v18, %v19632_v63  ;;  %v2675_v53 = vrot.slane %v14463_v45, 4  ;;  %v20017_v18 = vld [vmem:[#allocation46_spill] sm:$0xff] }
 0x1c3   : > { %3367 = vst.msk [vmem:[#allocation2 + $0x178] sm:$0xf] %vm1073_vm0, %v14539_v24  ;;  %v2681_v11 = vrot.slane %v14131_v36, 6  ;;  %v2682_v24 = vrot.slane %v14128_v42, 7  ;;  %5578 = vst.msk [vmem:[#allocation2 + $0x168] sm:$0xf] %vm1073_vm0, %v14567_v2  ;;  %v14581_v17 = vsel %vm13539_vm7, %v3436_v55, %v3438_v51 }
 0x1c4   : > { %1509 = vst.msk [vmem:[#allocation2 + $0x54] sm:$0xf] %vm1505_vm8, %v1422_v39  ;;  %20013 = vst [vmem:[#allocation96_spill] sm:$0xff] %v14581_v17  ;;  %v14585_v45 = vsel %vm13539_vm7, %v3440_v25, %v3442_v6  ;;  %v2678_v42 = vor.u32 %v2677_v46, %v2676_v8  ;;  %v20016_v32 = vrot.slane %v13579_v56, 5  ;;  %v1229_v51 = vrot.slane %v14509_v5, 4  ;;  %v12783_v39 = vld [vmem:[%s19504_s5 + $0x2e0] sm:$0xff]  }
 0x1c5   : > { %2175 = vst.msk [vmem:[#allocation2 + $0x250] sm:$0xf] %vm1073_vm0, %v14567_v2  ;;  %20014 = vst [vmem:[#allocation97_spill] sm:$0xff] %v14585_v45  ;;  %v1233_v25 = vrot.slane %v14094_v10, 5  ;;  %v20020_v8 = vrot.slane %v19968_v22, 5  ;;  %v14619_v5 = vshrl.u32 %v14012_v23, 16 }
 0x1c6   : > { %1724 = vst.msk [vmem:[#allocation2 + $0x54] sm:$0xf] %vm1720_vm10, %v14390_v43  ;;  %2442 = vst.msk [vmem:[#allocation2 + $0x20] sm:$0xf] %vm1720_vm10, %v2354_v1  ;;  %v14597_v55 = vsel %vm13120_vm5, %v20017_v18, %v20016_v32  ;;  %v14605_v43 = vor.u32 %v2682_v24, %v2681_v11  ;;  %v1859_v6 = vrot.slane %v14459_v38, 6  ;;  %v2207_v11 = vpop.permute.xlu1 %2206  ;;  %v20022_v24 = vrot.slane %v13859_v31, 4  ;;  %v1916_v32 = vpop.permute.xlu0 %1915 }
 0x1c7   : > { %20019 = vst [vmem:[#allocation46_spill] sm:$0xff] %v14597_v55  ;;  %4042 = vst.msk [vmem:[#allocation2 + $0x128] sm:$0xf] %vm1073_vm0, %v14581_v17  ;;  %2220 = vrot.lane.b32.xlu0 %v14597_v55, %s12918_s27  ;;  %v14616_v10 = vsel %vm13120_vm5, %v14237_v54, %v20020_v8  ;;  %v1237_v46 = vrot.slane %v14125_v41, 4  ;;  %v14632_v1 = vsel %vm13402_vm3, %v2675_v53, %v2678_v42  ;;  %v2680_v54 = vrot.slane %v2678_v42, 4 }
 0x1c8   : > { %4043 = vst.msk [vmem:[#allocation2 + $0x144] sm:$0xf] %vm1073_vm0, %v14585_v45  ;;  %20021 = vst [vmem:[#allocation8_spill] sm:$0xff] %v14616_v10  ;;  %v14638_v18 = vsel %vm13161_vm11, %v1812_v47, %v14573_v4  ;;  %v1858_v8 = vrot.slane %v14619_v5, 5  ;;  %1652 = vrot.lane.b32.xlu1 %v14597_v55, %s12917_s26  ;;  %v14650_v41 = vsel %vm13140_vm9, %v1229_v51, %v1233_v25  ;;  %v2868_v42 = vrot.slane %v13885_v40, 7 }
 0x1c9   : > { %2570 = vst.msk [vmem:[#allocation2 + $0x20] sm:$0xf] %vm1999_vm13, %v14441_v59  ;;  %v14627_v59 = vsel %vm13161_vm11, %v20022_v24, %v14356_v9  ;;  %20024 = vst [vmem:[#allocation99_spill] sm:$0xff] %v14632_v1  ;;  %v1857_v9 = vrot.slane %v14424_v29, 4  ;;  %v14655_v47 = vsel %vm13402_vm3, %v2680_v54, %v14605_v43  ;;  %v20028_v29 = vrot.slane %v13879_v60, 7 }
 0x1ca   : > { %20023 = vst [vmem:[#allocation98_spill] sm:$0xff] %v14627_v59  ;;  %2294 = vst.msk [vmem:[#allocation2 + $0x3c] sm:$0xf] %vm1505_vm8, %v2207_v11  ;;  %v20029_v11 = vld [vmem:[#allocation28_spill] sm:$0xff]  ;;  %v1860_v24 = vor.u32 %v1859_v6, %v1858_v8  ;;  %v14666_v51 = vshrl.u32 %v14218_v57, 16  ;;  %v3445_v54 = vrot.slane %v14345_v49, 7  ;;  %v14671_v31 = vpop.permute.xlu1 %2483  ;;  %v3048_v55 = vpop.permute.xlu0 %3047 }
 0x1cb   : > { %20025 = vst [vmem:[#allocation100_spill] sm:$0xff] %v14638_v18  ;;  %2799 = vst.msk [vmem:[#allocation2 + $0x190] sm:$0xf] %vm1073_vm0, %v14632_v1  ;;  %v2867_v53 = vrot.slane %v20028_v29, 4  ;;  %2497 = vrot.lane.b32.xlu0 %v20029_v11, %s12919_s28  ;;  %v2870_v63 = vrot.slane %v2868_v42, 4  ;;  %v19642_v6 = vrot.slane %v13987_v30, 7 }
 0x1cc   : > { %2003 = vst.msk [vmem:[#allocation2 + $0x54] sm:$0xf] %vm1999_vm13, %v1916_v32  ;;  %20026 = vst [vmem:[#allocation101_spill] sm:$0xff] %v14650_v41  ;;  %v14663_v32 = vshll.u32 %v14218_v57, 16  ;;  %v3444_v8 = vrot.slane %v3441_v12, 4  ;;  %v14682_v1 = vsel %vm13161_vm11, %v1857_v9, %v1860_v24  ;;  %v1863_v45 = vrot.slane %v14666_v51, 5  ;;  %2367 = vrot.lane.b32.xlu1 %v14627_v59, %s12917_s26 }
 0x1cd   : > { %20027 = vst [vmem:[#allocation102_spill] sm:$0xff] %v14655_v47  ;;  %2800 = vst.msk [vmem:[#allocation2 + $0x1ac] sm:$0xf] %vm1073_vm0, %v14655_v47  ;;  %v14675_v29 = vsel %vm13261_vm15, %v2867_v53, %v2868_v42  ;;  %v1862_v47 = vrot.slane %v1860_v24, 4  ;;  %v12443_v36 = vld [vmem:[#allocation2] ss:$28 sps:$4 sm:$0xff]   ;;  %v14691_v53 = vor.u32 %v1237_v46, %v1233_v25  ;;  %v14697_v9 = vsel %vm13261_vm15, %v2870_v63, %v19642_v6 }
 0x1ce   : > { %20030 = vst [vmem:[#allocation103_spill] sm:$0xff] %v14675_v29  ;;  %20031 = vst [vmem:[#allocation104_spill] sm:$0xff] %v14682_v1  ;;  %v1864_v17 = vrot.slane %v14663_v32, 6  ;;  %v3446_v42 = vor.u32 %v3445_v54, %v14202_v35  ;;  %v3448_v24 = vrot.slane %v3445_v54, 4  ;;  %v1327_v62 = vrot.slane %v14619_v5, 4  ;;  %v14709_v63 = vpop.permute.xlu1 %3720  ;;  %v2914_v56 = vpop.permute.xlu0 %2913 }
 0x1cf   : > { %3368 = vst.msk [vmem:[#allocation2 + $0x194] sm:$0xf] %vm1073_vm0, %v14675_v29  ;;  %20032 = vst [vmem:[#allocation105_spill] sm:$0xff] %v14697_v9  ;;  %1654 = vrot.lane.b32.xlu0 %v14616_v10, %s12917_s26  ;;  %v852_v29 = vpop.f32.mrf.mxu0  ;;  %v1333_v25 = vrot.slane %v14663_v32, 5  ;;  %v20035_v46 = vrot.slane %v14459_v38, 5 }
 0x1d0   : > { %3137 = vst.msk [vmem:[#allocation2 + $0x8] sm:$0xf] %vm1720_vm10, %v3048_v55  ;;  %v12445_v12 = vld [vmem:[#allocation2 + $0x4] ss:$28 sps:$4 sm:$0xff]   ;;  %v14702_v55 = vor.u32 %v1864_v17, %v1863_v45  ;;  %v853_v54 = vadd.f32 %v13851_v19, %v852_v29  ;;  %v14714_v6 = vsel %vm13539_vm7, %v3444_v8, %v3446_v42  ;;  %v2685_v17 = vrot.slane %v14605_v43, 4  ;;  %1929 = vrot.lane.b32.xlu1 %v14627_v59, %s12919_s28 }
 0x1d1   : > { %3369 = vst.msk [vmem:[#allocation2 + $0x1b0] sm:$0xf] %vm1073_vm0, %v14697_v9  ;;  %6726 = vmatprep.mubr.bf16.mxu1 %v12445_v12  ;;  %20033 = vst [vmem:[#allocation106_spill] sm:$0xff] %v14714_v6  ;;  %v2686_v45 = vrot.slane %v14345_v49, 6  ;;  %v1328_v12 = vor.u32 %v1327_v62, %v20035_v46  ;;  %v854_v11 = vpop.f32.mrf.mxu0  ;;  %v20036_v19 = vrot.slane %v14384_v0, 7  ;;  %v2687_v49 = vrot.slane %v14202_v35, 7 }
 0x1d2   : > { %6727 = vmatmul.mubr.bf16.vlgmr.msra.gmra.mxu1 %v12443_v36  ;;  %v14721_v9 = vsel %vm13161_vm11, %v1862_v47, %v14702_v55  ;;  %4044 = vst.msk [vmem:[#allocation2 + $0x160] sm:$0xf] %vm1073_vm0, %v14714_v6  ;;  %v939_v47 = vmax.f32 %v853_v54, 0.0  ;;  %v1337_v29 = vrot.slane %v14666_v51, 4  ;;  %v14736_v62 = vshll.u32 %v14261_v61, 16  ;;  %v14746_v46 = vpop.permute.xlu1 %1640 }
 0x1d3   : > { %20034 = vst [vmem:[#allocation107_spill] sm:$0xff] %v14721_v9  ;;  %v3450_v43 = vor.u32 %v20036_v19, %v14381_v50  ;;  %3001 = vst.msk [vmem:[#allocation2 + $0x40] sm:$0xf] %vm1505_vm8, %v2914_v56  ;;  %v2691_v11 = vrot.slane %v14384_v0, 6  ;;  %2369 = vrot.lane.b32.xlu0 %v14638_v18, %s12917_s26  ;;  %v1329_v8 = vrot.slane %v1328_v12, 4  ;;  %v855_v36 = vpop.f32.mrf.mxu0  ;;  %v2688_v56 = vor.u32 %v2687_v49, %v2686_v45 }
 0x1d4   : > { %v2692_v42 = vrot.slane %v14381_v50, 7  ;;  %v14748_v54 = vpack.c.bf16 %v939_v47, %v939_v47  ;;  %v14753_v19 = vld [vmem:[%s19501_s2] ss:$0 sm:$0xff]  ;;  %v1338_v12 = vor.u32 %v1337_v29, %v1333_v25  ;;  %v19649_v6 = vrot.slane %v14736_v62, 5  ;;  %1437 = vrot.lane.b32.xlu1 %v14650_v41, %s12918_s27 }
 0x1d5   : > { %v14743_v35 = vsel %vm13539_vm7, %v3448_v24, %v3450_v43  ;;  %v856_v59 = vadd.f32 %v14753_v19, %v855_v36  ;;  %v1424_v24 = vpop.permute.xlu0 %1423  ;;  %v14761_v50 = vsel %vm13140_vm9, %v1329_v8, %v1333_v25  ;;  %v20040_v45 = vrot.slane %v14218_v57, 6  ;;  %v857_v47 = vpop.f32.mrf.mxu0 }
 0x1d6   : > { %20037 = vst [vmem:[#allocation108_spill] sm:$0xff] %v14743_v35  ;;  %20038 = vst [vmem:[#allocation109_spill] sm:$0xff] %v14748_v54  ;;  %v2101_v49 = vrot.slane %v14261_v61, 6  ;;  %v14768_v36 = vsel %vm13402_vm3, %v2685_v17, %v2688_v56  ;;  %v1239_v29 = vrot.slane %v14691_v53, 4  ;;  %v1819_v25 = vrot.slane %v14259_v37, 6 }
 0x1d7   : > { %4045 = vst.msk [vmem:[#allocation2 + $0x17c] sm:$0xf] %vm1073_vm0, %v14743_v35  ;;  %20039 = vst [vmem:[#allocation110_spill] sm:$0xff] %v14761_v50  ;;  %v2100_v43 = vrot.slane %v20040_v45, 4  ;;  %v940_v8 = vmax.f32 %v856_v59, 0.0  ;;  %v1339_v45 = vrot.slane %v1338_v12, 4  ;;  %1931 = vrot.lane.b32.xlu0 %v14638_v18, %s12919_s28  ;;  %v14790_v47 = vor.u32 %v2692_v42, %v2691_v11  ;;  %v2356_v59 = vpop.permute.xlu1 %2355 }
 0x1d8   : > { %20041 = vst [vmem:[#allocation111_spill] sm:$0xff] %v14768_v36  ;;  %1510 = vst.msk [vmem:[#allocation2 + $0x70] sm:$0xf] %vm1505_vm8, %v1424_v24  ;;  %v1818_v53 = vrot.slane %v14240_v20, 5  ;;  %v2690_v24 = vrot.slane %v2688_v56, 4  ;;  %v20044_v11 = vrot.slane %v19968_v22, 5  ;;  %2222 = vrot.lane.b32.xlu1 %v14616_v10, %s12918_s27 }
 0x1d9   : > { %1100 = vst.msk [vmem:[#allocation2 + $0x2d8] sm:$0xf] %vm1073_vm0, %v14748_v54  ;;  %4880 = vst.msk [vmem:[#allocation2 + $0x1f0] sm:$0xf] %vm1073_vm0, %v14748_v54  ;;  %v14788_v17 = vsel %vm13183_vm12, %v2100_v43, %v2101_v49  ;;  %v14792_v12 = vpack.c.bf16 %v940_v8, %v940_v8  ;;  %v2209_v56 = vpop.permute.xlu0 %2208  ;;  %v1580_v43 = vrot.slane %v19974_v26, 5  ;;  %v1817_v10 = vrot.slane %v14573_v4, 4 }
 0x1da   : > { %2801 = vst.msk [vmem:[#allocation2 + $0x1c8] sm:$0xf] %vm1073_vm0, %v14768_v36  ;;  %5579 = vst.msk [vmem:[#allocation2 + $0x184] sm:$0xf] %vm1073_vm0, %v14788_v17  ;;  %v1579_v42 = vrot.slane %v20044_v11, 4  ;;  %v14811_v8 = vsel %vm13402_vm3, %v2690_v24, %v14790_v47  ;;  %v1247_v11 = vrot.slane %v14240_v20, 4 }
 0x1db   : > { %1725 = vst.msk [vmem:[#allocation2 + $0x70] sm:$0xf] %vm1720_vm10, %v14528_v3  ;;  %20042 = vst [vmem:[#allocation112_spill] sm:$0xff] %v14792_v12  ;;  %v14798_v3 = vsel %vm13140_vm9, %v1339_v45, %v19649_v6  ;;  %v20046_v45 = vrot.slane %v14259_v37, 5  ;;  %v19657_v24 = vrot.slane %v14467_v44, 6  ;;  %v1918_v6 = vpop.permute.xlu1 %1917  ;;  %v1582_v41 = vrot.slane %v1580_v43, 4 }
 0x1dc   : > { %20043 = vst [vmem:[#allocation113_spill] sm:$0xff] %v14798_v3  ;;  %2176 = vst.msk [vmem:[#allocation2 + $0x26c] sm:$0xf] %vm1073_vm0, %v14788_v17  ;;  %v3453_v35 = vrot.slane %v14619_v5, 7  ;;  %v19665_v26 = vrot.slane %v14218_v57, 7  ;;  %v20060_v22 = vrot.slane %v14384_v0, 7 }
 0x1dd   : > { %2443 = vst.msk [vmem:[#allocation2 + $0x3c] sm:$0xf] %vm1720_vm10, %v2356_v59  ;;  %20045 = vst [vmem:[#allocation114_spill] sm:$0xff] %v14811_v8  ;;  %v14822_v59 = vsel %vm13140_vm9, %v1239_v29, %v20046_v45  ;;  %v1823_v29 = vrot.slane %v13846_v33, 5  ;;  %v20048_v45 = vld [vmem:[#allocation35_spill] sm:$0xff]  ;;  %v20050_v33 = vld [vmem:[#allocation32_spill] sm:$0xff] }
 0x1de   : > { %2571 = vst.msk [vmem:[#allocation2 + $0x3c] sm:$0xf] %vm1999_vm13, %v14671_v31  ;;  %20047 = vst [vmem:[#allocation115_spill] sm:$0xff] %v14822_v59  ;;  %v2103_v31 = vrot.slane %v2101_v49, 4  ;;  %1439 = vrot.lane.b32.xlu0 %v14822_v59, %s12918_s27  ;;  %v1824_v20 = vrot.slane %v20048_v45, 6  ;;  %v14843_v49 = vpop.permute.xlu0 %2485  ;;  %v20049_v59 = vld [vmem:[#allocation26_spill] sm:$0xff]  ;;  %2499 = vrot.lane.b32.xlu1 %v20050_v33, %s12919_s28  ;;  %v3454_v0 = vor.u32 %v3453_v35, %v14459_v38 }
 0x1df   : > { %2295 = vst.msk [vmem:[#allocation2 + $0x58] sm:$0xf] %vm1505_vm8, %v2209_v56  ;;  %v1820_v56 = vor.u32 %v1819_v25, %v1818_v53  ;;  %v14855_v53 = vsel %vm13120_vm5, %v1579_v42, %v1580_v43  ;;  %v14866_v25 = vshrl.u32 %v14261_v61, 16  ;;  %v3050_v36 = vpop.permute.xlu1 %3049  ;;  %v20054_v43 = vrot.slane %v20049_v59, 5 }
 0x1e0   : > { %1101 = vst.msk [vmem:[#allocation2 + $0x2f4] sm:$0xf] %vm1073_vm0, %v14792_v12  ;;  %4881 = vst.msk [vmem:[#allocation2 + $0x20c] sm:$0xf] %vm1073_vm0, %v14792_v12  ;;  %v14840_v18 = vsel %vm13183_vm12, %v2103_v31, %v19657_v24  ;;  %v14863_v24 = vor.u32 %v1824_v20, %v1823_v29  ;;  %v1867_v29 = vrot.slane %v14702_v55, 4 }
 0x1e1   : > { %2802 = vst.msk [vmem:[#allocation2 + $0x1e4] sm:$0xf] %vm1073_vm0, %v14811_v8  ;;  %5580 = vst.msk [vmem:[#allocation2 + $0x1a0] sm:$0xf] %vm1073_vm0, %v14840_v18  ;;  %v1822_v4 = vrot.slane %v1820_v56, 4  ;;  %v1869_v8 = vrot.slane %v14736_v62, 6 }
 0x1e2   : > { %2004 = vst.msk [vmem:[#allocation2 + $0x70] sm:$0xf] %vm1999_vm13, %v1918_v6  ;;  %20051 = vst [vmem:[#allocation35_spill] sm:$0xff] %v14855_v53  ;;  %v20052_v6 = vrot.slane %v14259_v37, 5  ;;  %2224 = vrot.lane.b32.xlu0 %v14855_v53, %s12918_s27  ;;  %v3509_v42 = vpop.permute.xlu0 %3508  ;;  %v14872_v37 = vsel %vm13161_vm11, %v1817_v10, %v1820_v56  ;;  %v1868_v20 = vrot.slane %v14866_v25, 5  ;;  %1656 = vrot.lane.b32.xlu1 %v14855_v53, %s12917_s26  ;;  %v20056_v10 = vrot.slane %v13987_v30, 7 }
 0x1e3   : > { %2177 = vst.msk [vmem:[#allocation2 + $0x288] sm:$0xf] %vm1073_vm0, %v14840_v18  ;;  %20053 = vst [vmem:[#allocation116_spill] sm:$0xff] %v14872_v37  ;;  %v14897_v55 = vsel %vm13161_vm11, %v1822_v4, %v14863_v24 }
 0x1e4   : > { %v14859_v31 = vor.u32 %v1247_v11, %v20052_v6  ;;  %3138 = vst.msk [vmem:[#allocation2 + $0x24] sm:$0xf] %vm1720_vm10, %v3050_v36  ;;  %v14878_v11 = vsel %vm13120_vm5, %v1582_v41, %v20054_v43  ;;  %v2873_v56 = vrot.slane %v20056_v10, 4  ;;  %v2874_v6 = vrot.slane %v14012_v23, 7  ;;  %v20057_v41 = vld [vmem:[#allocation34_spill] sm:$0xff]  ;;  %20058 = vst [vmem:[#allocation118_spill] sm:$0xff] %v14897_v55  ;;  %v2916_v10 = vpop.permute.xlu1 %2915 }
 0x1e5   : > { %20055 = vst [vmem:[#allocation117_spill] sm:$0xff] %v14878_v11  ;;  %3598 = vst.msk [vmem:[#allocation2 + $0xc] sm:$0xf] %vm1505_vm8, %v3509_v42  ;;  %v1870_v42 = vor.u32 %v1869_v8, %v1868_v20  ;;  %v14903_v43 = vshrl.u32 %v14467_v44, 16 }
 0x1e6   : > { %v1249_v36 = vrot.slane %v14859_v31, 4  ;;  %3808 = vst.msk [vmem:[#allocation2 + $0xc] sm:$0xf] %vm1720_vm10, %v14472_v14  ;;  %2501 = vrot.lane.b32.xlu0 %v20057_v41, %s12919_s28  ;;  %v14900_v31 = vshll.u32 %v14467_v44, 16  ;;  %v14907_v53 = vsel %vm13261_vm15, %v2873_v56, %v2874_v6  ;;  %v2876_v14 = vrot.slane %v2874_v6, 4  ;;  %v3197_v8 = vpop.permute.xlu0 %3196  ;;  %2371 = vrot.lane.b32.xlu1 %v14872_v37, %s12917_s26 }
 0x1e7   : > { %20059 = vst [vmem:[#allocation119_spill] sm:$0xff] %v14907_v53  ;;  %v3452_v41 = vrot.slane %v20060_v22, 4  ;;  %3002 = vst.msk [vmem:[#allocation2 + $0x5c] sm:$0xf] %vm1505_vm8, %v2916_v10  ;;  %v14915_v4 = vsel %vm13161_vm11, %v1867_v29, %v1870_v42  ;;  %v1872_v20 = vrot.slane %v1870_v42, 4  ;;  %v1873_v33 = vrot.slane %v14903_v43, 5 }
 0x1e8   : > { %20061 = vst [vmem:[#allocation120_spill] sm:$0xff] %v14915_v4  ;;  %v1874_v7 = vrot.slane %v14900_v31, 6  ;;  %3370 = vst.msk [vmem:[#allocation2 + $0x1cc] sm:$0xf] %vm1073_vm0, %v14907_v53  ;;  %v14928_v22 = vsel %vm13261_vm15, %v2876_v14, %v19665_v26  ;;  %v3456_v29 = vrot.slane %v3453_v35, 4  ;;  %v19668_v56 = vrot.slane %v14666_v51, 7 }
 0x1e9   : > { %3286 = vst.msk [vmem:[#allocation2 + $0x8] sm:$0xf] %vm1999_vm13, %v3197_v8  ;;  %20062 = vst [vmem:[#allocation121_spill] sm:$0xff] %v14928_v22  ;;  %v1347_v42 = vrot.slane %v14866_v25, 4  ;;  %v1353_v10 = vrot.slane %v14900_v31, 5  ;;  %v2695_v14 = vrot.slane %v14790_v47, 4  ;;  %v1426_v8 = vpop.permute.xlu1 %1425  ;;  %v14943_v35 = vsel %vm13539_vm7, %v3452_v41, %v3454_v0 }
 0x1ea   : > { %1658 = vrot.lane.b32.xlu0 %v14878_v11, %s12917_s26  ;;  %v14934_v6 = vor.u32 %v1874_v7, %v1873_v33  ;;  %3371 = vst.msk [vmem:[#allocation2 + $0x1e8] sm:$0xf] %vm1073_vm0, %v14928_v22  ;;  %20063 = vst [vmem:[#allocation122_spill] sm:$0xff] %v14943_v35  ;;  %v3458_v26 = vor.u32 %v19668_v56, %v14663_v32  ;;  %v2696_v7 = vrot.slane %v14619_v5, 6  ;;  %v2697_v33 = vrot.slane %v14459_v38, 7  ;;  %v14951_v53 = vpop.permute.xlu0 %3722 }
 0x1eb   : > { %1511 = vst.msk [vmem:[#allocation2 + $0x8c] sm:$0xf] %vm1505_vm8, %v1426_v8  ;;  %v20065_v41 = vrot.slane %v14736_v62, 5  ;;  %v2701_v56 = vrot.slane %v14666_v51, 6  ;;  %v2702_v5 = vrot.slane %v14663_v32, 7  ;;  %1933 = vrot.lane.b32.xlu1 %v14872_v37, %s12919_s28  ;;  %v1357_v38 = vrot.slane %v14903_v43, 4 }
 0x1ec   : > { %v14956_v47 = vsel %vm13161_vm11, %v1872_v20, %v14934_v6  ;;  %4046 = vst.msk [vmem:[#allocation2 + $0x198] sm:$0xf] %vm1073_vm0, %v14943_v35  ;;  %v14970_v20 = vshll.u32 %v14511_v21, 16  ;;  %v2698_v8 = vor.u32 %v2697_v33, %v2696_v7  ;;  %v20067_v32 = vrot.slane %v20048_v45, 5 }
 0x1ed   : > { %20064 = vst [vmem:[#allocation123_spill] sm:$0xff] %v14956_v47  ;;  %v1348_v0 = vor.u32 %v1347_v42, %v20065_v41  ;;  %1726 = vst.msk [vmem:[#allocation2 + $0x8c] sm:$0xf] %vm1720_vm10, %v14746_v46  ;;  %v14974_v42 = vsel %vm13539_vm7, %v3456_v29, %v3458_v26  ;;  %v860_v41 = vpop.f32.mrf.mxu0  ;;  %v14986_v35 = vor.u32 %v2702_v5, %v2701_v56  ;;  %v2211_v22 = vpop.permute.xlu1 %2210 }
 0x1ee   : > { %20066 = vst [vmem:[#allocation124_spill] sm:$0xff] %v14974_v42  ;;  %2373 = vrot.lane.b32.xlu0 %v14897_v55, %s12917_s26  ;;  %v14982_v46 = vsel %vm13140_vm9, %v1249_v36, %v20067_v32  ;;  %4047 = vst.msk [vmem:[#allocation2 + $0x1b4] sm:$0xf] %vm1073_vm0, %v14974_v42  ;;  %v861_v26 = vadd.f32 %v14753_v19, %v860_v41  ;;  %v1358_v29 = vor.u32 %v1357_v38, %v1353_v10  ;;  %v14995_v36 = vpop.permute.xlu0 %1642 }
 0x1ef   : > { %20068 = vst [vmem:[#allocation125_spill] sm:$0xff] %v14982_v46  ;;  %v1349_v37 = vrot.slane %v1348_v0, 4  ;;  %v14992_v45 = vsel %vm13402_vm3, %v2695_v14, %v2698_v8  ;;  %2296 = vst.msk [vmem:[#allocation2 + $0x74] sm:$0xf] %vm1505_vm8, %v2211_v22  ;;  %v862_v56 = vpop.f32.mrf.mxu0  ;;  %v20071_v0 = vrot.slane %v14467_v44, 6  ;;  %v2107_v38 = vrot.slane %v14511_v21, 6  ;;  %1441 = vrot.lane.b32.xlu1 %v14982_v46, %s12918_s27 }
 0x1f0   : > { %20069 = vst [vmem:[#allocation126_spill] sm:$0xff] %v14992_v45  ;;  %2803 = vst.msk [vmem:[#allocation2 + $0x200] sm:$0xf] %vm1073_vm0, %v14992_v45  ;;  %v2700_v32 = vrot.slane %v2698_v8, 4  ;;  %v20072_v22 = vld [vmem:[#allocation38_spill] sm:$0xff]  ;;  %v941_v41 = vmax.f32 %v861_v26, 0.0 }
 0x1f1   : > { %v14999_v33 = vsel %vm13140_vm9, %v1349_v37, %v1353_v10  ;;  %v2106_v5 = vrot.slane %v20071_v0, 4  ;;  %v1259_v14 = vrot.slane %v20072_v22, 4  ;;  %v1359_v7 = vrot.slane %v1358_v29, 4  ;;  %v863_v37 = vpop.f32.mrf.mxu0  ;;  %v15020_v8 = vpop.permute.xlu1 %2487 }
 0x1f2   : > { %20070 = vst [vmem:[#allocation127_spill] sm:$0xff] %v14999_v33  ;;  %1935 = vrot.lane.b32.xlu0 %v14897_v55, %s12919_s28  ;;  %v15018_v56 = vsel %vm13402_vm3, %v2700_v32, %v14986_v35  ;;  %v15022_v0 = vpack.c.bf16 %v941_v41, %v941_v41  ;;  %v864_v26 = vadd.f32 %v14753_v19, %v863_v37  ;;  %v20076_v29 = vrot.slane %v14970_v20, 5  ;;  %v20079_v37 = vld [vmem:[#allocation30_spill] sm:$0xff] }
 0x1f3   : > { %v15013_v10 = vsel %vm13183_vm12, %v2106_v5, %v2107_v38  ;;  %20074 = vst [vmem:[#allocation128_spill] sm:$0xff] %v15018_v56  ;;  %2804 = vst.msk [vmem:[#allocation2 + $0x21c] sm:$0xf] %vm1073_vm0, %v15018_v56  ;;  %v2358_v5 = vpop.permute.xlu0 %2357  ;;  %v20078_v32 = vrot.slane %v20049_v59, 5  ;;  %v1586_v55 = vrot.slane %v20079_v37, 5  ;;  %v865_v46 = vpop.f32.mrf.mxu0  ;;  %2226 = vrot.lane.b32.xlu1 %v14878_v11, %s12918_s27  ;;  %v2109_v56 = vrot.slane %v2107_v38, 4 }
 0x1f4   : > { %20073 = vst [vmem:[#allocation38_spill] sm:$0xff] %v15013_v10  ;;  %20075 = vst [vmem:[#allocation129_spill] sm:$0xff] %v15022_v0  ;;  %v15029_v22 = vsel %vm13140_vm9, %v1359_v7, %v20076_v29  ;;  %v20080_v7 = vld [vmem:[#allocation40_spill] sm:$0xff]  ;;  %v19678_v46 = vrot.slane %v14748_v54, 6  ;;  %v20089_v42 = vrot.slane %v13795_v15, 5  ;;  %v15114_v59 = vshll.u32 %v14748_v54, 16 }
 0x1f5   : > { %20077 = vst [vmem:[#allocation130_spill] sm:$0xff] %v15029_v22  ;;  %5581 = vst.msk [vmem:[#allocation2 + $0x1bc] sm:$0xf] %vm1073_vm0, %v15013_v10  ;;  %v1585_v41 = vrot.slane %v20078_v32, 4  ;;  %v20081_v29 = vrot.slane %v20080_v7, 5  ;;  %v942_v32 = vmax.f32 %v864_v26, 0.0 }
 0x1f6   : > { %2178 = vst.msk [vmem:[#allocation2 + $0x2a4] sm:$0xf] %vm1073_vm0, %v15013_v10  ;;  %1102 = vst.msk [vmem:[#allocation2 + $0x310] sm:$0xf] %vm1073_vm0, %v15022_v0  ;;  %v1827_v26 = vrot.slane %v14863_v24, 4  ;;  %v20087_v11 = vld [vmem:[#allocation48_spill] sm:$0xff] }
 0x1f7   : > { %2444 = vst.msk [vmem:[#allocation2 + $0x58] sm:$0xf] %vm1720_vm10, %v2358_v5  ;;  %v15047_v45 = vsel %vm13140_vm9, %v1259_v14, %v20081_v29  ;;  %v3511_v5 = vpop.permute.xlu1 %3510  ;;  %v15058_v7 = vpack.c.bf16 %v942_v32, %v942_v32  ;;  %v15064_v14 = vsel %vm13183_vm12, %v2109_v56, %v19678_v46  ;;  %v1920_v38 = vpop.permute.xlu0 %1919  ;;  %v15078_v56 = vsel %vm13120_vm5, %v1585_v41, %v1586_v55  ;;  %v12454_v32 = vld [vmem:[#allocation2 + $0x38] ss:$28 sps:$4 sm:$0xff]  }
 0x1f8   : > { %20082 = vst [vmem:[#allocation40_spill] sm:$0xff] %v15047_v45  ;;  %4882 = vst.msk [vmem:[#allocation2 + $0x228] sm:$0xf] %vm1073_vm0, %v15022_v0  ;;  %1443 = vrot.lane.b32.xlu0 %v15047_v45, %s12918_s27  ;;  %v1588_v29 = vrot.slane %v1586_v55, 4  ;;  %v1879_v41 = vrot.slane %v14970_v20, 6  ;;  %v1877_v55 = vrot.slane %v14934_v6, 4  ;;  %v15101_v45 = vsel %vm13161_vm11, %v1827_v26, %v20087_v11 }
 0x1f9   : > { %2572 = vst.msk [vmem:[#allocation2 + $0x58] sm:$0xf] %vm1999_vm13, %v14843_v49  ;;  %20083 = vst [vmem:[#allocation131_spill] sm:$0xff] %v15058_v7  ;;  %v20085_v49 = vld [vmem:[#allocation44_spill] sm:$0xff]  ;;  %v20091_v6 = vrot.slane %v14218_v57, 7  ;;  %v2880_v11 = vrot.slane %v14261_v61, 7 }
 0x1fa   : > { %20084 = vst [vmem:[#allocation132_spill] sm:$0xff] %v15064_v14  ;;  %3599 = vst.msk [vmem:[#allocation2 + $0x28] sm:$0xf] %vm1505_vm8, %v3511_v5  ;;  %2503 = vrot.lane.b32.xlu1 %v20085_v49, %s12919_s28  ;;  %v15117_v49 = vshrl.u32 %v14748_v54, 16  ;;  %v20100_v47 = vrot.slane %v14970_v20, 5 }
 0x1fb   : > { %5582 = vst.msk [vmem:[#allocation2 + $0x1d8] sm:$0xf] %vm1073_vm0, %v15064_v14  ;;  %2179 = vst.msk [vmem:[#allocation2 + $0x2c0] sm:$0xf] %vm1073_vm0, %v15064_v14  ;;  %v3199_v5 = vpop.permute.xlu1 %3198  ;;  %v3857_v24 = vpop.permute.xlu0 %3856  ;;  %v2879_v37 = vrot.slane %v20091_v6, 4  ;;  %v3461_v14 = vrot.slane %v14866_v25, 7 }
 0x1fc   : > { %3809 = vst.msk [vmem:[#allocation2 + $0x28] sm:$0xf] %vm1720_vm10, %v14709_v63  ;;  %20086 = vst [vmem:[#allocation133_spill] sm:$0xff] %v15078_v56  ;;  %2228 = vrot.lane.b32.xlu0 %v15078_v56, %s12918_s27  ;;  %v15089_v63 = vshrl.u32 %v14511_v21, 16  ;;  %v1883_v22 = vrot.slane %v15117_v49, 5 }
 0x1fd   : > { %2005 = vst.msk [vmem:[#allocation2 + $0x8c] sm:$0xf] %vm1999_vm13, %v1920_v38  ;;  %3287 = vst.msk [vmem:[#allocation2 + $0x24] sm:$0xf] %vm1999_vm13, %v3199_v5  ;;  %v15107_v5 = vsel %vm13120_vm5, %v1588_v29, %v20089_v42  ;;  %v20093_v29 = vrot.slane %v14666_v51, 7  ;;  %v15138_v51 = vsel %vm13261_vm15, %v2879_v37, %v2880_v11  ;;  %v3464_v42 = vrot.slane %v3461_v14, 4 }
 0x1fe   : > { %1103 = vst.msk [vmem:[#allocation2 + $0x32c] sm:$0xf] %vm1073_vm0, %v15058_v7  ;;  %4883 = vst.msk [vmem:[#allocation2 + $0x244] sm:$0xf] %vm1073_vm0, %v15058_v7  ;;  %v1878_v38 = vrot.slane %v15089_v63, 5  ;;  %1660 = vrot.lane.b32.xlu1 %v15078_v56, %s12917_s26 }
 0x1ff   : > { %3946 = vst.msk [vmem:[#allocation2 + $0xc] sm:$0xf] %vm1999_vm13, %v3857_v24  ;;  %20088 = vst [vmem:[#allocation48_spill] sm:$0xff] %v15101_v45  ;;  %v20092_v24 = vld [vmem:[#allocation47_spill] sm:$0xff]  ;;  %v15120_v26 = vpop.permute.xlu1 %3724  ;;  %v3460_v6 = vrot.slane %v20093_v29, 4  ;;  %v2882_v29 = vrot.slane %v2880_v11, 4 }
 0x200   : > { %v12452_v46 = vld [vmem:[#allocation2 + $0x3c] ss:$28 sps:$4 sm:$0xff]   ;;  %20090 = vst [vmem:[#allocation134_spill] sm:$0xff] %v15107_v5  ;;  %2505 = vrot.lane.b32.xlu0 %v20092_v24, %s12919_s28  ;;  %v1880_v56 = vor.u32 %v1879_v41, %v1878_v38  ;;  %v19696_v41 = vrot.slane %v14903_v43, 7  ;;  %v3052_v38 = vpop.permute.xlu0 %3051  ;;  %20095 = vst [vmem:[#allocation136_spill] sm:$0xff] %v15138_v51 }
 0x201   : > { %6734 = vmatprep.mubr.bf16.mxu1 %v12452_v46  ;;  %v1884_v46 = vrot.slane %v15114_v59, 6  ;;  %3139 = vst.msk [vmem:[#allocation2 + $0x40] sm:$0xf] %vm1720_vm10, %v3052_v38  ;;  %v1373_v38 = vrot.slane %v15114_v59, 5 }
 0x202   : > { %6735 = vmatmul.mubr.bf16.gmra.mxu1 %v12454_v32  ;;  %v15129_v24 = vsel %vm13161_vm11, %v1877_v55, %v1880_v56  ;;  %v1882_v10 = vrot.slane %v1880_v56, 4  ;;  %2375 = vrot.lane.b32.xlu1 %v15101_v45, %s12917_s26  ;;  %v3462_v32 = vor.u32 %v3461_v14, %v14736_v62  ;;  %v1367_v55 = vrot.slane %v15089_v63, 4  ;;  %3372 = vst.msk [vmem:[#allocation2 + $0x204] sm:$0xf] %vm1073_vm0, %v15138_v51 }
 0x203   : > { %20094 = vst [vmem:[#allocation135_spill] sm:$0xff] %v15129_v24  ;;  %v15143_v56 = vor.u32 %v1884_v46, %v1883_v22  ;;  %v3466_v37 = vor.u32 %v19696_v41, %v14900_v31  ;;  %v15152_v11 = vpop.permute.xlu1 %1644  ;;  %v20096_v14 = vrot.slane %v14467_v44, 7  ;;  %v2705_v46 = vrot.slane %v14986_v35, 4 }
 0x204   : > { %1662 = vrot.lane.b32.xlu0 %v15107_v5, %s12917_s26  ;;  %v15162_v22 = vsel %vm13539_vm7, %v3460_v6, %v3462_v32  ;;  %v2706_v51 = vrot.slane %v14866_v25, 6  ;;  %v1428_v33 = vpop.permute.xlu0 %1427  ;;  %v1368_v4 = vor.u32 %v1367_v55, %v20100_v47  ;;  %v2707_v25 = vrot.slane %v14736_v62, 7  ;;  %v20102_v62 = vld [vmem:[#allocation50_spill] sm:$0xff] }
 0x205   : > { %v15158_v24 = vsel %vm13261_vm15, %v2882_v29, %v20096_v14  ;;  %20098 = vst [vmem:[#allocation138_spill] sm:$0xff] %v15162_v22  ;;  %v15169_v41 = vsel %vm13161_vm11, %v1882_v10, %v15143_v56  ;;  %4048 = vst.msk [vmem:[#allocation2 + $0x1d0] sm:$0xf] %vm1073_vm0, %v15162_v22  ;;  %v15179_v35 = vsel %vm13539_vm7, %v3464_v42, %v3466_v37  ;;  %v1377_v10 = vrot.slane %v15117_v49, 4 }
 0x206   : > { %20097 = vst [vmem:[#allocation137_spill] sm:$0xff] %v15158_v24  ;;  %20099 = vst [vmem:[#allocation139_spill] sm:$0xff] %v15169_v41  ;;  %1937 = vrot.lane.b32.xlu1 %v15101_v45, %s12919_s28  ;;  %v15187_v47 = vshll.u32 %v14792_v12, 16  ;;  %v2711_v6 = vrot.slane %v14903_v43, 6  ;;  %v2712_v42 = vrot.slane %v14900_v31, 7  ;;  %v2708_v29 = vor.u32 %v2707_v25, %v2706_v51  ;;  %v20106_v51 = vld [vmem:[#allocation51_spill] sm:$0xff] }
 0x207   : > { %3373 = vst.msk [vmem:[#allocation2 + $0x220] sm:$0xf] %vm1073_vm0, %v15158_v24  ;;  %20101 = vst [vmem:[#allocation140_spill] sm:$0xff] %v15179_v35  ;;  %v2360_v32 = vpop.permute.xlu1 %2359  ;;  %v1378_v55 = vor.u32 %v1377_v10, %v1373_v38  ;;  %v2113_v22 = vrot.slane %v14792_v12, 6 }
 0x208   : > { %1512 = vst.msk [vmem:[#allocation2 + $0xa8] sm:$0xf] %vm1505_vm8, %v1428_v33  ;;  %2377 = vrot.lane.b32.xlu0 %v20102_v62, %s12917_s26  ;;  %v1369_v33 = vrot.slane %v1368_v4, 4  ;;  %v19702_v37 = vrot.slane %v15187_v47, 5  ;;  %v15198_v14 = vor.u32 %v2712_v42, %v2711_v6  ;;  %v2213_v45 = vpop.permute.xlu0 %2212  ;;  %v15210_v4 = vsel %vm13402_vm3, %v2705_v46, %v2708_v29 }
 0x209   : > { %4049 = vst.msk [vmem:[#allocation2 + $0x1ec] sm:$0xf] %vm1073_vm0, %v15179_v35  ;;  %20105 = vst [vmem:[#allocation142_spill] sm:$0xff] %v15210_v4  ;;  %v1379_v25 = vrot.slane %v1378_v55, 4  ;;  %v20110_v6 = vrot.slane %v13795_v15, 5  ;;  %v2115_v55 = vrot.slane %v2113_v22, 4 }
 0x20a   : > { %1727 = vst.msk [vmem:[#allocation2 + $0xa8] sm:$0xf] %vm1720_vm10, %v14995_v36  ;;  %2445 = vst.msk [vmem:[#allocation2 + $0x74] sm:$0xf] %vm1720_vm10, %v2360_v32  ;;  %v15203_v31 = vsel %vm13140_vm9, %v1369_v33, %v1373_v38  ;;  %v20104_v36 = vrot.slane %v14748_v54, 6  ;;  %1445 = vrot.lane.b32.xlu1 %v20106_v51, %s12918_s27  ;;  %v2710_v38 = vrot.slane %v2708_v29, 4 }
 0x20b   : > { %20103 = vst [vmem:[#allocation141_spill] sm:$0xff] %v15203_v31  ;;  %2573 = vst.msk [vmem:[#allocation2 + $0x74] sm:$0xf] %vm1999_vm13, %v15020_v8  ;;  %v1922_v10 = vpop.permute.xlu1 %1921  ;;  %v1591_v42 = vrot.slane %v20110_v6, 4  ;;  %v1592_v33 = vrot.slane %v13879_v60, 5  ;;  %v15249_v29 = vshrl.u32 %v14792_v12, 16 }
 0x20c   : > { %v2112_v35 = vrot.slane %v20104_v36, 4  ;;  %2297 = vst.msk [vmem:[#allocation2 + $0x90] sm:$0xf] %vm1505_vm8, %v2213_v45  ;;  %1939 = vrot.lane.b32.xlu0 %v20102_v62, %s12919_s28  ;;  %v15229_v45 = vsel %vm13140_vm9, %v1379_v25, %v19702_v37  ;;  %v15238_v8 = vsel %vm13402_vm3, %v2710_v38, %v15198_v14  ;;  %v1889_v32 = vrot.slane %v15187_v47, 6  ;;  %v20111_v36 = vld [vmem:[#allocation55_spill] sm:$0xff] }
 0x20d   : > { %2805 = vst.msk [vmem:[#allocation2 + $0x238] sm:$0xf] %vm1073_vm0, %v15210_v4  ;;  %20108 = vst [vmem:[#allocation144_spill] sm:$0xff] %v15229_v45  ;;  %v2116_v25 = vrot.slane %v15022_v0, 6  ;;  %v1888_v6 = vrot.slane %v15249_v29, 5  ;;  %v3469_v51 = vrot.slane %v15089_v63, 7 }
 0x20e   : > { %v15223_v46 = vsel %vm13183_vm12, %v2112_v35, %v2113_v22  ;;  %20109 = vst [vmem:[#allocation145_spill] sm:$0xff] %v15238_v8  ;;  %2006 = vst.msk [vmem:[#allocation2 + $0xa8] sm:$0xf] %vm1999_vm13, %v1922_v10  ;;  %v2490_v35 = vpop.permute.xlu0 %2489  ;;  %2230 = vrot.lane.b32.xlu1 %v15107_v5, %s12918_s27  ;;  %v1887_v10 = vrot.slane %v15143_v56, 4  ;;  %v20113_v22 = vld [vmem:[#allocation54_spill] sm:$0xff]  ;;  %v15267_v5 = vsel %vm13120_vm5, %v1591_v42, %v1592_v33  ;;  %v20119_v15 = vrot.slane %v15187_v47, 5 }
 0x20f   : > { %20107 = vst [vmem:[#allocation143_spill] sm:$0xff] %v15223_v46  ;;  %5583 = vst.msk [vmem:[#allocation2 + $0x1f4] sm:$0xf] %vm1073_vm0, %v15223_v46  ;;  %v3859_v38 = vpop.permute.xlu1 %3858  ;;  %v15260_v62 = vsel %vm13183_vm12, %v2115_v55, %v2116_v25  ;;  %v3470_v24 = vor.u32 %v3469_v51, %v14970_v20  ;;  %v2118_v31 = vrot.slane %v2116_v25, 4  ;;  %v2716_v25 = vrot.slane %v15089_v63, 6 }
 0x210   : > { %2180 = vst.msk [vmem:[#allocation2 + $0x2dc] sm:$0xf] %vm1073_vm0, %v15223_v46  ;;  %2806 = vst.msk [vmem:[#allocation2 + $0x254] sm:$0xf] %vm1073_vm0, %v15238_v8  ;;  %1447 = vrot.lane.b32.xlu0 %v20111_v36, %s12918_s27  ;;  %v1890_v36 = vor.u32 %v1889_v32, %v1888_v6  ;;  %v1594_v32 = vrot.slane %v1592_v33, 4  ;;  %v2886_v6 = vrot.slane %v14511_v21, 7 }
 0x211   : > { %3947 = vst.msk [vmem:[#allocation2 + $0x28] sm:$0xf] %vm1999_vm13, %v3859_v38  ;;  %20112 = vst [vmem:[#allocation146_spill] sm:$0xff] %v15260_v62  ;;  %v15295_v8 = vshll.u32 %v15022_v0, 16  ;;  %v15298_v33 = vshrl.u32 %v15022_v0, 16  ;;  %v3472_v46 = vrot.slane %v3469_v51, 4 }
 0x212   : > { %v3513_v37 = vpop.permute.xlu0 %3512  ;;  %2507 = vrot.lane.b32.xlu1 %v20113_v22, %s12919_s28  ;;  %20114 = vst [vmem:[#allocation147_spill] sm:$0xff] %v15267_v5  ;;  %5584 = vst.msk [vmem:[#allocation2 + $0x210] sm:$0xf] %vm1073_vm0, %v15260_v62  ;;  %v1892_v55 = vrot.slane %v1890_v36, 4  ;;  %v2888_v4 = vrot.slane %v2886_v6, 4 }
 0x213   : > { %3600 = vst.msk [vmem:[#allocation2 + $0x44] sm:$0xf] %vm1505_vm8, %v3513_v37  ;;  %v3054_v56 = vpop.permute.xlu1 %3053  ;;  %v15279_v37 = vsel %vm13161_vm11, %v1887_v10, %v1890_v36  ;;  %v20117_v10 = vld [vmem:[#allocation58_spill] sm:$0xff]  ;;  %v1393_v22 = vrot.slane %v15295_v8, 5  ;;  %v20121_v36 = vrot.slane %v13885_v40, 5 }
 0x214   : > { %2181 = vst.msk [vmem:[#allocation2 + $0x2f8] sm:$0xf] %vm1073_vm0, %v15260_v62  ;;  %2232 = vrot.lane.b32.xlu0 %v15267_v5, %s12918_s27  ;;  %20115 = vst [vmem:[#allocation148_spill] sm:$0xff] %v15279_v37  ;;  %v1893_v62 = vrot.slane %v15298_v33, 5  ;;  %v1894_v37 = vrot.slane %v15295_v8, 6 }
 0x215   : > { %3810 = vst.msk [vmem:[#allocation2 + $0x44] sm:$0xf] %vm1720_vm10, %v14951_v53  ;;  %3140 = vst.msk [vmem:[#allocation2 + $0x5c] sm:$0xf] %vm1720_vm10, %v3054_v56  ;;  %v20116_v53 = vrot.slane %v14467_v44, 7  ;;  %v1387_v56 = vrot.slane %v15249_v29, 4 }
 0x216   : > { %v15282_v42 = vpop.permute.xlu0 %1646  ;;  %1664 = vrot.lane.b32.xlu1 %v15267_v5, %s12917_s26 }
 0x217   : > { %v2885_v38 = vrot.slane %v20116_v53, 4  ;;  %v1430_v5 = vpop.permute.xlu1 %1429 }
 0x218   : > { %2509 = vrot.lane.b32.xlu0 %v20117_v10, %s12919_s28  ;;  %1513 = vst.msk [vmem:[#allocation2 + $0xc4] sm:$0xf] %vm1505_vm8, %v1430_v5  ;;  %v1388_v10 = vor.u32 %v1387_v56, %v20119_v15  ;;  %v20120_v5 = vld [vmem:[#allocation63_spill] sm:$0xff]  ;;  %v15322_v15 = vsel %vm13120_vm5, %v1594_v32, %v20121_v36  ;;  %v19725_v32 = vrot.slane %v15058_v7, 6 }
 0x219   : > { %v15302_v53 = vsel %vm13261_vm15, %v2885_v38, %v2886_v6  ;;  %1728 = vst.msk [vmem:[#allocation2 + $0xc4] sm:$0xf] %vm1720_vm10, %v15152_v11  ;;  %20122 = vst [vmem:[#allocation150_spill] sm:$0xff] %v15322_v15  ;;  %v19727_v38 = vrot.slane %v14748_v54, 7  ;;  %v20123_v6 = vrot.slane %v14903_v43, 7  ;;  %v15331_v11 = vor.u32 %v1894_v37, %v1893_v62 }
 0x21a   : > { %20118 = vst [vmem:[#allocation149_spill] sm:$0xff] %v15302_v53  ;;  %v2362_v60 = vpop.permute.xlu0 %2361  ;;  %3374 = vst.msk [vmem:[#allocation2 + $0x23c] sm:$0xf] %vm1073_vm0, %v15302_v53  ;;  %2379 = vrot.lane.b32.xlu1 %v20120_v5, %s12917_s26  ;;  %v19726_v53 = vrot.slane %v15117_v49, 7  ;;  %v2717_v37 = vrot.slane %v14970_v20, 7 }
 0x21b   : > { %2446 = vst.msk [vmem:[#allocation2 + $0x90] sm:$0xf] %vm1720_vm10, %v2362_v60  ;;  %v3468_v56 = vrot.slane %v20123_v6, 4  ;;  %v1389_v60 = vrot.slane %v1388_v10, 4  ;;  %v2215_v45 = vpop.permute.xlu1 %2214  ;;  %v15338_v43 = vsel %vm13261_vm15, %v2888_v4, %v19727_v38  ;;  %v15352_v51 = vsel %vm13161_vm11, %v1892_v55, %v15331_v11  ;;  %v20128_v55 = vld [vmem:[#allocation66_spill] sm:$0xff] }
 0x21c   : > { %2574 = vst.msk [vmem:[#allocation2 + $0x90] sm:$0xf] %vm1999_vm13, %v2490_v35  ;;  %1666 = vrot.lane.b32.xlu0 %v15322_v15, %s12917_s26  ;;  %20124 = vst [vmem:[#allocation151_spill] sm:$0xff] %v15338_v43  ;;  %v15368_v4 = vsel %vm13183_vm12, %v2118_v31, %v19725_v32  ;;  %v2721_v31 = vrot.slane %v15117_v49, 6  ;;  %v2718_v20 = vor.u32 %v2717_v37, %v2716_v25  ;;  %v15402_v25 = vshll.u32 %v15058_v7, 16 }
 0x21d   : > { %v15342_v35 = vsel %vm13539_vm7, %v3468_v56, %v3470_v24  ;;  %2298 = vst.msk [vmem:[#allocation2 + $0xac] sm:$0xf] %vm1505_vm8, %v2215_v45  ;;  %v15347_v62 = vsel %vm13140_vm9, %v1389_v60, %v1393_v22  ;;  %20127 = vst [vmem:[#allocation154_spill] sm:$0xff] %v15352_v51  ;;  %v3474_v24 = vor.u32 %v19726_v53, %v15114_v59  ;;  %v2715_v45 = vrot.slane %v15198_v14, 4  ;;  %v20130_v60 = vld [vmem:[#allocation71_spill] sm:$0xff] }
 0x21e   : > { %20125 = vst [vmem:[#allocation152_spill] sm:$0xff] %v15342_v35  ;;  %v1924_v10 = vpop.permute.xlu0 %1923  ;;  %20126 = vst [vmem:[#allocation153_spill] sm:$0xff] %v15347_v62  ;;  %1941 = vrot.lane.b32.xlu1 %v20120_v5, %s12919_s28  ;;  %v2722_v14 = vrot.slane %v15114_v59, 7  ;;  %v2720_v37 = vrot.slane %v2718_v20, 4  ;;  %v1899_v32 = vrot.slane %v15402_v25, 6 }
 0x21f   : > { %3375 = vst.msk [vmem:[#allocation2 + $0x258] sm:$0xf] %vm1073_vm0, %v15338_v43  ;;  %4050 = vst.msk [vmem:[#allocation2 + $0x208] sm:$0xf] %vm1073_vm0, %v15342_v35  ;;  %v15381_v36 = vsel %vm13539_vm7, %v3472_v46, %v3474_v24  ;;  %v2492_v63 = vpop.permute.xlu1 %2491  ;;  %v12457_v46 = vld [vmem:[#allocation2 + $0x70] ss:$28 sps:$4 sm:$0xff]   ;;  %v15395_v59 = vsel %vm13402_vm3, %v2715_v45, %v2718_v20 }
 0x220   : > { %2007 = vst.msk [vmem:[#allocation2 + $0xc4] sm:$0xf] %vm1999_vm13, %v1924_v10  ;;  %2381 = vrot.lane.b32.xlu0 %v20128_v55, %s12917_s26  ;;  %20129 = vst [vmem:[#allocation155_spill] sm:$0xff] %v15381_v36  ;;  %v15387_v56 = vor.u32 %v2722_v14, %v2721_v31  ;;  %v1397_v24 = vrot.slane %v15298_v33, 4  ;;  %v19745_v43 = vrot.slane %v15022_v0, 7 }
 0x221   : > { %5585 = vst.msk [vmem:[#allocation2 + $0x22c] sm:$0xf] %vm1073_vm0, %v15368_v4  ;;  %2182 = vst.msk [vmem:[#allocation2 + $0x314] sm:$0xf] %vm1073_vm0, %v15368_v4 }
 0x222   : > { %4051 = vst.msk [vmem:[#allocation2 + $0x224] sm:$0xf] %vm1073_vm0, %v15381_v36  ;;  %v1432_v6 = vpop.permute.xlu0 %1431  ;;  %1449 = vrot.lane.b32.xlu1 %v20130_v60, %s12918_s27  ;;  %20131 = vst [vmem:[#allocation156_spill] sm:$0xff] %v15395_v59  ;;  %v1398_v14 = vor.u32 %v1397_v24, %v1393_v22  ;;  %v20133_v22 = vrot.slane %v13885_v40, 5  ;;  %v20134_v24 = vld [vmem:[#allocation74_spill] sm:$0xff]  ;;  %v868_v60 = vpop.f32.mrf.mxu0 }
 0x223   : > { %1514 = vst.msk [vmem:[#allocation2 + $0xe0] sm:$0xf] %vm1505_vm8, %v1432_v6  ;;  %v12455_v10 = vld [vmem:[#allocation2 + $0x74] ss:$28 sps:$4 sm:$0xff]   ;;  %v3515_v31 = vpop.permute.xlu1 %3514  ;;  %v1403_v6 = vrot.slane %v15402_v25, 5 }
 0x224   : > { %1729 = vst.msk [vmem:[#allocation2 + $0xe0] sm:$0xf] %vm1720_vm10, %v15282_v42  ;;  %1943 = vrot.lane.b32.xlu0 %v20128_v55, %s12919_s28  ;;  %6742 = vmatprep.mubr.bf16.mxu1 %v12455_v10  ;;  %v15411_v42 = vsel %vm13402_vm3, %v2720_v37, %v15387_v56  ;;  %v1597_v20 = vrot.slane %v20133_v22, 4  ;;  %v1598_v10 = vrot.slane %v13987_v30, 5  ;;  %v20139_v55 = vld [vmem:[#allocation77_spill] sm:$0xff]  ;;  %v870_v35 = vpop.f32.mrf.mxu0  ;;  %v20141_v30 = vrot.slane %v15117_v49, 7 }
 0x225   : > { %2807 = vst.msk [vmem:[#allocation2 + $0x270] sm:$0xf] %vm1073_vm0, %v15395_v59  ;;  %6743 = vmatmul.mubr.bf16.gmra.mxu1 %v12457_v46  ;;  %20132 = vst [vmem:[#allocation157_spill] sm:$0xff] %v15411_v42  ;;  %v1399_v46 = vrot.slane %v1398_v14, 4  ;;  %v15440_v14 = vshrl.u32 %v15058_v7, 16 }
 0x226   : > { %3601 = vst.msk [vmem:[#allocation2 + $0x60] sm:$0xf] %vm1505_vm8, %v3515_v31  ;;  %v2217_v45 = vpop.permute.xlu0 %2216  ;;  %2234 = vrot.lane.b32.xlu1 %v15322_v15, %s12918_s27  ;;  %v15435_v22 = vsel %vm13120_vm5, %v1597_v20, %v1598_v10  ;;  %v1600_v38 = vrot.slane %v1598_v10, 4  ;;  %v1897_v20 = vrot.slane %v15331_v11, 4  ;;  %v20138_v10 = vrot.slane %v14748_v54, 7  ;;  %v871_v49 = vpop.f32.mrf.mxu0 }
 0x227   : > { %3811 = vst.msk [vmem:[#allocation2 + $0x60] sm:$0xf] %vm1720_vm10, %v15120_v26  ;;  %v15425_v37 = vpop.permute.xlu1 %1648  ;;  %v15429_v26 = vsel %vm13140_vm9, %v1399_v46, %v1403_v6  ;;  %v1407_v15 = vrot.slane %v15440_v14, 4  ;;  %v869_v11 = vadd.f32 %v14753_v19, %v868_v60  ;;  %v3476_v40 = vrot.slane %v20141_v30, 4  ;;  %v20145_v30 = vld [vmem:[#allocation83_spill] sm:$0xff] }
 0x228   : > { %2299 = vst.msk [vmem:[#allocation2 + $0xc8] sm:$0xf] %vm1505_vm8, %v2217_v45  ;;  %1451 = vrot.lane.b32.xlu0 %v20134_v24, %s12918_s27  ;;  %20135 = vst [vmem:[#allocation158_spill] sm:$0xff] %v15429_v26  ;;  %v20136_v45 = vld [vmem:[#allocation72_spill] sm:$0xff]  ;;  %v1898_v24 = vrot.slane %v15440_v14, 5  ;;  %v2891_v5 = vrot.slane %v20138_v10, 4 }
 0x229   : > { %2808 = vst.msk [vmem:[#allocation2 + $0x28c] sm:$0xf] %vm1073_vm0, %v15411_v42  ;;  %20137 = vst [vmem:[#allocation72_spill] sm:$0xff] %v15435_v22  ;;  %v3477_v42 = vrot.slane %v15249_v29, 7  ;;  %v15460_v59 = vor.u32 %v1407_v15, %v1403_v6  ;;  %v20142_v15 = vrot.slane %v14012_v23, 5  ;;  %v943_v35 = vmax.f32 %v869_v11, 0.0 }
 0x22a   : > { %v2494_v31 = vpop.permute.xlu0 %2493  ;;  %2511 = vrot.lane.b32.xlu1 %v20136_v45, %s12919_s28  ;;  %v15462_v36 = vor.u32 %v1899_v32, %v1898_v24  ;;  %v19744_v24 = vrot.slane %v15298_v33, 7 }
 0x22b   : > { %v2364_v53 = vpop.permute.xlu1 %2363  ;;  %v15476_v32 = vsel %vm13120_vm5, %v1600_v38, %v20142_v15  ;;  %v3478_v60 = vor.u32 %v3477_v42, %v15187_v47  ;;  %v3480_v6 = vrot.slane %v3477_v42, 4 }
 0x22c   : > { %2236 = vrot.lane.b32.xlu0 %v15435_v22, %s12918_s27  ;;  %2447 = vst.msk [vmem:[#allocation2 + $0xac] sm:$0xf] %vm1720_vm10, %v2364_v53  ;;  %v2892_v53 = vrot.slane %v14792_v12, 7  ;;  %20143 = vst [vmem:[#allocation160_spill] sm:$0xff] %v15476_v32  ;;  %v3482_v15 = vor.u32 %v19744_v24, %v15295_v8  ;;  %v20153_v24 = vld [vmem:[#allocation87_spill] sm:$0xff] }
 0x22d   : > { %2575 = vst.msk [vmem:[#allocation2 + $0xac] sm:$0xf] %vm1999_vm13, %v2492_v63 }
 0x22e   : > { %v15444_v46 = vpop.permute.xlu0 %1650  ;;  %1668 = vrot.lane.b32.xlu1 %v15435_v22, %s12917_s26  ;;  %v15466_v22 = vsel %vm13261_vm15, %v2891_v5, %v2892_v53  ;;  %v2894_v10 = vrot.slane %v2892_v53, 4  ;;  %v15481_v5 = vsel %vm13161_vm11, %v1897_v20, %v15462_v36  ;;  %v872_v20 = vadd.f32 %v14753_v19, %v871_v49 }
 0x22f   : > { %v1926_v63 = vpop.permute.xlu1 %1925  ;;  %20140 = vst [vmem:[#allocation159_spill] sm:$0xff] %v15466_v22  ;;  %20144 = vst [vmem:[#allocation161_spill] sm:$0xff] %v15481_v5  ;;  %v20148_v53 = vrot.slane %v15058_v7, 6 }
 0x230   : > { %2513 = vrot.lane.b32.xlu0 %v20139_v55, %s12919_s28  ;;  %2008 = vst.msk [vmem:[#allocation2 + $0xe0] sm:$0xf] %vm1999_vm13, %v1926_v63  ;;  %v15492_v38 = vsel %vm13261_vm15, %v2894_v10, %v19745_v43  ;;  %v2726_v63 = vrot.slane %v15249_v29, 6  ;;  %v873_v10 = vpop.f32.mrf.mxu0 }
 0x231   : > { %3376 = vst.msk [vmem:[#allocation2 + $0x274] sm:$0xf] %vm1073_vm0, %v15466_v22  ;;  %20146 = vst [vmem:[#allocation162_spill] sm:$0xff] %v15492_v38  ;;  %v2121_v11 = vrot.slane %v20148_v53, 4  ;;  %v944_v53 = vmax.f32 %v872_v20, 0.0  ;;  %v2725_v20 = vrot.slane %v15387_v56, 4 }
 0x232   : > { %v2366_v55 = vpop.permute.xlu0 %2365  ;;  %2383 = vrot.lane.b32.xlu1 %v20145_v30, %s12917_s26  ;;  %3377 = vst.msk [vmem:[#allocation2 + $0x290] sm:$0xf] %vm1073_vm0, %v15492_v38  ;;  %v1902_v56 = vrot.slane %v15462_v36, 4  ;;  %v20154_v36 = vld [vmem:[#allocation89_spill] sm:$0xff] }
 0x233   : > { %2448 = vst.msk [vmem:[#allocation2 + $0xc8] sm:$0xf] %vm1720_vm10, %v2366_v55  ;;  %v15499_v55 = vpack.c.bf16 %v943_v35, %v943_v35  ;;  %v1434_v42 = vpop.permute.xlu1 %1433  ;;  %v2727_v35 = vrot.slane %v15187_v47, 7 }
 0x234   : > { %2576 = vst.msk [vmem:[#allocation2 + $0xc8] sm:$0xf] %vm1999_vm13, %v2494_v31  ;;  %1670 = vrot.lane.b32.xlu0 %v15476_v32, %s12917_s26  ;;  %v15509_v31 = vsel %vm13539_vm7, %v3476_v40, %v3478_v60  ;;  %v876_v40 = vpop.f32.mrf.mxu0  ;;  %v15533_v60 = vsel %vm13539_vm7, %v3480_v6, %v3482_v15 }
 0x235   : > { %20147 = vst [vmem:[#allocation163_spill] sm:$0xff] %v15499_v55  ;;  %20149 = vst [vmem:[#allocation164_spill] sm:$0xff] %v15509_v31  ;;  %v2122_v29 = vrot.slane %v15499_v55, 6  ;;  %v15520_v10 = vshll.u32 %v15499_v55, 16  ;;  %v15529_v47 = vshrl.u32 %v15499_v55, 16  ;;  %v877_v43 = vadd.f32 %v14753_v19, %v876_v40 }
 0x236   : > { %1515 = vst.msk [vmem:[#allocation2 + $0xfc] sm:$0xf] %vm1505_vm8, %v1434_v42  ;;  %v1928_v49 = vpop.permute.xlu0 %1927  ;;  %1945 = vrot.lane.b32.xlu1 %v20145_v30, %s12919_s28  ;;  %20152 = vst [vmem:[#allocation167_spill] sm:$0xff] %v15533_v60  ;;  %v2728_v42 = vor.u32 %v2727_v35, %v2726_v63  ;;  %v878_v15 = vpop.f32.mrf.mxu0  ;;  %v2731_v40 = vrot.slane %v15298_v33, 6 }
 0x237   : > { %4884 = vst.msk [vmem:[#allocation2 + $0x260] sm:$0xf] %vm1073_vm0, %v15499_v55  ;;  %20150 = vst [vmem:[#allocation165_spill] sm:$0xff] %v15520_v10  ;;  %v15544_v30 = vsel %vm13183_vm12, %v2121_v11, %v2122_v29  ;;  %v2219_v6 = vpop.permute.xlu1 %2218  ;;  %v1905_v63 = vrot.slane %v15529_v47, 5  ;;  %v1906_v19 = vrot.slane %v15520_v10, 6  ;;  %v945_v35 = vmax.f32 %v877_v43, 0.0 }
 0x238   : > { %4052 = vst.msk [vmem:[#allocation2 + $0x240] sm:$0xf] %vm1073_vm0, %v15509_v31  ;;  %20151 = vst [vmem:[#allocation166_spill] sm:$0xff] %v15529_v47  ;;  %2385 = vrot.lane.b32.xlu0 %v20153_v24, %s12917_s26  ;;  %v879_v31 = vpop.f32.mrf.mxu0  ;;  %v2732_v43 = vrot.slane %v15295_v8, 7 }
 0x239   : > { %1730 = vst.msk [vmem:[#allocation2 + $0xfc] sm:$0xf] %vm1720_vm10, %v15425_v37  ;;  %v15539_v37 = vpack.c.bf16 %v944_v53, %v944_v53  ;;  %v15563_v38 = vor.u32 %v1906_v19, %v1905_v63 }
 0x23a   : > { %2009 = vst.msk [vmem:[#allocation2 + $0xfc] sm:$0xf] %vm1999_vm13, %v1928_v49  ;;  %v1436_v11 = vpop.permute.xlu0 %1435  ;;  %v2473_v49 = vrot.slane %v2122_v29, 4  ;;  %1453 = vrot.lane.b32.xlu1 %v20154_v36, %s12918_s27  ;;  %v15574_v29 = vpack.c.bf16 %v945_v35, %v945_v35  ;;  %v881_v19 = vpop.f32.mrf.mxu0 }
 0x23b   : > { %4053 = vst.msk [vmem:[#allocation2 + $0x25c] sm:$0xf] %vm1073_vm0, %v15533_v60  ;;  %5586 = vst.msk [vmem:[#allocation2 + $0x248] sm:$0xf] %vm1073_vm0, %v15544_v30  ;;  %v2474_v53 = vrot.slane %v15539_v37, 6  ;;  %v15584_v8 = vsel %vm13161_vm11, %v1902_v56, %v15563_v38  ;;  %v1604_v56 = vrot.slane %v14218_v57, 5 }
 0x23c   : > { %2183 = vst.msk [vmem:[#allocation2 + $0x330] sm:$0xf] %vm1073_vm0, %v15544_v30  ;;  %4885 = vst.msk [vmem:[#allocation2 + $0x27c] sm:$0xf] %vm1073_vm0, %v15539_v37  ;;  %v12458_v15 = vld [vmem:[#allocation2 + $0xac] ss:$28 sps:$4 sm:$0xff]   ;;  %1947 = vrot.lane.b32.xlu0 %v20153_v24, %s12919_s28 }
 0x23d   : > { %2300 = vst.msk [vmem:[#allocation2 + $0xe4] sm:$0xf] %vm1505_vm8, %v2219_v6  ;;  %1516 = vst.msk [vmem:[#allocation2 + $0x118] sm:$0xf] %vm1505_vm8, %v1436_v11  ;;  %v12460_v60 = vld [vmem:[#allocation2 + $0xa8] ss:$28 sps:$4 sm:$0xff]   ;;  %v15567_v6 = vsel %vm13402_vm3, %v2725_v20, %v2728_v42  ;;  %v2496_v20 = vpop.permute.xlu1 %2495  ;;  %6750 = vmatprep.mubr.bf16.mxu1 %v12458_v15 }
 0x23e   : > { %20155 = vst [vmem:[#allocation168_spill] sm:$0xff] %v15567_v6  ;;  %1731 = vst.msk [vmem:[#allocation2 + $0x118] sm:$0xf] %vm1720_vm10, %v15444_v46  ;;  %v12851_v11 = vld [vmem:[%s19501_s2] ss:$0 sm:$0xff]  ;;  %v15588_v46 = vsel %vm13183_vm12, %v2473_v49, %v2474_v53  ;;  %v2221_v35 = vpop.permute.xlu0 %2220  ;;  %6751 = vmatmul.mubr.bf16.gmra.mxu1 %v12460_v60  ;;  %v20157_v24 = vrot.slane %v14012_v23, 5  ;;  %2238 = vrot.lane.b32.xlu1 %v15476_v32, %s12918_s27  ;;  %v884_v49 = vpop.f32.mrf.mxu0 }
 0x23f   : > { %v880_v63 = vadd.f32 %v12851_v11, %v879_v31  ;;  %2809 = vst.msk [vmem:[#allocation2 + $0x2a8] sm:$0xf] %vm1073_vm0, %v15567_v6  ;;  %20156 = vst [vmem:[#allocation169_spill] sm:$0xff] %v15584_v8  ;;  %v2730_v15 = vrot.slane %v2728_v42, 4  ;;  %v2476_v60 = vrot.slane %v2474_v53, 4  ;;  %v19755_v19 = vrot.slane %v15574_v29, 6 }
 0x240   : > { %v1603_v31 = vrot.slane %v20157_v24, 4  ;;  %4886 = vst.msk [vmem:[#allocation2 + $0x298] sm:$0xf] %vm1073_vm0, %v15574_v29  ;;  %5587 = vst.msk [vmem:[#allocation2 + $0x264] sm:$0xf] %vm1073_vm0, %v15588_v46  ;;  %v15601_v24 = vor.u32 %v2732_v43, %v2731_v40  ;;  %1455 = vrot.lane.b32.xlu0 %v14517_v27, %s12918_s27  ;;  %v885_v6 = vadd.f32 %v12851_v11, %v884_v49  ;;  %v886_v22 = vpop.f32.mrf.mxu0 }
 0x241   : > { %v946_v36 = vmax.f32 %v880_v63, 0.0  ;;  %2301 = vst.msk [vmem:[#allocation2 + $0x100] sm:$0xf] %vm1505_vm8, %v2221_v35  ;;  %v1653_v42 = vpop.permute.xlu1 %1652  ;;  %v15611_v35 = vsel %vm13183_vm12, %v2476_v60, %v19755_v19 }
 0x242   : > { %v15616_v53 = vsel %vm13402_vm3, %v2730_v15, %v15601_v24  ;;  %v2498_v40 = vpop.permute.xlu0 %2497  ;;  %5588 = vst.msk [vmem:[#allocation2 + $0x280] sm:$0xf] %vm1073_vm0, %v15611_v35  ;;  %2515 = vrot.lane.b32.xlu1 %v14499_v13, %s12919_s28  ;;  %v15628_v22 = vsel %vm13120_vm5, %v1603_v31, %v1604_v56  ;;  %v887_v43 = vpop.f32.mrf.mxu0  ;;  %v1606_v31 = vrot.slane %v1604_v56, 4 }
 0x243   : > { %v15605_v63 = vpack.c.bf16 %v946_v36, %v946_v36  ;;  %20159 = vst [vmem:[#allocation171_spill] sm:$0xff] %v15616_v53  ;;  %v947_v36 = vmax.f32 %v885_v6, 0.0  ;;  %2810 = vst.msk [vmem:[#allocation2 + $0x2c4] sm:$0xf] %vm1073_vm0, %v15616_v53  ;;  %v888_v6 = vadd.f32 %v12851_v11, %v887_v43  ;;  %v2898_v43 = vrot.slane %v15058_v7, 7 }
 0x244   : > { %20160 = vst [vmem:[#allocation172_spill] sm:$0xff] %v15628_v22  ;;  %2240 = vrot.lane.b32.xlu0 %v15628_v22, %s12918_s27  ;;  %v889_v60 = vpop.f32.mrf.mxu0 }
 0x245   : > { %20158 = vst [vmem:[#allocation170_spill] sm:$0xff] %v15605_v63  ;;  %4887 = vst.msk [vmem:[#allocation2 + $0x2b4] sm:$0xf] %vm1073_vm0, %v15605_v63  ;;  %v15632_v15 = vpack.c.bf16 %v947_v36, %v947_v36  ;;  %v2368_v49 = vpop.permute.xlu1 %2367  ;;  %v948_v32 = vmax.f32 %v888_v6, 0.0  ;;  %v20162_v36 = vrot.slane %v15022_v0, 7  ;;  %v3485_v6 = vrot.slane %v15440_v14, 7 }
 0x246   : > { %2449 = vst.msk [vmem:[#allocation2 + $0xe4] sm:$0xf] %vm1720_vm10, %v2368_v49  ;;  %v1655_v19 = vpop.permute.xlu0 %1654  ;;  %1672 = vrot.lane.b32.xlu1 %v15628_v22, %s12917_s26  ;;  %v2900_v56 = vrot.slane %v2898_v43, 4 }
 0x247   : > { %20161 = vst [vmem:[#allocation173_spill] sm:$0xff] %v15632_v15  ;;  %4888 = vst.msk [vmem:[#allocation2 + $0x2d0] sm:$0xf] %vm1073_vm0, %v15632_v15  ;;  %v2897_v11 = vrot.slane %v20162_v36, 4  ;;  %v15646_v49 = vpack.c.bf16 %v948_v32, %v948_v32  ;;  %v20164_v32 = vrot.slane %v15298_v33, 7  ;;  %v3486_v53 = vor.u32 %v3485_v6, %v15402_v25 }
 0x248   : > { %2577 = vst.msk [vmem:[#allocation2 + $0xe4] sm:$0xf] %vm1999_vm13, %v2496_v20  ;;  %2517 = vrot.lane.b32.xlu0 %v14567_v2, %s12919_s28  ;;  %v20167_v33 = vrot.slane %v15499_v55, 7 }
 0x249   : > { %v1930_v60 = vpop.permute.xlu1 %1929  ;;  %v15651_v20 = vsel %vm13261_vm15, %v2897_v11, %v2898_v43  ;;  %4889 = vst.msk [vmem:[#allocation2 + $0x2ec] sm:$0xf] %vm1073_vm0, %v15646_v49  ;;  %v3484_v22 = vrot.slane %v20164_v32, 4  ;;  %v2736_v43 = vrot.slane %v15440_v14, 6  ;;  %v3488_v11 = vrot.slane %v3485_v6, 4 }
 0x24a   : > { %20163 = vst [vmem:[#allocation174_spill] sm:$0xff] %v15651_v20  ;;  %2010 = vst.msk [vmem:[#allocation2 + $0x118] sm:$0xf] %vm1999_vm13, %v1930_v60  ;;  %v2370_v36 = vpop.permute.xlu0 %2369  ;;  %2387 = vrot.lane.b32.xlu1 %v14682_v1, %s12917_s26  ;;  %v20165_v60 = vrot.slane %v14261_v61, 5  ;;  %v15677_v32 = vsel %vm13261_vm15, %v2900_v56, %v20167_v33  ;;  %v2735_v14 = vrot.slane %v15601_v24, 4  ;;  %v2737_v6 = vrot.slane %v15402_v25, 7 }
 0x24b   : > { %3378 = vst.msk [vmem:[#allocation2 + $0x2ac] sm:$0xf] %vm1073_vm0, %v15651_v20  ;;  %20168 = vst [vmem:[#allocation176_spill] sm:$0xff] %v15677_v32  ;;  %v2741_v24 = vrot.slane %v15529_v47, 6 }
 0x24c   : > { %2450 = vst.msk [vmem:[#allocation2 + $0x100] sm:$0xf] %vm1720_vm10, %v2370_v36  ;;  %v15671_v27 = vsel %vm13120_vm5, %v1606_v31, %v20165_v60  ;;  %v15687_v31 = vsel %vm13539_vm7, %v3484_v22, %v3486_v53  ;;  %v20170_v36 = vrot.slane %v15529_v47, 7  ;;  %v2738_v22 = vor.u32 %v2737_v6, %v2736_v43  ;;  %v12463_v6 = vld [vmem:[#allocation2 + $0xe0] ss:$28 sps:$4 sm:$0xff]  }
 0x24d   : > { %20166 = vst [vmem:[#allocation175_spill] sm:$0xff] %v15671_v27  ;;  %2578 = vst.msk [vmem:[#allocation2 + $0x100] sm:$0xf] %vm1999_vm13, %v2498_v40  ;;  %1674 = vrot.lane.b32.xlu0 %v15671_v27, %s12917_s26  ;;  %v1438_v60 = vpop.permute.xlu1 %1437  ;;  %v2742_v40 = vrot.slane %v15520_v10, 7 }
 0x24e   : > { %3379 = vst.msk [vmem:[#allocation2 + $0x2c8] sm:$0xf] %vm1073_vm0, %v15677_v32  ;;  %20169 = vst [vmem:[#allocation177_spill] sm:$0xff] %v15687_v31  ;;  %v3490_v56 = vor.u32 %v20170_v36, %v15520_v10  ;;  %v1932_v33 = vpop.permute.xlu0 %1931  ;;  %1949 = vrot.lane.b32.xlu1 %v14682_v1, %s12919_s28  ;;  %v2740_v43 = vrot.slane %v2738_v22, 4  ;;  %v15763_v1 = vshll.u32 %v15574_v29, 16 }
 0x24f   : > { %4054 = vst.msk [vmem:[#allocation2 + $0x278] sm:$0xf] %vm1073_vm0, %v15687_v31  ;;  %v15707_v25 = vor.u32 %v2742_v40, %v2741_v24  ;;  %v20174_v40 = vrot.slane %v14261_v61, 5 }
 0x250   : > { %1517 = vst.msk [vmem:[#allocation2 + $0x134] sm:$0xf] %vm1505_vm8, %v1438_v60  ;;  %v15700_v53 = vsel %vm13539_vm7, %v3488_v11, %v3490_v56  ;;  %v15714_v11 = vsel %vm13402_vm3, %v2735_v14, %v2738_v22  ;;  %v1610_v22 = vrot.slane %v14467_v44, 5  ;;  %20180 = vst [vmem:[#allocation185_spill] sm:$0xff] %v15763_v1 }
 0x251   : > { %20171 = vst [vmem:[#allocation178_spill] sm:$0xff] %v15700_v53  ;;  %1732 = vst.msk [vmem:[#allocation2 + $0x134] sm:$0xf] %vm1720_vm10, %v1653_v42  ;;  %2389 = vrot.lane.b32.xlu0 %v14721_v9, %s12917_s26  ;;  %v2223_v36 = vpop.permute.xlu1 %2222  ;;  %v15722_v56 = vsel %vm13402_vm3, %v2740_v43, %v15707_v25  ;;  %v15739_v43 = vshrl.u32 %v15539_v37, 16 }
 0x252   : > { %4055 = vst.msk [vmem:[#allocation2 + $0x294] sm:$0xf] %vm1073_vm0, %v15700_v53  ;;  %20172 = vst [vmem:[#allocation179_spill] sm:$0xff] %v15714_v11  ;;  %v1440_v42 = vpop.permute.xlu0 %1439  ;;  %1457 = vrot.lane.b32.xlu1 %v14761_v50, %s12918_s27  ;;  %v1613_v50 = vrot.slane %v14511_v21, 5  ;;  %v20182_v53 = vrot.slane %v15529_v47, 7 }
 0x253   : > { %2011 = vst.msk [vmem:[#allocation2 + $0x134] sm:$0xf] %vm1999_vm13, %v1932_v33  ;;  %20173 = vst [vmem:[#allocation180_spill] sm:$0xff] %v15722_v56  ;;  %v1609_v33 = vrot.slane %v20174_v40, 4  ;;  %v2746_v21 = vrot.slane %v15739_v43, 6 }
 0x254   : > { %2811 = vst.msk [vmem:[#allocation2 + $0x2e0] sm:$0xf] %vm1073_vm0, %v15714_v11  ;;  %v12461_v14 = vld [vmem:[#allocation2 + $0xe4] ss:$28 sps:$4 sm:$0xff]   ;;  %2812 = vst.msk [vmem:[#allocation2 + $0x2fc] sm:$0xf] %vm1073_vm0, %v15722_v56 }
 0x255   : > { %2302 = vst.msk [vmem:[#allocation2 + $0x11c] sm:$0xf] %vm1505_vm8, %v2223_v36  ;;  %1518 = vst.msk [vmem:[#allocation2 + $0x150] sm:$0xf] %vm1505_vm8, %v1440_v42  ;;  %1951 = vrot.lane.b32.xlu0 %v14721_v9, %s12919_s28  ;;  %v2500_v24 = vpop.permute.xlu1 %2499  ;;  %6758 = vmatprep.mubr.bf16.mxu1 %v12461_v14  ;;  %v15744_v42 = vshll.u32 %v15539_v37, 16  ;;  %v15747_v14 = vshrl.u32 %v15574_v29, 16 }
 0x256   : > { %1733 = vst.msk [vmem:[#allocation2 + $0x150] sm:$0xf] %vm1720_vm10, %v1655_v19  ;;  %v2225_v60 = vpop.permute.xlu0 %2224  ;;  %6759 = vmatmul.mubr.bf16.gmra.mxu1 %v12463_v6  ;;  %2242 = vrot.lane.b32.xlu1 %v15671_v27, %s12918_s27  ;;  %20175 = vst [vmem:[#allocation181_spill] sm:$0xff] %v15739_v43  ;;  %v15753_v6 = vsel %vm13120_vm5, %v1609_v33, %v1610_v22  ;;  %v2904_v9 = vrot.slane %v15539_v37, 7  ;;  %v3493_v27 = vrot.slane %v15739_v43, 7  ;;  %v3492_v31 = vrot.slane %v20182_v53, 4 }
 0x257   : > { %2303 = vst.msk [vmem:[#allocation2 + $0x138] sm:$0xf] %vm1505_vm8, %v2225_v60  ;;  %20176 = vst [vmem:[#allocation182_spill] sm:$0xff] %v15744_v42  ;;  %v20179_v60 = vrot.slane %v15499_v55, 7  ;;  %v2751_v20 = vrot.slane %v15747_v14, 6  ;;  %v20185_v47 = vrot.slane %v15747_v14, 7 }
 0x258   : > { %20177 = vst [vmem:[#allocation183_spill] sm:$0xff] %v15747_v14  ;;  %20178 = vst [vmem:[#allocation184_spill] sm:$0xff] %v15753_v6  ;;  %v2906_v11 = vrot.slane %v2904_v9, 4  ;;  %v3496_v53 = vrot.slane %v3493_v27, 4 }
 0x259   : > { %1459 = vrot.lane.b32.xlu0 %v14798_v3, %s12918_s27  ;;  %v1657_v19 = vpop.permute.xlu1 %1656  ;;  %v2903_v40 = vrot.slane %v20179_v60, 4  ;;  %v1612_v3 = vrot.slane %v1610_v22, 4  ;;  %v19782_v60 = vrot.slane %v15574_v29, 7  ;;  %v3494_v22 = vor.u32 %v3493_v27, %v15744_v42 }
 0x25a   : > { %v2502_v36 = vpop.permute.xlu0 %2501  ;;  %2519 = vrot.lane.b32.xlu1 %v14788_v17, %s12919_s28  ;;  %v2752_v27 = vrot.slane %v15763_v1, 7 }
 0x25b   : > { %v15767_v33 = vsel %vm13261_vm15, %v2903_v40, %v2904_v9  ;;  %v2747_v40 = vrot.slane %v15744_v42, 7  ;;  %v15786_v9 = vsel %vm13261_vm15, %v2906_v11, %v19782_v60  ;;  %v3498_v11 = vor.u32 %v20185_v47, %v15763_v1 }
 0x25c   : > { %20181 = vst [vmem:[#allocation186_spill] sm:$0xff] %v15767_v33  ;;  %3380 = vst.msk [vmem:[#allocation2 + $0x2e4] sm:$0xf] %vm1073_vm0, %v15767_v33 }
 0x25d   : > { %2244 = vrot.lane.b32.xlu0 %v15753_v6, %s12918_s27  ;;  %v2372_v56 = vpop.permute.xlu1 %2371  ;;  %20183 = vst [vmem:[#allocation187_spill] sm:$0xff] %v15786_v9  ;;  %3381 = vst.msk [vmem:[#allocation2 + $0x300] sm:$0xf] %vm1073_vm0, %v15786_v9  ;;  %v2748_v60 = vor.u32 %v2747_v40, %v2746_v21  ;;  %v3042_v9 = vrot.slane %v15605_v63, 6  ;;  %v15816_v40 = vor.u32 %v2752_v27, %v2751_v20 }
 0x25e   : > { %2451 = vst.msk [vmem:[#allocation2 + $0x11c] sm:$0xf] %vm1720_vm10, %v2372_v56  ;;  %v1659_v32 = vpop.permute.xlu0 %1658  ;;  %1676 = vrot.lane.b32.xlu1 %v15753_v6, %s12917_s26  ;;  %v2745_v56 = vrot.slane %v15707_v25, 4  ;;  %v20186_v6 = vrot.slane %v15574_v29, 6 }
 0x25f   : > { %2579 = vst.msk [vmem:[#allocation2 + $0x11c] sm:$0xf] %vm1999_vm13, %v2500_v24  ;;  %v15796_v24 = vsel %vm13539_vm7, %v3492_v31, %v3494_v22  ;;  %v15810_v22 = vsel %vm13539_vm7, %v3496_v53, %v3498_v11  ;;  %v2750_v47 = vrot.slane %v2748_v60, 4  ;;  %v20194_v11 = vld [vmem:[#allocation127_spill] sm:$0xff] }
 0x260   : > { %20184 = vst [vmem:[#allocation188_spill] sm:$0xff] %v15796_v24  ;;  %4056 = vst.msk [vmem:[#allocation2 + $0x2b0] sm:$0xf] %vm1073_vm0, %v15796_v24  ;;  %v3041_v33 = vrot.slane %v20186_v6, 4  ;;  %v15814_v21 = vsel %vm13402_vm3, %v2745_v56, %v2748_v60  ;;  %v20189_v6 = vld [vmem:[#allocation120_spill] sm:$0xff] }
 0x261   : > { %2521 = vrot.lane.b32.xlu0 %v14840_v18, %s12919_s28  ;;  %v1934_v25 = vpop.permute.xlu1 %1933  ;;  %20187 = vst [vmem:[#allocation189_spill] sm:$0xff] %v15810_v22  ;;  %20188 = vst [vmem:[#allocation190_spill] sm:$0xff] %v15814_v21 }
 0x262   : > { %2012 = vst.msk [vmem:[#allocation2 + $0x150] sm:$0xf] %vm1999_vm13, %v1934_v25  ;;  %v2374_v31 = vpop.permute.xlu0 %2373  ;;  %2391 = vrot.lane.b32.xlu1 %v20189_v6, %s12917_s26  ;;  %v15823_v25 = vsel %vm13120_vm5, %v1612_v3, %v1613_v50  ;;  %v15831_v60 = vsel %vm13183_vm12, %v3041_v33, %v3042_v9  ;;  %v15839_v3 = vsel %vm13402_vm3, %v2750_v47, %v15816_v40  ;;  %v1616_v47 = vrot.slane %v14748_v54, 5 }
 0x263   : > { %2452 = vst.msk [vmem:[#allocation2 + $0x138] sm:$0xf] %vm1720_vm10, %v2374_v31  ;;  %20190 = vst [vmem:[#allocation191_spill] sm:$0xff] %v15823_v25  ;;  %v12466_v31 = vld [vmem:[#allocation2 + $0x118] ss:$28 sps:$4 sm:$0xff]   ;;  %v3044_v54 = vrot.slane %v3042_v9, 4 }
 0x264   : > { %4057 = vst.msk [vmem:[#allocation2 + $0x2cc] sm:$0xf] %vm1073_vm0, %v15810_v22  ;;  %2813 = vst.msk [vmem:[#allocation2 + $0x318] sm:$0xf] %vm1073_vm0, %v15814_v21  ;;  %v15894_v22 = vshll.u32 %v15632_v15, 16 }
 0x265   : > { %20191 = vst [vmem:[#allocation192_spill] sm:$0xff] %v15831_v60  ;;  %2580 = vst.msk [vmem:[#allocation2 + $0x138] sm:$0xf] %vm1999_vm13, %v2502_v36  ;;  %1678 = vrot.lane.b32.xlu0 %v15823_v25, %s12917_s26  ;;  %v1442_v20 = vpop.permute.xlu1 %1441  ;;  %v20193_v36 = vld [vmem:[#allocation123_spill] sm:$0xff] }
 0x266   : > { %20192 = vst [vmem:[#allocation193_spill] sm:$0xff] %v15839_v3  ;;  %5589 = vst.msk [vmem:[#allocation2 + $0x29c] sm:$0xf] %vm1073_vm0, %v15831_v60  ;;  %v1936_v33 = vpop.permute.xlu0 %1935  ;;  %1953 = vrot.lane.b32.xlu1 %v20189_v6, %s12919_s28  ;;  %v19807_v60 = vrot.slane %v15632_v15, 7 }
 0x267   : > { %2814 = vst.msk [vmem:[#allocation2 + $0x334] sm:$0xf] %vm1073_vm0, %v15839_v3  ;;  %v20200_v3 = vrot.slane %v15747_v14, 7 }
 0x268   : > { %1519 = vst.msk [vmem:[#allocation2 + $0x16c] sm:$0xf] %vm1505_vm8, %v1442_v20 }
 0x269   : > { %1734 = vst.msk [vmem:[#allocation2 + $0x16c] sm:$0xf] %vm1720_vm10, %v1657_v19  ;;  %2393 = vrot.lane.b32.xlu0 %v20193_v36, %s12917_s26  ;;  %v2227_v53 = vpop.permute.xlu1 %2226  ;;  %v1615_v19 = vrot.slane %v1613_v50, 4  ;;  %v15870_v50 = vshll.u32 %v15605_v63, 16 }
 0x26a   : > { %2013 = vst.msk [vmem:[#allocation2 + $0x16c] sm:$0xf] %vm1999_vm13, %v1936_v33  ;;  %v1444_v56 = vpop.permute.xlu0 %1443  ;;  %1461 = vrot.lane.b32.xlu1 %v20194_v11, %s12918_s27  ;;  %v15861_v33 = vshrl.u32 %v15605_v63, 16  ;;  %v20197_v11 = vld [vmem:[#allocation130_spill] sm:$0xff] }
 0x26b   : > { %2304 = vst.msk [vmem:[#allocation2 + $0x154] sm:$0xf] %vm1505_vm8, %v2227_v53  ;;  %1520 = vst.msk [vmem:[#allocation2 + $0x188] sm:$0xf] %vm1505_vm8, %v1444_v56 }
 0x26c   : > { %v12464_v27 = vld [vmem:[#allocation2 + $0x11c] ss:$28 sps:$4 sm:$0xff]   ;;  %1735 = vst.msk [vmem:[#allocation2 + $0x188] sm:$0xf] %vm1720_vm10, %v1659_v32  ;;  %v20195_v32 = vrot.slane %v15574_v29, 7  ;;  %20196 = vst [vmem:[#allocation194_spill] sm:$0xff] %v15870_v50 }
 0x26d   : > { %1955 = vrot.lane.b32.xlu0 %v20193_v36, %s12919_s28  ;;  %v2504_v20 = vpop.permute.xlu1 %2503  ;;  %6766 = vmatprep.mubr.bf16.mxu1 %v12464_v27  ;;  %v3319_v36 = vrot.slane %v15605_v63, 7  ;;  %v3501_v27 = vrot.slane %v15861_v33, 7 }
 0x26e   : > { %v2229_v53 = vpop.permute.xlu0 %2228  ;;  %6767 = vmatmul.mubr.bf16.gmra.mxu1 %v12466_v31  ;;  %2246 = vrot.lane.b32.xlu1 %v15823_v25, %s12918_s27  ;;  %v3318_v56 = vrot.slane %v20195_v32, 4  ;;  %v15877_v31 = vsel %vm13120_vm5, %v1615_v19, %v1616_v47  ;;  %v3045_v25 = vrot.slane %v15632_v15, 6 }
 0x26f   : > { %2305 = vst.msk [vmem:[#allocation2 + $0x170] sm:$0xf] %vm1505_vm8, %v2229_v53  ;;  %20198 = vst [vmem:[#allocation195_spill] sm:$0xff] %v15877_v31  ;;  %v15880_v53 = vshrl.u32 %v15632_v15, 16  ;;  %v3321_v63 = vrot.slane %v3319_v36, 4  ;;  %v3502_v19 = vor.u32 %v3501_v27, %v15870_v50  ;;  %v1619_v15 = vrot.slane %v14792_v12, 5 }
 0x270   : > { %v15885_v6 = vsel %vm13261_vm15, %v3318_v56, %v3319_v36  ;;  %v20201_v56 = vld [vmem:[#allocation38_spill] sm:$0xff]  ;;  %v3504_v36 = vrot.slane %v3501_v27, 4  ;;  %v5521_v44 = vrot.slane %v3045_v25, 4  ;;  %v3176_v27 = vrot.slane %v15816_v40, 4 }
 0x271   : > { %1463 = vrot.lane.b32.xlu0 %v20197_v11, %s12918_s27  ;;  %v1661_v32 = vpop.permute.xlu1 %1660  ;;  %20199 = vst [vmem:[#allocation196_spill] sm:$0xff] %v15885_v6  ;;  %v3500_v11 = vrot.slane %v20200_v3, 4  ;;  %3382 = vst.msk [vmem:[#allocation2 + $0x31c] sm:$0xf] %vm1073_vm0, %v15885_v6  ;;  %v19808_v24 = vrot.slane %v15880_v53, 7  ;;  %v15903_v3 = vsel %vm13261_vm15, %v3321_v63, %v19807_v60  ;;  %v19809_v6 = vrot.slane %v15646_v49, 6 }
 0x272   : > { %v2506_v21 = vpop.permute.xlu0 %2505  ;;  %2523 = vrot.lane.b32.xlu1 %v20201_v56, %s12919_s28  ;;  %3383 = vst.msk [vmem:[#allocation2 + $0x338] sm:$0xf] %vm1073_vm0, %v15903_v3  ;;  %v15919_v63 = vsel %vm13183_vm12, %v3044_v54, %v3045_v25  ;;  %v3190_v54 = vrot.slane %v15880_v53, 6 }
 0x273   : > { %v15912_v9 = vsel %vm13539_vm7, %v3500_v11, %v3502_v19  ;;  %v3506_v28 = vor.u32 %v19808_v24, %v15894_v22  ;;  %20202 = vst [vmem:[#allocation38_spill] sm:$0xff] %v15919_v63  ;;  %v5523_v11 = vsel %vm13183_vm12, %v5521_v44, %v19809_v6  ;;  %5590 = vst.msk [vmem:[#allocation2 + $0x2b8] sm:$0xf] %vm1073_vm0, %v15919_v63  ;;  %v3180_v19 = vrot.slane %v15861_v33, 6  ;;  %v20203_v63 = vld [vmem:[#allocation132_spill] sm:$0xff] }
 0x274   : > { %4058 = vst.msk [vmem:[#allocation2 + $0x2e8] sm:$0xf] %vm1073_vm0, %v15912_v9  ;;  %v3183_v24 = vrot.slane %v15870_v50, 7  ;;  %5591 = vst.msk [vmem:[#allocation2 + $0x2d4] sm:$0xf] %vm1073_vm0, %v5523_v11  ;;  %v3193_v44 = vrot.slane %v15894_v22, 7 }
 0x275   : > { %2248 = vrot.lane.b32.xlu0 %v15877_v31, %s12918_s27  ;;  %v2376_v60 = vpop.permute.xlu1 %2375  ;;  %v15936_v25 = vsel %vm13539_vm7, %v3504_v36, %v3506_v28  ;;  %v1618_v6 = vrot.slane %v1616_v47, 4  ;;  %v20204_v47 = vld [vmem:[#allocation135_spill] sm:$0xff] }
 0x276   : > { %2453 = vst.msk [vmem:[#allocation2 + $0x154] sm:$0xf] %vm1720_vm10, %v2376_v60  ;;  %v1663_v40 = vpop.permute.xlu0 %1662  ;;  %1680 = vrot.lane.b32.xlu1 %v15877_v31, %s12917_s26  ;;  %v3184_v60 = vor.u32 %v3183_v24, %v3180_v19  ;;  %v3194_v28 = vor.u32 %v3193_v44, %v3190_v54  ;;  %v12469_v44 = vld [vmem:[#allocation2 + $0x150] ss:$28 sps:$4 sm:$0xff]  }
 0x277   : > { %2581 = vst.msk [vmem:[#allocation2 + $0x154] sm:$0xf] %vm1999_vm13, %v2504_v20  ;;  %v15958_v24 = vsel %vm13120_vm5, %v1618_v6, %v1619_v15  ;;  %v20206_v6 = vld [vmem:[#allocation141_spill] sm:$0xff] }
 0x278   : > { %4059 = vst.msk [vmem:[#allocation2 + $0x304] sm:$0xf] %vm1073_vm0, %v15936_v25  ;;  %v15950_v11 = vsel %vm13402_vm3, %v3176_v27, %v3184_v60  ;;  %v3186_v20 = vrot.slane %v3184_v60, 4  ;;  %20205 = vst [vmem:[#allocation132_spill] sm:$0xff] %v15958_v24 }
 0x279   : > { %2525 = vrot.lane.b32.xlu0 %v20203_v63, %s12919_s28  ;;  %v1938_v36 = vpop.permute.xlu1 %1937 }
 0x27a   : > { %2014 = vst.msk [vmem:[#allocation2 + $0x188] sm:$0xf] %vm1999_vm13, %v1938_v36  ;;  %v2378_v31 = vpop.permute.xlu0 %2377  ;;  %2395 = vrot.lane.b32.xlu1 %v20204_v47, %s12917_s26  ;;  %v15962_v19 = vsel %vm13402_vm3, %v3186_v20, %v3194_v28  ;;  %v1621_v28 = vrot.slane %v1619_v15, 4  ;;  %v1622_v36 = vrot.slane %v15022_v0, 5  ;;  %v20207_v20 = vld [vmem:[#allocation144_spill] sm:$0xff] }
 0x27b   : > { %2454 = vst.msk [vmem:[#allocation2 + $0x170] sm:$0xf] %vm1720_vm10, %v2378_v31 }
 0x27c   : > { %2582 = vst.msk [vmem:[#allocation2 + $0x170] sm:$0xf] %vm1999_vm13, %v2506_v21 }
 0x27d   : > { %1682 = vrot.lane.b32.xlu0 %v15958_v24, %s12917_s26  ;;  %v1446_v27 = vpop.permute.xlu1 %1445 }
 0x27e   : > { %1521 = vst.msk [vmem:[#allocation2 + $0x1a4] sm:$0xf] %vm1505_vm8, %v1446_v27  ;;  %v1940_v31 = vpop.permute.xlu0 %1939  ;;  %1957 = vrot.lane.b32.xlu1 %v20204_v47, %s12919_s28 }
 0x27f   : > { %1736 = vst.msk [vmem:[#allocation2 + $0x1a4] sm:$0xf] %vm1720_vm10, %v1661_v32 }
 0x280   : > { %2015 = vst.msk [vmem:[#allocation2 + $0x1a4] sm:$0xf] %vm1999_vm13, %v1940_v31  ;;  %v20208_v31 = vld [vmem:[#allocation143_spill] sm:$0xff] }
 0x281   : > { %2397 = vrot.lane.b32.xlu0 %v15169_v41, %s12917_s26  ;;  %v2231_v52 = vpop.permute.xlu1 %2230 }
 0x282   : > { %2306 = vst.msk [vmem:[#allocation2 + $0x18c] sm:$0xf] %vm1505_vm8, %v2231_v52  ;;  %v1448_v21 = vpop.permute.xlu0 %1447  ;;  %1465 = vrot.lane.b32.xlu1 %v20206_v6, %s12918_s27  ;;  %v15991_v52 = vsel %vm13120_vm5, %v1621_v28, %v1622_v36  ;;  %v5294_v6 = vrot.slane %v15880_v53, 5 }
 0x283   : > { %1522 = vst.msk [vmem:[#allocation2 + $0x1c0] sm:$0xf] %vm1505_vm8, %v1448_v21  ;;  %v12467_v54 = vld [vmem:[#allocation2 + $0x154] ss:$28 sps:$4 sm:$0xff]   ;;  %20209 = vst [vmem:[#allocation143_spill] sm:$0xff] %v15991_v52 }
 0x284   : > { %1737 = vst.msk [vmem:[#allocation2 + $0x1c0] sm:$0xf] %vm1720_vm10, %v1663_v40  ;;  %6774 = vmatprep.mubr.bf16.mxu1 %v12467_v54  ;;  %v20210_v54 = vld [vmem:[#allocation148_spill] sm:$0xff] }
 0x285   : > { %1959 = vrot.lane.b32.xlu0 %v15169_v41, %s12919_s28  ;;  %v2508_v32 = vpop.permute.xlu1 %2507  ;;  %6775 = vmatmul.mubr.bf16.gmra.mxu1 %v12469_v44  ;;  %v20211_v44 = vld [vmem:[#allocation146_spill] sm:$0xff] }
 0x286   : > { %v2233_v60 = vpop.permute.xlu0 %2232  ;;  %2250 = vrot.lane.b32.xlu1 %v15958_v24, %s12918_s27  ;;  %v1624_v24 = vrot.slane %v1622_v36, 4 }
 0x287   : > { %2307 = vst.msk [vmem:[#allocation2 + $0x1a8] sm:$0xf] %vm1505_vm8, %v2233_v60 }
 0x289   : > { %1467 = vrot.lane.b32.xlu0 %v20207_v20, %s12918_s27  ;;  %v1665_v27 = vpop.permute.xlu1 %1664  ;;  %v1625_v20 = vrot.slane %v15058_v7, 5 }
 0x28a   : > { %v2510_v40 = vpop.permute.xlu0 %2509  ;;  %2527 = vrot.lane.b32.xlu1 %v20208_v31, %s12919_s28 }
 0x28d   : > { %2252 = vrot.lane.b32.xlu0 %v15991_v52, %s12918_s27  ;;  %v2380_v21 = vpop.permute.xlu1 %2379 }
 0x28e   : > { %2455 = vst.msk [vmem:[#allocation2 + $0x18c] sm:$0xf] %vm1720_vm10, %v2380_v21  ;;  %v1667_v15 = vpop.permute.xlu0 %1666  ;;  %2399 = vrot.lane.b32.xlu1 %v20210_v54, %s12917_s26 }
 0x28f   : > { %2583 = vst.msk [vmem:[#allocation2 + $0x18c] sm:$0xf] %vm1999_vm13, %v2508_v32 }
 0x291   : > { %2529 = vrot.lane.b32.xlu0 %v20211_v44, %s12919_s28  ;;  %v1942_v60 = vpop.permute.xlu1 %1941 }
 0x292   : > { %2016 = vst.msk [vmem:[#allocation2 + $0x1c0] sm:$0xf] %vm1999_vm13, %v1942_v60  ;;  %v2382_v28 = vpop.permute.xlu0 %2381  ;;  %1684 = vrot.lane.b32.xlu1 %v15991_v52, %s12917_s26  ;;  %v11572_v41 = vpop.f32.mrf.mxu1 }
 0x293   : > { %2456 = vst.msk [vmem:[#allocation2 + $0x1a8] sm:$0xf] %vm1720_vm10, %v2382_v28 }
 0x294   : > { %2584 = vst.msk [vmem:[#allocation2 + $0x1a8] sm:$0xf] %vm1999_vm13, %v2510_v40  ;;  %v11573_v40 = vpop.f32.mrf.mxu1 }
 0x295   : > { %1961 = vrot.lane.b32.xlu0 %v20210_v54, %s12919_s28  ;;  %v1450_v32 = vpop.permute.xlu1 %1449  ;;  %v16016_v60 = vadd.f32 %v11573_v40, %v11572_v41  ;;  %v12488_v41 = vld [vmem:[%s13041_s23 + $0x124] ss:$8 sps:$4 sm:$0xff]   ;;  %v12490_v40 = vld [vmem:[%s13041_s23 + $0x120] ss:$8 sps:$4 sm:$0xff]  }
 0x296   : > { %1523 = vst.msk [vmem:[#allocation2 + $0x1dc] sm:$0xf] %vm1505_vm8, %v1450_v32  ;;  %v1944_v21 = vpop.permute.xlu0 %1943  ;;  %1469 = vrot.lane.b32.xlu1 %v15347_v62, %s12918_s27  ;;  %v4458_v62 = vrot.slane %v15861_v33, 4  ;;  %890 = vmatprep.mubr.bf16.mxu0 %v12488_v41 }
 0x297   : > { %1738 = vst.msk [vmem:[#allocation2 + $0x1dc] sm:$0xf] %vm1720_vm10, %v1665_v27  ;;  %v16021_v27 = vsel %vm13120_vm5, %v1624_v24, %v1625_v20  ;;  %v5289_v24 = vrot.slane %v15861_v33, 5  ;;  %891 = vmatmul.mubr.bf16.gmra.mxu0 %v12490_v40  ;;  %v19827_v33 = vrot.slane %v15894_v22, 5  ;;  %v1627_v40 = vrot.slane %v1625_v20, 4 }
 0x298   : > { %2017 = vst.msk [vmem:[#allocation2 + $0x1dc] sm:$0xf] %vm1999_vm13, %v1944_v21  ;;  %20212 = vst [vmem:[#allocation146_spill] sm:$0xff] %v16021_v27  ;;  %v12472_v21 = vld [vmem:[#allocation2 + $0x188] ss:$28 sps:$4 sm:$0xff]  }
 0x299   : > { %2401 = vrot.lane.b32.xlu0 %v15352_v51, %s12917_s26  ;;  %v2235_v28 = vpop.permute.xlu1 %2234 }
 0x29a   : > { %2308 = vst.msk [vmem:[#allocation2 + $0x1c4] sm:$0xf] %vm1505_vm8, %v2235_v28  ;;  %v1452_v36 = vpop.permute.xlu0 %1451  ;;  %2254 = vrot.lane.b32.xlu1 %v16021_v27, %s12918_s27  ;;  %v19825_v28 = vrot.slane %v15870_v50, 5 }
 0x29b   : > { %1524 = vst.msk [vmem:[#allocation2 + $0x1f8] sm:$0xf] %vm1505_vm8, %v1452_v36  ;;  %v12470_v32 = vld [vmem:[#allocation2 + $0x18c] ss:$28 sps:$4 sm:$0xff]   ;;  %v5290_v36 = vrot.slane %v15870_v50, 6 }
 0x29c   : > { %1739 = vst.msk [vmem:[#allocation2 + $0x1f8] sm:$0xf] %vm1720_vm10, %v1667_v15  ;;  %6782 = vmatprep.mubr.bf16.mxu1 %v12470_v32  ;;  %v4459_v32 = vor.u32 %v4458_v62, %v19825_v28  ;;  %v1409_v28 = vrot.slane %v15460_v59, 4  ;;  %v12491_v59 = vld [vmem:[%s19502_s3 + $0xf8] sm:$0xff]  }
 0x29d   : > { %2531 = vrot.lane.b32.xlu0 %v15368_v4, %s12919_s28  ;;  %v2512_v52 = vpop.permute.xlu1 %2511  ;;  %6783 = vmatmul.mubr.bf16.gmra.mxu1 %v12472_v21  ;;  %v16038_v15 = vor.u32 %v5290_v36, %v5289_v24  ;;  %v5295_v21 = vrot.slane %v15894_v22, 6  ;;  %v1628_v24 = vrot.slane %v15499_v55, 5 }
 0x29e   : > { %v2237_v54 = vpop.permute.xlu0 %2236  ;;  %1963 = vrot.lane.b32.xlu1 %v15352_v51, %s12919_s28  ;;  %11662 = vmatprep.subr.bf16.mxu1 %v12491_v59  ;;  %v12497_v59 = vld [vmem:[%s19502_s3 + $0xb0] sm:$0xff]  }
 0x29f   : > { %2309 = vst.msk [vmem:[#allocation2 + $0x1e0] sm:$0xf] %vm1505_vm8, %v2237_v54  ;;  %20213 = vst [vmem:[#allocation197_spill] sm:$0xff] %v16038_v15  ;;  %v4460_v54 = vrot.slane %v4459_v32, 4  ;;  %v5293_v47 = vrot.slane %v16038_v15, 4  ;;  %v16049_v36 = vor.u32 %v5295_v21, %v5294_v6  ;;  %v16069_v21 = vsel %vm13120_vm5, %v1627_v40, %v1628_v24 }
 0x2a0   : > { %20216 = vst [vmem:[#allocation200_spill] sm:$0xff] %v16069_v21 }
 0x2a1   : > { %1686 = vrot.lane.b32.xlu0 %v16021_v27, %s12917_s26  ;;  %v1669_v41 = vpop.permute.xlu1 %1668  ;;  %v16057_v62 = vsel %vm13140_vm9, %v4460_v54, %v19827_v33  ;;  %v16064_v20 = vsel %vm13161_vm11, %v5293_v47, %v16049_v36  ;;  %v19826_v54 = vrot.slane %v15520_v10, 5  ;;  %v20260_v27 = vld [vmem:[#allocation84_spill] sm:$0xff] }
 0x2a2   : > { %v2514_v51 = vpop.permute.xlu0 %2513  ;;  %2533 = vrot.lane.b32.xlu1 %v15544_v30, %s12919_s28  ;;  %20214 = vst [vmem:[#allocation198_spill] sm:$0xff] %v16057_v62  ;;  %20215 = vst [vmem:[#allocation199_spill] sm:$0xff] %v16064_v20  ;;  %v12475_v62 = vld [vmem:[#allocation2 + $0x1c0] ss:$28 sps:$4 sm:$0xff]  }
 0x2a3   : > { %v16083_v40 = vsel %vm13140_vm9, %v1409_v28, %v19826_v54  ;;  %v2197_v54 = vrot.slane %v15539_v37, 5 }
 0x2a4   : > { %20217 = vst [vmem:[#allocation201_spill] sm:$0xff] %v16083_v40 }
 0x2a5   : > { %1471 = vrot.lane.b32.xlu0 %v15429_v26, %s12918_s27  ;;  %v2384_v32 = vpop.permute.xlu1 %2383 }
 0x2a6   : > { %2457 = vst.msk [vmem:[#allocation2 + $0x1c4] sm:$0xf] %vm1720_vm10, %v2384_v32  ;;  %v1671_v6 = vpop.permute.xlu0 %1670  ;;  %1688 = vrot.lane.b32.xlu1 %v16069_v21, %s12917_s26 }
 0x2a7   : > { %2585 = vst.msk [vmem:[#allocation2 + $0x1c4] sm:$0xf] %vm1999_vm13, %v2512_v52  ;;  %v12492_v52 = vld [vmem:[%s19502_s3 + $0xb8] sm:$0xff]  }
 0x2a8   : > { %11663 = vmatpush3.bf16.msra.mxu1 %v12492_v52 }
 0x2a9   : > { %2256 = vrot.lane.b32.xlu0 %v16069_v21, %s12918_s27  ;;  %v1946_v47 = vpop.permute.xlu1 %1945 }
 0x2aa   : > { %2018 = vst.msk [vmem:[#allocation2 + $0x1f8] sm:$0xf] %vm1999_vm13, %v1946_v47  ;;  %v2386_v32 = vpop.permute.xlu0 %2385  ;;  %1473 = vrot.lane.b32.xlu1 %v16083_v40, %s12918_s27 }
 0x2ab   : > { %2458 = vst.msk [vmem:[#allocation2 + $0x1e0] sm:$0xf] %vm1720_vm10, %v2386_v32  ;;  %v12496_v32 = vld [vmem:[%s19502_s3 + $0xf0] sm:$0xff]  }
 0x2ac   : > { %2586 = vst.msk [vmem:[#allocation2 + $0x1e0] sm:$0xf] %vm1999_vm13, %v2514_v51  ;;  %v2196_v51 = vrot.slane %v1628_v24, 4  ;;  %v2199_v24 = vrot.slane %v2197_v54, 4  ;;  %11664 = vmatprep.subr.bf16.mxu1 %v12496_v32  ;;  %v12498_v32 = vld [vmem:[%s13041_s23 + $0x134] ss:$8 sps:$4 sm:$0xff]  }
 0x2ad   : > { %2403 = vrot.lane.b32.xlu0 %v15481_v5, %s12917_s26  ;;  %v1454_v28 = vpop.permute.xlu1 %1453  ;;  %11665 = vmatpush3.bf16.msra.mxu1 %v12497_v59  ;;  %v20219_v59 = vrot.slane %v15574_v29, 5 }
 0x2ae   : > { %1525 = vst.msk [vmem:[#allocation2 + $0x214] sm:$0xf] %vm1505_vm8, %v1454_v28  ;;  %v1948_v47 = vpop.permute.xlu0 %1947  ;;  %2405 = vrot.lane.b32.xlu1 %v15584_v8, %s12917_s26  ;;  %v16119_v33 = vsel %vm13120_vm5, %v2196_v51, %v2197_v54  ;;  %v12501_v28 = vld [vmem:[%s13041_s23 + $0x130] ss:$8 sps:$4 sm:$0xff]   ;;  %v12502_v54 = vld [vmem:[%s19502_s3 + $0xa8] sm:$0xff]   ;;  %898 = vmatprep.mubr.bf16.mxu0 %v12498_v32  ;;  %v12504_v32 = vld [vmem:[%s19502_s3 + $0xa0] sm:$0xff]  }
 0x2af   : > { %1740 = vst.msk [vmem:[#allocation2 + $0x214] sm:$0xf] %vm1720_vm10, %v1669_v41  ;;  %20218 = vst [vmem:[#allocation202_spill] sm:$0xff] %v16119_v33  ;;  %899 = vmatmul.mubr.bf16.gmra.mxu0 %v12501_v28  ;;  %v12505_v28 = vld [vmem:[%s19502_s3 + $0xd8] sm:$0xff]  }
 0x2b0   : > { %2019 = vst.msk [vmem:[#allocation2 + $0x214] sm:$0xf] %vm1999_vm13, %v1948_v47  ;;  %v2335_v47 = vrot.slane %v15739_v43, 5 }
 0x2b1   : > { %1965 = vrot.lane.b32.xlu0 %v15481_v5, %s12919_s28  ;;  %v2239_v52 = vpop.permute.xlu1 %2238 }
 0x2b2   : > { %2310 = vst.msk [vmem:[#allocation2 + $0x1fc] sm:$0xf] %vm1505_vm8, %v2239_v52  ;;  %v1456_v41 = vpop.permute.xlu0 %1455  ;;  %1967 = vrot.lane.b32.xlu1 %v15584_v8, %s12919_s28  ;;  %v2338_v52 = vrot.slane %v15744_v42, 6 }
 0x2b3   : > { %1526 = vst.msk [vmem:[#allocation2 + $0x230] sm:$0xf] %vm1505_vm8, %v1456_v41  ;;  %v12473_v20 = vld [vmem:[#allocation2 + $0x1c4] ss:$28 sps:$4 sm:$0xff]   ;;  %v12500_v41 = vld [vmem:[%s19502_s3 + $0xe8] sm:$0xff]  }
 0x2b4   : > { %1741 = vst.msk [vmem:[#allocation2 + $0x230] sm:$0xf] %vm1720_vm10, %v1671_v6  ;;  %6790 = vmatprep.mubr.bf16.mxu1 %v12473_v20  ;;  %v16137_v6 = vsel %vm13120_vm5, %v2199_v24, %v20219_v59  ;;  %v2331_v20 = vrot.slane %v15563_v38, 4  ;;  %v2339_v50 = vor.u32 %v2338_v52, %v2335_v47  ;;  %11666 = vmatprep.subr.bf16.mxu1 %v12500_v41  ;;  %v2345_v59 = vrot.slane %v15747_v14, 5  ;;  %v20221_v47 = vld [vmem:[#allocation56_spill] sm:$0xff]  ;;  %v16162_v41 = vpop.f32.mrf.mxu1 }
 0x2b5   : > { %2258 = vrot.lane.b32.xlu0 %v16119_v33, %s12918_s27  ;;  %v2516_v15 = vpop.permute.xlu1 %2515  ;;  %6791 = vmatmul.mubr.bf16.gmra.mxu1 %v12475_v62  ;;  %20220 = vst [vmem:[#allocation203_spill] sm:$0xff] %v16137_v6  ;;  %v12503_v62 = vld [vmem:[%s19502_s3 + $0xe0] sm:$0xff]   ;;  %v2348_v38 = vrot.slane %v15763_v1, 6  ;;  %v20224_v1 = vld [vmem:[#allocation57_spill] sm:$0xff] }
 0x2b6   : > { %v2241_v51 = vpop.permute.xlu0 %2240  ;;  %2260 = vrot.lane.b32.xlu1 %v16137_v6, %s12918_s27  ;;  %11667 = vmatpush3.bf16.msra.mxu1 %v12502_v54  ;;  %v16157_v52 = vsel %vm13161_vm11, %v2331_v20, %v2339_v50  ;;  %v2341_v20 = vrot.slane %v2339_v50, 4  ;;  %v12508_v50 = vld [vmem:[%s19502_s3 + $0x90] sm:$0xff]  }
 0x2b7   : > { %2311 = vst.msk [vmem:[#allocation2 + $0x218] sm:$0xf] %vm1505_vm8, %v2241_v51  ;;  %11668 = vmatprep.subr.bf16.mxu1 %v12503_v62  ;;  %20222 = vst [vmem:[#allocation56_spill] sm:$0xff] %v16157_v52  ;;  %v12506_v62 = vld [vmem:[%s19502_s3 + $0x98] sm:$0xff]   ;;  %v16170_v6 = vor.u32 %v2348_v38, %v2345_v59 }
 0x2b9   : > { %2535 = vrot.lane.b32.xlu0 %v15588_v46, %s12919_s28  ;;  %v1673_v24 = vpop.permute.xlu1 %1672  ;;  %20223 = vst [vmem:[#allocation204_spill] sm:$0xff] %v16170_v6  ;;  %v16189_v38 = vsel %vm13161_vm11, %v2341_v20, %v16170_v6 }
 0x2ba   : > { %v2518_v51 = vpop.permute.xlu0 %2517  ;;  %3202 = vrot.lane.b32.xlu1 %v20221_v47, %s12919_s28  ;;  %11669 = vmatpush3.bf16.msra.mxu1 %v12504_v32  ;;  %v12507_v32 = vld [vmem:[%s19502_s3 + $0xd0] sm:$0xff]   ;;  %20225 = vst [vmem:[#allocation57_spill] sm:$0xff] %v16189_v38 }
 0x2bb   : > { %11670 = vmatprep.subr.bf16.mxu1 %v12505_v28  ;;  %v20226_v28 = vld [vmem:[#allocation59_spill] sm:$0xff] }
 0x2bd   : > { %2407 = vrot.lane.b32.xlu0 %v16157_v52, %s12917_s26  ;;  %v2388_v54 = vpop.permute.xlu1 %2387  ;;  %v16178_v52 = vpop.f32.mrf.mxu1 }
 0x2be   : > { %2459 = vst.msk [vmem:[#allocation2 + $0x1fc] sm:$0xf] %vm1720_vm10, %v2388_v54  ;;  %2537 = vrot.lane.b32.xlu1 %v15611_v35, %s12919_s28  ;;  %11671 = vmatpush3.bf16.msra.mxu1 %v12506_v62 }
 0x2bf   : > { %v1675_v47 = vpop.permute.xlu0 %1674  ;;  %2587 = vst.msk [vmem:[#allocation2 + $0x1fc] sm:$0xf] %vm1999_vm13, %v2516_v15  ;;  %11672 = vmatprep.subr.bf16.mxu1 %v12507_v32  ;;  %v12513_v32 = vld [vmem:[%s19502_s3 + $0x88] sm:$0xff]  }
 0x2c1   : > { %3200 = vrot.lane.b32.xlu0 %v20224_v1, %s12919_s28  ;;  %v1950_v54 = vpop.permute.xlu1 %1949  ;;  %v12512_v1 = vld [vmem:[%s19502_s3 + $0xc8] sm:$0xff]  }
 0x2c2   : > { %2020 = vst.msk [vmem:[#allocation2 + $0x230] sm:$0xf] %vm1999_vm13, %v1950_v54  ;;  %v11578_v59 = vpop.f32.mrf.mxu1  ;;  %2409 = vrot.lane.b32.xlu1 %v16189_v38, %s12917_s26  ;;  %11673 = vmatpush3.bf16.msra.mxu1 %v12508_v50  ;;  %v20228_v50 = vld [vmem:[#allocation16_spill] sm:$0xff] }
 0x2c3   : > { %v2390_v15 = vpop.permute.xlu0 %2389  ;;  %11674 = vmatprep.subr.bf16.mxu1 %v12512_v1  ;;  %v12518_v1 = vld [vmem:[%s19502_s3 + $0x80] sm:$0xff]  }
 0x2c4   : > { %2460 = vst.msk [vmem:[#allocation2 + $0x218] sm:$0xf] %vm1720_vm10, %v2390_v15  ;;  %v11579_v62 = vpop.f32.mrf.mxu1 }
 0x2c5   : > { %2588 = vst.msk [vmem:[#allocation2 + $0x218] sm:$0xf] %vm1999_vm13, %v2518_v51  ;;  %3860 = vrot.lane.b32.xlu0 %v20226_v28, %s12919_s28  ;;  %v16200_v54 = vadd.f32 %v11579_v62, %v11578_v59  ;;  %v1458_v20 = vpop.permute.xlu1 %1457  ;;  %v20227_v51 = vld [vmem:[#allocation60_spill] sm:$0xff]  ;;  %v12517_v59 = vld [vmem:[%s19502_s3 + $0xc0] sm:$0xff]  }
 0x2c6   : > { %1527 = vst.msk [vmem:[#allocation2 + $0x24c] sm:$0xf] %vm1505_vm8, %v1458_v20  ;;  %3862 = vrot.lane.b32.xlu1 %v20227_v51, %s12919_s28  ;;  %11675 = vmatpush3.bf16.msra.mxu1 %v12513_v32  ;;  %v20229_v20 = vld [vmem:[#allocation17_spill] sm:$0xff] }
 0x2c7   : > { %v1952_v15 = vpop.permute.xlu0 %1951  ;;  %1742 = vst.msk [vmem:[#allocation2 + $0x24c] sm:$0xf] %vm1720_vm10, %v1673_v24  ;;  %11676 = vmatprep.subr.bf16.mxu1 %v12517_v59  ;;  %v20231_v59 = vld [vmem:[#allocation62_spill] sm:$0xff] }
 0x2c8   : > { %2021 = vst.msk [vmem:[#allocation2 + $0x24c] sm:$0xf] %vm1999_vm13, %v1952_v15  ;;  %v12478_v15 = vld [vmem:[#allocation2 + $0x1f8] ss:$28 sps:$4 sm:$0xff]  }
 0x2c9   : > { %2917 = vrot.lane.b32.xlu0 %v20228_v50, %s12918_s27  ;;  %v2243_v62 = vpop.permute.xlu1 %2242  ;;  %v20230_v50 = vld [vmem:[#allocation61_spill] sm:$0xff] }
 0x2ca   : > { %2312 = vst.msk [vmem:[#allocation2 + $0x234] sm:$0xf] %vm1505_vm8, %v2243_v62  ;;  %2919 = vrot.lane.b32.xlu1 %v20229_v20, %s12918_s27  ;;  %11677 = vmatpush3.bf16.msra.mxu1 %v12518_v1  ;;  %v20232_v62 = vld [vmem:[#allocation20_spill] sm:$0xff] }
 0x2cb   : > { %v1460_v24 = vpop.permute.xlu0 %1459 }
 0x2cc   : > { %1528 = vst.msk [vmem:[#allocation2 + $0x268] sm:$0xf] %vm1505_vm8, %v1460_v24  ;;  %v12476_v38 = vld [vmem:[#allocation2 + $0x1fc] ss:$28 sps:$4 sm:$0xff]  }
 0x2cd   : > { %1743 = vst.msk [vmem:[#allocation2 + $0x268] sm:$0xf] %vm1720_vm10, %v1675_v47  ;;  %3516 = vrot.lane.b32.xlu0 %v20230_v50, %s12918_s27  ;;  %v2520_v32 = vpop.permute.xlu1 %2519  ;;  %6798 = vmatprep.mubr.bf16.mxu1 %v12476_v38  ;;  %v20233_v47 = vld [vmem:[#allocation23_spill] sm:$0xff]  ;;  %v20234_v50 = vld [vmem:[#allocation13_spill] sm:$0xff] }
 0x2ce   : > { %6799 = vmatmul.mubr.bf16.gmra.mxu1 %v12478_v15  ;;  %3518 = vrot.lane.b32.xlu1 %v20231_v59, %s12918_s27  ;;  %v20236_v15 = vld [vmem:[#allocation18_spill] sm:$0xff] }
 0x2cf   : > { %v2245_v6 = vpop.permute.xlu0 %2244 }
 0x2d0   : > { %2313 = vst.msk [vmem:[#allocation2 + $0x250] sm:$0xf] %vm1505_vm8, %v2245_v6  ;;  %v20235_v6 = vld [vmem:[#allocation14_spill] sm:$0xff] }
 0x2d1   : > { %3055 = vrot.lane.b32.xlu0 %v20232_v62, %s12917_s26  ;;  %v1677_v24 = vpop.permute.xlu1 %1676 }
 0x2d2   : > { %3057 = vrot.lane.b32.xlu1 %v20233_v47, %s12917_s26  ;;  %v20237_v47 = vld [vmem:[#allocation64_spill] sm:$0xff] }
 0x2d3   : > { %v2522_v20 = vpop.permute.xlu0 %2521 }
 0x2d5   : > { %3726 = vrot.lane.b32.xlu0 %v20234_v50, %s12917_s26  ;;  %v2392_v38 = vpop.permute.xlu1 %2391 }
 0x2d6   : > { %2461 = vst.msk [vmem:[#allocation2 + $0x234] sm:$0xf] %vm1720_vm10, %v2392_v38  ;;  %3728 = vrot.lane.b32.xlu1 %v20235_v6, %s12917_s26  ;;  %v20238_v38 = vld [vmem:[#allocation65_spill] sm:$0xff] }
 0x2d7   : > { %v1679_v1 = vpop.permute.xlu0 %1678  ;;  %2589 = vst.msk [vmem:[#allocation2 + $0x234] sm:$0xf] %vm1999_vm13, %v2520_v32 }
 0x2d9   : > { %3204 = vrot.lane.b32.xlu0 %v20236_v15, %s12919_s28  ;;  %v1954_v59 = vpop.permute.xlu1 %1953  ;;  %v20239_v15 = vld [vmem:[#allocation67_spill] sm:$0xff] }
 0x2da   : > { %2022 = vst.msk [vmem:[#allocation2 + $0x268] sm:$0xf] %vm1999_vm13, %v1954_v59  ;;  %3206 = vrot.lane.b32.xlu1 %v20237_v47, %s12919_s28  ;;  %v16251_v59 = vpop.f32.mrf.mxu1  ;;  %v12481_v47 = vld [vmem:[#allocation2 + $0x230] ss:$28 sps:$4 sm:$0xff]  }
 0x2db   : > { %v2394_v62 = vpop.permute.xlu0 %2393 }
 0x2dc   : > { %2462 = vst.msk [vmem:[#allocation2 + $0x250] sm:$0xf] %vm1720_vm10, %v2394_v62 }
 0x2dd   : > { %2590 = vst.msk [vmem:[#allocation2 + $0x250] sm:$0xf] %vm1999_vm13, %v2522_v20  ;;  %3864 = vrot.lane.b32.xlu0 %v20238_v38, %s12919_s28  ;;  %v1462_v32 = vpop.permute.xlu1 %1461 }
 0x2de   : > { %1529 = vst.msk [vmem:[#allocation2 + $0x284] sm:$0xf] %vm1505_vm8, %v1462_v32  ;;  %3866 = vrot.lane.b32.xlu1 %v20239_v15, %s12919_s28  ;;  %v16260_v32 = vpop.f32.mrf.mxu1 }
 0x2df   : > { %v1956_v8 = vpop.permute.xlu0 %1955  ;;  %1744 = vst.msk [vmem:[#allocation2 + $0x284] sm:$0xf] %vm1720_vm10, %v1677_v24 }
 0x2e0   : > { %2023 = vst.msk [vmem:[#allocation2 + $0x284] sm:$0xf] %vm1999_vm13, %v1956_v8  ;;  %v20240_v8 = vld [vmem:[#allocation68_spill] sm:$0xff] }
 0x2e1   : > { %2921 = vrot.lane.b32.xlu0 %v20226_v28, %s12918_s27  ;;  %v2247_v20 = vpop.permute.xlu1 %2246 }
 0x2e2   : > { %2314 = vst.msk [vmem:[#allocation2 + $0x26c] sm:$0xf] %vm1505_vm8, %v2247_v20  ;;  %2923 = vrot.lane.b32.xlu1 %v20227_v51, %s12918_s27  ;;  %v20241_v20 = vld [vmem:[#allocation69_spill] sm:$0xff]  ;;  %v20242_v51 = vld [vmem:[#allocation27_spill] sm:$0xff] }
 0x2e3   : > { %v1464_v62 = vpop.permute.xlu0 %1463 }
 0x2e4   : > { %1530 = vst.msk [vmem:[#allocation2 + $0x2a0] sm:$0xf] %vm1505_vm8, %v1464_v62  ;;  %v12479_v24 = vld [vmem:[#allocation2 + $0x234] ss:$28 sps:$4 sm:$0xff]  }
 0x2e5   : > { %1745 = vst.msk [vmem:[#allocation2 + $0x2a0] sm:$0xf] %vm1720_vm10, %v1679_v1  ;;  %3520 = vrot.lane.b32.xlu0 %v20240_v8, %s12918_s27  ;;  %v2524_v14 = vpop.permute.xlu1 %2523  ;;  %6806 = vmatprep.mubr.bf16.mxu1 %v12479_v24  ;;  %v11584_v43 = vpop.f32.mrf.mxu1  ;;  %v20243_v8 = vld [vmem:[#allocation28_spill] sm:$0xff]  ;;  %v20244_v24 = vld [vmem:[#allocation15_spill] sm:$0xff] }
 0x2e6   : > { %6807 = vmatmul.mubr.bf16.gmra.mxu1 %v12481_v47  ;;  %3522 = vrot.lane.b32.xlu1 %v20241_v20, %s12918_s27  ;;  %v20245_v20 = vld [vmem:[#allocation19_spill] sm:$0xff] }
 0x2e7   : > { %v2249_v28 = vpop.permute.xlu0 %2248  ;;  %v11585_v62 = vpop.f32.mrf.mxu1 }
 0x2e8   : > { %2315 = vst.msk [vmem:[#allocation2 + $0x288] sm:$0xf] %vm1505_vm8, %v2249_v28  ;;  %v16270_v33 = vadd.f32 %v11585_v62, %v11584_v43  ;;  %v20246_v43 = vld [vmem:[#allocation73_spill] sm:$0xff] }
 0x2e9   : > { %3059 = vrot.lane.b32.xlu0 %v20242_v51, %s12917_s26  ;;  %v1681_v1 = vpop.permute.xlu1 %1680 }
 0x2ea   : > { %3061 = vrot.lane.b32.xlu1 %v20243_v8, %s12917_s26  ;;  %v20247_v8 = vld [vmem:[#allocation75_spill] sm:$0xff] }
 0x2eb   : > { %v2526_v21 = vpop.permute.xlu0 %2525 }
 0x2ed   : > { %3730 = vrot.lane.b32.xlu0 %v20244_v24, %s12917_s26  ;;  %v2396_v47 = vpop.permute.xlu1 %2395 }
 0x2ee   : > { %2463 = vst.msk [vmem:[#allocation2 + $0x26c] sm:$0xf] %vm1720_vm10, %v2396_v47  ;;  %3732 = vrot.lane.b32.xlu1 %v20245_v20, %s12917_s26  ;;  %v20248_v47 = vld [vmem:[#allocation76_spill] sm:$0xff] }
 0x2ef   : > { %v1683_v28 = vpop.permute.xlu0 %1682  ;;  %2591 = vst.msk [vmem:[#allocation2 + $0x26c] sm:$0xf] %vm1999_vm13, %v2524_v14 }
 0x2f1   : > { %3208 = vrot.lane.b32.xlu0 %v20246_v43, %s12919_s28  ;;  %v1958_v51 = vpop.permute.xlu1 %1957  ;;  %v20249_v43 = vld [vmem:[#allocation78_spill] sm:$0xff] }
 0x2f2   : > { %2024 = vst.msk [vmem:[#allocation2 + $0x2a0] sm:$0xf] %vm1999_vm13, %v1958_v51  ;;  %3210 = vrot.lane.b32.xlu1 %v20247_v8, %s12919_s28  ;;  %v16293_v51 = vpop.f32.mrf.mxu1  ;;  %v12484_v8 = vld [vmem:[#allocation2 + $0x268] ss:$28 sps:$4 sm:$0xff]  }
 0x2f3   : > { %v2398_v62 = vpop.permute.xlu0 %2397 }
 0x2f4   : > { %2464 = vst.msk [vmem:[#allocation2 + $0x288] sm:$0xf] %vm1720_vm10, %v2398_v62 }
 0x2f5   : > { %2592 = vst.msk [vmem:[#allocation2 + $0x288] sm:$0xf] %vm1999_vm13, %v2526_v21  ;;  %3868 = vrot.lane.b32.xlu0 %v20248_v47, %s12919_s28  ;;  %v1466_v14 = vpop.permute.xlu1 %1465 }
 0x2f6   : > { %1531 = vst.msk [vmem:[#allocation2 + $0x2bc] sm:$0xf] %vm1505_vm8, %v1466_v14  ;;  %3870 = vrot.lane.b32.xlu1 %v20249_v43, %s12919_s28  ;;  %v16302_v14 = vpop.f32.mrf.mxu1 }
 0x2f7   : > { %v1960_v40 = vpop.permute.xlu0 %1959  ;;  %1746 = vst.msk [vmem:[#allocation2 + $0x2bc] sm:$0xf] %vm1720_vm10, %v1681_v1 }
 0x2f8   : > { %2025 = vst.msk [vmem:[#allocation2 + $0x2bc] sm:$0xf] %vm1999_vm13, %v1960_v40  ;;  %v20250_v40 = vld [vmem:[#allocation22_spill] sm:$0xff] }
 0x2f9   : > { %2925 = vrot.lane.b32.xlu0 %v20238_v38, %s12918_s27  ;;  %v2251_v21 = vpop.permute.xlu1 %2250 }
 0x2fa   : > { %2316 = vst.msk [vmem:[#allocation2 + $0x2a4] sm:$0xf] %vm1505_vm8, %v2251_v21  ;;  %2927 = vrot.lane.b32.xlu1 %v20239_v15, %s12918_s27  ;;  %v20251_v21 = vld [vmem:[#allocation79_spill] sm:$0xff]  ;;  %v20252_v15 = vld [vmem:[#allocation32_spill] sm:$0xff] }
 0x2fb   : > { %v1468_v62 = vpop.permute.xlu0 %1467 }
 0x2fc   : > { %1532 = vst.msk [vmem:[#allocation2 + $0x2d8] sm:$0xf] %vm1505_vm8, %v1468_v62  ;;  %v12482_v1 = vld [vmem:[#allocation2 + $0x26c] ss:$28 sps:$4 sm:$0xff]  }
 0x2fd   : > { %1747 = vst.msk [vmem:[#allocation2 + $0x2d8] sm:$0xf] %vm1720_vm10, %v1683_v28  ;;  %3524 = vrot.lane.b32.xlu0 %v20250_v40, %s12918_s27  ;;  %v2528_v42 = vpop.permute.xlu1 %2527  ;;  %6814 = vmatprep.mubr.bf16.mxu1 %v12482_v1  ;;  %v20254_v1 = vld [vmem:[#allocation34_spill] sm:$0xff] }
 0x2fe   : > { %v11590_v5 = vpop.f32.mrf.mxu1  ;;  %6815 = vmatmul.mubr.bf16.gmra.mxu1 %v12484_v8  ;;  %3526 = vrot.lane.b32.xlu1 %v20251_v21, %s12918_s27  ;;  %v20255_v8 = vld [vmem:[#allocation21_spill] sm:$0xff] }
 0x2ff   : > { %v2253_v38 = vpop.permute.xlu0 %2252 }
 0x300   : > { %2317 = vst.msk [vmem:[#allocation2 + $0x2c0] sm:$0xf] %vm1505_vm8, %v2253_v38  ;;  %v11591_v62 = vpop.f32.mrf.mxu1 }
 0x301   : > { %3063 = vrot.lane.b32.xlu0 %v20252_v15, %s12917_s26  ;;  %v16312_v10 = vadd.f32 %v11591_v62, %v11590_v5  ;;  %v2400_v28 = vpop.permute.xlu1 %2399  ;;  %v20256_v15 = vld [vmem:[#allocation24_spill] sm:$0xff] }
 0x302   : > { %2465 = vst.msk [vmem:[#allocation2 + $0x2a4] sm:$0xf] %vm1720_vm10, %v2400_v28  ;;  %3065 = vrot.lane.b32.xlu1 %v20254_v1, %s12917_s26  ;;  %v20257_v5 = vld [vmem:[#allocation80_spill] sm:$0xff]  ;;  %v20258_v28 = vld [vmem:[#allocation82_spill] sm:$0xff]  ;;  %v20259_v1 = vld [vmem:[#allocation81_spill] sm:$0xff] }
 0x303   : > { %20253 = vst [vmem:[#allocation59_spill] sm:$0xff] %v16312_v10  ;;  %v2530_v40 = vpop.permute.xlu0 %2529  ;;  %2593 = vst.msk [vmem:[#allocation2 + $0x2a4] sm:$0xf] %vm1999_vm13, %v2528_v42 }
 0x305   : > { %3734 = vrot.lane.b32.xlu0 %v20255_v8, %s12917_s26  ;;  %v1685_v38 = vpop.permute.xlu1 %1684 }
 0x306   : > { %3736 = vrot.lane.b32.xlu1 %v20256_v15, %s12917_s26 }
 0x307   : > { %v1962_v21 = vpop.permute.xlu0 %1961 }
 0x308   : > { %2026 = vst.msk [vmem:[#allocation2 + $0x2d8] sm:$0xf] %vm1999_vm13, %v1962_v21 }
 0x309   : > { %3212 = vrot.lane.b32.xlu0 %v20257_v5, %s12919_s28  ;;  %v1470_v62 = vpop.permute.xlu1 %1469 }
 0x30a   : > { %1533 = vst.msk [vmem:[#allocation2 + $0x2f4] sm:$0xf] %vm1505_vm8, %v1470_v62  ;;  %3214 = vrot.lane.b32.xlu1 %v20258_v28, %s12919_s28  ;;  %v16336_v62 = vpop.f32.mrf.mxu1  ;;  %v12487_v28 = vld [vmem:[#allocation2 + $0x2a0] ss:$28 sps:$4 sm:$0xff]  }
 0x30b   : > { %v2402_v42 = vpop.permute.xlu0 %2401  ;;  %1748 = vst.msk [vmem:[#allocation2 + $0x2f4] sm:$0xf] %vm1720_vm10, %v1685_v38  ;;  %20261 = vst [vmem:[#allocation60_spill] sm:$0xff] %v16336_v62 }
 0x30c   : > { %2466 = vst.msk [vmem:[#allocation2 + $0x2c0] sm:$0xf] %vm1720_vm10, %v2402_v42  ;;  %v16343_v26 = vpop.f32.mrf.mxu1 }
 0x30d   : > { %2594 = vst.msk [vmem:[#allocation2 + $0x2c0] sm:$0xf] %vm1999_vm13, %v2530_v40  ;;  %3872 = vrot.lane.b32.xlu0 %v20259_v1, %s12919_s28  ;;  %v2255_v21 = vpop.permute.xlu1 %2254  ;;  %20262 = vst [vmem:[#allocation16_spill] sm:$0xff] %v16343_v26 }
 0x30e   : > { %2318 = vst.msk [vmem:[#allocation2 + $0x2dc] sm:$0xf] %vm1505_vm8, %v2255_v21  ;;  %3874 = vrot.lane.b32.xlu1 %v20260_v27, %s12919_s28  ;;  %v20263_v21 = vld [vmem:[#allocation85_spill] sm:$0xff] }
 0x30f   : > { %v2532_v5 = vpop.permute.xlu0 %2531 }
 0x311   : > { %2929 = vrot.lane.b32.xlu0 %v20248_v47, %s12918_s27  ;;  %v1964_v38 = vpop.permute.xlu1 %1963  ;;  %v20264_v47 = vld [vmem:[#allocation86_spill] sm:$0xff] }
 0x312   : > { %2027 = vst.msk [vmem:[#allocation2 + $0x2f4] sm:$0xf] %vm1999_vm13, %v1964_v38  ;;  %2931 = vrot.lane.b32.xlu1 %v20249_v43, %s12918_s27  ;;  %v20265_v43 = vld [vmem:[#allocation44_spill] sm:$0xff] }
 0x313   : > { %v1687_v42 = vpop.permute.xlu0 %1686 }
 0x314   : > { %v12485_v40 = vld [vmem:[#allocation2 + $0x2a4] ss:$28 sps:$4 sm:$0xff]  }
 0x315   : > { %3528 = vrot.lane.b32.xlu0 %v20263_v21, %s12918_s27  ;;  %v2534_v15 = vpop.permute.xlu1 %2533  ;;  %6822 = vmatprep.mubr.bf16.mxu1 %v12485_v40  ;;  %v20266_v40 = vld [vmem:[#allocation47_spill] sm:$0xff] }
 0x316   : > { %v11596_v62 = vpop.f32.mrf.mxu1  ;;  %6823 = vmatmul.mubr.bf16.gmra.mxu1 %v12487_v28  ;;  %3530 = vrot.lane.b32.xlu1 %v20264_v47, %s12918_s27  ;;  %v20269_v47 = vld [vmem:[#allocation90_spill] sm:$0xff] }
 0x317   : > { %v1472_v8 = vpop.permute.xlu0 %1471 }
 0x318   : > { %1534 = vst.msk [vmem:[#allocation2 + $0x310] sm:$0xf] %vm1505_vm8, %v1472_v8  ;;  %v11597_v38 = vpop.f32.mrf.mxu1  ;;  %v20267_v8 = vld [vmem:[#allocation26_spill] sm:$0xff] }
 0x319   : > { %1749 = vst.msk [vmem:[#allocation2 + $0x310] sm:$0xf] %vm1720_vm10, %v1687_v42  ;;  %3067 = vrot.lane.b32.xlu0 %v20265_v43, %s12917_s26  ;;  %v16353_v26 = vadd.f32 %v11597_v38, %v11596_v62  ;;  %v1689_v10 = vpop.permute.xlu1 %1688  ;;  %v20268_v62 = vld [vmem:[#allocation30_spill] sm:$0xff] }
 0x31a   : > { %3069 = vrot.lane.b32.xlu1 %v20266_v40, %s12917_s26 }
 0x31b   : > { %v2257_v21 = vpop.permute.xlu0 %2256 }
 0x31c   : > { %2319 = vst.msk [vmem:[#allocation2 + $0x2f8] sm:$0xf] %vm1505_vm8, %v2257_v21  ;;  %v20271_v21 = vld [vmem:[#allocation91_spill] sm:$0xff] }
 0x31d   : > { %3738 = vrot.lane.b32.xlu0 %v20267_v8, %s12917_s26  ;;  %v1474_v28 = vpop.permute.xlu1 %1473 }
 0x31e   : > { %1535 = vst.msk [vmem:[#allocation2 + $0x32c] sm:$0xf] %vm1505_vm8, %v1474_v28  ;;  %3740 = vrot.lane.b32.xlu1 %v20268_v62, %s12917_s26  ;;  %v20272_v28 = vld [vmem:[#allocation95_spill] sm:$0xff] }
 0x31f   : > { %v2404_v42 = vpop.permute.xlu0 %2403  ;;  %1750 = vst.msk [vmem:[#allocation2 + $0x32c] sm:$0xf] %vm1720_vm10, %v1689_v10  ;;  %v20270_v10 = vld [vmem:[#allocation94_spill] sm:$0xff] }
 0x320   : > { %2467 = vst.msk [vmem:[#allocation2 + $0x2dc] sm:$0xf] %vm1720_vm10, %v2404_v42  ;;  %v16379_v42 = vpop.f32.mrf.mxu1 }
 0x321   : > { %2595 = vst.msk [vmem:[#allocation2 + $0x2dc] sm:$0xf] %vm1999_vm13, %v2532_v5  ;;  %3216 = vrot.lane.b32.xlu0 %v20269_v47, %s12919_s28  ;;  %v2406_v43 = vpop.permute.xlu1 %2405 }
 0x322   : > { %2468 = vst.msk [vmem:[#allocation2 + $0x2f8] sm:$0xf] %vm1720_vm10, %v2406_v43  ;;  %3218 = vrot.lane.b32.xlu1 %v20270_v10, %s12919_s28  ;;  %v16386_v10 = vpop.f32.mrf.mxu1 }
 0x323   : > { %v1966_v38 = vpop.permute.xlu0 %1965  ;;  %2596 = vst.msk [vmem:[#allocation2 + $0x2f8] sm:$0xf] %vm1999_vm13, %v2534_v15  ;;  %20273 = vst [vmem:[#allocation17_spill] sm:$0xff] %v16386_v10 }
 0x324   : > { %2028 = vst.msk [vmem:[#allocation2 + $0x310] sm:$0xf] %vm1999_vm13, %v1966_v38  ;;  %v12495_v38 = vld [vmem:[#allocation2 + $0x2d8] ss:$28 sps:$4 sm:$0xff]  }
 0x325   : > { %3876 = vrot.lane.b32.xlu0 %v20271_v21, %s12919_s28  ;;  %v1968_v40 = vpop.permute.xlu1 %1967 }
 0x326   : > { %2029 = vst.msk [vmem:[#allocation2 + $0x32c] sm:$0xf] %vm1999_vm13, %v1968_v40  ;;  %3878 = vrot.lane.b32.xlu1 %v20272_v28, %s12919_s28  ;;  %v20274_v40 = vld [vmem:[#allocation96_spill] sm:$0xff] }
 0x327   : > { %v2259_v5 = vpop.permute.xlu0 %2258 }
 0x328   : > { %2320 = vst.msk [vmem:[#allocation2 + $0x314] sm:$0xf] %vm1505_vm8, %v2259_v5 }
 0x329   : > { %2933 = vrot.lane.b32.xlu0 %v20259_v1, %s12918_s27  ;;  %v2261_v15 = vpop.permute.xlu1 %2260 }
 0x32a   : > { %2321 = vst.msk [vmem:[#allocation2 + $0x330] sm:$0xf] %vm1505_vm8, %v2261_v15  ;;  %v12493_v43 = vld [vmem:[#allocation2 + $0x2dc] ss:$28 sps:$4 sm:$0xff]   ;;  %2935 = vrot.lane.b32.xlu1 %v20260_v27, %s12918_s27 }
 0x32b   : > { %v2536_v47 = vpop.permute.xlu0 %2535  ;;  %6830 = vmatprep.mubr.bf16.mxu1 %v12493_v43  ;;  %v20275_v15 = vld [vmem:[#allocation97_spill] sm:$0xff]  ;;  %v20276_v27 = vld [vmem:[#allocation54_spill] sm:$0xff] }
 0x32c   : > { %6831 = vmatmul.mubr.bf16.gmra.mxu1 %v12495_v38  ;;  %v20278_v38 = vld [vmem:[#allocation58_spill] sm:$0xff] }
 0x32d   : > { %3532 = vrot.lane.b32.xlu0 %v20274_v40, %s12918_s27  ;;  %v3203_v5 = vpop.permute.xlu1 %3202 }
 0x32e   : > { %3289 = vst.msk [vmem:[#allocation2 + $0x5c] sm:$0xf] %vm1999_vm13, %v3203_v5  ;;  %v11602_v62 = vpop.f32.mrf.mxu1  ;;  %3534 = vrot.lane.b32.xlu1 %v20275_v15, %s12918_s27  ;;  %v20279_v5 = vld [vmem:[#allocation31_spill] sm:$0xff] }
 0x32f   : > { %v2408_v1 = vpop.permute.xlu0 %2407 }
 0x330   : > { %2469 = vst.msk [vmem:[#allocation2 + $0x314] sm:$0xf] %vm1720_vm10, %v2408_v1  ;;  %v11603_v8 = vpop.f32.mrf.mxu1 }
 0x331   : > { %2597 = vst.msk [vmem:[#allocation2 + $0x314] sm:$0xf] %vm1999_vm13, %v2536_v47  ;;  %3071 = vrot.lane.b32.xlu0 %v20276_v27, %s12917_s26  ;;  %v16397_v10 = vadd.f32 %v11603_v8, %v11602_v62  ;;  %v2538_v43 = vpop.permute.xlu1 %2537  ;;  %v20280_v8 = vld [vmem:[#allocation37_spill] sm:$0xff]  ;;  %v20281_v62 = vld [vmem:[#allocation99_spill] sm:$0xff] }
 0x332   : > { %3073 = vrot.lane.b32.xlu1 %v20278_v38, %s12917_s26  ;;  %v20283_v38 = vld [vmem:[#allocation103_spill] sm:$0xff] }
 0x333   : > { %20277 = vst [vmem:[#allocation61_spill] sm:$0xff] %v16397_v10  ;;  %v3201_v40 = vpop.permute.xlu0 %3200 }
 0x334   : > { %3288 = vst.msk [vmem:[#allocation2 + $0x40] sm:$0xf] %vm1999_vm13, %v3201_v40  ;;  %v20282_v40 = vld [vmem:[#allocation102_spill] sm:$0xff] }
 0x335   : > { %3742 = vrot.lane.b32.xlu0 %v20279_v5, %s12917_s26  ;;  %v2410_v1 = vpop.permute.xlu1 %2409  ;;  %v20287_v5 = vld [vmem:[#allocation106_spill] sm:$0xff] }
 0x336   : > { %2470 = vst.msk [vmem:[#allocation2 + $0x330] sm:$0xf] %vm1720_vm10, %v2410_v1  ;;  %3744 = vrot.lane.b32.xlu1 %v20280_v8, %s12917_s26  ;;  %v12511_v8 = vld [vmem:[#allocation2 + $0x310] ss:$28 sps:$4 sm:$0xff]  }
 0x337   : > { %v3861_v47 = vpop.permute.xlu0 %3860  ;;  %2598 = vst.msk [vmem:[#allocation2 + $0x330] sm:$0xf] %vm1999_vm13, %v2538_v43 }
 0x338   : > { %3948 = vst.msk [vmem:[#allocation2 + $0x44] sm:$0xf] %vm1999_vm13, %v3861_v47 }
 0x339   : > { %3220 = vrot.lane.b32.xlu0 %v20281_v62, %s12919_s28  ;;  %v3863_v15 = vpop.permute.xlu1 %3862  ;;  %v20284_v62 = vld [vmem:[#allocation105_spill] sm:$0xff] }
 0x33a   : > { %3949 = vst.msk [vmem:[#allocation2 + $0x60] sm:$0xf] %vm1999_vm13, %v3863_v15  ;;  %3222 = vrot.lane.b32.xlu1 %v20282_v40, %s12919_s28  ;;  %v16421_v15 = vpop.f32.mrf.mxu1 }
 0x33b   : > { %v2918_v27 = vpop.permute.xlu0 %2917  ;;  %20285 = vst [vmem:[#allocation62_spill] sm:$0xff] %v16421_v15 }
 0x33c   : > { %3003 = vst.msk [vmem:[#allocation2 + $0x78] sm:$0xf] %vm1505_vm8, %v2918_v27  ;;  %v12516_v27 = vld [vmem:[#allocation2 + $0xc] ss:$28 sps:$4 sm:$0xff]  }
 0x33d   : > { %3880 = vrot.lane.b32.xlu0 %v20283_v38, %s12919_s28  ;;  %v2920_v43 = vpop.permute.xlu1 %2919 }
 0x33e   : > { %3004 = vst.msk [vmem:[#allocation2 + $0x94] sm:$0xf] %vm1505_vm8, %v2920_v43  ;;  %v12509_v47 = vld [vmem:[#allocation2 + $0x314] ss:$28 sps:$4 sm:$0xff]   ;;  %3882 = vrot.lane.b32.xlu1 %v20284_v62, %s12919_s28 }
 0x33f   : > { %v3517_v1 = vpop.permute.xlu0 %3516  ;;  %6838 = vmatprep.mubr.bf16.mxu1 %v12509_v47  ;;  %v5605_v10 = vld [vmem:[#allocation2 + $0x40] sm:$0xff] }
 0x340   : > { %3602 = vst.msk [vmem:[#allocation2 + $0x7c] sm:$0xf] %vm1505_vm8, %v3517_v1  ;;  %6839 = vmatmul.mubr.bf16.gmra.mxu1 %v12511_v8  ;;  %v16429_v1 = vpop.f32.mrf.mxu1  ;;  %v12514_v8 = vld [vmem:[#allocation2 + $0x8] ss:$28 sps:$4 sm:$0xff]  }
 0x341   : > { %2937 = vrot.lane.b32.xlu0 %v20271_v21, %s12918_s27  ;;  %v3519_v40 = vpop.permute.xlu1 %3518  ;;  %6879 = vmatprep.mubr.bf16.mxu1 %v12516_v27  ;;  %20286 = vst [vmem:[#allocation20_spill] sm:$0xff] %v16429_v1  ;;  %v20288_v27 = vld [vmem:[#allocation108_spill] sm:$0xff] }
 0x342   : > { %3603 = vst.msk [vmem:[#allocation2 + $0x98] sm:$0xf] %vm1505_vm8, %v3519_v40  ;;  %2939 = vrot.lane.b32.xlu1 %v20272_v28, %s12918_s27  ;;  %v12519_v40 = vld [vmem:[#allocation2 + $0x44] ss:$28 sps:$4 sm:$0xff]  }
 0x343   : > { %v3056_v43 = vpop.permute.xlu0 %3055 }
 0x344   : > { %3141 = vst.msk [vmem:[#allocation2 + $0x78] sm:$0xf] %vm1720_vm10, %v3056_v43 }
 0x345   : > { %3536 = vrot.lane.b32.xlu0 %v20287_v5, %s12918_s27  ;;  %v3058_v15 = vpop.permute.xlu1 %3057  ;;  %v11608_v47 = vpop.f32.mrf.mxu1 }
 0x346   : > { %3142 = vst.msk [vmem:[#allocation2 + $0x94] sm:$0xf] %vm1720_vm10, %v3058_v15  ;;  %3538 = vrot.lane.b32.xlu1 %v20288_v27, %s12918_s27  ;;  %v20290_v15 = vld [vmem:[#allocation77_spill] sm:$0xff] }
 0x347   : > { %v3727_v21 = vpop.permute.xlu0 %3726  ;;  %v11609_v28 = vpop.f32.mrf.mxu1  ;;  %v5609_v27 = vld [vmem:[#allocation2 + $0x5c] sm:$0xff] }
 0x348   : > { %3812 = vst.msk [vmem:[#allocation2 + $0x7c] sm:$0xf] %vm1720_vm10, %v3727_v21  ;;  %v16439_v43 = vadd.f32 %v11609_v28, %v11608_v47  ;;  %6880 = vmatmul.mubr.bf16.vlgmr.msra.gmra.mxu1 %v12514_v8  ;;  %v20291_v21 = vld [vmem:[#allocation39_spill] sm:$0xff]  ;;  %v10963_v8 = vcombine.low %v5605_v10, %v5609_v27  ;;  %v20296_v27 = vld [vmem:[#allocation121_spill] sm:$0xff] }
 0x349   : > { %3075 = vrot.lane.b32.xlu0 %v20136_v45, %s12917_s26  ;;  %v3729_v1 = vpop.permute.xlu1 %3728  ;;  %6887 = vmatprep.mubr.bf16.mxu1 %v12519_v40  ;;  %v20293_v28 = vld [vmem:[#allocation111_spill] sm:$0xff] }
 0x34a   : > { %20289 = vst [vmem:[#allocation23_spill] sm:$0xff] %v16439_v43  ;;  %3813 = vst.msk [vmem:[#allocation2 + $0x98] sm:$0xf] %vm1720_vm10, %v3729_v1  ;;  %3077 = vrot.lane.b32.xlu1 %v20290_v15, %s12917_s26  ;;  %v20292_v1 = vld [vmem:[#allocation49_spill] sm:$0xff]  ;;  %v20294_v15 = vld [vmem:[#allocation114_spill] sm:$0xff] }
 0x34b   : > { %v3205_v5 = vpop.permute.xlu0 %3204 }
 0x34c   : > { %3290 = vst.msk [vmem:[#allocation2 + $0x78] sm:$0xf] %vm1999_vm13, %v3205_v5 }
 0x34d   : > { %3746 = vrot.lane.b32.xlu0 %v20291_v21, %s12917_s26  ;;  %v3207_v45 = vpop.permute.xlu1 %3206 }
 0x34e   : > { %3291 = vst.msk [vmem:[#allocation2 + $0x94] sm:$0xf] %vm1999_vm13, %v3207_v45  ;;  %3748 = vrot.lane.b32.xlu1 %v20292_v1, %s12917_s26  ;;  %v20295_v45 = vld [vmem:[#allocation119_spill] sm:$0xff] }
 0x34f   : > { %v3865_v47 = vpop.permute.xlu0 %3864 }
 0x350   : > { %3950 = vst.msk [vmem:[#allocation2 + $0x7c] sm:$0xf] %vm1999_vm13, %v3865_v47  ;;  %6888 = vmatmul.mubr.bf16.gmra.mxu1 %v10963_v8  ;;  %v16463_v8 = vpop.f32.mrf.mxu1 }
 0x351   : > { %3224 = vrot.lane.b32.xlu0 %v20293_v28, %s12919_s28  ;;  %v3867_v40 = vpop.permute.xlu1 %3866  ;;  %20297 = vst [vmem:[#allocation13_spill] sm:$0xff] %v16463_v8 }
 0x352   : > { %3951 = vst.msk [vmem:[#allocation2 + $0x98] sm:$0xf] %vm1999_vm13, %v3867_v40  ;;  %3226 = vrot.lane.b32.xlu1 %v20294_v15, %s12919_s28 }
 0x353   : > { %v2922_v5 = vpop.permute.xlu0 %2921 }
 0x354   : > { %3005 = vst.msk [vmem:[#allocation2 + $0xb0] sm:$0xf] %vm1505_vm8, %v2922_v5 }
 0x355   : > { %3884 = vrot.lane.b32.xlu0 %v20295_v45, %s12919_s28  ;;  %v2924_v47 = vpop.permute.xlu1 %2923 }
 0x356   : > { %3006 = vst.msk [vmem:[#allocation2 + $0xcc] sm:$0xf] %vm1505_vm8, %v2924_v47  ;;  %3886 = vrot.lane.b32.xlu1 %v20296_v27, %s12919_s28  ;;  %v16471_v47 = vpop.f32.mrf.mxu1 }
 0x357   : > { %v3521_v10 = vpop.permute.xlu0 %3520  ;;  %v5613_v40 = vld [vmem:[#allocation2 + $0x78] sm:$0xff]  ;;  %20298 = vst [vmem:[#allocation14_spill] sm:$0xff] %v16471_v47 }
 0x358   : > { %3604 = vst.msk [vmem:[#allocation2 + $0xb4] sm:$0xf] %vm1505_vm8, %v3521_v10  ;;  %v20299_v10 = vld [vmem:[#allocation122_spill] sm:$0xff] }
 0x359   : > { %2941 = vrot.lane.b32.xlu0 %v20283_v38, %s12918_s27  ;;  %v3523_v28 = vpop.permute.xlu1 %3522  ;;  %v5617_v5 = vld [vmem:[#allocation2 + $0x94] sm:$0xff] }
 0x35a   : > { %v12521_v15 = vld [vmem:[#allocation2 + $0x7c] ss:$28 sps:$4 sm:$0xff]   ;;  %3605 = vst.msk [vmem:[#allocation2 + $0xd0] sm:$0xf] %vm1505_vm8, %v3523_v28  ;;  %v10970_v21 = vcombine.low %v5613_v40, %v5617_v5  ;;  %2943 = vrot.lane.b32.xlu1 %v20284_v62, %s12918_s27  ;;  %v20300_v28 = vld [vmem:[#allocation124_spill] sm:$0xff] }
 0x35b   : > { %v3060_v1 = vpop.permute.xlu0 %3059  ;;  %6895 = vmatprep.mubr.bf16.mxu1 %v12521_v15  ;;  %v16484_v40 = vld [vmem:[%s19501_s2] ss:$0 sm:$0xff] }
 0x35c   : > { %3143 = vst.msk [vmem:[#allocation2 + $0xb0] sm:$0xf] %vm1720_vm10, %v3060_v1  ;;  %6896 = vmatmul.mubr.bf16.gmra.mxu1 %v10970_v21  ;;  %v892_v1 = vpop.f32.mrf.mxu0 }
 0x35d   : > { %3540 = vrot.lane.b32.xlu0 %v20299_v10, %s12918_s27  ;;  %v3062_v38 = vpop.permute.xlu1 %3061  ;;  %v11614_v43 = vpop.f32.mrf.mxu1  ;;  %v893_v21 = vadd.f32 %v16484_v40, %v892_v1 }
 0x35e   : > { %3144 = vst.msk [vmem:[#allocation2 + $0xcc] sm:$0xf] %vm1720_vm10, %v3062_v38  ;;  %3542 = vrot.lane.b32.xlu1 %v20300_v28, %s12918_s27  ;;  %v894_v10 = vpop.f32.mrf.mxu0 }
 0x35f   : > { %v3731_v8 = vpop.permute.xlu0 %3730  ;;  %v11615_v62 = vpop.f32.mrf.mxu1  ;;  %v949_v38 = vmax.f32 %v893_v21, 0.0 }
 0x360   : > { %3814 = vst.msk [vmem:[#allocation2 + $0xb4] sm:$0xf] %vm1720_vm10, %v3731_v8  ;;  %v16487_v5 = vadd.f32 %v11615_v62, %v11614_v43 }
 0x361   : > { %3079 = vrot.lane.b32.xlu0 %v14499_v13, %s12917_s26  ;;  %v3733_v15 = vpop.permute.xlu1 %3732  ;;  %v895_v13 = vpop.f32.mrf.mxu0  ;;  %v16495_v28 = vpack.c.bf16 %v949_v38, %v949_v38 }
 0x362   : > { %20301 = vst [vmem:[#allocation18_spill] sm:$0xff] %v16487_v5  ;;  %3815 = vst.msk [vmem:[#allocation2 + $0xd0] sm:$0xf] %vm1720_vm10, %v3733_v15  ;;  %3081 = vrot.lane.b32.xlu1 %v14567_v2, %s12917_s26  ;;  %v896_v43 = vadd.f32 %v16484_v40, %v895_v13  ;;  %v20302_v2 = vld [vmem:[#allocation126_spill] sm:$0xff] }
 0x363   : > { %v3209_v8 = vpop.permute.xlu0 %3208  ;;  %v897_v62 = vpop.f32.mrf.mxu0  ;;  %4890 = vst.msk [vmem:[#allocation2 + $0x308] sm:$0xf] %vm1073_vm0, %v16495_v28  ;;  %v5525_v10 = vrot.slane %v16495_v28, 6 }
 0x364   : > { %3292 = vst.msk [vmem:[#allocation2 + $0xb0] sm:$0xf] %vm1999_vm13, %v3209_v8  ;;  %v950_v21 = vmax.f32 %v896_v43, 0.0  ;;  %v20304_v43 = vld [vmem:[#allocation128_spill] sm:$0xff] }
 0x365   : > { %3750 = vrot.lane.b32.xlu0 %v14012_v23, %s12917_s26  ;;  %v3211_v1 = vpop.permute.xlu1 %3210  ;;  %v5527_v38 = vrot.slane %v5525_v10, 4 }
 0x366   : > { %3293 = vst.msk [vmem:[#allocation2 + $0xcc] sm:$0xf] %vm1999_vm13, %v3211_v1  ;;  %3752 = vrot.lane.b32.xlu1 %v14218_v57, %s12917_s26  ;;  %v16507_v8 = vpack.c.bf16 %v950_v21, %v950_v21 }
 0x367   : > { %v3869_v15 = vpop.permute.xlu0 %3868 }
 0x368   : > { %3952 = vst.msk [vmem:[#allocation2 + $0xb4] sm:$0xf] %vm1999_vm13, %v3869_v15  ;;  %20303 = vst [vmem:[#allocation64_spill] sm:$0xff] %v16507_v8  ;;  %v5528_v62 = vrot.slane %v16507_v8, 6  ;;  %v20305_v15 = vld [vmem:[#allocation136_spill] sm:$0xff] }
 0x369   : > { %3228 = vrot.lane.b32.xlu0 %v20302_v2, %s12919_s28  ;;  %v3871_v13 = vpop.permute.xlu1 %3870  ;;  %4891 = vst.msk [vmem:[#allocation2 + $0x324] sm:$0xf] %vm1073_vm0, %v16507_v8  ;;  %v20306_v8 = vld [vmem:[#allocation137_spill] sm:$0xff] }
 0x36a   : > { %3953 = vst.msk [vmem:[#allocation2 + $0xd0] sm:$0xf] %vm1999_vm13, %v3871_v13  ;;  %3230 = vrot.lane.b32.xlu1 %v20304_v43, %s12919_s28  ;;  %v5529_v21 = vsel %vm13183_vm12, %v5527_v38, %v5528_v62 }
 0x36b   : > { %v2926_v1 = vpop.permute.xlu0 %2925  ;;  %5593 = vst.msk [vmem:[#allocation2 + $0x30c] sm:$0xf] %vm1073_vm0, %v5529_v21 }
 0x36c   : > { %3007 = vst.msk [vmem:[#allocation2 + $0xe8] sm:$0xf] %vm1505_vm8, %v2926_v1  ;;  %v16525_v1 = vpop.f32.mrf.mxu1 }
 0x36d   : > { %3888 = vrot.lane.b32.xlu0 %v20305_v15, %s12919_s28  ;;  %v2928_v2 = vpop.permute.xlu1 %2927  ;;  %20307 = vst [vmem:[#allocation65_spill] sm:$0xff] %v16525_v1 }
 0x36e   : > { %3008 = vst.msk [vmem:[#allocation2 + $0x104] sm:$0xf] %vm1505_vm8, %v2928_v2  ;;  %3890 = vrot.lane.b32.xlu1 %v20306_v8, %s12919_s28  ;;  %v20308_v2 = vrot.slane %v15646_v49, 6  ;;  %v16535_v1 = vpop.f32.mrf.mxu1 }
 0x36f   : > { %v3525_v13 = vpop.permute.xlu0 %3524  ;;  %v5621_v57 = vld [vmem:[#allocation2 + $0xb0] sm:$0xff] }
 0x370   : > { %3606 = vst.msk [vmem:[#allocation2 + $0xec] sm:$0xf] %vm1505_vm8, %v3525_v13  ;;  %v5524_v13 = vrot.slane %v20308_v2, 4 }
 0x371   : > { %2945 = vrot.lane.b32.xlu0 %v20295_v45, %s12918_s27  ;;  %v3527_v43 = vpop.permute.xlu1 %3526  ;;  %v5625_v23 = vld [vmem:[#allocation2 + $0xcc] sm:$0xff]  ;;  %v20309_v45 = vld [vmem:[#allocation138_spill] sm:$0xff] }
 0x372   : > { %v12523_v38 = vld [vmem:[#allocation2 + $0xb4] ss:$28 sps:$4 sm:$0xff]   ;;  %3607 = vst.msk [vmem:[#allocation2 + $0x108] sm:$0xf] %vm1505_vm8, %v3527_v43  ;;  %v10977_v5 = vcombine.low %v5621_v57, %v5625_v23  ;;  %2947 = vrot.lane.b32.xlu1 %v20296_v27, %s12918_s27  ;;  %v5526_v43 = vsel %vm13183_vm12, %v5524_v13, %v5525_v10 }
 0x373   : > { %v3064_v21 = vpop.permute.xlu0 %3063  ;;  %6903 = vmatprep.mubr.bf16.mxu1 %v12523_v38  ;;  %5592 = vst.msk [vmem:[#allocation2 + $0x2f0] sm:$0xf] %vm1073_vm0, %v5526_v43  ;;  %v20310_v27 = vld [vmem:[#allocation140_spill] sm:$0xff]  ;;  %v5530_v43 = vrot.slane %v5528_v62, 4  ;;  %v20313_v62 = vld [vmem:[#allocation142_spill] sm:$0xff] }
 0x374   : > { %3145 = vst.msk [vmem:[#allocation2 + $0xe8] sm:$0xf] %vm1720_vm10, %v3064_v21  ;;  %6904 = vmatmul.mubr.bf16.gmra.mxu1 %v10977_v5  ;;  %v900_v5 = vpop.f32.mrf.mxu0 }
 0x375   : > { %3544 = vrot.lane.b32.xlu0 %v20309_v45, %s12918_s27  ;;  %v3066_v47 = vpop.permute.xlu1 %3065  ;;  %v11620_v57 = vpop.f32.mrf.mxu1  ;;  %v901_v10 = vadd.f32 %v16484_v40, %v900_v5  ;;  %v20312_v5 = vld [vmem:[#allocation88_spill] sm:$0xff] }
 0x376   : > { %3146 = vst.msk [vmem:[#allocation2 + $0x104] sm:$0xf] %vm1720_vm10, %v3066_v47  ;;  %3546 = vrot.lane.b32.xlu1 %v20310_v27, %s12918_s27  ;;  %v902_v45 = vpop.f32.mrf.mxu0 }
 0x377   : > { %v3735_v23 = vpop.permute.xlu0 %3734  ;;  %v11621_v38 = vpop.f32.mrf.mxu1  ;;  %v951_v13 = vmax.f32 %v901_v10, 0.0 }
 0x378   : > { %3816 = vst.msk [vmem:[#allocation2 + $0xec] sm:$0xf] %vm1720_vm10, %v3735_v23  ;;  %v16548_v21 = vadd.f32 %v11621_v38, %v11620_v57  ;;  %v903_v57 = vpop.f32.mrf.mxu0 }
 0x379   : > { %3083 = vrot.lane.b32.xlu0 %v14788_v17, %s12917_s26  ;;  %v3737_v2 = vpop.permute.xlu1 %3736  ;;  %v16557_v23 = vpack.c.bf16 %v951_v13, %v951_v13  ;;  %v904_v38 = vadd.f32 %v16484_v40, %v903_v57  ;;  %v20315_v57 = vld [vmem:[#allocation145_spill] sm:$0xff] }
 0x37a   : > { %3817 = vst.msk [vmem:[#allocation2 + $0x108] sm:$0xf] %vm1720_vm10, %v3737_v2  ;;  %3085 = vrot.lane.b32.xlu1 %v14840_v18, %s12917_s26  ;;  %v905_v2 = vpop.f32.mrf.mxu0 }
 0x37b   : > { %v3213_v47 = vpop.permute.xlu0 %3212  ;;  %20311 = vst [vmem:[#allocation67_spill] sm:$0xff] %v16557_v23  ;;  %v5531_v18 = vrot.slane %v16557_v23, 6  ;;  %4892 = vst.msk [vmem:[#allocation2 + $0x340] sm:$0xf] %vm1073_vm0, %v16557_v23  ;;  %v952_v10 = vmax.f32 %v904_v38, 0.0 }
 0x37c   : > { %3294 = vst.msk [vmem:[#allocation2 + $0xe8] sm:$0xf] %vm1999_vm13, %v3213_v47 }
 0x37d   : > { %3754 = vrot.lane.b32.xlu0 %v14261_v61, %s12917_s26  ;;  %v3215_v17 = vpop.permute.xlu1 %3214  ;;  %v5532_v13 = vsel %vm13183_vm12, %v5530_v43, %v5531_v18  ;;  %v5533_v45 = vrot.slane %v5531_v18, 4 }
 0x37e   : > { %3295 = vst.msk [vmem:[#allocation2 + $0x104] sm:$0xf] %vm1999_vm13, %v3215_v17  ;;  %3756 = vrot.lane.b32.xlu1 %v20312_v5, %s12917_s26  ;;  %v16573_v17 = vpack.c.bf16 %v952_v10, %v952_v10  ;;  %v16588_v10 = vpop.f32.mrf.mxu1 }
 0x37f   : > { %v3873_v27 = vpop.permute.xlu0 %3872  ;;  %5594 = vst.msk [vmem:[#allocation2 + $0x328] sm:$0xf] %vm1073_vm0, %v5532_v13 }
 0x380   : > { %3954 = vst.msk [vmem:[#allocation2 + $0xec] sm:$0xf] %vm1999_vm13, %v3873_v27  ;;  %20314 = vst [vmem:[#allocation68_spill] sm:$0xff] %v16573_v17  ;;  %v20316_v27 = vld [vmem:[#allocation149_spill] sm:$0xff]  ;;  %v5534_v38 = vrot.slane %v16573_v17, 6 }
 0x381   : > { %3232 = vrot.lane.b32.xlu0 %v20313_v62, %s12919_s28  ;;  %v3875_v47 = vpop.permute.xlu1 %3874  ;;  %v20317_v62 = vld [vmem:[#allocation151_spill] sm:$0xff] }
 0x382   : > { %3955 = vst.msk [vmem:[#allocation2 + $0x108] sm:$0xf] %vm1999_vm13, %v3875_v47  ;;  %3234 = vrot.lane.b32.xlu1 %v20315_v57, %s12919_s28  ;;  %v5535_v18 = vsel %vm13183_vm12, %v5533_v45, %v5534_v38  ;;  %v16596_v38 = vpop.f32.mrf.mxu1 }
 0x383   : > { %v2930_v40 = vpop.permute.xlu0 %2929  ;;  %5595 = vst.msk [vmem:[#allocation2 + $0x344] sm:$0xf] %vm1073_vm0, %v5535_v18 }
 0x384   : > { %3009 = vst.msk [vmem:[#allocation2 + $0x120] sm:$0xf] %vm1505_vm8, %v2930_v40 }
 0x385   : > { %3892 = vrot.lane.b32.xlu0 %v20316_v27, %s12919_s28  ;;  %v2932_v2 = vpop.permute.xlu1 %2931 }
 0x386   : > { %3010 = vst.msk [vmem:[#allocation2 + $0x13c] sm:$0xf] %vm1505_vm8, %v2932_v2  ;;  %3894 = vrot.lane.b32.xlu1 %v20317_v62, %s12919_s28 }
 0x387   : > { %v3529_v43 = vpop.permute.xlu0 %3528  ;;  %v5629_v47 = vld [vmem:[#allocation2 + $0xe8] sm:$0xff] }
 0x388   : > { %3608 = vst.msk [vmem:[#allocation2 + $0x124] sm:$0xf] %vm1505_vm8, %v3529_v43  ;;  %v20318_v43 = vld [vmem:[#allocation152_spill] sm:$0xff] }
 0x389   : > { %2949 = vrot.lane.b32.xlu0 %v20305_v15, %s12918_s27  ;;  %v3531_v13 = vpop.permute.xlu1 %3530  ;;  %v5633_v40 = vld [vmem:[#allocation2 + $0x104] sm:$0xff] }
 0x38a   : > { %v12525_v57 = vld [vmem:[#allocation2 + $0xec] ss:$28 sps:$4 sm:$0xff]   ;;  %3609 = vst.msk [vmem:[#allocation2 + $0x140] sm:$0xf] %vm1505_vm8, %v3531_v13  ;;  %v10984_v45 = vcombine.low %v5629_v47, %v5633_v40  ;;  %2951 = vrot.lane.b32.xlu1 %v20306_v8, %s12918_s27 }
 0x38b   : > { %v3068_v2 = vpop.permute.xlu0 %3067  ;;  %6911 = vmatprep.mubr.bf16.mxu1 %v12525_v57  ;;  %v20319_v47 = vld [vmem:[#allocation155_spill] sm:$0xff] }
 0x38c   : > { %3147 = vst.msk [vmem:[#allocation2 + $0x120] sm:$0xf] %vm1720_vm10, %v3068_v2  ;;  %6912 = vmatmul.mubr.bf16.gmra.mxu1 %v10984_v45  ;;  %v20321_v2 = vld [vmem:[#allocation92_spill] sm:$0xff] }
 0x38d   : > { %3548 = vrot.lane.b32.xlu0 %v20318_v43, %s12918_s27  ;;  %v3070_v15 = vpop.permute.xlu1 %3069 }
 0x38e   : > { %3148 = vst.msk [vmem:[#allocation2 + $0x13c] sm:$0xf] %vm1720_vm10, %v3070_v15  ;;  %v11626_v48 = vpop.f32.mrf.mxu1  ;;  %3550 = vrot.lane.b32.xlu1 %v20319_v47, %s12918_s27  ;;  %v20325_v47 = vld [vmem:[#allocation159_spill] sm:$0xff] }
 0x38f   : > { %v3739_v18 = vpop.permute.xlu0 %3738 }
 0x390   : > { %3818 = vst.msk [vmem:[#allocation2 + $0x124] sm:$0xf] %vm1720_vm10, %v3739_v18  ;;  %v11627_v8 = vpop.f32.mrf.mxu1 }
 0x391   : > { %3087 = vrot.lane.b32.xlu0 %v20201_v56, %s12917_s26  ;;  %v16606_v13 = vadd.f32 %v11627_v8, %v11626_v48  ;;  %v3741_v40 = vpop.permute.xlu1 %3740  ;;  %v20322_v48 = vld [vmem:[#allocation109_spill] sm:$0xff]  ;;  %v20323_v56 = vld [vmem:[#allocation156_spill] sm:$0xff] }
 0x392   : > { %3819 = vst.msk [vmem:[#allocation2 + $0x140] sm:$0xf] %vm1720_vm10, %v3741_v40  ;;  %3089 = vrot.lane.b32.xlu1 %v20203_v63, %s12917_s26  ;;  %v20324_v63 = vld [vmem:[#allocation157_spill] sm:$0xff] }
 0x393   : > { %20320 = vst [vmem:[#allocation69_spill] sm:$0xff] %v16606_v13  ;;  %v3217_v57 = vpop.permute.xlu0 %3216 }
 0x394   : > { %3296 = vst.msk [vmem:[#allocation2 + $0x120] sm:$0xf] %vm1999_vm13, %v3217_v57  ;;  %v20326_v57 = vld [vmem:[#allocation162_spill] sm:$0xff] }
 0x395   : > { %3758 = vrot.lane.b32.xlu0 %v20321_v2, %s12917_s26  ;;  %v3219_v45 = vpop.permute.xlu1 %3218 }
 0x396   : > { %3297 = vst.msk [vmem:[#allocation2 + $0x13c] sm:$0xf] %vm1999_vm13, %v3219_v45  ;;  %3760 = vrot.lane.b32.xlu1 %v20322_v48, %s12917_s26  ;;  %v16630_v45 = vpop.f32.mrf.mxu1 }
 0x397   : > { %v3877_v43 = vpop.permute.xlu0 %3876  ;;  %20327 = vst [vmem:[#allocation27_spill] sm:$0xff] %v16630_v45 }
 0x398   : > { %3956 = vst.msk [vmem:[#allocation2 + $0x124] sm:$0xf] %vm1999_vm13, %v3877_v43 }
 0x399   : > { %3236 = vrot.lane.b32.xlu0 %v20323_v56, %s12919_s28  ;;  %v3879_v15 = vpop.permute.xlu1 %3878 }
 0x39a   : > { %3957 = vst.msk [vmem:[#allocation2 + $0x140] sm:$0xf] %vm1999_vm13, %v3879_v15  ;;  %3238 = vrot.lane.b32.xlu1 %v20324_v63, %s12919_s28 }
 0x39b   : > { %v2934_v18 = vpop.permute.xlu0 %2933 }
 0x39c   : > { %3011 = vst.msk [vmem:[#allocation2 + $0x158] sm:$0xf] %vm1505_vm8, %v2934_v18 }
 0x39d   : > { %3896 = vrot.lane.b32.xlu0 %v20325_v47, %s12919_s28  ;;  %v2936_v8 = vpop.permute.xlu1 %2935 }
 0x39e   : > { %3012 = vst.msk [vmem:[#allocation2 + $0x174] sm:$0xf] %vm1505_vm8, %v2936_v8  ;;  %3898 = vrot.lane.b32.xlu1 %v20326_v57, %s12919_s28  ;;  %v16638_v8 = vpop.f32.mrf.mxu1 }
 0x39f   : > { %v3533_v40 = vpop.permute.xlu0 %3532  ;;  %v5637_v56 = vld [vmem:[#allocation2 + $0x120] sm:$0xff]  ;;  %20328 = vst [vmem:[#allocation28_spill] sm:$0xff] %v16638_v8 }
 0x3a0   : > { %3610 = vst.msk [vmem:[#allocation2 + $0x15c] sm:$0xf] %vm1505_vm8, %v3533_v40  ;;  %v20329_v40 = vld [vmem:[#allocation164_spill] sm:$0xff] }
 0x3a1   : > { %2953 = vrot.lane.b32.xlu0 %v20316_v27, %s12918_s27  ;;  %v3535_v43 = vpop.permute.xlu1 %3534  ;;  %v5641_v15 = vld [vmem:[#allocation2 + $0x13c] sm:$0xff] }
 0x3a2   : > { %v12527_v18 = vld [vmem:[#allocation2 + $0x124] ss:$28 sps:$4 sm:$0xff]   ;;  %3611 = vst.msk [vmem:[#allocation2 + $0x178] sm:$0xf] %vm1505_vm8, %v3535_v43  ;;  %v10991_v17 = vcombine.low %v5637_v56, %v5641_v15  ;;  %2955 = vrot.lane.b32.xlu1 %v20317_v62, %s12918_s27 }
 0x3a3   : > { %v3072_v63 = vpop.permute.xlu0 %3071  ;;  %6919 = vmatprep.mubr.bf16.mxu1 %v12527_v18  ;;  %v20330_v43 = vld [vmem:[#allocation167_spill] sm:$0xff] }
 0x3a4   : > { %3149 = vst.msk [vmem:[#allocation2 + $0x158] sm:$0xf] %vm1720_vm10, %v3072_v63  ;;  %6920 = vmatmul.mubr.bf16.gmra.mxu1 %v10991_v17 }
 0x3a5   : > { %3552 = vrot.lane.b32.xlu0 %v20329_v40, %s12918_s27  ;;  %v3074_v27 = vpop.permute.xlu1 %3073  ;;  %v20334_v40 = vld [vmem:[#allocation174_spill] sm:$0xff] }
 0x3a6   : > { %3150 = vst.msk [vmem:[#allocation2 + $0x174] sm:$0xf] %vm1720_vm10, %v3074_v27  ;;  %v11632_v48 = vpop.f32.mrf.mxu1  ;;  %3554 = vrot.lane.b32.xlu1 %v20330_v43, %s12918_s27 }
 0x3a7   : > { %v3743_v23 = vpop.permute.xlu0 %3742 }
 0x3a8   : > { %3820 = vst.msk [vmem:[#allocation2 + $0x15c] sm:$0xf] %vm1720_vm10, %v3743_v23  ;;  %v11633_v62 = vpop.f32.mrf.mxu1 }
 0x3a9   : > { %3091 = vrot.lane.b32.xlu0 %v20208_v31, %s12917_s26  ;;  %v16648_v56 = vadd.f32 %v11633_v62, %v11632_v48  ;;  %v3745_v15 = vpop.permute.xlu1 %3744  ;;  %v20332_v31 = vld [vmem:[#allocation168_spill] sm:$0xff] }
 0x3aa   : > { %3821 = vst.msk [vmem:[#allocation2 + $0x178] sm:$0xf] %vm1720_vm10, %v3745_v15  ;;  %3093 = vrot.lane.b32.xlu1 %v20211_v44, %s12917_s26  ;;  %v20333_v44 = vld [vmem:[#allocation171_spill] sm:$0xff]  ;;  %v20335_v62 = vld [vmem:[#allocation176_spill] sm:$0xff]  ;;  %v16672_v15 = vpop.f32.mrf.mxu1 }
 0x3ab   : > { %20331 = vst [vmem:[#allocation15_spill] sm:$0xff] %v16648_v56  ;;  %v3221_v17 = vpop.permute.xlu0 %3220  ;;  %20336 = vst [vmem:[#allocation19_spill] sm:$0xff] %v16672_v15 }
 0x3ac   : > { %3298 = vst.msk [vmem:[#allocation2 + $0x158] sm:$0xf] %vm1999_vm13, %v3221_v17 }
 0x3ad   : > { %3762 = vrot.lane.b32.xlu0 %v14792_v12, %s12917_s26  ;;  %v3223_v23 = vpop.permute.xlu1 %3222  ;;  %v20346_v12 = vld [vmem:[#allocation187_spill] sm:$0xff] }
 0x3ae   : > { %3299 = vst.msk [vmem:[#allocation2 + $0x174] sm:$0xf] %vm1999_vm13, %v3223_v23  ;;  %3764 = vrot.lane.b32.xlu1 %v15022_v0, %s12917_s26 }
 0x3af   : > { %v3881_v18 = vpop.permute.xlu0 %3880 }
 0x3b0   : > { %3958 = vst.msk [vmem:[#allocation2 + $0x15c] sm:$0xf] %vm1999_vm13, %v3881_v18 }
 0x3b1   : > { %3240 = vrot.lane.b32.xlu0 %v20332_v31, %s12919_s28  ;;  %v3883_v48 = vpop.permute.xlu1 %3882 }
 0x3b2   : > { %3959 = vst.msk [vmem:[#allocation2 + $0x178] sm:$0xf] %vm1999_vm13, %v3883_v48  ;;  %3242 = vrot.lane.b32.xlu1 %v20333_v44, %s12919_s28  ;;  %v16680_v44 = vpop.f32.mrf.mxu1 }
 0x3b3   : > { %v2938_v63 = vpop.permute.xlu0 %2937  ;;  %20337 = vst [vmem:[#allocation73_spill] sm:$0xff] %v16680_v44 }
 0x3b4   : > { %3013 = vst.msk [vmem:[#allocation2 + $0x190] sm:$0xf] %vm1505_vm8, %v2938_v63 }
 0x3b5   : > { %3900 = vrot.lane.b32.xlu0 %v20334_v40, %s12919_s28  ;;  %v2940_v27 = vpop.permute.xlu1 %2939 }
 0x3b6   : > { %3014 = vst.msk [vmem:[#allocation2 + $0x1ac] sm:$0xf] %vm1505_vm8, %v2940_v27  ;;  %3902 = vrot.lane.b32.xlu1 %v20335_v62, %s12919_s28  ;;  %v20338_v27 = vld [vmem:[#allocation177_spill] sm:$0xff] }
 0x3b7   : > { %v3537_v43 = vpop.permute.xlu0 %3536  ;;  %v5645_v23 = vld [vmem:[#allocation2 + $0x158] sm:$0xff] }
 0x3b8   : > { %3612 = vst.msk [vmem:[#allocation2 + $0x194] sm:$0xf] %vm1505_vm8, %v3537_v43 }
 0x3b9   : > { %2957 = vrot.lane.b32.xlu0 %v20325_v47, %s12918_s27  ;;  %v3539_v17 = vpop.permute.xlu1 %3538  ;;  %v5649_v18 = vld [vmem:[#allocation2 + $0x174] sm:$0xff] }
 0x3ba   : > { %v12529_v31 = vld [vmem:[#allocation2 + $0x15c] ss:$28 sps:$4 sm:$0xff]   ;;  %3613 = vst.msk [vmem:[#allocation2 + $0x1b0] sm:$0xf] %vm1505_vm8, %v3539_v17  ;;  %v10998_v63 = vcombine.low %v5645_v23, %v5649_v18  ;;  %2959 = vrot.lane.b32.xlu1 %v20326_v57, %s12918_s27 }
 0x3bb   : > { %v3076_v48 = vpop.permute.xlu0 %3075  ;;  %6927 = vmatprep.mubr.bf16.mxu1 %v12529_v31  ;;  %v20339_v17 = vld [vmem:[#allocation178_spill] sm:$0xff] }
 0x3bc   : > { %3151 = vst.msk [vmem:[#allocation2 + $0x190] sm:$0xf] %vm1720_vm10, %v3076_v48  ;;  %6928 = vmatmul.mubr.bf16.gmra.mxu1 %v10998_v63 }
 0x3bd   : > { %3556 = vrot.lane.b32.xlu0 %v20338_v27, %s12918_s27  ;;  %v3078_v47 = vpop.permute.xlu1 %3077  ;;  %v3986_v27 = vshrl.u32 %v15646_v49, 16 }
 0x3be   : > { %3152 = vst.msk [vmem:[#allocation2 + $0x1ac] sm:$0xf] %vm1720_vm10, %v3078_v47  ;;  %v11638_v0 = vpop.f32.mrf.mxu1  ;;  %3558 = vrot.lane.b32.xlu1 %v20339_v17, %s12918_s27  ;;  %v20342_v17 = vrot.slane %v15894_v22, 5  ;;  %v16719_v22 = vshll.u32 %v16495_v28, 16 }
 0x3bf   : > { %v3747_v43 = vpop.permute.xlu0 %3746 }
 0x3c0   : > { %3822 = vst.msk [vmem:[#allocation2 + $0x194] sm:$0xf] %vm1720_vm10, %v3747_v43  ;;  %v11639_v57 = vpop.f32.mrf.mxu1  ;;  %v3989_v43 = vshll.u32 %v15646_v49, 16 }
 0x3c1   : > { %3095 = vrot.lane.b32.xlu0 %v15368_v4, %s12917_s26  ;;  %v16690_v23 = vadd.f32 %v11639_v57, %v11638_v0  ;;  %v3749_v18 = vpop.permute.xlu1 %3748  ;;  %v20341_v0 = vld [vmem:[#allocation179_spill] sm:$0xff]  ;;  %v4468_v4 = vrot.slane %v15880_v53, 4 }
 0x3c2   : > { %3823 = vst.msk [vmem:[#allocation2 + $0x1b0] sm:$0xf] %vm1720_vm10, %v3749_v18  ;;  %3097 = vrot.lane.b32.xlu1 %v15544_v30, %s12917_s26  ;;  %v20343_v18 = vld [vmem:[#allocation180_spill] sm:$0xff]  ;;  %v16734_v2 = vpop.f32.mrf.mxu1 }
 0x3c3   : > { %20340 = vst [vmem:[#allocation75_spill] sm:$0xff] %v16690_v23  ;;  %v3225_v31 = vpop.permute.xlu0 %3224  ;;  %v4469_v57 = vor.u32 %v4468_v4, %v20342_v17  ;;  %v5300_v23 = vrot.slane %v3989_v43, 6  ;;  %v4478_v4 = vrot.slane %v3986_v27, 4  ;;  %20348 = vst [vmem:[#allocation78_spill] sm:$0xff] %v16734_v2 }
 0x3c4   : > { %3300 = vst.msk [vmem:[#allocation2 + $0x190] sm:$0xf] %vm1999_vm13, %v3225_v31  ;;  %v16714_v31 = vshrl.u32 %v16495_v28, 16 }
 0x3c5   : > { %3766 = vrot.lane.b32.xlu0 %v15058_v7, %s12917_s26  ;;  %v3227_v48 = vpop.permute.xlu1 %3226 }
 0x3c6   : > { %3301 = vst.msk [vmem:[#allocation2 + $0x1ac] sm:$0xf] %vm1999_vm13, %v3227_v48  ;;  %3768 = vrot.lane.b32.xlu1 %v15499_v55, %s12917_s26  ;;  %v20344_v48 = vld [vmem:[#allocation186_spill] sm:$0xff]  ;;  %v3988_v55 = vrot.slane %v3986_v27, 7  ;;  %v3997_v5 = vrot.slane %v16714_v31, 7 }
 0x3c7   : > { %v3885_v63 = vpop.permute.xlu0 %3884 }
 0x3c8   : > { %3960 = vst.msk [vmem:[#allocation2 + $0x194] sm:$0xf] %vm1999_vm13, %v3885_v63  ;;  %v4470_v63 = vrot.slane %v4469_v57, 4  ;;  %v5304_v57 = vrot.slane %v16714_v31, 5  ;;  %v3993_v13 = vrot.slane %v3988_v55, 4 }
 0x3c9   : > { %3244 = vrot.lane.b32.xlu0 %v20341_v0, %s12919_s28  ;;  %v3887_v30 = vpop.permute.xlu1 %3886  ;;  %v4474_v0 = vrot.slane %v3989_v43, 5 }
 0x3ca   : > { %3961 = vst.msk [vmem:[#allocation2 + $0x1b0] sm:$0xf] %vm1999_vm13, %v3887_v30  ;;  %3246 = vrot.lane.b32.xlu1 %v20343_v18, %s12919_s28  ;;  %v5299_v30 = vrot.slane %v3986_v27, 5  ;;  %v5298_v18 = vrot.slane %v16049_v36, 4  ;;  %v5305_v27 = vrot.slane %v16719_v22, 6 }
 0x3cb   : > { %v2942_v47 = vpop.permute.xlu0 %2941  ;;  %v16724_v17 = vsel %vm13140_vm9, %v4470_v63, %v4474_v0  ;;  %v4479_v15 = vor.u32 %v4478_v4, %v4474_v0  ;;  %v4484_v63 = vrot.slane %v16719_v22, 5 }
 0x3cc   : > { %3015 = vst.msk [vmem:[#allocation2 + $0x1c8] sm:$0xf] %vm1505_vm8, %v2942_v47  ;;  %20345 = vst [vmem:[#allocation76_spill] sm:$0xff] %v16724_v17  ;;  %v5301_v44 = vor.u32 %v5300_v23, %v5299_v30  ;;  %v3991_v17 = vor.u32 %v3989_v43, %v3988_v55  ;;  %v12543_v23 = vld [vmem:[%s19502_s3 + $0x178] sm:$0xff]   ;;  %v16746_v4 = vor.u32 %v5305_v27, %v5304_v57  ;;  %v16768_v55 = vpop.f32.mrf.mxu1 }
 0x3cd   : > { %3904 = vrot.lane.b32.xlu0 %v20344_v48, %s12919_s28  ;;  %v2944_v7 = vpop.permute.xlu1 %2943  ;;  %v4480_v0 = vrot.slane %v4479_v15, 4  ;;  %v12544_v43 = vld [vmem:[%s19502_s3 + $0x138] sm:$0xff]   ;;  %11768 = vmatprep.subr.bf16.mxu0 %v12543_v23 }
 0x3ce   : > { %3016 = vst.msk [vmem:[#allocation2 + $0x1e4] sm:$0xf] %vm1505_vm8, %v2944_v7  ;;  %3906 = vrot.lane.b32.xlu1 %v20346_v12, %s12919_s28  ;;  %v20347_v7 = vrot.slane %v15880_v53, 7  ;;  %v16744_v53 = vsel %vm13161_vm11, %v5298_v18, %v5301_v44  ;;  %v5303_v30 = vrot.slane %v5301_v44, 4  ;;  %11769 = vmatpush3.bf16.msra.mxu0 %v12544_v43 }
 0x3cf   : > { %v3541_v47 = vpop.permute.xlu0 %3540  ;;  %v5653_v36 = vld [vmem:[#allocation2 + $0x190] sm:$0xff]  ;;  %v16760_v15 = vsel %vm13140_vm9, %v4480_v0, %v4484_v63 }
 0x3d0   : > { %3614 = vst.msk [vmem:[#allocation2 + $0x1cc] sm:$0xf] %vm1505_vm8, %v3541_v47  ;;  %v3984_v56 = vrot.slane %v20347_v7, 4  ;;  %v20352_v0 = vld [vmem:[#allocation193_spill] sm:$0xff] }
 0x3d1   : > { %2961 = vrot.lane.b32.xlu0 %v20334_v40, %s12918_s27  ;;  %v3543_v47 = vpop.permute.xlu1 %3542  ;;  %v5657_v8 = vld [vmem:[#allocation2 + $0x1ac] sm:$0xff] }
 0x3d2   : > { %v12531_v45 = vld [vmem:[#allocation2 + $0x194] ss:$28 sps:$4 sm:$0xff]   ;;  %3615 = vst.msk [vmem:[#allocation2 + $0x1e8] sm:$0xf] %vm1505_vm8, %v3543_v47  ;;  %v11005_v7 = vcombine.low %v5653_v36, %v5657_v8  ;;  %v3992_v2 = vsel %vm13539_vm7, %v3984_v56, %v3991_v17  ;;  %2963 = vrot.lane.b32.xlu1 %v20335_v62, %s12918_s27  ;;  %v16765_v8 = vsel %vm13161_vm11, %v5303_v30, %v16746_v4  ;;  %v4488_v36 = vrot.slane %v16714_v31, 4 }
 0x3d3   : > { %v3080_v40 = vpop.permute.xlu0 %3079  ;;  %6935 = vmatprep.mubr.bf16.mxu1 %v12531_v45  ;;  %4060 = vst.msk [vmem:[#allocation2 + $0x320] sm:$0xf] %vm1073_vm0, %v3992_v2  ;;  %v20349_v56 = vld [vmem:[#allocation188_spill] sm:$0xff]  ;;  %v4000_v62 = vor.u32 %v16719_v22, %v3997_v5  ;;  %v20350_v2 = vld [vmem:[#allocation189_spill] sm:$0xff] }
 0x3d4   : > { %3153 = vst.msk [vmem:[#allocation2 + $0x1c8] sm:$0xf] %vm1720_vm10, %v3080_v40  ;;  %6936 = vmatmul.mubr.bf16.gmra.mxu1 %v11005_v7  ;;  %v16798_v23 = vor.u32 %v4488_v36, %v4484_v63  ;;  %v20353_v30 = vld [vmem:[#allocation196_spill] sm:$0xff] }
 0x3d5   : > { %3560 = vrot.lane.b32.xlu0 %v20349_v56, %s12918_s27  ;;  %v3082_v45 = vpop.permute.xlu1 %3081  ;;  %v4001_v18 = vsel %vm13539_vm7, %v3993_v13, %v4000_v62  ;;  %v12548_v40 = vld [vmem:[%s19502_s3 + $0x170] sm:$0xff]  }
 0x3d6   : > { %3154 = vst.msk [vmem:[#allocation2 + $0x1e4] sm:$0xf] %vm1720_vm10, %v3082_v45  ;;  %v11644_v17 = vpop.f32.mrf.mxu1  ;;  %3562 = vrot.lane.b32.xlu1 %v20350_v2, %s12918_s27  ;;  %11770 = vmatprep.subr.bf16.mxu0 %v12548_v40  ;;  %v12549_v63 = vld [vmem:[%s19502_s3 + $0x130] sm:$0xff]  }
 0x3d7   : > { %v3751_v44 = vpop.permute.xlu0 %3750  ;;  %4061 = vst.msk [vmem:[#allocation2 + $0x33c] sm:$0xf] %vm1073_vm0, %v4001_v18  ;;  %11771 = vmatpush3.bf16.msra.mxu0 %v12549_v63  ;;  %v3854_v63 = vrot.slane %v16495_v28, 7  ;;  %vm12921_vm0 = vmmov 0  }
 0x3d8   : > { %3824 = vst.msk [vmem:[#allocation2 + $0x1cc] sm:$0xf] %vm1720_vm10, %v3751_v44  ;;  %v11645_v5 = vpop.f32.mrf.mxu1 }
 0x3d9   : > { %3099 = vrot.lane.b32.xlu0 %v15588_v46, %s12917_s26  ;;  %v16782_v22 = vadd.f32 %v11645_v5, %v11644_v17  ;;  %v3753_v57 = vpop.permute.xlu1 %3752  ;;  %v20351_v46 = vld [vmem:[#allocation190_spill] sm:$0xff] }
 0x3da   : > { %3825 = vst.msk [vmem:[#allocation2 + $0x1e8] sm:$0xf] %vm1720_vm10, %v3753_v57  ;;  %3101 = vrot.lane.b32.xlu1 %v15611_v35, %s12917_s26  ;;  %v16809_v43 = vpop.f32.mrf.mxu1 }
 0x3db   : > { %v3229_v27 = vpop.permute.xlu0 %3228 }
 0x3dc   : > { %3302 = vst.msk [vmem:[#allocation2 + $0x1c8] sm:$0xf] %vm1999_vm13, %v3229_v27  ;;  %v16820_v2 = vpop.f32.mrf.mxu1  ;;  %v20354_v27 = vld [vmem:[#allocation192_spill] sm:$0xff] }
 0x3dd   : > { %3770 = vrot.lane.b32.xlu0 %v15539_v37, %s12917_s26  ;;  %v3231_v58 = vpop.permute.xlu1 %3230 }
 0x3de   : > { %3303 = vst.msk [vmem:[#allocation2 + $0x1e4] sm:$0xf] %vm1999_vm13, %v3231_v58  ;;  %3772 = vrot.lane.b32.xlu1 %v15574_v29, %s12917_s26 }
 0x3df   : > { %v3889_v13 = vpop.permute.xlu0 %3888 }
 0x3e0   : > { %3962 = vst.msk [vmem:[#allocation2 + $0x1cc] sm:$0xf] %vm1999_vm13, %v3889_v13  ;;  %v20355_v13 = vld [vmem:[#allocation38_spill] sm:$0xff] }
 0x3e1   : > { %3248 = vrot.lane.b32.xlu0 %v20351_v46, %s12919_s28  ;;  %v3891_v47 = vpop.permute.xlu1 %3890  ;;  %v20356_v46 = vld [vmem:[#allocation170_spill] sm:$0xff] }
 0x3e2   : > { %3963 = vst.msk [vmem:[#allocation2 + $0x1e8] sm:$0xf] %vm1999_vm13, %v3891_v47  ;;  %3250 = vrot.lane.b32.xlu1 %v20352_v0, %s12919_s28  ;;  %v3851_v47 = vrot.slane %v15646_v49, 7 }
 0x3e3   : > { %v2946_v35 = vpop.permute.xlu0 %2945 }
 0x3e4   : > { %3017 = vst.msk [vmem:[#allocation2 + $0x200] sm:$0xf] %vm1505_vm8, %v2946_v35  ;;  %v20357_v35 = vld [vmem:[#allocation173_spill] sm:$0xff] }
 0x3e5   : > { %3908 = vrot.lane.b32.xlu0 %v20353_v30, %s12919_s28  ;;  %v2948_v7 = vpop.permute.xlu1 %2947  ;;  %v20358_v0 = vrot.slane %v20357_v35, 7 }
 0x3e6   : > { %3018 = vst.msk [vmem:[#allocation2 + $0x21c] sm:$0xf] %vm1505_vm8, %v2948_v7  ;;  %3910 = vrot.lane.b32.xlu1 %v15903_v3, %s12919_s28 }
 0x3e7   : > { %v3545_v31 = vpop.permute.xlu0 %3544  ;;  %v5661_v62 = vld [vmem:[#allocation2 + $0x1c8] sm:$0xff]  ;;  %v3850_v30 = vrot.slane %v20358_v0, 4 }
 0x3e8   : > { %3616 = vst.msk [vmem:[#allocation2 + $0x204] sm:$0xf] %vm1505_vm8, %v3545_v31  ;;  %v3853_v31 = vrot.slane %v3851_v47, 4 }
 0x3e9   : > { %2965 = vrot.lane.b32.xlu0 %v20344_v48, %s12918_s27  ;;  %v3547_v56 = vpop.permute.xlu1 %3546  ;;  %v5665_v45 = vld [vmem:[#allocation2 + $0x1e4] sm:$0xff] }
 0x3ea   : > { %v12533_v44 = vld [vmem:[#allocation2 + $0x1cc] ss:$28 sps:$4 sm:$0xff]   ;;  %3617 = vst.msk [vmem:[#allocation2 + $0x220] sm:$0xf] %vm1505_vm8, %v3547_v56  ;;  %v11012_v18 = vcombine.low %v5661_v62, %v5665_v45  ;;  %2967 = vrot.lane.b32.xlu1 %v20346_v12, %s12918_s27  ;;  %v3852_v45 = vsel %vm13261_vm15, %v3850_v30, %v3851_v47 }
 0x3eb   : > { %v3084_v17 = vpop.permute.xlu0 %3083  ;;  %6943 = vmatprep.mubr.bf16.mxu1 %v12533_v44  ;;  %v12551_v44 = vld [vmem:[%s19502_s3 + $0x128] sm:$0xff]  }
 0x3ec   : > { %3155 = vst.msk [vmem:[#allocation2 + $0x200] sm:$0xf] %vm1720_vm10, %v3084_v17  ;;  %6944 = vmatmul.mubr.bf16.gmra.mxu1 %v11012_v18  ;;  %v11650_v48 = vpop.f32.mrf.mxu1  ;;  %v20361_v30 = vld [vmem:[#allocation12_spill] sm:$0xff] }
 0x3ed   : > { %3564 = vrot.lane.b32.xlu0 %v15912_v9, %s12918_s27  ;;  %v3086_v3 = vpop.permute.xlu1 %3085 }
 0x3ee   : > { %3156 = vst.msk [vmem:[#allocation2 + $0x21c] sm:$0xf] %vm1720_vm10, %v3086_v3  ;;  %3566 = vrot.lane.b32.xlu1 %v15936_v25, %s12918_s27  ;;  %v11651_v57 = vpop.f32.mrf.mxu1 }
 0x3ef   : > { %v3755_v5 = vpop.permute.xlu0 %3754  ;;  %v16833_v12 = vadd.f32 %v11651_v57, %v11650_v48  ;;  %v12555_v48 = vld [vmem:[%s19502_s3 + $0x188] sm:$0xff]  }
 0x3f0   : > { %3826 = vst.msk [vmem:[#allocation2 + $0x204] sm:$0xf] %vm1720_vm10, %v3755_v5  ;;  %v16852_v56 = vpop.f32.mrf.mxu1  ;;  %v20360_v5 = vld [vmem:[#allocation11_spill] sm:$0xff] }
 0x3f1   : > { %3103 = vrot.lane.b32.xlu0 %v20354_v27, %s12917_s26  ;;  %v3757_v58 = vpop.permute.xlu1 %3756  ;;  %v19868_v27 = vmov 0.0  }
 0x3f2   : > { %3827 = vst.msk [vmem:[#allocation2 + $0x220] sm:$0xf] %vm1720_vm10, %v3757_v58  ;;  %3105 = vrot.lane.b32.xlu1 %v20355_v13, %s12917_s26  ;;  %v16869_v3 = vpop.f32.mrf.mxu1  ;;  %12235 = vmatprep.subr.bf16.mxu1 %v19868_v27 }
 0x3f3   : > { %v3233_v9 = vpop.permute.xlu0 %3232  ;;  %12236 = vmatpush3.bf16.msra.mxu1 %v12555_v48 }
 0x3f4   : > { %3304 = vst.msk [vmem:[#allocation2 + $0x200] sm:$0xf] %vm1999_vm13, %v3233_v9  ;;  %12237 = vmatprep.subr.bf16.mxu1 %v19868_v27 }
 0x3f5   : > { %3774 = vrot.lane.b32.xlu0 %v20356_v46, %s12917_s26  ;;  %v3235_v36 = vpop.permute.xlu1 %3234 }
 0x3f6   : > { %3305 = vst.msk [vmem:[#allocation2 + $0x21c] sm:$0xf] %vm1999_vm13, %v3235_v36  ;;  %3776 = vrot.lane.b32.xlu1 %v20357_v35, %s12917_s26 }
 0x3f7   : > { %v3893_v25 = vpop.permute.xlu0 %3892 }
 0x3f8   : > { %3964 = vst.msk [vmem:[#allocation2 + $0x204] sm:$0xf] %vm1999_vm13, %v3893_v25  ;;  %v12556_v25 = vld [vmem:[%s19502_s3 + $0x160] sm:$0xff]  }
 0x3f9   : > { %3252 = vrot.lane.b32.xlu0 %v15950_v11, %s12919_s28  ;;  %v3895_v40 = vpop.permute.xlu1 %3894  ;;  %v12550_v11 = vld [vmem:[%s19502_s3 + $0x168] sm:$0xff]  }
 0x3fa   : > { %3965 = vst.msk [vmem:[#allocation2 + $0x220] sm:$0xf] %vm1999_vm13, %v3895_v40  ;;  %3254 = vrot.lane.b32.xlu1 %v15962_v19, %s12919_s28  ;;  %11772 = vmatprep.subr.bf16.mxu0 %v12550_v11  ;;  %v3855_v19 = vsel %vm13261_vm15, %v3853_v31, %v3854_v63  ;;  %v12558_v31 = vld [vmem:[%s19502_s3 + $0x180] sm:$0xff]   ;;  %v20362_v63 = vld [vmem:[#allocation45_spill] sm:$0xff] }
 0x3fb   : > { %v2950_v7 = vpop.permute.xlu0 %2949  ;;  %11773 = vmatpush3.bf16.msra.mxu0 %v12551_v44  ;;  %12238 = vmatpush3.bf16.msra.mxu1 %v12558_v31 }
 0x3fc   : > { %3019 = vst.msk [vmem:[#allocation2 + $0x238] sm:$0xf] %vm1505_vm8, %v2950_v7  ;;  %v12557_v7 = vld [vmem:[%s19502_s3 + $0x120] sm:$0xff]   ;;  %11774 = vmatprep.subr.bf16.mxu0 %v12556_v25 }
 0x3fd   : > { %3912 = vrot.lane.b32.xlu0 %v3852_v45, %s12919_s28  ;;  %v2952_v17 = vpop.permute.xlu1 %2951 }
 0x3fe   : > { %3020 = vst.msk [vmem:[#allocation2 + $0x254] sm:$0xf] %vm1505_vm8, %v2952_v17  ;;  %3914 = vrot.lane.b32.xlu1 %v3855_v19, %s12919_s28  ;;  %v12559_v17 = vld [vmem:[%s19502_s3 + $0x158] sm:$0xff]  }
 0x3ff   : > { %v3549_v18 = vpop.permute.xlu0 %3548  ;;  %v5669_v57 = vld [vmem:[#allocation2 + $0x200] sm:$0xff]  ;;  %11775 = vmatpush3.bf16.msra.mxu0 %v12557_v7  ;;  %v20363_v19 = vld [vmem:[#allocation53_spill] sm:$0xff] }
 0x400   : > { %3618 = vst.msk [vmem:[#allocation2 + $0x23c] sm:$0xf] %vm1505_vm8, %v3549_v18  ;;  %v11656_v9 = vpop.f32.mrf.mxu1  ;;  %11776 = vmatprep.subr.bf16.mxu0 %v12559_v17  ;;  %v12563_v7 = vld [vmem:[%s19502_s3 + $0x110] sm:$0xff]  }
 0x401   : > { %4068 = vrot.lane.b32.xlu0 %v20360_v5, %s12918_s27  ;;  %v3551_v58 = vpop.permute.xlu1 %3550  ;;  %v5673_v13 = vld [vmem:[#allocation2 + $0x21c] sm:$0xff] }
 0x402   : > { %v12535_v36 = vld [vmem:[#allocation2 + $0x204] ss:$28 sps:$4 sm:$0xff]   ;;  %3619 = vst.msk [vmem:[#allocation2 + $0x258] sm:$0xf] %vm1505_vm8, %v3551_v58  ;;  %v11019_v0 = vcombine.low %v5669_v57, %v5673_v13  ;;  %4070 = vrot.lane.b32.xlu1 %v20361_v30, %s12918_s27  ;;  %v11657_v40 = vpop.f32.mrf.mxu1  ;;  %v12561_v57 = vld [vmem:[%s19502_s3 + $0x118] sm:$0xff]  }
 0x403   : > { %v3088_v47 = vpop.permute.xlu0 %3087  ;;  %6951 = vmatprep.mubr.bf16.mxu1 %v12535_v36  ;;  %v16895_v45 = vadd.f32 %v11657_v40, %v11656_v9  ;;  %v20364_v58 = vld [vmem:[#allocation33_spill] sm:$0xff]  ;;  %v16919_v13 = vld [vmem:[%s19503_s4] ss:$0 sm:$0xff]  ;;  %11777 = vmatpush3.bf16.msra.mxu0 %v12561_v57  ;;  %v10948_v40 = vrot.slane %v20360_v5, 9 }
 0x404   : > { %3157 = vst.msk [vmem:[#allocation2 + $0x238] sm:$0xf] %vm1720_vm10, %v3088_v47  ;;  %6952 = vmatmul.mubr.bf16.gmra.mxu1 %v11019_v0  ;;  %v16897_v44 = vpop.f32.mrf.mxu1  ;;  %v12562_v9 = vld [vmem:[%s19502_s3 + $0x150] sm:$0xff]   ;;  %v6729_v31 = vadd.f32 %v16016_v60, %v16919_v13  ;;  %v371_v57 = vld [vmem:[%s13041_s23 + $0x140] sm:$0xff] }
 0x405   : > { %4922 = vrot.lane.b32.xlu0 %v20362_v63, %s12918_s27  ;;  %v3090_v11 = vpop.permute.xlu1 %3089  ;;  %v20365_v0 = vld [vmem:[#allocation36_spill] sm:$0xff]  ;;  %11778 = vmatprep.subr.bf16.mxu0 %v12562_v9  ;;  %v20366_v17 = vld [vmem:[#allocation41_spill] sm:$0xff]  ;;  %v10853_v5 = vcombine.low %v371_v57, %v371_v57 }
 0x406   : > { %3158 = vst.msk [vmem:[#allocation2 + $0x254] sm:$0xf] %vm1720_vm10, %v3090_v11  ;;  %4924 = vrot.lane.b32.xlu1 %v20363_v19, %s12918_s27  ;;  %v16906_v48 = vpop.f32.mrf.mxu1  ;;  %v11577_v11 = vadd.f32 %v16178_v52, %v16162_v41  ;;  %v12566_v9 = vld [vmem:[%s19502_s3 + $0x148] sm:$0xff]   ;;  %v20367_v52 = vld [vmem:[#allocation42_spill] sm:$0xff]  ;;  %v20368_v41 = vld [vmem:[#allocation25_spill] sm:$0xff] }
 0x407   : > { %v3759_v18 = vpop.permute.xlu0 %3758  ;;  %11779 = vmatpush3.bf16.msra.mxu0 %v12563_v7 }
 0x408   : > { %3828 = vst.msk [vmem:[#allocation2 + $0x23c] sm:$0xf] %vm1720_vm10, %v3759_v18  ;;  %v11678_v25 = vpop.f32.mrf.mxu1  ;;  %11780 = vmatprep.subr.bf16.mxu0 %v12566_v9  ;;  %v6737_v9 = vadd.f32 %v16200_v54, %v16919_v13 }
 0x409   : > { %4496 = vrot.lane.b32.xlu0 %v20364_v58, %s12917_s26  ;;  %v3761_v36 = vpop.permute.xlu1 %3760 }
 0x40a   : > { %3829 = vst.msk [vmem:[#allocation2 + $0x258] sm:$0xf] %vm1720_vm10, %v3761_v36  ;;  %4498 = vrot.lane.b32.xlu1 %v20365_v0, %s12917_s26  ;;  %v11679_v30 = vpop.f32.mrf.mxu1 }
 0x40b   : > { %v3237_v47 = vpop.permute.xlu0 %3236  ;;  %v11680_v18 = vadd.f32 %v11679_v30, %v11678_v25  ;;  %v4619_v25 = vsel %vm13120_vm5, %v10948_v40, %v20368_v41  ;;  %v11583_v41 = vadd.f32 %v16260_v32, %v16251_v59 }
 0x40c   : > { %3306 = vst.msk [vmem:[#allocation2 + $0x238] sm:$0xf] %vm1999_vm13, %v3237_v47  ;;  %v11681_v36 = vpop.f32.mrf.mxu1  ;;  %v10854_v47 = vcombine.high %v371_v57, %v371_v57  ;;  %v12569_v57 = vld [vmem:[%s19502_s3 + $0x140] sm:$0xff]  }
 0x40d   : > { %5050 = vrot.lane.b32.xlu0 %v20366_v17, %s12917_s26  ;;  %v3239_v58 = vpop.permute.xlu1 %3238  ;;  %v16939_v0 = vadd.f32 %v11680_v18, %v6729_v31  ;;  %v12568_v31 = vld [vmem:[%s19502_s3 + $0x108] sm:$0xff]   ;;  %v6732_v18 = vadd.f32 %v11577_v11, %v16919_v13  ;;  %v20369_v11 = vld [vmem:[#allocation29_spill] sm:$0xff]  ;;  %v6740_v59 = vadd.f32 %v11583_v41, %v16919_v13 }
 0x40e   : > { %3307 = vst.msk [vmem:[#allocation2 + $0x254] sm:$0xf] %vm1999_vm13, %v3239_v58  ;;  %5052 = vrot.lane.b32.xlu1 %v20367_v52, %s12917_s26  ;;  %v11682_v30 = vpop.f32.mrf.mxu1  ;;  %906 = vmatprep.mubr.bf16.mxu0 %v10854_v47  ;;  %v20372_v41 = vld [vmem:[#allocation101_spill] sm:$0xff] }
 0x40f   : > { %v3897_v60 = vpop.permute.xlu0 %3896  ;;  %v11683_v7 = vadd.f32 %v11682_v30, %v11681_v36  ;;  %907 = vmatmul.mubr.bf16.gmra.mxu0 %v10853_v5  ;;  %v12570_v5 = vld [vmem:[%s19502_s3 + $0x100] sm:$0xff]  }
 0x410   : > { %3966 = vst.msk [vmem:[#allocation2 + $0x23c] sm:$0xf] %vm1999_vm13, %v3897_v60  ;;  %v11684_v60 = vpop.f32.mrf.mxu1  ;;  %11781 = vmatpush3.bf16.msra.mxu0 %v12568_v31 }
 0x411   : > { %4707 = vrot.lane.b32.xlu0 %v4619_v25, %s12919_s28  ;;  %v3899_v58 = vpop.permute.xlu1 %3898  ;;  %v16956_v40 = vadd.f32 %v11683_v7, %v6732_v18  ;;  %11782 = vmatprep.subr.bf16.mxu0 %v12569_v57  ;;  %v20370_v25 = vld [vmem:[#allocation43_spill] sm:$0xff] }
 0x412   : > { %3967 = vst.msk [vmem:[#allocation2 + $0x258] sm:$0xf] %vm1999_vm13, %v3899_v58  ;;  %4709 = vrot.lane.b32.xlu1 %v20369_v11, %s12919_s28  ;;  %v11685_v36 = vpop.f32.mrf.mxu1  ;;  %v20371_v58 = vld [vmem:[#allocation98_spill] sm:$0xff] }
 0x413   : > { %v2954_v47 = vpop.permute.xlu0 %2953  ;;  %v11686_v30 = vadd.f32 %v11685_v36, %v11684_v60 }
 0x414   : > { %3021 = vst.msk [vmem:[#allocation2 + $0x270] sm:$0xf] %vm1505_vm8, %v2954_v47  ;;  %v11687_v18 = vpop.f32.mrf.mxu1  ;;  %11783 = vmatpush3.bf16.msra.mxu0 %v12570_v5 }
 0x415   : > { %5325 = vrot.lane.b32.xlu0 %v20370_v25, %s12919_s28  ;;  %v2956_v31 = vpop.permute.xlu1 %2955  ;;  %v16971_v7 = vadd.f32 %v11686_v30, %v6737_v9 }
 0x416   : > { %3022 = vst.msk [vmem:[#allocation2 + $0x28c] sm:$0xf] %vm1505_vm8, %v2956_v31  ;;  %5327 = vrot.lane.b32.xlu1 %v20371_v58, %s12919_s28  ;;  %v11688_v54 = vpop.f32.mrf.mxu1  ;;  %v11589_v58 = vadd.f32 %v16302_v14, %v16293_v51  ;;  %v20374_v14 = vld [vmem:[#allocation46_spill] sm:$0xff] }
 0x417   : > { %v3553_v57 = vpop.permute.xlu0 %3552  ;;  %v11689_v32 = vadd.f32 %v11688_v54, %v11687_v18  ;;  %v5677_v47 = vld [vmem:[#allocation2 + $0x238] sm:$0xff] }
 0x418   : > { %3620 = vst.msk [vmem:[#allocation2 + $0x274] sm:$0xf] %vm1505_vm8, %v3553_v57  ;;  %v6745_v57 = vadd.f32 %v16270_v33, %v16919_v13 }
 0x419   : > { %4072 = vrot.lane.b32.xlu0 %v20234_v50, %s12918_s27  ;;  %v3555_v60 = vpop.permute.xlu1 %3554  ;;  %v5681_v11 = vld [vmem:[#allocation2 + $0x254] sm:$0xff]  ;;  %v16980_v9 = vadd.f32 %v11689_v32, %v6740_v59 }
 0x41a   : > { %v12537_v36 = vld [vmem:[#allocation2 + $0x23c] ss:$28 sps:$4 sm:$0xff]   ;;  %3621 = vst.msk [vmem:[#allocation2 + $0x290] sm:$0xf] %vm1505_vm8, %v3555_v60  ;;  %v11026_v25 = vcombine.low %v5677_v47, %v5681_v11  ;;  %4074 = vrot.lane.b32.xlu1 %v20235_v6, %s12918_s27  ;;  %v20373_v6 = vld [vmem:[#allocation115_spill] sm:$0xff]  ;;  %v6748_v11 = vadd.f32 %v11589_v58, %v16919_v13 }
 0x41b   : > { %v3092_v5 = vpop.permute.xlu0 %3091  ;;  %6959 = vmatprep.mubr.bf16.mxu1 %v12537_v36 }
 0x41c   : > { %3159 = vst.msk [vmem:[#allocation2 + $0x270] sm:$0xf] %vm1720_vm10, %v3092_v5  ;;  %v11690_v50 = vpop.f32.mrf.mxu1  ;;  %6960 = vmatmul.mubr.bf16.gmra.mxu1 %v11026_v25  ;;  %v20375_v25 = vld [vmem:[#allocation8_spill] sm:$0xff] }
 0x41d   : > { %4926 = vrot.lane.b32.xlu0 %v20372_v41, %s12918_s27  ;;  %v3094_v30 = vpop.permute.xlu1 %3093 }
 0x41e   : > { %3160 = vst.msk [vmem:[#allocation2 + $0x28c] sm:$0xf] %vm1720_vm10, %v3094_v30  ;;  %v11691_v18 = vpop.f32.mrf.mxu1  ;;  %4928 = vrot.lane.b32.xlu1 %v20373_v6, %s12918_s27  ;;  %v20376_v30 = vld [vmem:[#allocation100_spill] sm:$0xff] }
 0x41f   : > { %v3763_v31 = vpop.permute.xlu0 %3762  ;;  %v11692_v54 = vadd.f32 %v11691_v18, %v11690_v50 }
 0x420   : > { %3830 = vst.msk [vmem:[#allocation2 + $0x274] sm:$0xf] %vm1720_vm10, %v3763_v31  ;;  %v11693_v59 = vpop.f32.mrf.mxu1 }
 0x421   : > { %4500 = vrot.lane.b32.xlu0 %v20362_v63, %s12917_s26  ;;  %v16998_v32 = vadd.f32 %v11692_v54, %v6745_v57  ;;  %v3765_v60 = vpop.permute.xlu1 %3764 }
 0x422   : > { %3831 = vst.msk [vmem:[#allocation2 + $0x290] sm:$0xf] %vm1720_vm10, %v3765_v60  ;;  %v11694_v33 = vpop.f32.mrf.mxu1  ;;  %4502 = vrot.lane.b32.xlu1 %v20363_v19, %s12917_s26 }
 0x423   : > { %v3241_v47 = vpop.permute.xlu0 %3240  ;;  %v11695_v51 = vadd.f32 %v11694_v33, %v11693_v59 }
 0x424   : > { %3308 = vst.msk [vmem:[#allocation2 + $0x270] sm:$0xf] %vm1999_vm13, %v3241_v47  ;;  %v20378_v47 = vld [vmem:[#allocation125_spill] sm:$0xff] }
 0x425   : > { %5054 = vrot.lane.b32.xlu0 %v20374_v14, %s12917_s26  ;;  %v17007_v63 = vadd.f32 %v11695_v51, %v6748_v11  ;;  %v3243_v36 = vpop.permute.xlu1 %3242 }
 0x426   : > { %3309 = vst.msk [vmem:[#allocation2 + $0x28c] sm:$0xf] %vm1999_vm13, %v3243_v36  ;;  %5056 = vrot.lane.b32.xlu1 %v20375_v25, %s12917_s26  ;;  %v20379_v36 = vld [vmem:[#allocation59_spill] sm:$0xff] }
 0x427   : > { %v3901_v5 = vpop.permute.xlu0 %3900 }
 0x428   : > { %3968 = vst.msk [vmem:[#allocation2 + $0x274] sm:$0xf] %vm1999_vm13, %v3901_v5  ;;  %v6753_v5 = vadd.f32 %v20379_v36, %v16919_v13  ;;  %v20385_v36 = vld [vmem:[#allocation118_spill] sm:$0xff] }
 0x429   : > { %4711 = vrot.lane.b32.xlu0 %v20366_v17, %s12919_s28  ;;  %v3903_v50 = vpop.permute.xlu1 %3902  ;;  %v20377_v17 = vld [vmem:[#allocation116_spill] sm:$0xff] }
 0x42a   : > { %3969 = vst.msk [vmem:[#allocation2 + $0x290] sm:$0xf] %vm1999_vm13, %v3903_v50  ;;  %4713 = vrot.lane.b32.xlu1 %v20367_v52, %s12919_s28  ;;  %v20380_v50 = vld [vmem:[#allocation60_spill] sm:$0xff] }
 0x42b   : > { %v2958_v19 = vpop.permute.xlu0 %2957 }
 0x42c   : > { %3023 = vst.msk [vmem:[#allocation2 + $0x2a8] sm:$0xf] %vm1505_vm8, %v2958_v19  ;;  %v20381_v19 = vld [vmem:[#allocation16_spill] sm:$0xff] }
 0x42d   : > { %5329 = vrot.lane.b32.xlu0 %v20376_v30, %s12919_s28  ;;  %v2960_v31 = vpop.permute.xlu1 %2959  ;;  %v11595_v30 = vadd.f32 %v20381_v19, %v20380_v50  ;;  %v20387_v19 = vld [vmem:[#allocation21_spill] sm:$0xff] }
 0x42e   : > { %3024 = vst.msk [vmem:[#allocation2 + $0x2c4] sm:$0xf] %vm1505_vm8, %v2960_v31  ;;  %5331 = vrot.lane.b32.xlu1 %v20377_v17, %s12919_s28 }
 0x42f   : > { %v3557_v18 = vpop.permute.xlu0 %3556  ;;  %v5685_v58 = vld [vmem:[#allocation2 + $0x270] sm:$0xff] }
 0x430   : > { %3622 = vst.msk [vmem:[#allocation2 + $0x2ac] sm:$0xf] %vm1505_vm8, %v3557_v18 }
 0x431   : > { %4076 = vrot.lane.b32.xlu0 %v20244_v24, %s12918_s27  ;;  %v3559_v57 = vpop.permute.xlu1 %3558  ;;  %v5689_v54 = vld [vmem:[#allocation2 + $0x28c] sm:$0xff] }
 0x432   : > { %v12539_v59 = vld [vmem:[#allocation2 + $0x274] ss:$28 sps:$4 sm:$0xff]   ;;  %3623 = vst.msk [vmem:[#allocation2 + $0x2c8] sm:$0xf] %vm1505_vm8, %v3559_v57  ;;  %v11033_v60 = vcombine.low %v5685_v58, %v5689_v54  ;;  %4078 = vrot.lane.b32.xlu1 %v20245_v20, %s12918_s27 }
 0x433   : > { %v3096_v52 = vpop.permute.xlu0 %3095  ;;  %6967 = vmatprep.mubr.bf16.mxu1 %v12539_v59  ;;  %v20382_v20 = vld [vmem:[#allocation40_spill] sm:$0xff]  ;;  %v6756_v59 = vadd.f32 %v11595_v30, %v16919_v13 }
 0x434   : > { %3161 = vst.msk [vmem:[#allocation2 + $0x2a8] sm:$0xf] %vm1720_vm10, %v3096_v52  ;;  %v11696_v33 = vpop.f32.mrf.mxu1  ;;  %6968 = vmatmul.mubr.bf16.gmra.mxu1 %v11033_v60  ;;  %v20383_v60 = vld [vmem:[#allocation35_spill] sm:$0xff] }
 0x435   : > { %4930 = vrot.lane.b32.xlu0 %v20378_v47, %s12918_s27  ;;  %v3098_v24 = vpop.permute.xlu1 %3097 }
 0x436   : > { %3162 = vst.msk [vmem:[#allocation2 + $0x2c4] sm:$0xf] %vm1720_vm10, %v3098_v24  ;;  %v11697_v51 = vpop.f32.mrf.mxu1  ;;  %4932 = vrot.lane.b32.xlu1 %v20382_v20, %s12918_s27 }
 0x437   : > { %v3767_v11 = vpop.permute.xlu0 %3766  ;;  %v11698_v31 = vadd.f32 %v11697_v51, %v11696_v33 }
 0x438   : > { %3832 = vst.msk [vmem:[#allocation2 + $0x2ac] sm:$0xf] %vm1720_vm10, %v3767_v11  ;;  %v11699_v18 = vpop.f32.mrf.mxu1  ;;  %v20384_v11 = vld [vmem:[#allocation117_spill] sm:$0xff] }
 0x439   : > { %4504 = vrot.lane.b32.xlu0 %v20372_v41, %s12917_s26  ;;  %v17043_v17 = vadd.f32 %v11698_v31, %v6753_v5  ;;  %v3769_v57 = vpop.permute.xlu1 %3768 }
 0x43a   : > { %3833 = vst.msk [vmem:[#allocation2 + $0x2c8] sm:$0xf] %vm1720_vm10, %v3769_v57  ;;  %v11700_v54 = vpop.f32.mrf.mxu1  ;;  %4506 = vrot.lane.b32.xlu1 %v20373_v6, %s12917_s26 }
 0x43b   : > { %v3245_v58 = vpop.permute.xlu0 %3244  ;;  %v11701_v52 = vadd.f32 %v11700_v54, %v11699_v18  ;;  %v20388_v54 = vld [vmem:[#allocation24_spill] sm:$0xff] }
 0x43c   : > { %3310 = vst.msk [vmem:[#allocation2 + $0x2a8] sm:$0xf] %vm1999_vm13, %v3245_v58 }
 0x43d   : > { %5058 = vrot.lane.b32.xlu0 %v20383_v60, %s12917_s26  ;;  %v17052_v41 = vadd.f32 %v11701_v52, %v6756_v59  ;;  %v3247_v33 = vpop.permute.xlu1 %3246  ;;  %v20389_v59 = vld [vmem:[#allocation51_spill] sm:$0xff] }
 0x43e   : > { %3311 = vst.msk [vmem:[#allocation2 + $0x2c4] sm:$0xf] %vm1999_vm13, %v3247_v33  ;;  %5060 = vrot.lane.b32.xlu1 %v20384_v11, %s12917_s26 }
 0x43f   : > { %v3905_v24 = vpop.permute.xlu0 %3904 }
 0x440   : > { %3970 = vst.msk [vmem:[#allocation2 + $0x2ac] sm:$0xf] %vm1999_vm13, %v3905_v24 }
 0x441   : > { %4715 = vrot.lane.b32.xlu0 %v20374_v14, %s12919_s28  ;;  %v3907_v51 = vpop.permute.xlu1 %3906  ;;  %v20386_v14 = vld [vmem:[#allocation48_spill] sm:$0xff] }
 0x442   : > { %3971 = vst.msk [vmem:[#allocation2 + $0x2c8] sm:$0xf] %vm1999_vm13, %v3907_v51  ;;  %4717 = vrot.lane.b32.xlu1 %v20375_v25, %s12919_s28 }
 0x443   : > { %v2962_v6 = vpop.permute.xlu0 %2961 }
 0x444   : > { %3025 = vst.msk [vmem:[#allocation2 + $0x2e0] sm:$0xf] %vm1505_vm8, %v2962_v6  ;;  %v6761_v6 = vadd.f32 %v16353_v26, %v16919_v13 }
 0x445   : > { %5333 = vrot.lane.b32.xlu0 %v20385_v36, %s12919_s28  ;;  %v2964_v5 = vpop.permute.xlu1 %2963  ;;  %v20390_v36 = vld [vmem:[#allocation17_spill] sm:$0xff] }
 0x446   : > { %3026 = vst.msk [vmem:[#allocation2 + $0x2fc] sm:$0xf] %vm1505_vm8, %v2964_v5  ;;  %5335 = vrot.lane.b32.xlu1 %v20386_v14, %s12919_s28  ;;  %v11601_v5 = vadd.f32 %v20390_v36, %v16379_v42  ;;  %v20396_v36 = vld [vmem:[#allocation26_spill] sm:$0xff] }
 0x447   : > { %v3561_v50 = vpop.permute.xlu0 %3560  ;;  %v5693_v31 = vld [vmem:[#allocation2 + $0x2a8] sm:$0xff] }
 0x448   : > { %3624 = vst.msk [vmem:[#allocation2 + $0x2e4] sm:$0xf] %vm1505_vm8, %v3561_v50  ;;  %v20391_v50 = vld [vmem:[#allocation55_spill] sm:$0xff] }
 0x449   : > { %4080 = vrot.lane.b32.xlu0 %v20387_v19, %s12918_s27  ;;  %v3563_v30 = vpop.permute.xlu1 %3562  ;;  %v5697_v18 = vld [vmem:[#allocation2 + $0x2c4] sm:$0xff] }
 0x44a   : > { %v12541_v57 = vld [vmem:[#allocation2 + $0x2ac] ss:$28 sps:$4 sm:$0xff]   ;;  %3625 = vst.msk [vmem:[#allocation2 + $0x300] sm:$0xf] %vm1505_vm8, %v3563_v30  ;;  %v11040_v58 = vcombine.low %v5693_v31, %v5697_v18  ;;  %4082 = vrot.lane.b32.xlu1 %v20388_v54, %s12918_s27 }
 0x44b   : > { %v3100_v25 = vpop.permute.xlu0 %3099  ;;  %6975 = vmatprep.mubr.bf16.mxu1 %v12541_v57  ;;  %v6764_v57 = vadd.f32 %v11601_v5, %v16919_v13 }
 0x44c   : > { %3163 = vst.msk [vmem:[#allocation2 + $0x2e0] sm:$0xf] %vm1720_vm10, %v3100_v25  ;;  %v11702_v52 = vpop.f32.mrf.mxu1  ;;  %6976 = vmatmul.mubr.bf16.gmra.mxu1 %v11040_v58  ;;  %v20392_v25 = vld [vmem:[#allocation133_spill] sm:$0xff] }
 0x44d   : > { %4934 = vrot.lane.b32.xlu0 %v20389_v59, %s12918_s27  ;;  %v3102_v33 = vpop.permute.xlu1 %3101 }
 0x44e   : > { %3164 = vst.msk [vmem:[#allocation2 + $0x2fc] sm:$0xf] %vm1720_vm10, %v3102_v33  ;;  %v11703_v51 = vpop.f32.mrf.mxu1  ;;  %4936 = vrot.lane.b32.xlu1 %v20391_v50, %s12918_s27 }
 0x44f   : > { %v3771_v24 = vpop.permute.xlu0 %3770  ;;  %v11704_v14 = vadd.f32 %v11703_v51, %v11702_v52  ;;  %v20393_v52 = vld [vmem:[#allocation134_spill] sm:$0xff] }
 0x450   : > { %3834 = vst.msk [vmem:[#allocation2 + $0x2e4] sm:$0xf] %vm1720_vm10, %v3771_v24  ;;  %v11705_v19 = vpop.f32.mrf.mxu1  ;;  %v20394_v24 = vld [vmem:[#allocation50_spill] sm:$0xff] }
 0x451   : > { %4508 = vrot.lane.b32.xlu0 %v20378_v47, %s12917_s26  ;;  %v17088_v30 = vadd.f32 %v11704_v14, %v6761_v6  ;;  %v3773_v31 = vpop.permute.xlu1 %3772 }
 0x452   : > { %3835 = vst.msk [vmem:[#allocation2 + $0x300] sm:$0xf] %vm1720_vm10, %v3773_v31  ;;  %v11706_v26 = vpop.f32.mrf.mxu1  ;;  %4510 = vrot.lane.b32.xlu1 %v20382_v20, %s12917_s26  ;;  %v20397_v31 = vld [vmem:[#allocation30_spill] sm:$0xff] }
 0x453   : > { %v3249_v18 = vpop.permute.xlu0 %3248  ;;  %v11707_v42 = vadd.f32 %v11706_v26, %v11705_v19 }
 0x454   : > { %3312 = vst.msk [vmem:[#allocation2 + $0x2e0] sm:$0xf] %vm1999_vm13, %v3249_v18  ;;  %v20398_v18 = vld [vmem:[#allocation71_spill] sm:$0xff] }
 0x455   : > { %5062 = vrot.lane.b32.xlu0 %v20392_v25, %s12917_s26  ;;  %v17097_v47 = vadd.f32 %v11707_v42, %v6764_v57  ;;  %v3251_v58 = vpop.permute.xlu1 %3250 }
 0x456   : > { %3313 = vst.msk [vmem:[#allocation2 + $0x2fc] sm:$0xf] %vm1999_vm13, %v3251_v58  ;;  %5064 = vrot.lane.b32.xlu1 %v20393_v52, %s12917_s26 }
 0x457   : > { %v3909_v54 = vpop.permute.xlu0 %3908 }
 0x458   : > { %3972 = vst.msk [vmem:[#allocation2 + $0x2e4] sm:$0xf] %vm1999_vm13, %v3909_v54  ;;  %v20399_v54 = vld [vmem:[#allocation61_spill] sm:$0xff] }
 0x459   : > { %4719 = vrot.lane.b32.xlu0 %v20383_v60, %s12919_s28  ;;  %v3911_v33 = vpop.permute.xlu1 %3910  ;;  %v20395_v60 = vld [vmem:[#allocation63_spill] sm:$0xff] }
 0x45a   : > { %3973 = vst.msk [vmem:[#allocation2 + $0x300] sm:$0xf] %vm1999_vm13, %v3911_v33  ;;  %4721 = vrot.lane.b32.xlu1 %v20384_v11, %s12919_s28  ;;  %v6769_v33 = vadd.f32 %v20399_v54, %v16919_v13  ;;  %v20404_v54 = vld [vmem:[#allocation150_spill] sm:$0xff] }
 0x45b   : > { %v2966_v20 = vpop.permute.xlu0 %2965 }
 0x45c   : > { %3027 = vst.msk [vmem:[#allocation2 + $0x318] sm:$0xf] %vm1505_vm8, %v2966_v20  ;;  %v20400_v20 = vld [vmem:[#allocation62_spill] sm:$0xff] }
 0x45d   : > { %5337 = vrot.lane.b32.xlu0 %v20394_v24, %s12919_s28  ;;  %v2968_v51 = vpop.permute.xlu1 %2967  ;;  %v12545_v14 = vld [vmem:[#allocation2 + $0x2e0] ss:$28 sps:$4 sm:$0xff]   ;;  %v20401_v24 = vld [vmem:[#allocation20_spill] sm:$0xff] }
 0x45e   : > { %3028 = vst.msk [vmem:[#allocation2 + $0x334] sm:$0xf] %vm1505_vm8, %v2968_v51  ;;  %5339 = vrot.lane.b32.xlu1 %v20395_v60, %s12919_s28  ;;  %v11607_v51 = vadd.f32 %v20401_v24, %v20400_v20  ;;  %v20405_v20 = vld [vmem:[#allocation66_spill] sm:$0xff] }
 0x45f   : > { %v3565_v6 = vpop.permute.xlu0 %3564 }
 0x460   : > { %3626 = vst.msk [vmem:[#allocation2 + $0x31c] sm:$0xf] %vm1505_vm8, %v3565_v6  ;;  %v20402_v6 = vld [vmem:[#allocation74_spill] sm:$0xff] }
 0x461   : > { %4084 = vrot.lane.b32.xlu0 %v20396_v36, %s12918_s27  ;;  %v3567_v5 = vpop.permute.xlu1 %3566  ;;  %v12547_v19 = vld [vmem:[#allocation2 + $0x2e4] ss:$28 sps:$4 sm:$0xff]  }
 0x462   : > { %3627 = vst.msk [vmem:[#allocation2 + $0x338] sm:$0xf] %vm1505_vm8, %v3567_v5  ;;  %4086 = vrot.lane.b32.xlu1 %v20397_v31, %s12918_s27  ;;  %6983 = vmatprep.mubr.bf16.mxu1 %v12547_v19  ;;  %v6772_v31 = vadd.f32 %v11607_v51, %v16919_v13 }
 0x463   : > { %v3104_v11 = vpop.permute.xlu0 %3103  ;;  %6984 = vmatmul.mubr.bf16.gmra.mxu1 %v12545_v14 }
 0x464   : > { %3165 = vst.msk [vmem:[#allocation2 + $0x318] sm:$0xf] %vm1720_vm10, %v3104_v11  ;;  %v11708_v26 = vpop.f32.mrf.mxu1 }
 0x465   : > { %4938 = vrot.lane.b32.xlu0 %v20398_v18, %s12918_s27  ;;  %v3106_v57 = vpop.permute.xlu1 %3105 }
 0x466   : > { %3166 = vst.msk [vmem:[#allocation2 + $0x334] sm:$0xf] %vm1720_vm10, %v3106_v57  ;;  %v11709_v58 = vpop.f32.mrf.mxu1  ;;  %4940 = vrot.lane.b32.xlu1 %v20402_v6, %s12918_s27 }
 0x467   : > { %v3775_v42 = vpop.permute.xlu0 %3774  ;;  %v11710_v60 = vadd.f32 %v11709_v58, %v11708_v26  ;;  %v20403_v26 = vld [vmem:[#allocation147_spill] sm:$0xff] }
 0x468   : > { %3836 = vst.msk [vmem:[#allocation2 + $0x31c] sm:$0xf] %vm1720_vm10, %v3775_v42  ;;  %v11711_v36 = vpop.f32.mrf.mxu1 }
 0x469   : > { %4512 = vrot.lane.b32.xlu0 %v20389_v59, %s12917_s26  ;;  %v17133_v5 = vadd.f32 %v11710_v60, %v6769_v33  ;;  %v3777_v14 = vpop.permute.xlu1 %3776  ;;  %v20407_v60 = vld [vmem:[#allocation31_spill] sm:$0xff] }
 0x46a   : > { %3837 = vst.msk [vmem:[#allocation2 + $0x338] sm:$0xf] %vm1720_vm10, %v3777_v14  ;;  %v11712_v11 = vpop.f32.mrf.mxu1  ;;  %4514 = vrot.lane.b32.xlu1 %v20391_v50, %s12917_s26 }
 0x46b   : > { %v3253_v19 = vpop.permute.xlu0 %3252  ;;  %v11713_v57 = vadd.f32 %v11712_v11, %v11711_v36  ;;  %v20408_v11 = vld [vmem:[#allocation37_spill] sm:$0xff] }
 0x46c   : > { %3314 = vst.msk [vmem:[#allocation2 + $0x318] sm:$0xf] %vm1999_vm13, %v3253_v19 }
 0x46d   : > { %5066 = vrot.lane.b32.xlu0 %v20403_v26, %s12917_s26  ;;  %v17142_v59 = vadd.f32 %v11713_v57, %v6772_v31  ;;  %v3255_v42 = vpop.permute.xlu1 %3254  ;;  %v20409_v31 = vld [vmem:[#allocation89_spill] sm:$0xff] }
 0x46e   : > { %3315 = vst.msk [vmem:[#allocation2 + $0x334] sm:$0xf] %vm1999_vm13, %v3255_v42  ;;  %5068 = vrot.lane.b32.xlu1 %v20404_v54, %s12917_s26 }
 0x46f   : > { %v3913_v58 = vpop.permute.xlu0 %3912 }
 0x470   : > { %3974 = vst.msk [vmem:[#allocation2 + $0x31c] sm:$0xf] %vm1999_vm13, %v3913_v58 }
 0x471   : > { %4723 = vrot.lane.b32.xlu0 %v20392_v25, %s12919_s28  ;;  %v3915_v33 = vpop.permute.xlu1 %3914  ;;  %v20406_v25 = vld [vmem:[#allocation83_spill] sm:$0xff] }
 0x472   : > { %3975 = vst.msk [vmem:[#allocation2 + $0x338] sm:$0xf] %vm1999_vm13, %v3915_v33  ;;  %4725 = vrot.lane.b32.xlu1 %v20393_v52, %s12919_s28 }
 0x473   : > { %v4069_v50 = vpop.permute.xlu0 %4068 }
 0x474   : > { %4158 = vst.msk [vmem:[#allocation2 + $0x10] sm:$0xf] %vm1505_vm8, %v4069_v50  ;;  %v20410_v50 = vld [vmem:[#allocation23_spill] sm:$0xff] }
 0x475   : > { %5341 = vrot.lane.b32.xlu0 %v20405_v20, %s12919_s28  ;;  %v4071_v24 = vpop.permute.xlu1 %4070  ;;  %v12552_v14 = vld [vmem:[#allocation2 + $0x318] ss:$28 sps:$4 sm:$0xff]   ;;  %v6777_v20 = vadd.f32 %v20410_v50, %v16919_v13 }
 0x476   : > { %4159 = vst.msk [vmem:[#allocation2 + $0x2c] sm:$0xf] %vm1505_vm8, %v4071_v24  ;;  %5343 = vrot.lane.b32.xlu1 %v20406_v25, %s12919_s28  ;;  %v20411_v24 = vld [vmem:[#allocation13_spill] sm:$0xff] }
 0x477   : > { %v4923_v51 = vpop.permute.xlu0 %4922  ;;  %v12560_v50 = vld [vmem:[#allocation2 + $0x18] ss:$28 sps:$4 sm:$0xff]  }
 0x478   : > { %5012 = vst.msk [vmem:[#allocation2 + $0x14] sm:$0xf] %vm1505_vm8, %v4923_v51  ;;  %v20412_v51 = vld [vmem:[#allocation14_spill] sm:$0xff] }
 0x479   : > { %4088 = vrot.lane.b32.xlu0 %v20407_v60, %s12918_s27  ;;  %v4925_v36 = vpop.permute.xlu1 %4924  ;;  %v12554_v19 = vld [vmem:[#allocation2 + $0x31c] ss:$28 sps:$4 sm:$0xff]   ;;  %v11613_v25 = vadd.f32 %v20412_v51, %v20411_v24  ;;  %v20415_v51 = vld [vmem:[#allocation160_spill] sm:$0xff] }
 0x47a   : > { %5013 = vst.msk [vmem:[#allocation2 + $0x30] sm:$0xf] %vm1505_vm8, %v4925_v36  ;;  %4090 = vrot.lane.b32.xlu1 %v20408_v11, %s12918_s27  ;;  %6991 = vmatprep.mubr.bf16.mxu1 %v12554_v19  ;;  %v20413_v60 = vld [vmem:[#allocation93_spill] sm:$0xff] }
 0x47b   : > { %v4497_v52 = vpop.permute.xlu0 %4496  ;;  %6992 = vmatmul.mubr.bf16.gmra.mxu1 %v12552_v14  ;;  %v6780_v24 = vadd.f32 %v11613_v25, %v16919_v13 }
 0x47c   : > { %4586 = vst.msk [vmem:[#allocation2 + $0x10] sm:$0xf] %vm1720_vm10, %v4497_v52  ;;  %v11714_v57 = vpop.f32.mrf.mxu1  ;;  %12239 = vmatprep.mubr.msk.bf16.mxu1 %vm12921_vm0, %v19868_v27 }
 0x47d   : > { %4942 = vrot.lane.b32.xlu0 %v20409_v31, %s12918_s27  ;;  %v4499_v42 = vpop.permute.xlu1 %4498 }
 0x47e   : > { %4587 = vst.msk [vmem:[#allocation2 + $0x2c] sm:$0xf] %vm1720_vm10, %v4499_v42  ;;  %v11715_v33 = vpop.f32.mrf.mxu1  ;;  %4944 = vrot.lane.b32.xlu1 %v20413_v60, %s12918_s27 }
 0x47f   : > { %v5051_v58 = vpop.permute.xlu0 %5050  ;;  %v11716_v36 = vadd.f32 %v11715_v33, %v11714_v57 }
 0x480   : > { %5140 = vst.msk [vmem:[#allocation2 + $0x14] sm:$0xf] %vm1720_vm10, %v5051_v58  ;;  %v11717_v14 = vpop.f32.mrf.mxu1 }
 0x481   : > { %4516 = vrot.lane.b32.xlu0 %v20398_v18, %s12917_s26  ;;  %v17180_v19 = vadd.f32 %v11716_v36, %v6777_v20  ;;  %v5053_v52 = vpop.permute.xlu1 %5052  ;;  %v20414_v18 = vld [vmem:[#allocation72_spill] sm:$0xff] }
 0x482   : > { %5141 = vst.msk [vmem:[#allocation2 + $0x30] sm:$0xf] %vm1720_vm10, %v5053_v52  ;;  %v11718_v42 = vpop.f32.mrf.mxu1  ;;  %4518 = vrot.lane.b32.xlu1 %v20402_v6, %s12917_s26  ;;  %v12567_v36 = vld [vmem:[#allocation2 + $0x50] ss:$28 sps:$4 sm:$0xff]  }
 0x483   : > { %v4708_v11 = vpop.permute.xlu0 %4707  ;;  %v11719_v57 = vadd.f32 %v11718_v42, %v11717_v14  ;;  %12240 = vmatmul.mubr.msk.bf16.vlgmr.msra.gmra.mxu1 %vm6648_vm14, %v12560_v50  ;;  %v20416_v14 = vld [vmem:[#allocation87_spill] sm:$0xff] }
 0x484   : > { %4797 = vst.msk [vmem:[#allocation2 + $0x10] sm:$0xf] %vm1999_vm13, %v4708_v11  ;;  %12243 = vmatprep.mubr.msk.bf16.mxu1 %vm12921_vm0, %v19868_v27  ;;  %v20417_v11 = vld [vmem:[#allocation104_spill] sm:$0xff]  ;;  %v20418_v42 = vld [vmem:[#allocation39_spill] sm:$0xff] }
 0x485   : > { %5070 = vrot.lane.b32.xlu0 %v20414_v18, %s12917_s26  ;;  %v17190_v58 = vadd.f32 %v11719_v57, %v6780_v24  ;;  %v4710_v33 = vpop.permute.xlu1 %4709 }
 0x486   : > { %4798 = vst.msk [vmem:[#allocation2 + $0x2c] sm:$0xf] %vm1999_vm13, %v4710_v33  ;;  %5072 = vrot.lane.b32.xlu1 %v20415_v51, %s12917_s26  ;;  %v20419_v33 = vld [vmem:[#allocation49_spill] sm:$0xff] }
 0x487   : > { %v5326_v20 = vpop.permute.xlu0 %5325 }
 0x488   : > { %5415 = vst.msk [vmem:[#allocation2 + $0x14] sm:$0xf] %vm1999_vm13, %v5326_v20  ;;  %v12574_v20 = vld [vmem:[#allocation2 + $0x88] ss:$28 sps:$4 sm:$0xff]  }
 0x489   : > { %4727 = vrot.lane.b32.xlu0 %v20403_v26, %s12919_s28  ;;  %v5328_v6 = vpop.permute.xlu1 %5327 }
 0x48a   : > { %5416 = vst.msk [vmem:[#allocation2 + $0x30] sm:$0xf] %vm1999_vm13, %v5328_v6  ;;  %4729 = vrot.lane.b32.xlu1 %v20404_v54, %s12919_s28  ;;  %v20420_v6 = vld [vmem:[#allocation110_spill] sm:$0xff] }
 0x48b   : > { %v4073_v25 = vpop.permute.xlu0 %4072  ;;  %12244 = vmatmul.mubr.msk.bf16.gmra.mxu1 %vm6648_vm14, %v12567_v36 }
 0x48c   : > { %4160 = vst.msk [vmem:[#allocation2 + $0x48] sm:$0xf] %vm1505_vm8, %v4073_v25  ;;  %12247 = vmatprep.mubr.msk.bf16.mxu1 %vm12921_vm0, %v19868_v27 }
 0x48d   : > { %5345 = vrot.lane.b32.xlu0 %v20416_v14, %s12919_s28  ;;  %v4075_v52 = vpop.permute.xlu1 %4074  ;;  %v12571_v50 = vld [vmem:[#allocation2 + $0x10] ss:$28 sps:$4 sm:$0xff]  }
 0x48e   : > { %4161 = vst.msk [vmem:[#allocation2 + $0x64] sm:$0xf] %vm1505_vm8, %v4075_v52  ;;  %5347 = vrot.lane.b32.xlu1 %v20417_v11, %s12919_s28 }
 0x48f   : > { %v4927_v26 = vpop.permute.xlu0 %4926 }
 0x490   : > { %5014 = vst.msk [vmem:[#allocation2 + $0x4c] sm:$0xf] %vm1505_vm8, %v4927_v26  ;;  %v20421_v26 = vld [vmem:[#allocation18_spill] sm:$0xff] }
 0x491   : > { %4092 = vrot.lane.b32.xlu0 %v20418_v42, %s12918_s27  ;;  %v4929_v54 = vpop.permute.xlu1 %4928  ;;  %v12573_v24 = vld [vmem:[#allocation2 + $0x14] ss:$28 sps:$4 sm:$0xff]   ;;  %v6785_v11 = vadd.f32 %v20421_v26, %v16919_v13 }
 0x492   : > { %5015 = vst.msk [vmem:[#allocation2 + $0x68] sm:$0xf] %vm1505_vm8, %v4929_v54  ;;  %4094 = vrot.lane.b32.xlu1 %v20419_v33, %s12918_s27  ;;  %7032 = vmatprep.mubr.bf16.mxu0 %v12573_v24  ;;  %v20422_v42 = vld [vmem:[#allocation65_spill] sm:$0xff] }
 0x493   : > { %v4501_v57 = vpop.permute.xlu0 %4500  ;;  %7033 = vmatmul.mubr.bf16.vlgmr.msra.gmra.mxu0 %v12571_v50  ;;  %12248 = vmatmul.mubr.msk.bf16.gmra.mxu1 %vm6648_vm14, %v12574_v20  ;;  %v11619_v54 = vadd.f32 %v16535_v1, %v20422_v42  ;;  %v20423_v50 = vld [vmem:[#allocation113_spill] sm:$0xff]  ;;  %v20425_v42 = vmov 0.0  }
 0x494   : > { %4588 = vst.msk [vmem:[#allocation2 + $0x48] sm:$0xf] %vm1720_vm10, %v4501_v57  ;;  %v11720_v25 = vpop.f32.mrf.mxu1  ;;  %12251 = vmatprep.mubr.msk.bf16.mxu1 %vm12921_vm0, %v19868_v27 }
 0x495   : > { %4946 = vrot.lane.b32.xlu0 %v20420_v6, %s12918_s27  ;;  %v4503_v36 = vpop.permute.xlu1 %4502  ;;  %v6788_v27 = vadd.f32 %v11619_v54, %v16919_v13 }
 0x496   : > { %4589 = vst.msk [vmem:[#allocation2 + $0x64] sm:$0xf] %vm1720_vm10, %v4503_v36  ;;  %v11721_v52 = vpop.f32.mrf.mxu1  ;;  %4948 = vrot.lane.b32.xlu1 %v20423_v50, %s12918_s27 }
 0x497   : > { %v5055_v14 = vpop.permute.xlu0 %5054  ;;  %v11722_v24 = vadd.f32 %v11721_v52, %v11720_v25  ;;  %v12575_v25 = vld [vmem:[#allocation2 + $0xc0] ss:$28 sps:$4 sm:$0xff]  }
 0x498   : > { %5142 = vst.msk [vmem:[#allocation2 + $0x4c] sm:$0xf] %vm1720_vm10, %v5055_v14  ;;  %v11723_v57 = vpop.f32.mrf.mxu1  ;;  %v20424_v14 = vld [vmem:[#allocation172_spill] sm:$0xff] }
 0x499   : > { %4520 = vrot.lane.b32.xlu0 %v20409_v31, %s12917_s26  ;;  %v17234_v33 = vadd.f32 %v11722_v24, %v6785_v11  ;;  %v5057_v20 = vpop.permute.xlu1 %5056  ;;  %v12576_v24 = vld [vmem:[#allocation2 + $0xf8] ss:$28 sps:$4 sm:$0xff]  }
 0x49a   : > { %5143 = vst.msk [vmem:[#allocation2 + $0x68] sm:$0xf] %vm1720_vm10, %v5057_v20  ;;  %v11724_v26 = vpop.f32.mrf.mxu1  ;;  %4522 = vrot.lane.b32.xlu1 %v20413_v60, %s12917_s26  ;;  %v20426_v60 = vld [vmem:[#allocation175_spill] sm:$0xff] }
 0x49b   : > { %v4712_v36 = vpop.permute.xlu0 %4711  ;;  %v11725_v1 = vadd.f32 %v11724_v26, %v11723_v57  ;;  %12252 = vmatmul.mubr.msk.bf16.gmra.mxu1 %vm6648_vm14, %v12575_v25  ;;  %v20427_v57 = vld [vmem:[#allocation107_spill] sm:$0xff] }
 0x49c   : > { %4799 = vst.msk [vmem:[#allocation2 + $0x48] sm:$0xf] %vm1999_vm13, %v4712_v36  ;;  %12255 = vmatprep.mubr.msk.bf16.mxu1 %vm12921_vm0, %v20425_v42 }
 0x49d   : > { %5074 = vrot.lane.b32.xlu0 %v20424_v14, %s12917_s26  ;;  %v17243_v31 = vadd.f32 %v11725_v1, %v6788_v27  ;;  %v4714_v52 = vpop.permute.xlu1 %4713 }
 0x49e   : > { %4800 = vst.msk [vmem:[#allocation2 + $0x64] sm:$0xf] %vm1999_vm13, %v4714_v52  ;;  %5076 = vrot.lane.b32.xlu1 %v20426_v60, %s12917_s26 }
 0x49f   : > { %v5330_v11 = vpop.permute.xlu0 %5329 }
 0x4a0   : > { %5417 = vst.msk [vmem:[#allocation2 + $0x4c] sm:$0xf] %vm1999_vm13, %v5330_v11 }
 0x4a1   : > { %4731 = vrot.lane.b32.xlu0 %v20414_v18, %s12919_s28  ;;  %v5332_v54 = vpop.permute.xlu1 %5331  ;;  %v20428_v18 = vld [vmem:[#allocation120_spill] sm:$0xff] }
 0x4a2   : > { %5418 = vst.msk [vmem:[#allocation2 + $0x68] sm:$0xf] %vm1999_vm13, %v5332_v54  ;;  %4733 = vrot.lane.b32.xlu1 %v20415_v51, %s12919_s28  ;;  %v20429_v51 = vld [vmem:[#allocation52_spill] sm:$0xff] }
 0x4a3   : > { %v4077_v27 = vpop.permute.xlu0 %4076  ;;  %12256 = vmatmul.mubr.msk.bf16.gmra.mxu1 %vm6648_vm14, %v12576_v24  ;;  %v12579_v24 = vld [vmem:[#allocation2 + $0x130] ss:$28 sps:$4 sm:$0xff]  }
 0x4a4   : > { %4162 = vst.msk [vmem:[#allocation2 + $0x80] sm:$0xf] %vm1505_vm8, %v4077_v27  ;;  %12259 = vmatprep.mubr.msk.bf16.mxu1 %vm12921_vm0, %v20425_v42  ;;  %v20430_v27 = vld [vmem:[#allocation70_spill] sm:$0xff] }
 0x4a5   : > { %5349 = vrot.lane.b32.xlu0 %v20427_v57, %s12919_s28  ;;  %v4079_v20 = vpop.permute.xlu1 %4078  ;;  %v20431_v57 = vld [vmem:[#allocation127_spill] sm:$0xff] }
 0x4a6   : > { %4163 = vst.msk [vmem:[#allocation2 + $0x9c] sm:$0xf] %vm1505_vm8, %v4079_v20  ;;  %5351 = vrot.lane.b32.xlu1 %v20428_v18, %s12919_s28 }
 0x4a7   : > { %v4931_v36 = vpop.permute.xlu0 %4930  ;;  %v5606_v1 = vld [vmem:[#allocation2 + $0x48] sm:$0xff] }
 0x4a8   : > { %5016 = vst.msk [vmem:[#allocation2 + $0x84] sm:$0xf] %vm1505_vm8, %v4931_v36 }
 0x4a9   : > { %4096 = vrot.lane.b32.xlu0 %v20429_v51, %s12918_s27  ;;  %v4933_v26 = vpop.permute.xlu1 %4932  ;;  %v5610_v25 = vld [vmem:[#allocation2 + $0x64] sm:$0xff] }
 0x4aa   : > { %v12577_v52 = vld [vmem:[#allocation2 + $0x4c] ss:$28 sps:$4 sm:$0xff]   ;;  %5017 = vst.msk [vmem:[#allocation2 + $0xa0] sm:$0xf] %vm1505_vm8, %v4933_v26  ;;  %v10965_v54 = vcombine.low %v5606_v1, %v5610_v25  ;;  %4098 = vrot.lane.b32.xlu1 %v20430_v27, %s12918_s27  ;;  %v6793_v26 = vadd.f32 %v16548_v21, %v16919_v13  ;;  %v11625_v1 = vadd.f32 %v16596_v38, %v16588_v10  ;;  %v20432_v25 = vld [vmem:[#allocation130_spill] sm:$0xff] }
 0x4ab   : > { %v4505_v11 = vpop.permute.xlu0 %4504  ;;  %7040 = vmatprep.mubr.bf16.mxu0 %v12577_v52  ;;  %12260 = vmatmul.mubr.msk.bf16.gmra.mxu1 %vm6648_vm14, %v12579_v24  ;;  %v12580_v38 = vld [vmem:[#allocation2 + $0x168] ss:$28 sps:$4 sm:$0xff]  }
 0x4ac   : > { %4590 = vst.msk [vmem:[#allocation2 + $0x80] sm:$0xf] %vm1720_vm10, %v4505_v11  ;;  %7041 = vmatmul.mubr.bf16.gmra.mxu0 %v10965_v54  ;;  %v11726_v20 = vpop.f32.mrf.mxu1  ;;  %12263 = vmatprep.mubr.msk.bf16.mxu1 %vm12921_vm0, %v20425_v42 }
 0x4ad   : > { %4950 = vrot.lane.b32.xlu0 %v20431_v57, %s12918_s27  ;;  %v4507_v36 = vpop.permute.xlu1 %4506 }
 0x4ae   : > { %4591 = vst.msk [vmem:[#allocation2 + $0x9c] sm:$0xf] %vm1720_vm10, %v4507_v36  ;;  %v11727_v51 = vpop.f32.mrf.mxu1  ;;  %4952 = vrot.lane.b32.xlu1 %v20432_v25, %s12918_s27  ;;  %v6796_v36 = vadd.f32 %v11625_v1, %v16919_v13 }
 0x4af   : > { %v5059_v18 = vpop.permute.xlu0 %5058  ;;  %v11728_v52 = vadd.f32 %v11727_v51, %v11726_v20  ;;  %v20433_v20 = vld [vmem:[#allocation184_spill] sm:$0xff] }
 0x4b0   : > { %5144 = vst.msk [vmem:[#allocation2 + $0x84] sm:$0xf] %vm1720_vm10, %v5059_v18  ;;  %v11729_v11 = vpop.f32.mrf.mxu1 }
 0x4b1   : > { %4524 = vrot.lane.b32.xlu0 %v20420_v6, %s12917_s26  ;;  %v17288_v54 = vadd.f32 %v11728_v52, %v6793_v26  ;;  %v5061_v27 = vpop.permute.xlu1 %5060  ;;  %v12581_v52 = vld [vmem:[#allocation2 + $0x1a0] ss:$28 sps:$4 sm:$0xff]  }
 0x4b2   : > { %5145 = vst.msk [vmem:[#allocation2 + $0xa0] sm:$0xf] %vm1720_vm10, %v5061_v27  ;;  %v11730_v21 = vpop.f32.mrf.mxu1  ;;  %4526 = vrot.lane.b32.xlu1 %v20423_v50, %s12917_s26  ;;  %v20435_v50 = vld [vmem:[#allocation191_spill] sm:$0xff] }
 0x4b3   : > { %v4716_v24 = vpop.permute.xlu0 %4715  ;;  %v11731_v10 = vadd.f32 %v11730_v21, %v11729_v11  ;;  %12264 = vmatmul.mubr.msk.bf16.gmra.mxu1 %vm6648_vm14, %v12580_v38  ;;  %v20436_v11 = vld [vmem:[#allocation123_spill] sm:$0xff] }
 0x4b4   : > { %4801 = vst.msk [vmem:[#allocation2 + $0x80] sm:$0xf] %vm1999_vm13, %v4716_v24  ;;  %12267 = vmatprep.mubr.msk.bf16.mxu1 %vm12921_vm0, %v20425_v42 }
 0x4b5   : > { %5078 = vrot.lane.b32.xlu0 %v20433_v20, %s12917_s26  ;;  %v17297_v6 = vadd.f32 %v11731_v10, %v6796_v36  ;;  %v4718_v18 = vpop.permute.xlu1 %4717 }
 0x4b6   : > { %4802 = vst.msk [vmem:[#allocation2 + $0x9c] sm:$0xf] %vm1999_vm13, %v4718_v18  ;;  %5080 = vrot.lane.b32.xlu1 %v20435_v50, %s12917_s26 }
 0x4b7   : > { %20434 = vst [vmem:[#allocation22_spill] sm:$0xff] %v17297_v6  ;;  %v5334_v51 = vpop.permute.xlu0 %5333 }
 0x4b8   : > { %5419 = vst.msk [vmem:[#allocation2 + $0x84] sm:$0xf] %vm1999_vm13, %v5334_v51  ;;  %v20438_v51 = vld [vmem:[#allocation88_spill] sm:$0xff] }
 0x4b9   : > { %4735 = vrot.lane.b32.xlu0 %v20424_v14, %s12919_s28  ;;  %v5336_v26 = vpop.permute.xlu1 %5335  ;;  %v20437_v14 = vld [vmem:[#allocation135_spill] sm:$0xff] }
 0x4ba   : > { %5420 = vst.msk [vmem:[#allocation2 + $0xa0] sm:$0xf] %vm1999_vm13, %v5336_v26  ;;  %4737 = vrot.lane.b32.xlu1 %v20426_v60, %s12919_s28  ;;  %v12584_v26 = vld [vmem:[#allocation2 + $0x1d8] ss:$28 sps:$4 sm:$0xff]  }
 0x4bb   : > { %v4081_v1 = vpop.permute.xlu0 %4080  ;;  %12268 = vmatmul.mubr.msk.bf16.gmra.mxu1 %vm6648_vm14, %v12581_v52 }
 0x4bc   : > { %4164 = vst.msk [vmem:[#allocation2 + $0xb8] sm:$0xf] %vm1505_vm8, %v4081_v1  ;;  %12271 = vmatprep.mubr.msk.bf16.mxu1 %vm12921_vm0, %v20425_v42  ;;  %v20439_v1 = vld [vmem:[#allocation141_spill] sm:$0xff] }
 0x4bd   : > { %5353 = vrot.lane.b32.xlu0 %v20436_v11, %s12919_s28  ;;  %v4083_v27 = vpop.permute.xlu1 %4082 }
 0x4be   : > { %4165 = vst.msk [vmem:[#allocation2 + $0xd4] sm:$0xf] %vm1505_vm8, %v4083_v27  ;;  %5355 = vrot.lane.b32.xlu1 %v20437_v14, %s12919_s28 }
 0x4bf   : > { %v4935_v24 = vpop.permute.xlu0 %4934  ;;  %v5614_v21 = vld [vmem:[#allocation2 + $0x80] sm:$0xff] }
 0x4c0   : > { %5018 = vst.msk [vmem:[#allocation2 + $0xbc] sm:$0xf] %vm1505_vm8, %v4935_v24  ;;  %v20440_v24 = vld [vmem:[#allocation69_spill] sm:$0xff] }
 0x4c1   : > { %4100 = vrot.lane.b32.xlu0 %v14261_v61, %s12918_s27  ;;  %v4937_v60 = vpop.permute.xlu1 %4936  ;;  %v5618_v36 = vld [vmem:[#allocation2 + $0x9c] sm:$0xff]  ;;  %v6801_v14 = vadd.f32 %v20440_v24, %v16919_v13 }
 0x4c2   : > { %v12582_v10 = vld [vmem:[#allocation2 + $0x84] ss:$28 sps:$4 sm:$0xff]   ;;  %5019 = vst.msk [vmem:[#allocation2 + $0xd8] sm:$0xf] %vm1505_vm8, %v4937_v60  ;;  %v10972_v18 = vcombine.low %v5614_v21, %v5618_v36  ;;  %4102 = vrot.lane.b32.xlu1 %v20438_v51, %s12918_s27  ;;  %v20442_v21 = vld [vmem:[#allocation28_spill] sm:$0xff] }
 0x4c3   : > { %v4509_v38 = vpop.permute.xlu0 %4508  ;;  %7048 = vmatprep.mubr.bf16.mxu0 %v12582_v10  ;;  %12272 = vmatmul.mubr.msk.bf16.gmra.mxu1 %vm6648_vm14, %v12584_v26  ;;  %v20441_v60 = vld [vmem:[#allocation27_spill] sm:$0xff]  ;;  %v20443_v10 = vld [vmem:[#allocation144_spill] sm:$0xff] }
 0x4c4   : > { %4592 = vst.msk [vmem:[#allocation2 + $0xb8] sm:$0xf] %vm1720_vm10, %v4509_v38  ;;  %7049 = vmatmul.mubr.bf16.gmra.mxu0 %v10972_v18  ;;  %v11732_v61 = vpop.f32.mrf.mxu1  ;;  %12275 = vmatprep.mubr.msk.bf16.mxu1 %vm12921_vm0, %v20425_v42  ;;  %v11631_v36 = vadd.f32 %v20442_v21, %v20441_v60 }
 0x4c5   : > { %4954 = vrot.lane.b32.xlu0 %v20439_v1, %s12918_s27  ;;  %v4511_v52 = vpop.permute.xlu1 %4510 }
 0x4c6   : > { %4593 = vst.msk [vmem:[#allocation2 + $0xd4] sm:$0xf] %vm1720_vm10, %v4511_v52  ;;  %v11733_v27 = vpop.f32.mrf.mxu1  ;;  %4956 = vrot.lane.b32.xlu1 %v20443_v10, %s12918_s27  ;;  %v6804_v6 = vadd.f32 %v11631_v36, %v16919_v13  ;;  %v20447_v13 = vld [vmem:[#allocation132_spill] sm:$0xff] }
 0x4c7   : > { %v5063_v11 = vpop.permute.xlu0 %5062  ;;  %v11734_v38 = vadd.f32 %v11733_v27, %v11732_v61  ;;  %v12585_v61 = vld [vmem:[#allocation2 + $0x210] ss:$28 sps:$4 sm:$0xff]  }
 0x4c8   : > { %5146 = vst.msk [vmem:[#allocation2 + $0xbc] sm:$0xf] %vm1720_vm10, %v5063_v11  ;;  %v11735_v18 = vpop.f32.mrf.mxu1  ;;  %v20445_v27 = vld [vmem:[#allocation195_spill] sm:$0xff] }
 0x4c9   : > { %4528 = vrot.lane.b32.xlu0 %v20431_v57, %s12917_s26  ;;  %v17342_v51 = vadd.f32 %v11734_v38, %v6801_v14  ;;  %v5065_v26 = vpop.permute.xlu1 %5064  ;;  %v12586_v38 = vld [vmem:[#allocation2 + $0x248] ss:$28 sps:$4 sm:$0xff]  }
 0x4ca   : > { %5147 = vst.msk [vmem:[#allocation2 + $0xd8] sm:$0xf] %vm1720_vm10, %v5065_v26  ;;  %v11736_v24 = vpop.f32.mrf.mxu1  ;;  %4530 = vrot.lane.b32.xlu1 %v20432_v25, %s12917_s26 }
 0x4cb   : > { %20444 = vst [vmem:[#allocation79_spill] sm:$0xff] %v17342_v51  ;;  %v4720_v52 = vpop.permute.xlu0 %4719  ;;  %v11737_v11 = vadd.f32 %v11736_v24, %v11735_v18  ;;  %12276 = vmatmul.mubr.msk.bf16.gmra.mxu1 %vm6648_vm14, %v12585_v61  ;;  %v20448_v18 = vld [vmem:[#allocation139_spill] sm:$0xff] }
 0x4cc   : > { %4803 = vst.msk [vmem:[#allocation2 + $0xb8] sm:$0xf] %vm1999_vm13, %v4720_v52  ;;  %12279 = vmatprep.mubr.msk.bf16.mxu1 %vm12921_vm0, %v20425_v42 }
 0x4cd   : > { %5082 = vrot.lane.b32.xlu0 %v20445_v27, %s12917_s26  ;;  %v17351_v57 = vadd.f32 %v11737_v11, %v6804_v6  ;;  %v4722_v14 = vpop.permute.xlu1 %4721  ;;  %v20449_v11 = vld [vmem:[#allocation148_spill] sm:$0xff] }
 0x4ce   : > { %4804 = vst.msk [vmem:[#allocation2 + $0xd4] sm:$0xf] %vm1999_vm13, %v4722_v14  ;;  %5084 = vrot.lane.b32.xlu1 %v20447_v13, %s12917_s26 }
 0x4cf   : > { %20446 = vst [vmem:[#allocation32_spill] sm:$0xff] %v17351_v57  ;;  %v5338_v60 = vpop.permute.xlu0 %5337  ;;  %v908_v25 = vpop.f32.mrf.mxu0 }
 0x4d0   : > { %5421 = vst.msk [vmem:[#allocation2 + $0xbc] sm:$0xf] %vm1999_vm13, %v5338_v60 }
 0x4d1   : > { %4739 = vrot.lane.b32.xlu0 %v20433_v20, %s12919_s28  ;;  %v5340_v6 = vpop.permute.xlu1 %5339  ;;  %v909_v36 = vpop.f32.mrf.mxu0 }
 0x4d2   : > { %5422 = vst.msk [vmem:[#allocation2 + $0xd8] sm:$0xf] %vm1999_vm13, %v5340_v6  ;;  %4741 = vrot.lane.b32.xlu1 %v20435_v50, %s12919_s28  ;;  %v20450_v50 = vld [vmem:[#allocation92_spill] sm:$0xff]  ;;  %v20451_v36 = vld [vmem:[#allocation109_spill] sm:$0xff] }
 0x4d3   : > { %v4085_v21 = vpop.permute.xlu0 %4084  ;;  %v910_v26 = vpop.f32.mrf.mxu0  ;;  %12280 = vmatmul.mubr.msk.bf16.gmra.mxu1 %vm6648_vm14, %v12586_v38  ;;  %v12589_v38 = vld [vmem:[#allocation2 + $0x280] ss:$28 sps:$4 sm:$0xff]  }
 0x4d4   : > { %4166 = vst.msk [vmem:[#allocation2 + $0xf0] sm:$0xf] %vm1505_vm8, %v4085_v21  ;;  %12283 = vmatprep.mubr.msk.bf16.mxu1 %vm12921_vm0, %v20425_v42 }
 0x4d5   : > { %5357 = vrot.lane.b32.xlu0 %v20448_v18, %s12919_s28  ;;  %v4087_v52 = vpop.permute.xlu1 %4086  ;;  %v911_v24 = vpop.f32.mrf.mxu0  ;;  %v20452_v18 = vld [vmem:[#allocation153_spill] sm:$0xff] }
 0x4d6   : > { %4167 = vst.msk [vmem:[#allocation2 + $0x10c] sm:$0xf] %vm1505_vm8, %v4087_v52  ;;  %5359 = vrot.lane.b32.xlu1 %v20449_v11, %s12919_s28  ;;  %v17390_v11 = vld [vmem:[%s19503_s4] ss:$0 sm:$0xff] }
 0x4d7   : > { %v4939_v20 = vpop.permute.xlu0 %4938  ;;  %v5622_v14 = vld [vmem:[#allocation2 + $0xb8] sm:$0xff] }
 0x4d8   : > { %5020 = vst.msk [vmem:[#allocation2 + $0xf4] sm:$0xf] %vm1505_vm8, %v4939_v20 }
 0x4d9   : > { %4104 = vrot.lane.b32.xlu0 %v20450_v50, %s12918_s27  ;;  %v4941_v61 = vpop.permute.xlu1 %4940  ;;  %v5626_v60 = vld [vmem:[#allocation2 + $0xd4] sm:$0xff]  ;;  %v20453_v50 = vld [vmem:[#allocation15_spill] sm:$0xff] }
 0x4da   : > { %v12587_v25 = vld [vmem:[#allocation2 + $0xbc] ss:$28 sps:$4 sm:$0xff]   ;;  %5021 = vst.msk [vmem:[#allocation2 + $0x110] sm:$0xf] %vm1505_vm8, %v4941_v61  ;;  %v10979_v21 = vcombine.low %v5622_v14, %v5626_v60  ;;  %4106 = vrot.lane.b32.xlu1 %v20451_v36, %s12918_s27  ;;  %v6809_v61 = vadd.f32 %v17390_v11, %v20453_v50  ;;  %v20454_v14 = vld [vmem:[#allocation19_spill] sm:$0xff] }
 0x4db   : > { %v4513_v6 = vpop.permute.xlu0 %4512  ;;  %7056 = vmatprep.mubr.bf16.mxu0 %v12587_v25  ;;  %12284 = vmatmul.mubr.msk.bf16.gmra.mxu1 %vm6648_vm14, %v12589_v38  ;;  %v20455_v60 = vld [vmem:[#allocation73_spill] sm:$0xff] }
 0x4dc   : > { %4594 = vst.msk [vmem:[#allocation2 + $0xf0] sm:$0xf] %vm1720_vm10, %v4513_v6  ;;  %7057 = vmatmul.mubr.bf16.gmra.mxu0 %v10979_v21  ;;  %v11738_v26 = vpop.f32.mrf.mxu1  ;;  %12287 = vmatprep.mubr.msk.bf16.mxu1 %vm12921_vm0, %v20425_v42  ;;  %v11637_v25 = vadd.f32 %v20455_v60, %v20454_v14  ;;  %v20456_v6 = vld [vmem:[#allocation158_spill] sm:$0xff] }
 0x4dd   : > { %4958 = vrot.lane.b32.xlu0 %v20452_v18, %s12918_s27  ;;  %v4515_v52 = vpop.permute.xlu1 %4514  ;;  %v20460_v60 = vld [vmem:[#allocation166_spill] sm:$0xff] }
 0x4de   : > { %4595 = vst.msk [vmem:[#allocation2 + $0x10c] sm:$0xf] %vm1720_vm10, %v4515_v52  ;;  %v11739_v24 = vpop.f32.mrf.mxu1  ;;  %4960 = vrot.lane.b32.xlu1 %v20456_v6, %s12918_s27  ;;  %v6812_v51 = vadd.f32 %v17390_v11, %v11637_v25  ;;  %v4428_v25 = vrot.slane %v20460_v60, 4 }
 0x4df   : > { %v5067_v20 = vpop.permute.xlu0 %5066  ;;  %v11740_v21 = vadd.f32 %v11739_v24, %v11738_v26  ;;  %v12590_v26 = vld [vmem:[#allocation2 + $0x2b8] ss:$28 sps:$4 sm:$0xff]   ;;  %v20457_v24 = vld [vmem:[#allocation143_spill] sm:$0xff] }
 0x4e0   : > { %5148 = vst.msk [vmem:[#allocation2 + $0xf4] sm:$0xf] %vm1720_vm10, %v5067_v20  ;;  %v11741_v36 = vpop.f32.mrf.mxu1 }
 0x4e1   : > { %4532 = vrot.lane.b32.xlu0 %v20439_v1, %s12917_s26  ;;  %v17401_v38 = vadd.f32 %v11740_v21, %v6809_v61  ;;  %v5069_v52 = vpop.permute.xlu1 %5068  ;;  %v12591_v21 = vld [vmem:[#allocation2 + $0x2f0] ss:$28 sps:$4 sm:$0xff]  }
 0x4e2   : > { %5149 = vst.msk [vmem:[#allocation2 + $0x110] sm:$0xf] %vm1720_vm10, %v5069_v52  ;;  %v11742_v50 = vpop.f32.mrf.mxu1  ;;  %4534 = vrot.lane.b32.xlu1 %v20443_v10, %s12917_s26  ;;  %v20459_v10 = vld [vmem:[#allocation146_spill] sm:$0xff] }
 0x4e3   : > { %v4724_v57 = vpop.permute.xlu0 %4723  ;;  %v11743_v20 = vadd.f32 %v11742_v50, %v11741_v36  ;;  %12288 = vmatmul.mubr.msk.bf16.gmra.mxu1 %vm6648_vm14, %v12590_v26  ;;  %v20461_v36 = vld [vmem:[#allocation154_spill] sm:$0xff]  ;;  %v20462_v50 = vld [vmem:[#allocation165_spill] sm:$0xff] }
 0x4e4   : > { %4805 = vst.msk [vmem:[#allocation2 + $0xf0] sm:$0xf] %vm1999_vm13, %v4724_v57  ;;  %12291 = vmatprep.mubr.msk.bf16.mxu1 %vm12921_vm0, %v20425_v42 }
 0x4e5   : > { %5086 = vrot.lane.b32.xlu0 %v20457_v24, %s12917_s26  ;;  %v17410_v1 = vadd.f32 %v11743_v20, %v6812_v51  ;;  %v4726_v61 = vpop.permute.xlu1 %4725  ;;  %v20463_v20 = vrot.slane %v20462_v50, 5 }
 0x4e6   : > { %4806 = vst.msk [vmem:[#allocation2 + $0x10c] sm:$0xf] %vm1999_vm13, %v4726_v61  ;;  %5088 = vrot.lane.b32.xlu1 %v20459_v10, %s12917_s26  ;;  %v20465_v61 = vld [vmem:[#allocation112_spill] sm:$0xff] }
 0x4e7   : > { %20458 = vst [vmem:[#allocation34_spill] sm:$0xff] %v17410_v1  ;;  %v5342_v14 = vpop.permute.xlu0 %5341  ;;  %v4429_v26 = vor.u32 %v4428_v25, %v20463_v20  ;;  %v20467_v25 = vld [vmem:[#allocation129_spill] sm:$0xff] }
 0x4e8   : > { %5423 = vst.msk [vmem:[#allocation2 + $0xf4] sm:$0xf] %vm1999_vm13, %v5342_v14  ;;  %v20468_v20 = vld [vmem:[#allocation201_spill] sm:$0xff] }
 0x4e9   : > { %4743 = vrot.lane.b32.xlu0 %v20445_v27, %s12919_s28  ;;  %v5344_v57 = vpop.permute.xlu1 %5343 }
 0x4ea   : > { %5424 = vst.msk [vmem:[#allocation2 + $0x110] sm:$0xf] %vm1999_vm13, %v5344_v57  ;;  %4745 = vrot.lane.b32.xlu1 %v20447_v13, %s12919_s28  ;;  %v20464_v13 = vld [vmem:[#allocation161_spill] sm:$0xff] }
 0x4eb   : > { %v4089_v51 = vpop.permute.xlu0 %4088  ;;  %12292 = vmatmul.mubr.msk.bf16.gmra.mxu1 %vm6648_vm14, %v12591_v21 }
 0x4ec   : > { %4168 = vst.msk [vmem:[#allocation2 + $0x128] sm:$0xf] %vm1505_vm8, %v4089_v51  ;;  %12295 = vmatprep.mubr.msk.bf16.mxu1 %vm12921_vm0, %v20425_v42  ;;  %v4430_v42 = vrot.slane %v4429_v26, 4 }
 0x4ed   : > { %5361 = vrot.lane.b32.xlu0 %v20461_v36, %s12919_s28  ;;  %v4091_v52 = vpop.permute.xlu1 %4090 }
 0x4ee   : > { %4169 = vst.msk [vmem:[#allocation2 + $0x144] sm:$0xf] %vm1505_vm8, %v4091_v52  ;;  %5363 = vrot.lane.b32.xlu1 %v20464_v13, %s12919_s28  ;;  %v20466_v52 = vld [vmem:[#allocation182_spill] sm:$0xff] }
 0x4ef   : > { %v4943_v27 = vpop.permute.xlu0 %4942  ;;  %v5630_v57 = vld [vmem:[#allocation2 + $0xf0] sm:$0xff]  ;;  %v4434_v50 = vrot.slane %v20466_v52, 5 }
 0x4f0   : > { %5022 = vst.msk [vmem:[#allocation2 + $0x12c] sm:$0xf] %vm1505_vm8, %v4943_v27  ;;  %v12594_v27 = vld [vmem:[#allocation2 + $0x328] ss:$28 sps:$4 sm:$0xff]  }
 0x4f1   : > { %4108 = vrot.lane.b32.xlu0 %v20465_v61, %s12918_s27  ;;  %v4945_v14 = vpop.permute.xlu1 %4944  ;;  %v5634_v51 = vld [vmem:[#allocation2 + $0x10c] sm:$0xff] }
 0x4f2   : > { %v12592_v60 = vld [vmem:[#allocation2 + $0xf4] ss:$28 sps:$4 sm:$0xff]   ;;  %5023 = vst.msk [vmem:[#allocation2 + $0x148] sm:$0xf] %vm1505_vm8, %v4945_v14  ;;  %v10986_v36 = vcombine.low %v5630_v57, %v5634_v51  ;;  %4110 = vrot.lane.b32.xlu1 %v20467_v25, %s12918_s27  ;;  %v17450_v14 = vsel %vm13140_vm9, %v4430_v42, %v4434_v50  ;;  %v20469_v51 = vld [vmem:[#allocation75_spill] sm:$0xff] }
 0x4f3   : > { %v4517_v21 = vpop.permute.xlu0 %4516  ;;  %7064 = vmatprep.mubr.bf16.mxu0 %v12592_v60  ;;  %12296 = vmatmul.mubr.msk.bf16.gmra.mxu1 %vm6648_vm14, %v12594_v27  ;;  %v6817_v60 = vadd.f32 %v17390_v11, %v20469_v51 }
 0x4f4   : > { %4596 = vst.msk [vmem:[#allocation2 + $0x128] sm:$0xf] %vm1720_vm10, %v4517_v21  ;;  %7065 = vmatmul.mubr.bf16.gmra.mxu0 %v10986_v36  ;;  %v11744_v13 = vpop.f32.mrf.mxu1  ;;  %v20470_v21 = vld [vmem:[#allocation78_spill] sm:$0xff] }
 0x4f5   : > { %4962 = vrot.lane.b32.xlu0 %v20468_v20, %s12918_s27  ;;  %v4519_v61 = vpop.permute.xlu1 %4518  ;;  %v11643_v52 = vadd.f32 %v16768_v55, %v20470_v21  ;;  %v20473_v21 = vld [vmem:[#allocation181_spill] sm:$0xff] }
 0x4f6   : > { %4597 = vst.msk [vmem:[#allocation2 + $0x144] sm:$0xf] %vm1720_vm10, %v4519_v61  ;;  %v11745_v57 = vpop.f32.mrf.mxu1  ;;  %4964 = vrot.lane.b32.xlu1 %v17450_v14, %s12918_s27 }
 0x4f7   : > { %v5071_v26 = vpop.permute.xlu0 %5070  ;;  %v11746_v36 = vadd.f32 %v11745_v57, %v11744_v13  ;;  %v6820_v1 = vadd.f32 %v17390_v11, %v11643_v52  ;;  %v20471_v13 = vld [vmem:[#allocation200_spill] sm:$0xff]  ;;  %v4438_v52 = vrot.slane %v20473_v21, 4 }
 0x4f8   : > { %5150 = vst.msk [vmem:[#allocation2 + $0x12c] sm:$0xf] %vm1720_vm10, %v5071_v26  ;;  %v11747_v25 = vpop.f32.mrf.mxu1  ;;  %v20477_v21 = vld [vmem:[#allocation56_spill] sm:$0xff] }
 0x4f9   : > { %4536 = vrot.lane.b32.xlu0 %v20452_v18, %s12917_s26  ;;  %v17461_v27 = vadd.f32 %v11746_v36, %v6817_v60  ;;  %v5073_v42 = vpop.permute.xlu1 %5072  ;;  %v20472_v60 = vld [vmem:[#allocation202_spill] sm:$0xff] }
 0x4fa   : > { %5151 = vst.msk [vmem:[#allocation2 + $0x148] sm:$0xf] %vm1720_vm10, %v5073_v42  ;;  %v11748_v51 = vpop.f32.mrf.mxu1  ;;  %4538 = vrot.lane.b32.xlu1 %v20456_v6, %s12917_s26  ;;  %v4439_v42 = vor.u32 %v4438_v52, %v4434_v50 }
 0x4fb   : > { %v4728_v61 = vpop.permute.xlu0 %4727  ;;  %v11749_v55 = vadd.f32 %v11748_v51, %v11747_v25  ;;  %v20476_v51 = vld [vmem:[#allocation185_spill] sm:$0xff] }
 0x4fc   : > { %4807 = vst.msk [vmem:[#allocation2 + $0x128] sm:$0xf] %vm1999_vm13, %v4728_v61  ;;  %v20475_v61 = vld [vmem:[#allocation169_spill] sm:$0xff] }
 0x4fd   : > { %5090 = vrot.lane.b32.xlu0 %v20471_v13, %s12917_s26  ;;  %v17470_v18 = vadd.f32 %v11749_v55, %v6820_v1  ;;  %v4730_v26 = vpop.permute.xlu1 %4729  ;;  %v20474_v1 = vld [vmem:[#allocation183_spill] sm:$0xff]  ;;  %v4444_v55 = vrot.slane %v20476_v51, 5 }
 0x4fe   : > { %4808 = vst.msk [vmem:[#allocation2 + $0x144] sm:$0xf] %vm1999_vm13, %v4730_v26  ;;  %5092 = vrot.lane.b32.xlu1 %v20472_v60, %s12917_s26  ;;  %v4448_v25 = vrot.slane %v20474_v1, 4 }
 0x4ff   : > { %v5346_v57 = vpop.permute.xlu0 %5345 }
 0x500   : > { %5425 = vst.msk [vmem:[#allocation2 + $0x12c] sm:$0xf] %vm1999_vm13, %v5346_v57  ;;  %v4449_v57 = vor.u32 %v4448_v25, %v4444_v55  ;;  %v20479_v25 = vld [vmem:[#allocation163_spill] sm:$0xff] }
 0x501   : > { %4747 = vrot.lane.b32.xlu0 %v20457_v24, %s12919_s28  ;;  %v5348_v6 = vpop.permute.xlu1 %5347 }
 0x502   : > { %5426 = vst.msk [vmem:[#allocation2 + $0x148] sm:$0xf] %vm1999_vm13, %v5348_v6  ;;  %4749 = vrot.lane.b32.xlu1 %v20459_v10, %s12919_s28  ;;  %v4440_v6 = vrot.slane %v4439_v42, 4 }
 0x503   : > { %v4093_v36 = vpop.permute.xlu0 %4092 }
 0x504   : > { %4170 = vst.msk [vmem:[#allocation2 + $0x160] sm:$0xf] %vm1505_vm8, %v4093_v36  ;;  %v20478_v36 = vld [vmem:[#allocation131_spill] sm:$0xff]  ;;  %v17499_v42 = vsel %vm13140_vm9, %v4440_v6, %v4444_v55  ;;  %v6825_v55 = vadd.f32 %v17390_v11, %v16782_v22  ;;  %v11649_v6 = vadd.f32 %v16820_v2, %v16809_v43  ;;  %v4693_v2 = vrot.slane %v20356_v46, 5 }
 0x505   : > { %5365 = vrot.lane.b32.xlu0 %v20475_v61, %s12919_s28  ;;  %v4095_v26 = vpop.permute.xlu1 %4094 }
 0x506   : > { %4171 = vst.msk [vmem:[#allocation2 + $0x17c] sm:$0xf] %vm1505_vm8, %v4095_v26  ;;  %5367 = vrot.lane.b32.xlu1 %v20477_v21, %s12919_s28  ;;  %v4450_v26 = vrot.slane %v4449_v57, 4  ;;  %v20480_v57 = vld [vmem:[#allocation194_spill] sm:$0xff] }
 0x507   : > { %v4947_v24 = vpop.permute.xlu0 %4946  ;;  %v5638_v50 = vld [vmem:[#allocation2 + $0x128] sm:$0xff] }
 0x508   : > { %5024 = vst.msk [vmem:[#allocation2 + $0x164] sm:$0xf] %vm1505_vm8, %v4947_v24 }
 0x509   : > { %4112 = vrot.lane.b32.xlu0 %v20478_v36, %s12918_s27  ;;  %v4949_v10 = vpop.permute.xlu1 %4948  ;;  %v5642_v52 = vld [vmem:[#allocation2 + $0x144] sm:$0xff] }
 0x50a   : > { %v12595_v1 = vld [vmem:[#allocation2 + $0x12c] ss:$28 sps:$4 sm:$0xff]   ;;  %5025 = vst.msk [vmem:[#allocation2 + $0x180] sm:$0xf] %vm1505_vm8, %v4949_v10  ;;  %v10993_v51 = vcombine.low %v5638_v50, %v5642_v52  ;;  %4114 = vrot.lane.b32.xlu1 %v20479_v25, %s12918_s27  ;;  %v20481_v10 = vrot.slane %v20480_v57, 5 }
 0x50b   : > { %v4521_v61 = vpop.permute.xlu0 %4520  ;;  %7072 = vmatprep.mubr.bf16.mxu0 %v12595_v1 }
 0x50c   : > { %4598 = vst.msk [vmem:[#allocation2 + $0x160] sm:$0xf] %vm1720_vm10, %v4521_v61  ;;  %7073 = vmatmul.mubr.bf16.gmra.mxu0 %v10993_v51  ;;  %v11750_v24 = vpop.f32.mrf.mxu1  ;;  %v17508_v50 = vsel %vm13140_vm9, %v4450_v26, %v20481_v10 }
 0x50d   : > { %4966 = vrot.lane.b32.xlu0 %v17499_v42, %s12918_s27  ;;  %v4523_v21 = vpop.permute.xlu1 %4522 }
 0x50e   : > { %4599 = vst.msk [vmem:[#allocation2 + $0x17c] sm:$0xf] %vm1720_vm10, %v4523_v21  ;;  %v11751_v52 = vpop.f32.mrf.mxu1  ;;  %4968 = vrot.lane.b32.xlu1 %v17508_v50, %s12918_s27  ;;  %v20482_v21 = vrot.slane %v15574_v29, 5 }
 0x50f   : > { %v5075_v36 = vpop.permute.xlu0 %5074  ;;  %v11752_v1 = vadd.f32 %v11751_v52, %v11750_v24  ;;  %v20483_v24 = vld [vmem:[#allocation203_spill] sm:$0xff] }
 0x510   : > { %5152 = vst.msk [vmem:[#allocation2 + $0x164] sm:$0xf] %vm1720_vm10, %v5075_v36  ;;  %v11753_v61 = vpop.f32.mrf.mxu1  ;;  %v4692_v43 = vrot.slane %v20482_v21, 4  ;;  %v6828_v36 = vadd.f32 %v17390_v11, %v11649_v6  ;;  %v20486_v21 = vld [vmem:[#allocation197_spill] sm:$0xff] }
 0x511   : > { %4540 = vrot.lane.b32.xlu0 %v20468_v20, %s12917_s26  ;;  %v17519_v51 = vadd.f32 %v11752_v1, %v6825_v55  ;;  %v5077_v26 = vpop.permute.xlu1 %5076  ;;  %v20484_v1 = vld [vmem:[#allocation204_spill] sm:$0xff] }
 0x512   : > { %5153 = vst.msk [vmem:[#allocation2 + $0x180] sm:$0xf] %vm1720_vm10, %v5077_v26  ;;  %v11754_v22 = vpop.f32.mrf.mxu1  ;;  %4542 = vrot.lane.b32.xlu1 %v17450_v14, %s12917_s26  ;;  %v17536_v55 = vsel %vm13120_vm5, %v4692_v43, %v4693_v2  ;;  %v20485_v26 = vld [vmem:[#allocation57_spill] sm:$0xff] }
 0x513   : > { %v4732_v25 = vpop.permute.xlu0 %4731  ;;  %v11755_v20 = vadd.f32 %v11754_v22, %v11753_v61  ;;  %v5288_v61 = vrot.slane %v20484_v1, 4 }
 0x514   : > { %4809 = vst.msk [vmem:[#allocation2 + $0x160] sm:$0xf] %vm1999_vm13, %v4732_v25 }
 0x515   : > { %5094 = vrot.lane.b32.xlu0 %v20483_v24, %s12917_s26  ;;  %v17531_v57 = vadd.f32 %v11755_v20, %v6828_v36  ;;  %v4734_v10 = vpop.permute.xlu1 %4733 }
 0x516   : > { %4810 = vst.msk [vmem:[#allocation2 + $0x17c] sm:$0xf] %vm1999_vm13, %v4734_v10  ;;  %5096 = vrot.lane.b32.xlu1 %v17536_v55, %s12917_s26 }
 0x517   : > { %v5350_v52 = vpop.permute.xlu0 %5349 }
 0x518   : > { %5427 = vst.msk [vmem:[#allocation2 + $0x164] sm:$0xf] %vm1999_vm13, %v5350_v52 }
 0x519   : > { %4751 = vrot.lane.b32.xlu0 %v20471_v13, %s12919_s28  ;;  %v5352_v14 = vpop.permute.xlu1 %5351  ;;  %v5292_v13 = vsel %vm13161_vm11, %v5288_v61, %v20486_v21 }
 0x51a   : > { %5428 = vst.msk [vmem:[#allocation2 + $0x180] sm:$0xf] %vm1999_vm13, %v5352_v14  ;;  %4753 = vrot.lane.b32.xlu1 %v20472_v60, %s12919_s28  ;;  %v20487_v14 = vld [vmem:[#allocation198_spill] sm:$0xff] }
 0x51b   : > { %v4097_v6 = vpop.permute.xlu0 %4096 }
 0x51c   : > { %4172 = vst.msk [vmem:[#allocation2 + $0x198] sm:$0xf] %vm1505_vm8, %v4097_v6 }
 0x51d   : > { %5369 = vrot.lane.b32.xlu0 %v20485_v26, %s12919_s28  ;;  %v4099_v25 = vpop.permute.xlu1 %4098  ;;  %v4695_v26 = vrot.slane %v4693_v2, 4 }
 0x51e   : > { %4173 = vst.msk [vmem:[#allocation2 + $0x1b4] sm:$0xf] %vm1505_vm8, %v4099_v25  ;;  %5371 = vrot.lane.b32.xlu1 %v5292_v13, %s12919_s28  ;;  %v6833_v25 = vadd.f32 %v17390_v11, %v16833_v12  ;;  %v4696_v13 = vrot.slane %v20357_v35, 5 }
 0x51f   : > { %v4951_v22 = vpop.permute.xlu0 %4950  ;;  %v5646_v60 = vld [vmem:[#allocation2 + $0x160] sm:$0xff] }
 0x520   : > { %5026 = vst.msk [vmem:[#allocation2 + $0x19c] sm:$0xf] %vm1505_vm8, %v4951_v22  ;;  %v11655_v22 = vadd.f32 %v16869_v3, %v16852_v56  ;;  %v4698_v56 = vrot.slane %v4696_v13, 4  ;;  %v4699_v3 = vrot.slane %v15646_v49, 5 }
 0x521   : > { %4116 = vrot.lane.b32.xlu0 %v15539_v37, %s12918_s27  ;;  %v4953_v43 = vpop.permute.xlu1 %4952  ;;  %v5650_v36 = vld [vmem:[#allocation2 + $0x17c] sm:$0xff] }
 0x522   : > { %v12597_v20 = vld [vmem:[#allocation2 + $0x164] ss:$28 sps:$4 sm:$0xff]   ;;  %5027 = vst.msk [vmem:[#allocation2 + $0x1b8] sm:$0xf] %vm1505_vm8, %v4953_v43  ;;  %v11000_v52 = vcombine.low %v5646_v60, %v5650_v36  ;;  %4118 = vrot.lane.b32.xlu1 %v15574_v29, %s12918_s27  ;;  %v20488_v29 = vld [vmem:[#allocation76_spill] sm:$0xff] }
 0x523   : > { %v4525_v10 = vpop.permute.xlu0 %4524  ;;  %7080 = vmatprep.mubr.bf16.mxu0 %v12597_v20  ;;  %v11756_v6 = vpop.f32.mrf.mxu1  ;;  %v6836_v20 = vadd.f32 %v17390_v11, %v11655_v22 }
 0x524   : > { %4600 = vst.msk [vmem:[#allocation2 + $0x198] sm:$0xf] %vm1720_vm10, %v4525_v10  ;;  %7081 = vmatmul.mubr.bf16.gmra.mxu0 %v11000_v52 }
 0x525   : > { %4970 = vrot.lane.b32.xlu0 %v20487_v14, %s12918_s27  ;;  %v4527_v37 = vpop.permute.xlu1 %4526  ;;  %v11757_v61 = vpop.f32.mrf.mxu1 }
 0x526   : > { %4601 = vst.msk [vmem:[#allocation2 + $0x1b4] sm:$0xf] %vm1720_vm10, %v4527_v37  ;;  %4972 = vrot.lane.b32.xlu1 %v20488_v29, %s12918_s27  ;;  %v11758_v21 = vadd.f32 %v11757_v61, %v11756_v6 }
 0x527   : > { %v5079_v1 = vpop.permute.xlu0 %5078  ;;  %v11759_v43 = vpop.f32.mrf.mxu1 }
 0x528   : > { %5154 = vst.msk [vmem:[#allocation2 + $0x19c] sm:$0xf] %vm1720_vm10, %v5079_v1  ;;  %v17575_v60 = vadd.f32 %v11758_v21, %v6833_v25  ;;  %v17594_v1 = vsel %vm13120_vm5, %v4698_v56, %v4699_v3  ;;  %v20490_v21 = vld [vmem:[#allocation64_spill] sm:$0xff] }
 0x529   : > { %4544 = vrot.lane.b32.xlu0 %v17499_v42, %s12917_s26  ;;  %v5081_v2 = vpop.permute.xlu1 %5080  ;;  %v11760_v36 = vpop.f32.mrf.mxu1  ;;  %v17585_v42 = vsel %vm13120_vm5, %v4695_v26, %v4696_v13  ;;  %v20489_v26 = vld [vmem:[#allocation199_spill] sm:$0xff]  ;;  %v4492_v13 = vshll.u32 %v20490_v21, 16 }
 0x52a   : > { %5155 = vst.msk [vmem:[#allocation2 + $0x1b8] sm:$0xf] %vm1720_vm10, %v5081_v2  ;;  %4546 = vrot.lane.b32.xlu1 %v17508_v50, %s12917_s26  ;;  %v11761_v10 = vadd.f32 %v11760_v36, %v11759_v43 }
 0x52b   : > { %v4736_v12 = vpop.permute.xlu0 %4735  ;;  %v17616_v36 = vrot.slane %v4492_v13, 5 }
 0x52c   : > { %4811 = vst.msk [vmem:[#allocation2 + $0x198] sm:$0xf] %vm1999_vm13, %v4736_v12  ;;  %v17589_v52 = vadd.f32 %v11761_v10, %v6836_v20  ;;  %v4490_v12 = vrot.slane %v16798_v23, 4  ;;  %v4701_v10 = vrot.slane %v4699_v3, 4 }
 0x52d   : > { %5098 = vrot.lane.b32.xlu0 %v17585_v42, %s12917_s26  ;;  %v4738_v6 = vpop.permute.xlu1 %4737 }
 0x52e   : > { %4812 = vst.msk [vmem:[#allocation2 + $0x1b4] sm:$0xf] %vm1999_vm13, %v4738_v6  ;;  %5100 = vrot.lane.b32.xlu1 %v17594_v1, %s12917_s26  ;;  %v17627_v23 = vsel %vm13140_vm9, %v4490_v12, %v17616_v36  ;;  %v11661_v6 = vadd.f32 %v16906_v48, %v16897_v44  ;;  %v4705_v48 = vrot.slane %v20490_v21, 5 }
 0x52f   : > { %v5354_v37 = vpop.permute.xlu0 %5353 }
 0x530   : > { %5429 = vst.msk [vmem:[#allocation2 + $0x19c] sm:$0xf] %vm1999_vm13, %v5354_v37 }
 0x531   : > { %4755 = vrot.lane.b32.xlu0 %v20483_v24, %s12919_s28  ;;  %v5356_v50 = vpop.permute.xlu1 %5355 }
 0x532   : > { %5430 = vst.msk [vmem:[#allocation2 + $0x1b8] sm:$0xf] %vm1999_vm13, %v5356_v50  ;;  %4757 = vrot.lane.b32.xlu1 %v17536_v55, %s12919_s28  ;;  %v4702_v50 = vrot.slane %v16495_v28, 5 }
 0x533   : > { %v4101_v61 = vpop.permute.xlu0 %4100 }
 0x534   : > { %4174 = vst.msk [vmem:[#allocation2 + $0x1d0] sm:$0xf] %vm1505_vm8, %v4101_v61  ;;  %v4704_v44 = vrot.slane %v4702_v50, 4 }
 0x535   : > { %5373 = vrot.lane.b32.xlu0 %v20489_v26, %s12919_s28  ;;  %v4103_v25 = vpop.permute.xlu1 %4102  ;;  %v12599_v43 = vld [vmem:[#allocation2 + $0x198] ss:$28 sps:$4 sm:$0xff]  }
 0x536   : > { %4175 = vst.msk [vmem:[#allocation2 + $0x1ec] sm:$0xf] %vm1505_vm8, %v4103_v25  ;;  %5375 = vrot.lane.b32.xlu1 %v16744_v53, %s12919_s28 }
 0x537   : > { %v4955_v22 = vpop.permute.xlu0 %4954 }
 0x538   : > { %5028 = vst.msk [vmem:[#allocation2 + $0x1d4] sm:$0xf] %vm1505_vm8, %v4955_v22  ;;  %v4902_v22 = vshrl.u32 %v20490_v21, 16 }
 0x539   : > { %4120 = vrot.lane.b32.xlu0 %v20356_v46, %s12918_s27  ;;  %v4957_v24 = vpop.permute.xlu1 %4956  ;;  %v12601_v55 = vld [vmem:[#allocation2 + $0x19c] ss:$28 sps:$4 sm:$0xff]  }
 0x53a   : > { %5029 = vst.msk [vmem:[#allocation2 + $0x1f0] sm:$0xf] %vm1505_vm8, %v4957_v24  ;;  %4122 = vrot.lane.b32.xlu1 %v20357_v35, %s12918_s27  ;;  %7088 = vmatprep.mubr.bf16.mxu0 %v12601_v55  ;;  %v6841_v35 = vadd.f32 %v17390_v11, %v16895_v45  ;;  %v6844_v24 = vadd.f32 %v17390_v11, %v11661_v6 }
 0x53b   : > { %v4529_v2 = vpop.permute.xlu0 %4528  ;;  %7089 = vmatmul.mubr.bf16.gmra.mxu0 %v12599_v43  ;;  %v11762_v53 = vpop.f32.mrf.mxu1 }
 0x53c   : > { %4602 = vst.msk [vmem:[#allocation2 + $0x1d0] sm:$0xf] %vm1720_vm10, %v4529_v2 }
 0x53d   : > { %4974 = vrot.lane.b32.xlu0 %v16760_v15, %s12918_s27  ;;  %v4531_v46 = vpop.permute.xlu1 %4530  ;;  %v11763_v20 = vpop.f32.mrf.mxu1 }
 0x53e   : > { %4603 = vst.msk [vmem:[#allocation2 + $0x1ec] sm:$0xf] %vm1720_vm10, %v4531_v46  ;;  %4976 = vrot.lane.b32.xlu1 %v17627_v23, %s12918_s27  ;;  %v11764_v37 = vadd.f32 %v11763_v20, %v11762_v53  ;;  %v5309_v46 = vrot.slane %v4902_v22, 5  ;;  %v20491_v20 = vld [vmem:[#allocation67_spill] sm:$0xff] }
 0x53f   : > { %v5083_v56 = vpop.permute.xlu0 %5082  ;;  %v11765_v61 = vpop.f32.mrf.mxu1 }
 0x540   : > { %5156 = vst.msk [vmem:[#allocation2 + $0x1d4] sm:$0xf] %vm1720_vm10, %v5083_v56  ;;  %v17639_v26 = vadd.f32 %v11764_v37, %v6841_v35  ;;  %v5310_v56 = vrot.slane %v4492_v13, 6  ;;  %v4904_v35 = vrot.slane %v4902_v22, 4  ;;  %v4908_v37 = vshll.u32 %v20491_v20, 16  ;;  %v20492_v22 = vld [vmem:[#allocation68_spill] sm:$0xff] }
 0x541   : > { %4548 = vrot.lane.b32.xlu0 %v20487_v14, %s12917_s26  ;;  %v5085_v3 = vpop.permute.xlu1 %5084  ;;  %v11766_v25 = vpop.f32.mrf.mxu1  ;;  %v17650_v14 = vsel %vm13120_vm5, %v4701_v10, %v4702_v50  ;;  %v4912_v10 = vshrl.u32 %v20491_v20, 16 }
 0x542   : > { %5157 = vst.msk [vmem:[#allocation2 + $0x1f0] sm:$0xf] %vm1720_vm10, %v5085_v3  ;;  %4550 = vrot.lane.b32.xlu1 %v20488_v29, %s12917_s26  ;;  %v11767_v43 = vadd.f32 %v11766_v25, %v11765_v61  ;;  %v17663_v29 = vsel %vm13120_vm5, %v4704_v44, %v4705_v48  ;;  %v17678_v25 = vor.u32 %v5310_v56, %v5309_v46  ;;  %v4910_v44 = vrot.slane %v4908_v37, 5 }
 0x543   : > { %v4740_v45 = vpop.permute.xlu0 %4739  ;;  %v17654_v55 = vpop.f32.mrf.mxu1  ;;  %v4914_v50 = vrot.slane %v4912_v10, 4  ;;  %v5314_v21 = vrot.slane %v4912_v10, 5 }
 0x544   : > { %4813 = vst.msk [vmem:[#allocation2 + $0x1d0] sm:$0xf] %vm1999_vm13, %v4740_v45  ;;  %v17656_v2 = vadd.f32 %v11767_v43, %v6844_v24  ;;  %v5308_v45 = vrot.slane %v16746_v4, 4  ;;  %v4918_v24 = vshll.u32 %v20492_v22, 16 }
 0x545   : > { %5102 = vrot.lane.b32.xlu0 %v17650_v14, %s12917_s26  ;;  %v4742_v12 = vpop.permute.xlu1 %4741  ;;  %v12241_v53 = vpop.f32.mrf.mxu1  ;;  %v4915_v4 = vor.u32 %v4914_v50, %v4910_v44 }
 0x546   : > { %4814 = vst.msk [vmem:[#allocation2 + $0x1ec] sm:$0xf] %vm1999_vm13, %v4742_v12  ;;  %5104 = vrot.lane.b32.xlu1 %v17663_v29, %s12917_s26  ;;  %v5312_v53 = vsel %vm13161_vm11, %v5308_v45, %v17678_v25  ;;  %v4920_v56 = vrot.slane %v4918_v24, 5 }
 0x547   : > { %v5358_v11 = vpop.permute.xlu0 %5357  ;;  %v17671_v6 = vpop.f32.mrf.mxu1 }
 0x548   : > { %5431 = vst.msk [vmem:[#allocation2 + $0x1d4] sm:$0xf] %vm1999_vm13, %v5358_v11 }
 0x549   : > { %4759 = vrot.lane.b32.xlu0 %v17585_v42, %s12919_s28  ;;  %v5360_v61 = vpop.permute.xlu1 %5359  ;;  %v12242_v3 = vpop.f32.mrf.mxu1  ;;  %v4905_v42 = vor.u32 %v4904_v35, %v17616_v36  ;;  %v4916_v36 = vrot.slane %v4915_v4, 4 }
 0x54a   : > { %5432 = vst.msk [vmem:[#allocation2 + $0x1f0] sm:$0xf] %vm1999_vm13, %v5360_v61  ;;  %4761 = vrot.lane.b32.xlu1 %v17594_v1, %s12919_s28 }
 0x54b   : > { %v4105_v13 = vpop.permute.xlu0 %4104  ;;  %v17689_v43 = vpop.f32.mrf.mxu1  ;;  %v4906_v1 = vrot.slane %v4905_v42, 4  ;;  %v4921_v42 = vsel %vm13140_vm9, %v4916_v36, %v4920_v56  ;;  %v5048_v56 = vrot.slane %v20492_v22, 5 }
 0x54c   : > { %4176 = vst.msk [vmem:[#allocation2 + $0x208] sm:$0xf] %vm1505_vm8, %v4105_v13 }
 0x54d   : > { %5377 = vrot.lane.b32.xlu0 %v16765_v8, %s12919_s28  ;;  %v4107_v12 = vpop.permute.xlu1 %4106  ;;  %v12245_v46 = vpop.f32.mrf.mxu1  ;;  %v12602_v50 = vld [vmem:[#allocation2 + $0x1d0] ss:$28 sps:$4 sm:$0xff]  }
 0x54e   : > { %4177 = vst.msk [vmem:[#allocation2 + $0x224] sm:$0xf] %vm1505_vm8, %v4107_v12  ;;  %5379 = vrot.lane.b32.xlu1 %v5312_v53, %s12919_s28 }
 0x54f   : > { %v4959_v11 = vpop.permute.xlu0 %4958  ;;  %v17699_v8 = vpop.f32.mrf.mxu1 }
 0x550   : > { %5030 = vst.msk [vmem:[#allocation2 + $0x20c] sm:$0xf] %vm1505_vm8, %v4959_v11 }
 0x551   : > { %4124 = vrot.lane.b32.xlu0 %v15646_v49, %s12918_s27  ;;  %v4961_v35 = vpop.permute.xlu1 %4960  ;;  %v12604_v61 = vld [vmem:[#allocation2 + $0x1d4] ss:$28 sps:$4 sm:$0xff]   ;;  %v12246_v3 = vpop.f32.mrf.mxu1  ;;  %v4911_v49 = vsel %vm13140_vm9, %v4906_v1, %v4910_v44  ;;  %v5044_v1 = vrot.slane %v4705_v48, 4  ;;  %vm7381_vm9 = vcmask 519168  }
 0x552   : > { %5031 = vst.msk [vmem:[#allocation2 + $0x228] sm:$0xf] %vm1505_vm8, %v4961_v35  ;;  %4126 = vrot.lane.b32.xlu1 %v16495_v28, %s12918_s27  ;;  %7096 = vmatprep.mubr.bf16.mxu0 %v12604_v61  ;;  %v5045_v28 = vrot.slane %v20491_v20, 5 }
 0x553   : > { %v4533_v13 = vpop.permute.xlu0 %4532  ;;  %v11784_v45 = vpop.f32.mrf.mxu0  ;;  %7097 = vmatmul.mubr.bf16.gmra.mxu0 %v12602_v50 }
 0x554   : > { %4604 = vst.msk [vmem:[#allocation2 + $0x208] sm:$0xf] %vm1720_vm10, %v4533_v13  ;;  %v17712_v12 = vpop.f32.mrf.mxu1  ;;  %v5047_v36 = vrot.slane %v5045_v28, 4  ;;  %v5319_v13 = vshrl.u32 %v20492_v22, 16  ;;  %v5046_v48 = vsel %vm13120_vm5, %v5044_v1, %v5045_v28  ;;  %v5313_v1 = vrot.slane %v17678_v25, 4 }
 0x555   : > { %4978 = vrot.lane.b32.xlu0 %v4911_v49, %s12918_s27  ;;  %v4535_v4 = vpop.permute.xlu1 %4534  ;;  %v11785_v53 = vpop.f32.mrf.mxu0 }
 0x556   : > { %4605 = vst.msk [vmem:[#allocation2 + $0x224] sm:$0xf] %vm1720_vm10, %v4535_v4  ;;  %4980 = vrot.lane.b32.xlu1 %v4921_v42, %s12918_s27  ;;  %v11786_v44 = vadd.f32 %v11785_v53, %v11784_v45  ;;  %v12249_v46 = vpop.f32.mrf.mxu1  ;;  %v5315_v42 = vrot.slane %v4908_v37, 6  ;;  %v5049_v10 = vsel %vm13120_vm5, %v5047_v36, %v5048_v56  ;;  %v5321_v20 = vrot.slane %v5319_v13, 5  ;;  %v12621_v36 = vld [vmem:[%s19504_s5 + $0x38] sm:$0xff]   ;;  %s10740_s27 = scalar_lea.sflag [#allocation6], %s323_s29 }
 0x557   : > { %v5087_v11 = vpop.permute.xlu0 %5086  ;;  %v11787_v16 = vpop.f32.mrf.mxu0  ;;  %v5322_v37 = vrot.slane %v4918_v24, 6 }
 0x558   : > { %5158 = vst.msk [vmem:[#allocation2 + $0x20c] sm:$0xf] %vm1720_vm10, %v5087_v11  ;;  %v7035_v35 = vadd.f32 %v11786_v44, %v16939_v0  ;;  %v17724_v61 = vpop.f32.mrf.mxu1 }
 0x559   : > { %4552 = vrot.lane.b32.xlu0 %v16760_v15, %s12917_s26  ;;  %v5089_v50 = vpop.permute.xlu1 %5088  ;;  %v11788_v49 = vpop.f32.mrf.mxu0 }
 0x55a   : > { %5159 = vst.msk [vmem:[#allocation2 + $0x228] sm:$0xf] %vm1720_vm10, %v5089_v50  ;;  %v7188_v15 = vadd.f32 %v17654_v55, %v7035_v35  ;;  %4554 = vrot.lane.b32.xlu1 %v17627_v23, %s12917_s26  ;;  %v11789_v0 = vadd.f32 %v11788_v49, %v11787_v16  ;;  %v12250_v45 = vpop.f32.mrf.mxu1  ;;  %v12620_v23 = vld [vmem:[%s19504_s5 + $0x78] sm:$0xff]   ;;  %v5316_v16 = vor.u32 %v5315_v42, %v5314_v21  ;;  %v12626_v49 = vld [vmem:[%s19504_s5 + $0x30] sm:$0xff]  }
 0x55b   : > { %v4744_v3 = vpop.permute.xlu0 %4743  ;;  %11891 = vmatprep.subr.bf16.mxu0 %v12620_v23  ;;  %v5323_v50 = vor.u32 %v5322_v37, %v5321_v20 }
 0x55c   : > { %4815 = vst.msk [vmem:[#allocation2 + $0x208] sm:$0xf] %vm1999_vm13, %v4744_v3  ;;  %v7306_v4 = vmax.f32 %v7188_v15, 0.0  ;;  %v7038_v55 = vadd.f32 %v11789_v0, %v16956_v40  ;;  %v17742_v53 = vpop.f32.mrf.mxu1  ;;  %11892 = vmatpush3.bf16.msra.mxu0 %v12621_v36  ;;  %v5318_v35 = vrot.slane %v5316_v16, 4 }
 0x55d   : > { %5106 = vrot.lane.b32.xlu0 %v5046_v48, %s12917_s26  ;;  %v4746_v11 = vpop.permute.xlu1 %4745 }
 0x55e   : > { %4816 = vst.msk [vmem:[#allocation2 + $0x224] sm:$0xf] %vm1999_vm13, %v4746_v11  ;;  %v11486_v44 = vpack.c.bf16 %v7306_v4, %v7306_v4  ;;  %v7191_v46 = vadd.f32 %v17671_v6, %v7038_v55  ;;  %5108 = vrot.lane.b32.xlu1 %v5049_v10, %s12917_s26  ;;  %v12253_v40 = vpop.f32.mrf.mxu1  ;;  %v12622_v6 = vld [vmem:[%s19504_s5 + $0x70] sm:$0xff]   ;;  %v5324_v4 = vsel %vm13161_vm11, %v5318_v35, %v5323_v50 }
 0x55f   : > { %v5362_v28 = vpop.permute.xlu0 %5361  ;;  %11893 = vmatprep.subr.bf16.mxu0 %v12622_v6 }
 0x560   : > { %5433 = vst.msk [vmem:[#allocation2 + $0x20c] sm:$0xf] %vm1999_vm13, %v5362_v28  ;;  %v7307_v22 = vmax.f32 %v7191_v46, 0.0  ;;  %v17762_v56 = vpop.f32.mrf.mxu1  ;;  %v11137_v21 = vrot.slane %v11486_v44, 9  ;;  %v11139_v45 = vrot.slane %v11486_v44, 11  ;;  %11894 = vmatpush3.bf16.msra.mxu0 %v12626_v49  ;;  %v11138_v55 = vrot.slane %v11486_v44, 10 }
 0x561   : > { %4763 = vrot.lane.b32.xlu0 %v17650_v14, %s12919_s28  ;;  %v5364_v24 = vpop.permute.xlu1 %5363  ;;  %7382 = vst.msk [vmem:[#allocation3] sm:$0xf] %vm7381_vm9, %v11486_v44  ;;  %v5317_v14 = vsel %vm13161_vm11, %v5313_v1, %v5316_v16  ;;  %vm7466_vm11 = vcmask 1043968  }
 0x562   : > { %5434 = vst.msk [vmem:[#allocation2 + $0x228] sm:$0xf] %vm1999_vm13, %v5364_v24  ;;  %v17766_v13 = vpack.c.bf16 %v7307_v22, %v7307_v22  ;;  %4765 = vrot.lane.b32.xlu1 %v17663_v29, %s12919_s28  ;;  %v12254_v3 = vpop.f32.mrf.mxu1 }
 0x563   : > { %v4109_v25 = vpop.permute.xlu0 %4108 }
 0x564   : > { %4178 = vst.msk [vmem:[#allocation2 + $0x240] sm:$0xf] %vm1505_vm8, %v4109_v25  ;;  %v17777_v0 = vpop.f32.mrf.mxu1  ;;  %v7401_v48 = vrot.slane %v17766_v13, 5  ;;  %v7536_v42 = vrot.slane %v17766_v13, 7  ;;  %v7480_v29 = vrot.slane %v17766_v13, 6 }
 0x565   : > { %5381 = vrot.lane.b32.xlu0 %v5317_v14, %s12919_s28  ;;  %v4111_v15 = vpop.permute.xlu1 %4110  ;;  %7383 = vst.msk [vmem:[#allocation3 + $0x34] sm:$0xf] %vm7381_vm9, %v17766_v13  ;;  %7657 = vst.msk [vmem:[#allocation3 + $0x8] sm:$0xf] %vm7381_vm9, %v17766_v13  ;;  %v12605_v46 = vld [vmem:[#allocation2 + $0x208] ss:$28 sps:$4 sm:$0xff]  }
 0x566   : > { %4179 = vst.msk [vmem:[#allocation2 + $0x25c] sm:$0xf] %vm1505_vm8, %v4111_v15  ;;  %5383 = vrot.lane.b32.xlu1 %v5324_v4, %s12919_s28  ;;  %v12257_v11 = vpop.f32.mrf.mxu1  ;;  %v7402_v23 = vsel %vm13120_vm5, %v11137_v21, %v7401_v48  ;;  %v7537_v28 = vsel %vm13261_vm15, %v11139_v45, %v7536_v42  ;;  %v7481_v20 = vsel %vm13183_vm12, %v11138_v55, %v7480_v29  ;;  %v12627_v15 = vld [vmem:[%s19504_s5 + $0x68] sm:$0xff]  }
 0x567   : > { %v4963_v10 = vpop.permute.xlu0 %4962  ;;  %7523 = vst.msk [vmem:[#allocation3 + $0x4] sm:$0xf] %vm7381_vm9, %v7481_v20  ;;  %v12628_v45 = vld [vmem:[%s19504_s5 + $0x28] sm:$0xff]   ;;  %11895 = vmatprep.subr.bf16.mxu0 %v12627_v15  ;;  %v7482_v15 = vrot.slane %v7480_v29, 4 }
 0x568   : > { %5032 = vst.msk [vmem:[#allocation2 + $0x244] sm:$0xf] %vm1505_vm8, %v4963_v10  ;;  %v17804_v44 = vpop.f32.mrf.mxu1  ;;  %11896 = vmatpush3.bf16.msra.mxu0 %v12628_v45 }
 0x569   : > { %7433 = vrot.lane.b32.xlu0 %v7402_v23, %s12917_s26  ;;  %v4965_v37 = vpop.permute.xlu1 %4964  ;;  %v12607_v40 = vld [vmem:[#allocation2 + $0x20c] ss:$28 sps:$4 sm:$0xff]  }
 0x56a   : > { %5033 = vst.msk [vmem:[#allocation2 + $0x260] sm:$0xf] %vm1505_vm8, %v4965_v37  ;;  %v12258_v16 = vpop.f32.mrf.mxu1  ;;  %7104 = vmatprep.mubr.bf16.mxu0 %v12607_v40  ;;  %v12631_v40 = vld [vmem:[%s19504_s5 + $0x58] sm:$0xff]  }
 0x56b   : > { %v4537_v1 = vpop.permute.xlu0 %4536  ;;  %7105 = vmatmul.mubr.bf16.gmra.mxu0 %v12605_v46  ;;  %v12629_v46 = vld [vmem:[%s19504_s5 + $0x60] sm:$0xff]  }
 0x56c   : > { %4606 = vst.msk [vmem:[#allocation2 + $0x240] sm:$0xf] %vm1720_vm10, %v4537_v1  ;;  %v11790_v36 = vpop.f32.mrf.mxu0  ;;  %v17810_v22 = vpop.f32.mrf.mxu1  ;;  %11897 = vmatprep.subr.bf16.mxu0 %v12629_v46  ;;  %v12634_v46 = vld [vmem:[%s19504_s5 + $0x10] sm:$0xff]  }
 0x56d   : > { %7568 = vrot.lane.b32.xlu0 %v7537_v28, %s12917_s26  ;;  %v4539_v6 = vpop.permute.xlu1 %4538 }
 0x56e   : > { %4607 = vst.msk [vmem:[#allocation2 + $0x25c] sm:$0xf] %vm1720_vm10, %v4539_v6  ;;  %v11791_v25 = vpop.f32.mrf.mxu0  ;;  %v12261_v50 = vpop.f32.mrf.mxu1  ;;  %v7403_v6 = vrot.slane %v7401_v48, 4  ;;  %v12633_v48 = vld [vmem:[%s19504_s5 + $0x50] sm:$0xff]  }
 0x56f   : > { %v5091_v24 = vpop.permute.xlu0 %5090  ;;  %v11792_v35 = vadd.f32 %v11791_v25, %v11790_v36  ;;  %v12632_v25 = vld [vmem:[%s19504_s5 + $0x18] sm:$0xff]  }
 0x570   : > { %5160 = vst.msk [vmem:[#allocation2 + $0x244] sm:$0xf] %vm1720_vm10, %v5091_v24  ;;  %v11793_v14 = vpop.f32.mrf.mxu0  ;;  %v17815_v21 = vpop.f32.mrf.mxu1  ;;  %v7538_v24 = vrot.slane %v7536_v42, 4 }
 0x571   : > { %v7043_v3 = vadd.f32 %v11792_v35, %v16971_v7  ;;  %v5093_v49 = vpop.permute.xlu1 %5092 }
 0x572   : > { %5161 = vst.msk [vmem:[#allocation2 + $0x260] sm:$0xf] %vm1720_vm10, %v5093_v49  ;;  %v11794_v4 = vpop.f32.mrf.mxu0  ;;  %v12262_v11 = vpop.f32.mrf.mxu1 }
 0x573   : > { %v4748_v10 = vpop.permute.xlu0 %4747  ;;  %v7196_v55 = vadd.f32 %v17689_v43, %v7043_v3  ;;  %v11795_v7 = vadd.f32 %v11794_v4, %v11793_v14  ;;  %v12630_v43 = vld [vmem:[%s19504_s5 + $0x20] sm:$0xff]  }
 0x574   : > { %4817 = vst.msk [vmem:[#allocation2 + $0x240] sm:$0xf] %vm1999_vm13, %v4748_v10  ;;  %v17827_v37 = vpop.f32.mrf.mxu1  ;;  %11898 = vmatpush3.bf16.msra.mxu0 %v12630_v43 }
 0x575   : > { %v7308_v23 = vmax.f32 %v7196_v55, 0.0  ;;  %v7046_v28 = vadd.f32 %v11795_v7, %v16980_v9  ;;  %v4750_v20 = vpop.permute.xlu1 %4749  ;;  %11899 = vmatprep.subr.bf16.mxu0 %v12631_v40 }
 0x576   : > { %4818 = vst.msk [vmem:[#allocation2 + $0x25c] sm:$0xf] %vm1999_vm13, %v4750_v20  ;;  %v12265_v36 = vpop.f32.mrf.mxu1 }
 0x577   : > { %v5366_v1 = vpop.permute.xlu0 %5365  ;;  %v11488_v16 = vpack.c.bf16 %v7308_v23, %v7308_v23  ;;  %v7199_v9 = vadd.f32 %v17699_v8, %v7046_v28 }
 0x578   : > { %5435 = vst.msk [vmem:[#allocation2 + $0x244] sm:$0xf] %vm1999_vm13, %v5366_v1  ;;  %v17848_v14 = vpop.f32.mrf.mxu1  ;;  %11900 = vmatpush3.bf16.msra.mxu0 %v12632_v25  ;;  %v12635_v1 = vld [vmem:[%s19504_s5 + $0x48] sm:$0xff]  }
 0x579   : > { %v7309_v35 = vmax.f32 %v7199_v9, 0.0  ;;  %v5368_v50 = vpop.permute.xlu1 %5367  ;;  %v7404_v8 = vrot.slane %v11488_v16, 5  ;;  %v7539_v3 = vrot.slane %v11488_v16, 7  ;;  %7384 = vst.msk [vmem:[#allocation3 + $0x68] sm:$0xf] %vm7381_vm9, %v11488_v16  ;;  %v7483_v42 = vrot.slane %v11488_v16, 6  ;;  %11901 = vmatprep.subr.bf16.mxu0 %v12633_v48 }
 0x57a   : > { %7658 = vst.msk [vmem:[#allocation3 + $0x3c] sm:$0xf] %vm7381_vm9, %v11488_v16  ;;  %v12266_v10 = vpop.f32.mrf.mxu1  ;;  %v12636_v25 = vld [vmem:[%s19504_s5 + $0x8] sm:$0xff]  }
 0x57b   : > { %5436 = vst.msk [vmem:[#allocation2 + $0x260] sm:$0xf] %vm1999_vm13, %v5368_v50  ;;  %v4113_v49 = vpop.permute.xlu0 %4112  ;;  %v17858_v45 = vpack.c.bf16 %v7309_v35, %v7309_v35  ;;  %v7405_v4 = vsel %vm13120_vm5, %v7403_v6, %v7404_v8  ;;  %v7540_v55 = vsel %vm13261_vm15, %v7538_v24, %v7539_v3  ;;  %v7406_v7 = vrot.slane %v7404_v8, 4 }
 0x57c   : > { %4180 = vst.msk [vmem:[#allocation2 + $0x278] sm:$0xf] %vm1505_vm8, %v4113_v49  ;;  %7435 = vrot.lane.b32.xlu1 %v7405_v4, %s12917_s26  ;;  %v7484_v11 = vsel %vm13183_vm12, %v7482_v15, %v7483_v42  ;;  %v17868_v29 = vpop.f32.mrf.mxu1  ;;  %v7541_v28 = vrot.slane %v7539_v3, 4  ;;  %v7485_v16 = vrot.slane %v7483_v42, 4  ;;  %11902 = vmatpush3.bf16.msra.mxu0 %v12634_v46  ;;  %v12637_v42 = vld [vmem:[%s19504_s5 + $0x40] sm:$0xff]  }
 0x57d   : > { %v4115_v13 = vpop.permute.xlu1 %4114  ;;  %v7407_v23 = vrot.slane %v17858_v45, 5  ;;  %v7542_v20 = vrot.slane %v17858_v45, 7  ;;  %7385 = vst.msk [vmem:[#allocation3 + $0x9c] sm:$0xf] %vm7381_vm9, %v17858_v45  ;;  %7659 = vst.msk [vmem:[#allocation3 + $0x70] sm:$0xf] %vm7381_vm9, %v17858_v45  ;;  %11903 = vmatprep.subr.bf16.mxu0 %v12635_v1 }
 0x57e   : > { %7524 = vst.msk [vmem:[#allocation3 + $0x38] sm:$0xf] %vm7381_vm9, %v7484_v11  ;;  %v7486_v43 = vrot.slane %v17858_v45, 6  ;;  %v12269_v9 = vpop.f32.mrf.mxu1  ;;  %v12608_v8 = vld [vmem:[#allocation2 + $0x240] ss:$28 sps:$4 sm:$0xff]  }
 0x57f   : > { %4181 = vst.msk [vmem:[#allocation2 + $0x294] sm:$0xf] %vm1505_vm8, %v4115_v13  ;;  %v4967_v40 = vpop.permute.xlu0 %4966  ;;  %v7408_v36 = vsel %vm13120_vm5, %v7406_v7, %v7407_v23  ;;  %v7543_v6 = vsel %vm13261_vm15, %v7541_v28, %v7542_v20 }
 0x580   : > { %5034 = vst.msk [vmem:[#allocation2 + $0x27c] sm:$0xf] %vm1505_vm8, %v4967_v40  ;;  %7570 = vrot.lane.b32.xlu1 %v7540_v55, %s12917_s26  ;;  %7437 = vrot.lane.b32.xlu0 %v7408_v36, %s12917_s26  ;;  %v7487_v24 = vsel %vm13183_vm12, %v7485_v16, %v7486_v43  ;;  %v17903_v50 = vpop.f32.mrf.mxu1  ;;  %v12638_v55 = vld [vmem:[%s19504_s5] sm:$0xff]  }
 0x581   : > { %v4969_v35 = vpop.permute.xlu1 %4968  ;;  %7525 = vst.msk [vmem:[#allocation3 + $0x6c] sm:$0xf] %vm7381_vm9, %v7487_v24  ;;  %11904 = vmatpush3.bf16.msra.mxu0 %v12636_v25 }
 0x582   : > { %v12610_v3 = vld [vmem:[#allocation2 + $0x244] ss:$28 sps:$4 sm:$0xff]   ;;  %5035 = vst.msk [vmem:[#allocation2 + $0x298] sm:$0xf] %vm1505_vm8, %v4969_v35  ;;  %v12270_v49 = vpop.f32.mrf.mxu1  ;;  %11905 = vmatprep.subr.bf16.mxu0 %v12637_v42 }
 0x583   : > { %v4541_v48 = vpop.permute.xlu0 %4540  ;;  %7112 = vmatprep.mubr.bf16.mxu0 %v12610_v3 }
 0x584   : > { %4608 = vst.msk [vmem:[#allocation2 + $0x278] sm:$0xf] %vm1720_vm10, %v4541_v48  ;;  %v11796_v15 = vpop.f32.mrf.mxu0  ;;  %7113 = vmatmul.mubr.bf16.gmra.mxu0 %v12608_v8  ;;  %7572 = vrot.lane.b32.xlu0 %v7543_v6, %s12917_s26  ;;  %v17912_v4 = vpop.f32.mrf.mxu1 }
 0x585   : > { %v4543_v10 = vpop.permute.xlu1 %4542  ;;  %11906 = vmatpush3.bf16.msra.mxu0 %v12638_v55 }
 0x586   : > { %4609 = vst.msk [vmem:[#allocation2 + $0x294] sm:$0xf] %vm1720_vm10, %v4543_v10  ;;  %v11797_v11 = vpop.f32.mrf.mxu0  ;;  %v12273_v28 = vpop.f32.mrf.mxu1  ;;  %v7544_v10 = vrot.slane %v7542_v20, 4 }
 0x587   : > { %v5095_v7 = vpop.permute.xlu0 %5094  ;;  %v11798_v13 = vadd.f32 %v11797_v11, %v11796_v15 }
 0x588   : > { %5162 = vst.msk [vmem:[#allocation2 + $0x27c] sm:$0xf] %vm1720_vm10, %v5095_v7  ;;  %v11799_v46 = vpop.f32.mrf.mxu0  ;;  %v17920_v16 = vpop.f32.mrf.mxu1 }
 0x589   : > { %v7051_v40 = vadd.f32 %v11798_v13, %v16998_v32  ;;  %v5097_v1 = vpop.permute.xlu1 %5096 }
 0x58a   : > { %5163 = vst.msk [vmem:[#allocation2 + $0x298] sm:$0xf] %vm1720_vm10, %v5097_v1  ;;  %v11800_v36 = vpop.f32.mrf.mxu0  ;;  %v12274_v25 = vpop.f32.mrf.mxu1 }
 0x58b   : > { %v4752_v9 = vpop.permute.xlu0 %4751  ;;  %v7204_v6 = vadd.f32 %v17712_v12, %v7051_v40  ;;  %v11801_v24 = vadd.f32 %v11800_v36, %v11799_v46  ;;  %v7409_v12 = vrot.slane %v7407_v23, 4  ;;  %v7488_v23 = vrot.slane %v7486_v43, 4 }
 0x58c   : > { %4819 = vst.msk [vmem:[#allocation2 + $0x278] sm:$0xf] %vm1999_vm13, %v4752_v9  ;;  %v17926_v48 = vpop.f32.mrf.mxu1 }
 0x58d   : > { %v7310_v35 = vmax.f32 %v7204_v6, 0.0  ;;  %v7054_v8 = vadd.f32 %v11801_v24, %v17007_v63  ;;  %v4754_v3 = vpop.permute.xlu1 %4753 }
 0x58e   : > { %4820 = vst.msk [vmem:[#allocation2 + $0x294] sm:$0xf] %vm1999_vm13, %v4754_v3  ;;  %v12277_v15 = vpop.f32.mrf.mxu1 }
 0x58f   : > { %v5370_v32 = vpop.permute.xlu0 %5369  ;;  %v11490_v42 = vpack.c.bf16 %v7310_v35, %v7310_v35  ;;  %v7207_v49 = vadd.f32 %v17724_v61, %v7054_v8 }
 0x590   : > { %5437 = vst.msk [vmem:[#allocation2 + $0x27c] sm:$0xf] %vm1999_vm13, %v5370_v32  ;;  %v17935_v7 = vpop.f32.mrf.mxu1 }
 0x591   : > { %v7311_v55 = vmax.f32 %v7207_v49, 0.0  ;;  %v5372_v63 = vpop.permute.xlu1 %5371  ;;  %v7410_v11 = vrot.slane %v11490_v42, 5  ;;  %v7545_v13 = vrot.slane %v11490_v42, 7  ;;  %v7489_v28 = vrot.slane %v11490_v42, 6  ;;  %7386 = vst.msk [vmem:[#allocation3 + $0xd0] sm:$0xf] %vm7381_vm9, %v11490_v42 }
 0x592   : > { %7660 = vst.msk [vmem:[#allocation3 + $0xa4] sm:$0xf] %vm7381_vm9, %v11490_v42  ;;  %v12278_v20 = vpop.f32.mrf.mxu1 }
 0x593   : > { %5438 = vst.msk [vmem:[#allocation2 + $0x298] sm:$0xf] %vm1999_vm13, %v5372_v63  ;;  %v4117_v61 = vpop.permute.xlu0 %4116  ;;  %v17942_v46 = vpack.c.bf16 %v7311_v55, %v7311_v55  ;;  %v7411_v40 = vsel %vm13120_vm5, %v7409_v12, %v7410_v11  ;;  %v7546_v1 = vsel %vm13261_vm15, %v7544_v10, %v7545_v13  ;;  %v7412_v9 = vrot.slane %v7410_v11, 4 }
 0x594   : > { %4182 = vst.msk [vmem:[#allocation2 + $0x2b0] sm:$0xf] %vm1505_vm8, %v4117_v61  ;;  %7439 = vrot.lane.b32.xlu1 %v7411_v40, %s12917_s26  ;;  %v7490_v36 = vsel %vm13183_vm12, %v7488_v23, %v7489_v28  ;;  %v17952_v45 = vpop.f32.mrf.mxu1  ;;  %v7547_v24 = vrot.slane %v7545_v13, 4  ;;  %v7491_v3 = vrot.slane %v7489_v28, 4 }
 0x595   : > { %v4119_v6 = vpop.permute.xlu1 %4118  ;;  %v7413_v43 = vrot.slane %v17942_v46, 5  ;;  %v7548_v25 = vrot.slane %v17942_v46, 7  ;;  %v7492_v35 = vrot.slane %v17942_v46, 6  ;;  %7387 = vst.msk [vmem:[#allocation3 + $0x104] sm:$0xf] %vm7381_vm9, %v17942_v46 }
 0x596   : > { %7661 = vst.msk [vmem:[#allocation3 + $0xd8] sm:$0xf] %vm7381_vm9, %v17942_v46  ;;  %7526 = vst.msk [vmem:[#allocation3 + $0xa0] sm:$0xf] %vm7381_vm9, %v7490_v36  ;;  %v12281_v32 = vpop.f32.mrf.mxu1  ;;  %v12611_v55 = vld [vmem:[#allocation2 + $0x278] ss:$28 sps:$4 sm:$0xff]  }
 0x597   : > { %4183 = vst.msk [vmem:[#allocation2 + $0x2cc] sm:$0xf] %vm1505_vm8, %v4119_v6  ;;  %v4971_v8 = vpop.permute.xlu0 %4970  ;;  %v7414_v42 = vsel %vm13120_vm5, %v7412_v9, %v7413_v43  ;;  %v7549_v49 = vsel %vm13261_vm15, %v7547_v24, %v7548_v25  ;;  %v17974_v15 = vsel %vm13183_vm12, %v7491_v3, %v7492_v35 }
 0x598   : > { %5036 = vst.msk [vmem:[#allocation2 + $0x2b4] sm:$0xf] %vm1505_vm8, %v4971_v8  ;;  %7574 = vrot.lane.b32.xlu1 %v7546_v1, %s12917_s26  ;;  %7441 = vrot.lane.b32.xlu0 %v7414_v42, %s12917_s26  ;;  %v17977_v10 = vpop.f32.mrf.mxu1 }
 0x599   : > { %7759 = vst.msk [vmem:[#allocation3 + $0xc] sm:$0xf] %vm7381_vm9, %v7549_v49  ;;  %v4973_v12 = vpop.permute.xlu1 %4972  ;;  %7527 = vst.msk [vmem:[#allocation3 + $0xd4] sm:$0xf] %vm7381_vm9, %v17974_v15 }
 0x59a   : > { %v12613_v63 = vld [vmem:[#allocation2 + $0x27c] ss:$28 sps:$4 sm:$0xff]   ;;  %5037 = vst.msk [vmem:[#allocation2 + $0x2d0] sm:$0xf] %vm1505_vm8, %v4973_v12  ;;  %v12282_v13 = vpop.f32.mrf.mxu1 }
 0x59b   : > { %v4545_v11 = vpop.permute.xlu0 %4544  ;;  %7120 = vmatprep.mubr.bf16.mxu0 %v12613_v63 }
 0x59c   : > { %4610 = vst.msk [vmem:[#allocation2 + $0x2b0] sm:$0xf] %vm1720_vm10, %v4545_v11  ;;  %v11802_v28 = vpop.f32.mrf.mxu0  ;;  %7121 = vmatmul.mubr.bf16.gmra.mxu0 %v12611_v55  ;;  %7576 = vrot.lane.b32.xlu0 %v7549_v49, %s12917_s26  ;;  %v17984_v23 = vpop.f32.mrf.mxu1 }
 0x59d   : > { %v4547_v61 = vpop.permute.xlu1 %4546 }
 0x59e   : > { %4611 = vst.msk [vmem:[#allocation2 + $0x2cc] sm:$0xf] %vm1720_vm10, %v4547_v61  ;;  %v11803_v40 = vpop.f32.mrf.mxu0  ;;  %v12285_v9 = vpop.f32.mrf.mxu1 }
 0x59f   : > { %v5099_v20 = vpop.permute.xlu0 %5098  ;;  %v11804_v1 = vadd.f32 %v11803_v40, %v11802_v28  ;;  %v7550_v40 = vrot.slane %v7548_v25, 4  ;;  %v11163_v25 = vrot.slane %v17942_v46, 10 }
 0x5a0   : > { %5164 = vst.msk [vmem:[#allocation2 + $0x2b4] sm:$0xf] %vm1720_vm10, %v5099_v20  ;;  %v11805_v36 = vpop.f32.mrf.mxu0  ;;  %v17989_v8 = vpop.f32.mrf.mxu1  ;;  %v7415_v20 = vrot.slane %v7413_v43, 4  ;;  %v7494_v43 = vrot.slane %v7492_v35, 4 }
 0x5a1   : > { %v7059_v6 = vadd.f32 %v11804_v1, %v17043_v17  ;;  %v5101_v24 = vpop.permute.xlu1 %5100 }
 0x5a2   : > { %5165 = vst.msk [vmem:[#allocation2 + $0x2d0] sm:$0xf] %vm1720_vm10, %v5101_v24  ;;  %v11806_v32 = vpop.f32.mrf.mxu0  ;;  %v12286_v12 = vpop.f32.mrf.mxu1 }
 0x5a3   : > { %v4756_v3 = vpop.permute.xlu0 %4755  ;;  %v7212_v42 = vadd.f32 %v17742_v53, %v7059_v6  ;;  %v11807_v49 = vadd.f32 %v11806_v32, %v11805_v36  ;;  %v11162_v12 = vrot.slane %v17942_v46, 9 }
 0x5a4   : > { %4821 = vst.msk [vmem:[#allocation2 + $0x2b0] sm:$0xf] %vm1999_vm13, %v4756_v3  ;;  %v17995_v13 = vpop.f32.mrf.mxu1 }
 0x5a5   : > { %v7312_v55 = vmax.f32 %v7212_v42, 0.0  ;;  %v7062_v63 = vadd.f32 %v11807_v49, %v17052_v41  ;;  %v4758_v11 = vpop.permute.xlu1 %4757 }
 0x5a6   : > { %4822 = vst.msk [vmem:[#allocation2 + $0x2cc] sm:$0xf] %vm1999_vm13, %v4758_v11  ;;  %v12289_v53 = vpop.f32.mrf.mxu1 }
 0x5a7   : > { %v5374_v17 = vpop.permute.xlu0 %5373  ;;  %v17998_v28 = vpack.c.bf16 %v7312_v55, %v7312_v55  ;;  %v7215_v61 = vadd.f32 %v17762_v56, %v7062_v63 }
 0x5a8   : > { %5439 = vst.msk [vmem:[#allocation2 + $0x2b4] sm:$0xf] %vm1999_vm13, %v5374_v17  ;;  %v18002_v36 = vpop.f32.mrf.mxu1 }
 0x5a9   : > { %v7313_v1 = vmax.f32 %v7215_v61, 0.0  ;;  %v5376_v9 = vpop.permute.xlu1 %5375  ;;  %v7416_v41 = vrot.slane %v17998_v28, 5  ;;  %v7551_v6 = vrot.slane %v17998_v28, 7  ;;  %v7495_v24 = vrot.slane %v17998_v28, 6  ;;  %7388 = vst.msk [vmem:[#allocation3 + $0x138] sm:$0xf] %vm7381_vm9, %v17998_v28 }
 0x5aa   : > { %7662 = vst.msk [vmem:[#allocation3 + $0x10c] sm:$0xf] %vm7381_vm9, %v17998_v28  ;;  %v12290_v32 = vpop.f32.mrf.mxu1 }
 0x5ab   : > { %5440 = vst.msk [vmem:[#allocation2 + $0x2d0] sm:$0xf] %vm1999_vm13, %v5376_v9  ;;  %v4121_v56 = vpop.permute.xlu0 %4120  ;;  %v18015_v3 = vpack.c.bf16 %v7313_v1, %v7313_v1  ;;  %v7417_v42 = vsel %vm13120_vm5, %v7415_v20, %v7416_v41  ;;  %v7552_v49 = vsel %vm13261_vm15, %v7550_v40, %v7551_v6  ;;  %v7418_v55 = vrot.slane %v7416_v41, 4 }
 0x5ac   : > { %4184 = vst.msk [vmem:[#allocation2 + $0x2e8] sm:$0xf] %vm1505_vm8, %v4121_v56  ;;  %7443 = vrot.lane.b32.xlu1 %v7417_v42, %s12917_s26  ;;  %v7553_v63 = vrot.slane %v7551_v6, 4  ;;  %v18026_v35 = vsel %vm13183_vm12, %v7494_v43, %v7495_v24  ;;  %v18031_v11 = vsel %vm13183_vm12, %v11163_v25, %v7495_v24  ;;  %v18033_v61 = vpop.f32.mrf.mxu1  ;;  %v7839_v1 = vsel %vm13120_vm5, %v11162_v12, %v7416_v41 }
 0x5ad   : > { %7760 = vst.msk [vmem:[#allocation3 + $0x40] sm:$0xf] %vm7381_vm9, %v7552_v49  ;;  %v4123_v17 = vpop.permute.xlu1 %4122  ;;  %v7419_v53 = vrot.slane %v18015_v3, 5  ;;  %v7554_v20 = vrot.slane %v18015_v3, 7  ;;  %v7498_v40 = vrot.slane %v18015_v3, 6  ;;  %v7497_v6 = vrot.slane %v7495_v24, 4 }
 0x5ae   : > { %7389 = vst.msk [vmem:[#allocation3 + $0x16c] sm:$0xf] %vm7381_vm9, %v18015_v3  ;;  %7528 = vst.msk [vmem:[#allocation3 + $0x108] sm:$0xf] %vm7381_vm9, %v18026_v35  ;;  %v12293_v56 = vpop.f32.mrf.mxu1  ;;  %v12614_v42 = vld [vmem:[#allocation2 + $0x2b0] ss:$28 sps:$4 sm:$0xff]  }
 0x5af   : > { %7663 = vst.msk [vmem:[#allocation3 + $0x140] sm:$0xf] %vm7381_vm9, %v18015_v3  ;;  %v4975_v9 = vpop.permute.xlu0 %4974  ;;  %7881 = vst.msk [vmem:[#allocation3 + $0x10] sm:$0xf] %vm7381_vm9, %v7839_v1  ;;  %v7420_v43 = vsel %vm13120_vm5, %v7418_v55, %v7419_v53  ;;  %v7555_v25 = vsel %vm13261_vm15, %v7553_v63, %v7554_v20  ;;  %v18063_v41 = vsel %vm13183_vm12, %v7497_v6, %v7498_v40 }
 0x5b0   : > { %4185 = vst.msk [vmem:[#allocation2 + $0x304] sm:$0xf] %vm1505_vm8, %v4123_v17  ;;  %5038 = vst.msk [vmem:[#allocation2 + $0x2ec] sm:$0xf] %vm1505_vm8, %v4975_v9  ;;  %7578 = vrot.lane.b32.xlu1 %v7552_v49, %s12917_s26  ;;  %7445 = vrot.lane.b32.xlu0 %v7420_v43, %s12917_s26  ;;  %v18067_v32 = vpop.f32.mrf.mxu1 }
 0x5b1   : > { %7761 = vst.msk [vmem:[#allocation3 + $0x74] sm:$0xf] %vm7381_vm9, %v7555_v25  ;;  %7882 = vst.msk [vmem:[#allocation3 + $0x44] sm:$0xf] %vm7381_vm9, %v7420_v43  ;;  %v4977_v24 = vpop.permute.xlu1 %4976 }
 0x5b2   : > { %v12616_v12 = vld [vmem:[#allocation2 + $0x2b4] ss:$28 sps:$4 sm:$0xff]   ;;  %7529 = vst.msk [vmem:[#allocation3 + $0x13c] sm:$0xf] %vm7381_vm9, %v18063_v41  ;;  %v12294_v55 = vpop.f32.mrf.mxu1 }
 0x5b3   : > { %5039 = vst.msk [vmem:[#allocation2 + $0x308] sm:$0xf] %vm1505_vm8, %v4977_v24  ;;  %v4549_v49 = vpop.permute.xlu0 %4548  ;;  %7128 = vmatprep.mubr.bf16.mxu0 %v12616_v12  ;;  %v12649_v55 = vld [vmem:[%s19504_s5 + $0xb8] sm:$0xff]  }
 0x5b4   : > { %4612 = vst.msk [vmem:[#allocation2 + $0x2e8] sm:$0xf] %vm1720_vm10, %v4549_v49  ;;  %v11808_v63 = vpop.f32.mrf.mxu0  ;;  %7129 = vmatmul.mubr.bf16.gmra.mxu0 %v12614_v42  ;;  %7580 = vrot.lane.b32.xlu0 %v7555_v25, %s12917_s26  ;;  %v18074_v1 = vpop.f32.mrf.mxu1  ;;  %v12648_v25 = vld [vmem:[%s19504_s5 + $0xf8] sm:$0xff]  }
 0x5b5   : > { %v4551_v17 = vpop.permute.xlu1 %4550  ;;  %11943 = vmatprep.subr.bf16.mxu1 %v12648_v25  ;;  %v7421_v25 = vrot.slane %v7419_v53, 4 }
 0x5b6   : > { %4613 = vst.msk [vmem:[#allocation2 + $0x304] sm:$0xf] %vm1720_vm10, %v4551_v17  ;;  %v11809_v6 = vpop.f32.mrf.mxu0  ;;  %v12297_v43 = vpop.f32.mrf.mxu1  ;;  %11944 = vmatpush3.bf16.msra.mxu1 %v12649_v55  ;;  %v7556_v55 = vrot.slane %v7554_v20, 4  ;;  %v12654_v20 = vld [vmem:[%s19504_s5 + $0xe0] sm:$0xff]  }
 0x5b7   : > { %v5103_v9 = vpop.permute.xlu0 %5102  ;;  %v11810_v56 = vadd.f32 %v11809_v6, %v11808_v63 }
 0x5b8   : > { %5166 = vst.msk [vmem:[#allocation2 + $0x2ec] sm:$0xf] %vm1720_vm10, %v5103_v9  ;;  %v11811_v24 = vpop.f32.mrf.mxu0  ;;  %7692 = vrot.lane.b32.xlu0 %v17974_v15, %s12917_s26  ;;  %v18081_v49 = vpop.f32.mrf.mxu1 }
 0x5b9   : > { %v7067_v12 = vadd.f32 %v11810_v56, %v17088_v30  ;;  %v5105_v42 = vpop.permute.xlu1 %5104 }
 0x5ba   : > { %5167 = vst.msk [vmem:[#allocation2 + $0x308] sm:$0xf] %vm1720_vm10, %v5105_v42  ;;  %v11812_v17 = vpop.f32.mrf.mxu0  ;;  %v12298_v15 = vpop.f32.mrf.mxu1  ;;  %v12650_v42 = vld [vmem:[%s19504_s5 + $0xf0] sm:$0xff]  }
 0x5bb   : > { %v4760_v63 = vpop.permute.xlu0 %4759  ;;  %v7220_v9 = vadd.f32 %v17777_v0, %v7067_v12  ;;  %v11813_v30 = vadd.f32 %v11812_v17, %v11811_v24  ;;  %v12651_v0 = vld [vmem:[%s19504_s5 + $0xb0] sm:$0xff]   ;;  %v12652_v24 = vld [vmem:[%s19504_s5 + $0xe8] sm:$0xff]   ;;  %11945 = vmatprep.subr.bf16.mxu1 %v12650_v42 }
 0x5bc   : > { %4823 = vst.msk [vmem:[#allocation2 + $0x2e8] sm:$0xf] %vm1999_vm13, %v4760_v63  ;;  %7786 = vrot.lane.b32.xlu0 %v17942_v46, %s12917_s26  ;;  %11946 = vmatpush3.bf16.msra.mxu1 %v12651_v0  ;;  %v12653_v63 = vld [vmem:[%s19504_s5 + $0xa8] sm:$0xff]  }
 0x5bd   : > { %v7314_v6 = vmax.f32 %v7220_v9, 0.0  ;;  %v7070_v56 = vadd.f32 %v11813_v30, %v17097_v47  ;;  %v4762_v43 = vpop.permute.xlu1 %4761  ;;  %11947 = vmatprep.subr.bf16.mxu1 %v12652_v24 }
 0x5be   : > { %4824 = vst.msk [vmem:[#allocation2 + $0x304] sm:$0xf] %vm1999_vm13, %v4762_v43 }
 0x5bf   : > { %v5378_v46 = vpop.permute.xlu0 %5377  ;;  %v18105_v12 = vpack.c.bf16 %v7314_v6, %v7314_v6  ;;  %v7223_v47 = vadd.f32 %v17804_v44, %v7070_v56  ;;  %v7500_v6 = vrot.slane %v7498_v40, 4 }
 0x5c0   : > { %5441 = vst.msk [vmem:[#allocation2 + $0x2ec] sm:$0xf] %vm1999_vm13, %v5378_v46  ;;  %11948 = vmatpush3.bf16.msra.mxu1 %v12653_v63  ;;  %v12655_v63 = vld [vmem:[%s19504_s5 + $0xa0] sm:$0xff]  }
 0x5c1   : > { %v7315_v17 = vmax.f32 %v7223_v47, 0.0  ;;  %v5380_v9 = vpop.permute.xlu1 %5379  ;;  %v7422_v30 = vrot.slane %v18105_v12, 5  ;;  %v7557_v44 = vrot.slane %v18105_v12, 7  ;;  %7390 = vst.msk [vmem:[#allocation3 + $0x1a0] sm:$0xf] %vm7381_vm9, %v18105_v12  ;;  %v7501_v53 = vrot.slane %v18105_v12, 6  ;;  %11949 = vmatprep.subr.bf16.mxu1 %v12654_v20 }
 0x5c2   : > { %7664 = vst.msk [vmem:[#allocation3 + $0x174] sm:$0xf] %vm7381_vm9, %v18105_v12 }
 0x5c3   : > { %5442 = vst.msk [vmem:[#allocation2 + $0x308] sm:$0xf] %vm1999_vm13, %v5380_v9  ;;  %v4125_v15 = vpop.permute.xlu0 %4124  ;;  %v18129_v56 = vpack.c.bf16 %v7315_v17, %v7315_v17  ;;  %v7423_v43 = vsel %vm13120_vm5, %v7421_v25, %v7422_v30  ;;  %v7558_v42 = vsel %vm13261_vm15, %v7556_v55, %v7557_v44  ;;  %v7424_v0 = vrot.slane %v7422_v30, 4  ;;  %v12656_v30 = vld [vmem:[%s19504_s5 + $0xd8] sm:$0xff]  }
 0x5c4   : > { %4186 = vst.msk [vmem:[#allocation2 + $0x320] sm:$0xf] %vm1505_vm8, %v4125_v15  ;;  %7447 = vrot.lane.b32.xlu1 %v7423_v43, %s12917_s26  ;;  %v18141_v40 = vsel %vm13183_vm12, %v7500_v6, %v7501_v53  ;;  %v7559_v47 = vrot.slane %v7557_v44, 4  ;;  %v7503_v9 = vrot.slane %v7501_v53, 4  ;;  %v12657_v15 = vld [vmem:[%s19504_s5 + $0x98] sm:$0xff]   ;;  %11950 = vmatpush3.bf16.msra.mxu1 %v12655_v63  ;;  %v12659_v63 = vld [vmem:[%s19504_s5 + $0x90] sm:$0xff]  }
 0x5c5   : > { %7762 = vst.msk [vmem:[#allocation3 + $0xa8] sm:$0xf] %vm7381_vm9, %v7558_v42  ;;  %7883 = vst.msk [vmem:[#allocation3 + $0x78] sm:$0xf] %vm7381_vm9, %v7423_v43  ;;  %v4127_v24 = vpop.permute.xlu1 %4126  ;;  %v7425_v46 = vrot.slane %v18129_v56, 5  ;;  %v7560_v25 = vrot.slane %v18129_v56, 7  ;;  %11951 = vmatprep.subr.bf16.mxu1 %v12656_v30 }
 0x5c6   : > { %7391 = vst.msk [vmem:[#allocation3 + $0x1d4] sm:$0xf] %vm7381_vm9, %v18129_v56  ;;  %7665 = vst.msk [vmem:[#allocation3 + $0x1a8] sm:$0xf] %vm7381_vm9, %v18129_v56  ;;  %v7504_v55 = vrot.slane %v18129_v56, 6 }
 0x5c7   : > { %7989 = vst.msk [vmem:[#allocation3 + $0x14] sm:$0xf] %vm7381_vm9, %v18129_v56  ;;  %7530 = vst.msk [vmem:[#allocation3 + $0x170] sm:$0xf] %vm7381_vm9, %v18141_v40  ;;  %v4979_v17 = vpop.permute.xlu0 %4978  ;;  %v7426_v44 = vsel %vm13120_vm5, %v7424_v0, %v7425_v46  ;;  %v7561_v20 = vsel %vm13261_vm15, %v7559_v47, %v7560_v25  ;;  %v12617_v43 = vld [vmem:[#allocation2 + $0x2e8] ss:$28 sps:$4 sm:$0xff]  }
 0x5c8   : > { %4187 = vst.msk [vmem:[#allocation2 + $0x33c] sm:$0xf] %vm1505_vm8, %v4127_v24  ;;  %5040 = vst.msk [vmem:[#allocation2 + $0x324] sm:$0xf] %vm1505_vm8, %v4979_v17  ;;  %7582 = vrot.lane.b32.xlu1 %v7558_v42, %s12917_s26  ;;  %7449 = vrot.lane.b32.xlu0 %v7426_v44, %s12917_s26  ;;  %v18178_v53 = vsel %vm13183_vm12, %v7503_v9, %v7504_v55  ;;  %v12658_v24 = vld [vmem:[%s19504_s5 + $0xd0] sm:$0xff]  }
 0x5c9   : > { %7763 = vst.msk [vmem:[#allocation3 + $0xdc] sm:$0xf] %vm7381_vm9, %v7561_v20  ;;  %7884 = vst.msk [vmem:[#allocation3 + $0xac] sm:$0xf] %vm7381_vm9, %v7426_v44  ;;  %v4981_v6 = vpop.permute.xlu1 %4980  ;;  %11952 = vmatpush3.bf16.msra.mxu1 %v12657_v15  ;;  %v12663_v15 = vld [vmem:[%s19504_s5 + $0xc8] sm:$0xff]  }
 0x5ca   : > { %v12619_v0 = vld [vmem:[#allocation2 + $0x2ec] ss:$28 sps:$4 sm:$0xff]   ;;  %7531 = vst.msk [vmem:[#allocation3 + $0x1a4] sm:$0xf] %vm7381_vm9, %v18178_v53  ;;  %11953 = vmatprep.subr.bf16.mxu1 %v12658_v24 }
 0x5cb   : > { %5041 = vst.msk [vmem:[#allocation2 + $0x340] sm:$0xf] %vm1505_vm8, %v4981_v6  ;;  %v4553_v42 = vpop.permute.xlu0 %4552  ;;  %7136 = vmatprep.mubr.bf16.mxu0 %v12619_v0 }
 0x5cc   : > { %4614 = vst.msk [vmem:[#allocation2 + $0x320] sm:$0xf] %vm1720_vm10, %v4553_v42  ;;  %v11814_v47 = vpop.f32.mrf.mxu0  ;;  %7137 = vmatmul.mubr.bf16.gmra.mxu0 %v12617_v43  ;;  %7694 = vrot.lane.b32.xlu1 %v18026_v35, %s12917_s26  ;;  %v12664_v43 = vld [vmem:[%s19504_s5 + $0x88] sm:$0xff]  }
 0x5cd   : > { %v4555_v17 = vpop.permute.xlu1 %4554  ;;  %7584 = vrot.lane.b32.xlu0 %v7561_v20, %s12917_s26  ;;  %11954 = vmatpush3.bf16.msra.mxu1 %v12659_v63  ;;  %v12665_v63 = vld [vmem:[%s19504_s5 + $0xc0] sm:$0xff]  }
 0x5ce   : > { %4615 = vst.msk [vmem:[#allocation2 + $0x33c] sm:$0xf] %vm1720_vm10, %v4555_v17  ;;  %v11815_v30 = vpop.f32.mrf.mxu0  ;;  %11955 = vmatprep.subr.bf16.mxu1 %v12663_v15  ;;  %v7506_v15 = vrot.slane %v7504_v55, 4 }
 0x5cf   : > { %v5107_v9 = vpop.permute.xlu0 %5106  ;;  %v11816_v44 = vadd.f32 %v11815_v30, %v11814_v47 }
 0x5d0   : > { %5168 = vst.msk [vmem:[#allocation2 + $0x324] sm:$0xf] %vm1720_vm10, %v5107_v9  ;;  %v11817_v6 = vpop.f32.mrf.mxu0  ;;  %7788 = vrot.lane.b32.xlu1 %v17998_v28, %s12917_s26 }
 0x5d1   : > { %v7075_v35 = vadd.f32 %v11816_v44, %v17133_v5  ;;  %v5109_v20 = vpop.permute.xlu1 %5108  ;;  %7696 = vrot.lane.b32.xlu0 %v18063_v41, %s12917_s26  ;;  %11956 = vmatpush3.bf16.msra.mxu1 %v12664_v43  ;;  %v7562_v44 = vrot.slane %v7560_v25, 4  ;;  %v11169_v43 = vrot.slane %v18129_v56, 11 }
 0x5d2   : > { %5169 = vst.msk [vmem:[#allocation2 + $0x340] sm:$0xf] %vm1720_vm10, %v5109_v20  ;;  %v11818_v42 = vpop.f32.mrf.mxu0  ;;  %11957 = vmatprep.subr.bf16.mxu1 %v12665_v63 }
 0x5d3   : > { %v4764_v0 = vpop.permute.xlu0 %4763  ;;  %v7228_v28 = vadd.f32 %v17810_v22, %v7075_v35  ;;  %v11819_v5 = vadd.f32 %v11818_v42, %v11817_v6  ;;  %v12666_v22 = vld [vmem:[%s19504_s5 + $0x80] sm:$0xff]  }
 0x5d4   : > { %4825 = vst.msk [vmem:[#allocation2 + $0x320] sm:$0xf] %vm1999_vm13, %v4764_v0 }
 0x5d5   : > { %v7316_v24 = vmax.f32 %v7228_v28, 0.0  ;;  %v7078_v47 = vadd.f32 %v11819_v5, %v17142_v59  ;;  %v4766_v17 = vpop.permute.xlu1 %4765  ;;  %7790 = vrot.lane.b32.xlu0 %v18015_v3, %s12917_s26  ;;  %v7427_v3 = vrot.slane %v7425_v46, 4  ;;  %11958 = vmatpush3.bf16.msra.mxu1 %v12666_v22 }
 0x5d6   : > { %4826 = vst.msk [vmem:[#allocation2 + $0x33c] sm:$0xf] %vm1999_vm13, %v4766_v17 }
 0x5d7   : > { %v5382_v9 = vpop.permute.xlu0 %5381  ;;  %v18222_v30 = vpack.c.bf16 %v7316_v24, %v7316_v24  ;;  %v7231_v59 = vadd.f32 %v17815_v21, %v7078_v47 }
 0x5d8   : > { %5443 = vst.msk [vmem:[#allocation2 + $0x324] sm:$0xf] %vm1999_vm13, %v5382_v9 }
 0x5d9   : > { %v7317_v6 = vmax.f32 %v7231_v59, 0.0  ;;  %v5384_v35 = vpop.permute.xlu1 %5383  ;;  %7392 = vst.msk [vmem:[#allocation3 + $0x208] sm:$0xf] %vm7381_vm9, %v18222_v30  ;;  %7666 = vst.msk [vmem:[#allocation3 + $0x1dc] sm:$0xf] %vm7381_vm9, %v18222_v30  ;;  %v7428_v21 = vrot.slane %v18222_v30, 5 }
 0x5da   : > { %7990 = vst.msk [vmem:[#allocation3 + $0x48] sm:$0xf] %vm7381_vm9, %v18222_v30  ;;  %8201 = vst.msk [vmem:[#allocation3 + $0x1c] sm:$0xf] %vm7381_vm9, %v18222_v30  ;;  %v7563_v46 = vrot.slane %v18222_v30, 7  ;;  %v7507_v25 = vrot.slane %v18222_v30, 6 }
 0x5db   : > { %5444 = vst.msk [vmem:[#allocation2 + $0x340] sm:$0xf] %vm1999_vm13, %v5384_v35  ;;  %v7434_v20 = vpop.permute.xlu0 %7433  ;;  %v18245_v0 = vpack.c.bf16 %v7317_v6, %v7317_v6  ;;  %v18250_v42 = vsel %vm13120_vm5, %v7427_v3, %v7428_v21  ;;  %v7430_v55 = vrot.slane %v7428_v21, 4 }
 0x5dc   : > { %7467 = vst.msk [vmem:[#allocation3] sm:$0xf] %vm7466_vm11, %v7434_v20  ;;  %v7564_v28 = vsel %vm13261_vm15, %v7562_v44, %v7563_v46  ;;  %7451 = vrot.lane.b32.xlu1 %v18250_v42, %s12917_s26  ;;  %v7565_v5 = vrot.slane %v7563_v46, 4  ;;  %v18261_v24 = vsel %vm13183_vm12, %v7506_v15, %v7507_v25  ;;  %v18265_v47 = vsel %vm13261_vm15, %v11169_v43, %v7563_v46 }
 0x5dd   : > { %7885 = vst.msk [vmem:[#allocation3 + $0xe0] sm:$0xf] %vm7381_vm9, %v18250_v42  ;;  %7764 = vst.msk [vmem:[#allocation3 + $0x110] sm:$0xf] %vm7381_vm9, %v7564_v28  ;;  %v7431_v17 = vrot.slane %v18245_v0, 5  ;;  %v7566_v63 = vrot.slane %v18245_v0, 7 }
 0x5de   : > { %7667 = vst.msk [vmem:[#allocation3 + $0x210] sm:$0xf] %vm7381_vm9, %v18245_v0  ;;  %7991 = vst.msk [vmem:[#allocation3 + $0x7c] sm:$0xf] %vm7381_vm9, %v18245_v0  ;;  %v7509_v22 = vrot.slane %v7507_v25, 4  ;;  %v7510_v9 = vrot.slane %v18245_v0, 6 }
 0x5df   : > { %8202 = vst.msk [vmem:[#allocation3 + $0x50] sm:$0xf] %vm7381_vm9, %v18245_v0  ;;  %7532 = vst.msk [vmem:[#allocation3 + $0x1d8] sm:$0xf] %vm7381_vm9, %v18261_v24  ;;  %v7569_v59 = vpop.permute.xlu0 %7568  ;;  %v18283_v3 = vsel %vm13120_vm5, %v7430_v55, %v7431_v17  ;;  %v18287_v44 = vsel %vm13261_vm15, %v7565_v5, %v7566_v63  ;;  %v12623_v35 = vld [vmem:[#allocation2 + $0x320] ss:$28 sps:$4 sm:$0xff]  }
 0x5e0   : > { %8085 = vst.msk [vmem:[#allocation3 + $0x18] sm:$0xf] %vm7381_vm9, %v18261_v24  ;;  %v18291_v6 = vsel %vm13183_vm12, %v7509_v22, %v7510_v9  ;;  %7586 = vrot.lane.b32.xlu1 %v7564_v28, %s12917_s26  ;;  %7453 = vrot.lane.b32.xlu0 %v18283_v3, %s12917_s26  ;;  %7886 = vst.msk [vmem:[#allocation3 + $0x114] sm:$0xf] %vm7381_vm9, %v18283_v3 }
 0x5e1   : > { %7601 = vst.msk [vmem:[#allocation3 + $0x4] sm:$0xf] %vm7466_vm11, %v7569_v59 }
 0x5e2   : > { %7765 = vst.msk [vmem:[#allocation3 + $0x144] sm:$0xf] %vm7381_vm9, %v18287_v44  ;;  %7533 = vst.msk [vmem:[#allocation3 + $0x20c] sm:$0xf] %vm7381_vm9, %v18291_v6  ;;  %v12625_v21 = vld [vmem:[#allocation2 + $0x324] ss:$28 sps:$4 sm:$0xff]  }
 0x5e3   : > { %8086 = vst.msk [vmem:[#allocation3 + $0x4c] sm:$0xf] %vm7381_vm9, %v18291_v6  ;;  %7144 = vmatprep.mubr.bf16.mxu0 %v12625_v21  ;;  %v7855_v21 = vrot.slane %v7431_v17, 4 }
 0x5e4   : > { %v11820_v46 = vpop.f32.mrf.mxu0  ;;  %7145 = vmatmul.mubr.bf16.gmra.mxu0 %v12623_v35  ;;  %7698 = vrot.lane.b32.xlu1 %v18141_v40, %s12917_s26 }
 0x5e5   : > { %7700 = vrot.lane.b32.xlu0 %v18178_v53, %s12917_s26 }
 0x5e6   : > { %v11821_v25 = vpop.f32.mrf.mxu0 }
 0x5e7   : > { %v11822_v20 = vadd.f32 %v11821_v25, %v11820_v46 }
 0x5e8   : > { %v11823_v15 = vpop.f32.mrf.mxu0  ;;  %7792 = vrot.lane.b32.xlu1 %v18105_v12, %s12917_s26 }
 0x5e9   : > { %v7083_v43 = vadd.f32 %v11822_v20, %v17180_v19  ;;  %7794 = vrot.lane.b32.xlu0 %v18129_v56, %s12917_s26  ;;  %v12673_v19 = vld [vmem:[%s19504_s5 + $0x178] sm:$0xff]  }
 0x5ea   : > { %v11824_v28 = vpop.f32.mrf.mxu0  ;;  %11995 = vmatprep.subr.bf16.mxu0 %v12673_v19 }
 0x5eb   : > { %v7236_v55 = vadd.f32 %v17827_v37, %v7083_v43  ;;  %v11825_v5 = vadd.f32 %v11824_v28, %v11823_v15  ;;  %v7680_v37 = vrot.slane %v7510_v9, 4  ;;  %v7736_v43 = vrot.slane %v7566_v63, 4 }
 0x5ec   : > { %7588 = vrot.lane.b32.xlu1 %v18287_v44, %s12917_s26 }
 0x5ed   : > { %v7318_v22 = vmax.f32 %v7236_v55, 0.0  ;;  %v7086_v59 = vadd.f32 %v11825_v5, %v17190_v58  ;;  %7704 = vrot.lane.b32.xlu0 %v18291_v6, %s12917_s26 }
 0x5ee   : > { %v7436_v12 = vpop.permute.xlu1 %7435 }
 0x5ef   : > { %v11510_v35 = vpack.c.bf16 %v7318_v22, %v7318_v22  ;;  %v7239_v56 = vadd.f32 %v17848_v14, %v7086_v59  ;;  %7468 = vst.msk [vmem:[#allocation3 + $0x34] sm:$0xf] %vm7466_vm11, %v7436_v12 }
 0x5f0   : > { %7702 = vrot.lane.b32.xlu1 %v18261_v24, %s12917_s26 }
 0x5f1   : > { %7992 = vst.msk [vmem:[#allocation3 + $0xb0] sm:$0xf] %vm7381_vm9, %v11510_v35  ;;  %8203 = vst.msk [vmem:[#allocation3 + $0x84] sm:$0xf] %vm7381_vm9, %v11510_v35  ;;  %v7319_v58 = vmax.f32 %v7239_v56, 0.0  ;;  %7798 = vrot.lane.b32.xlu0 %v18245_v0, %s12917_s26  ;;  %v7681_v46 = vrot.slane %v11510_v35, 6 }
 0x5f2   : > { %v7856_v25 = vrot.slane %v11510_v35, 5  ;;  %v7737_v20 = vrot.slane %v11510_v35, 7  ;;  %v7571_v14 = vpop.permute.xlu1 %7570  ;;  %v7438_v15 = vpop.permute.xlu0 %7437 }
 0x5f3   : > { %v18330_v28 = vpack.c.bf16 %v7319_v58, %v7319_v58  ;;  %7602 = vst.msk [vmem:[#allocation3 + $0x38] sm:$0xf] %vm7466_vm11, %v7571_v14  ;;  %7469 = vst.msk [vmem:[#allocation3 + $0x68] sm:$0xf] %vm7466_vm11, %v7438_v15  ;;  %v18336_v17 = vsel %vm13183_vm12, %v7680_v37, %v7681_v46  ;;  %v7683_v0 = vrot.slane %v7681_v46, 4  ;;  %v12674_v37 = vld [vmem:[%s19504_s5 + $0x138] sm:$0xff]  }
 0x5f4   : > { %v18340_v9 = vsel %vm13120_vm5, %v7855_v21, %v7856_v25  ;;  %7796 = vrot.lane.b32.xlu1 %v18222_v30, %s12917_s26  ;;  %8087 = vst.msk [vmem:[#allocation3 + $0x80] sm:$0xf] %vm7381_vm9, %v18336_v17  ;;  %v18350_v63 = vsel %vm13261_vm15, %v7736_v43, %v7737_v20  ;;  %v7858_v55 = vrot.slane %v7856_v25, 4  ;;  %v7739_v19 = vrot.slane %v7737_v20, 4  ;;  %v12678_v46 = vld [vmem:[%s19504_s5 + $0x170] sm:$0xff]   ;;  %v12682_v15 = vld [vmem:[%s19504_s5 + $0x168] sm:$0xff]  }
 0x5f5   : > { %7887 = vst.msk [vmem:[#allocation3 + $0x148] sm:$0xf] %vm7381_vm9, %v18340_v9  ;;  %7993 = vst.msk [vmem:[#allocation3 + $0xe4] sm:$0xf] %vm7381_vm9, %v18330_v28  ;;  %7926 = vrot.lane.b32.xlu0 %v18031_v11, %s12917_s26  ;;  %v7684_v30 = vrot.slane %v18330_v28, 6  ;;  %v7859_v5 = vrot.slane %v18330_v28, 5 }
 0x5f6   : > { %8204 = vst.msk [vmem:[#allocation3 + $0xb8] sm:$0xf] %vm7381_vm9, %v18330_v28  ;;  %7766 = vst.msk [vmem:[#allocation3 + $0x178] sm:$0xf] %vm7381_vm9, %v18350_v63  ;;  %v7740_v22 = vrot.slane %v18330_v28, 7  ;;  %v7573_v59 = vpop.permute.xlu0 %7572  ;;  %v12679_v20 = vld [vmem:[%s19504_s5 + $0x130] sm:$0xff]  }
 0x5f7   : > { %7603 = vst.msk [vmem:[#allocation3 + $0x6c] sm:$0xf] %vm7466_vm11, %v7573_v59  ;;  %v18366_v12 = vsel %vm13183_vm12, %v7683_v0, %v7684_v30  ;;  %v18370_v11 = vsel %vm13120_vm5, %v7858_v55, %v7859_v5  ;;  %v12639_v21 = vld [vmem:[#allocation3] ss:$52 sps:$4 sm:$0xff]  }
 0x5f8   : > { %7706 = vrot.lane.b32.xlu1 %v18336_v17, %s12917_s26  ;;  %8088 = vst.msk [vmem:[#allocation3 + $0xb4] sm:$0xf] %vm7381_vm9, %v18366_v12  ;;  %7888 = vst.msk [vmem:[#allocation3 + $0x17c] sm:$0xf] %vm7381_vm9, %v18370_v11  ;;  %v18380_v56 = vsel %vm13261_vm15, %v7739_v19, %v7740_v22  ;;  %v12683_v55 = vld [vmem:[%s19504_s5 + $0x128] sm:$0xff]  }
 0x5f9   : > { %8018 = vrot.lane.b32.xlu0 %v18250_v42, %s12917_s26  ;;  %7767 = vst.msk [vmem:[#allocation3 + $0x1ac] sm:$0xf] %vm7381_vm9, %v18380_v56 }
 0x5fa   : > { %v12641_v58 = vld [vmem:[#allocation3 + $0x4] ss:$52 sps:$4 sm:$0xff]  }
 0x5fb   : > { %v11826_v25 = vpop.f32.mrf.mxu0  ;;  %10045 = vmatprep.mubr.bf16.mxu0 %v12641_v58 }
 0x5fc   : > { %7800 = vrot.lane.b32.xlu1 %v11510_v35, %s12917_s26  ;;  %10046 = vmatmul.mubr.bf16.vlgmr.msra.gmra.mxu0 %v12639_v21 }
 0x5fd   : > { %7708 = vrot.lane.b32.xlu0 %v18366_v12, %s12917_s26  ;;  %v11827_v42 = vpop.f32.mrf.mxu0  ;;  %11996 = vmatpush3.bf16.msra.mxu0 %v12674_v37  ;;  %v12684_v37 = vld [vmem:[%s19504_s5 + $0x160] sm:$0xff]  }
 0x5fe   : > { %v11828_v14 = vadd.f32 %v11827_v42, %v11826_v25  ;;  %11997 = vmatprep.subr.bf16.mxu0 %v12678_v46  ;;  %v7861_v46 = vrot.slane %v7859_v5, 4  ;;  %v12690_v5 = vld [vmem:[%s19504_s5 + $0x118] sm:$0xff]  }
 0x5ff   : > { %v11829_v43 = vpop.f32.mrf.mxu0 }
 0x600   : > { %7928 = vrot.lane.b32.xlu1 %v18063_v41, %s12917_s26  ;;  %v7091_v35 = vadd.f32 %v11828_v14, %v17234_v33 }
 0x601   : > { %7802 = vrot.lane.b32.xlu0 %v18330_v28, %s12917_s26  ;;  %v11830_v0 = vpop.f32.mrf.mxu0  ;;  %11998 = vmatpush3.bf16.msra.mxu0 %v12679_v20 }
 0x602   : > { %v7244_v59 = vadd.f32 %v17868_v29, %v7091_v35  ;;  %v11831_v19 = vadd.f32 %v11830_v0, %v11829_v43  ;;  %11999 = vmatprep.subr.bf16.mxu0 %v12682_v15  ;;  %v12685_v29 = vld [vmem:[%s19504_s5 + $0x120] sm:$0xff]  }
 0x604   : > { %8020 = vrot.lane.b32.xlu1 %v18283_v3, %s12917_s26  ;;  %v7320_v33 = vmax.f32 %v7244_v59, 0.0  ;;  %v7094_v41 = vadd.f32 %v11831_v19, %v17243_v31  ;;  %v12689_v31 = vld [vmem:[%s19504_s5 + $0x158] sm:$0xff]   ;;  %v7686_v3 = vrot.slane %v7684_v30, 4  ;;  %v7742_v30 = vrot.slane %v7740_v22, 4  ;;  %v12691_v22 = vld [vmem:[%s19504_s5 + $0x150] sm:$0xff]  }
 0x605   : > { %7930 = vrot.lane.b32.xlu0 %v18141_v40, %s12917_s26  ;;  %12000 = vmatpush3.bf16.msra.mxu0 %v12683_v55 }
 0x606   : > { %v7440_v28 = vpop.permute.xlu1 %7439  ;;  %v18421_v21 = vpack.c.bf16 %v7320_v33, %v7320_v33  ;;  %v7247_v58 = vadd.f32 %v17903_v50, %v7094_v41  ;;  %12001 = vmatprep.subr.bf16.mxu0 %v12684_v37 }
 0x607   : > { %7470 = vst.msk [vmem:[#allocation3 + $0x9c] sm:$0xf] %vm7466_vm11, %v7440_v28  ;;  %v12692_v28 = vld [vmem:[%s19504_s5 + $0x110] sm:$0xff]  }
 0x608   : > { %7994 = vst.msk [vmem:[#allocation3 + $0x118] sm:$0xf] %vm7381_vm9, %v18421_v21  ;;  %8205 = vst.msk [vmem:[#allocation3 + $0xec] sm:$0xf] %vm7381_vm9, %v18421_v21  ;;  %v7321_v40 = vmax.f32 %v7247_v58, 0.0  ;;  %v7687_v50 = vrot.slane %v18421_v21, 6 }
 0x609   : > { %8022 = vrot.lane.b32.xlu0 %v18340_v9, %s12917_s26  ;;  %v7862_v25 = vrot.slane %v18421_v21, 5  ;;  %v7743_v42 = vrot.slane %v18421_v21, 7  ;;  %12002 = vmatpush3.bf16.msra.mxu0 %v12685_v29  ;;  %v11186_v29 = vrot.slane %v18421_v21, 9 }
 0x60a   : > { %v7575_v20 = vpop.permute.xlu1 %7574  ;;  %v7442_v14 = vpop.permute.xlu0 %7441  ;;  %v18440_v15 = vpack.c.bf16 %v7321_v40, %v7321_v40  ;;  %v18446_v9 = vsel %vm13183_vm12, %v7686_v3, %v7687_v50  ;;  %12003 = vmatprep.subr.bf16.mxu0 %v12689_v31  ;;  %v7689_v35 = vrot.slane %v7687_v50, 4  ;;  %v12696_v3 = vld [vmem:[%s19504_s5 + $0x148] sm:$0xff]  }
 0x60b   : > { %7604 = vst.msk [vmem:[#allocation3 + $0xa0] sm:$0xf] %vm7466_vm11, %v7575_v20  ;;  %7471 = vst.msk [vmem:[#allocation3 + $0xd0] sm:$0xf] %vm7466_vm11, %v7442_v14  ;;  %v7863_v43 = vsel %vm13120_vm5, %v7861_v46, %v7862_v25  ;;  %7710 = vrot.lane.b32.xlu1 %v18446_v9, %s12917_s26  ;;  %v18460_v0 = vsel %vm13261_vm15, %v7742_v30, %v7743_v42  ;;  %v7864_v59 = vrot.slane %v7862_v25, 4  ;;  %v7745_v41 = vrot.slane %v7743_v42, 4 }
 0x60c   : > { %8089 = vst.msk [vmem:[#allocation3 + $0xe8] sm:$0xf] %vm7381_vm9, %v18446_v9  ;;  %7889 = vst.msk [vmem:[#allocation3 + $0x1b0] sm:$0xf] %vm7381_vm9, %v7863_v43  ;;  %v7690_v55 = vrot.slane %v18440_v15, 6  ;;  %v18468_v19 = vrot.slane %v18440_v15, 5 }
 0x60d   : > { %7995 = vst.msk [vmem:[#allocation3 + $0x14c] sm:$0xf] %vm7381_vm9, %v18440_v15  ;;  %8206 = vst.msk [vmem:[#allocation3 + $0x120] sm:$0xf] %vm7381_vm9, %v18440_v15  ;;  %v7746_v37 = vrot.slane %v18440_v15, 7  ;;  %12004 = vmatpush3.bf16.msra.mxu0 %v12690_v5  ;;  %v12697_v42 = vld [vmem:[%s19504_s5 + $0x108] sm:$0xff]  }
 0x60e   : > { %7768 = vst.msk [vmem:[#allocation3 + $0x1e0] sm:$0xf] %vm7381_vm9, %v18460_v0  ;;  %8294 = vst.msk [vmem:[#allocation3 + $0x20] sm:$0xf] %vm7381_vm9, %v18460_v0  ;;  %v7577_v33 = vpop.permute.xlu0 %7576  ;;  %v18482_v58 = vsel %vm13183_vm12, %v7689_v35, %v7690_v55  ;;  %v18487_v31 = vsel %vm13120_vm5, %v7864_v59, %v18468_v19  ;;  %12005 = vmatprep.subr.bf16.mxu0 %v12691_v22  ;;  %v8374_v40 = vsel %vm13120_vm5, %v11186_v29, %v18468_v19  ;;  %v12642_v50 = vld [vmem:[#allocation3 + $0x68] ss:$52 sps:$4 sm:$0xff]  }
 0x60f   : > { %7605 = vst.msk [vmem:[#allocation3 + $0xd4] sm:$0xf] %vm7466_vm11, %v7577_v33  ;;  %7804 = vrot.lane.b32.xlu1 %v18421_v21, %s12917_s26  ;;  %7712 = vrot.lane.b32.xlu0 %v18482_v58, %s12917_s26  ;;  %v18504_v46 = vsel %vm13261_vm15, %v7745_v41, %v7746_v37  ;;  %v12698_v14 = vld [vmem:[%s19504_s5 + $0x140] sm:$0xff]  }
 0x610   : > { %8090 = vst.msk [vmem:[#allocation3 + $0x11c] sm:$0xf] %vm7381_vm9, %v18482_v58  ;;  %7890 = vst.msk [vmem:[#allocation3 + $0x1e4] sm:$0xf] %vm7381_vm9, %v18487_v31  ;;  %v12699_v22 = vld [vmem:[%s19504_s5 + $0x100] sm:$0xff]  }
 0x611   : > { %7769 = vst.msk [vmem:[#allocation3 + $0x214] sm:$0xf] %vm7381_vm9, %v18504_v46  ;;  %8295 = vst.msk [vmem:[#allocation3 + $0x54] sm:$0xf] %vm7381_vm9, %v18504_v46  ;;  %12006 = vmatpush3.bf16.msra.mxu0 %v12692_v28  ;;  %v20494_v28 = vld [vmem:[#allocation22_spill] sm:$0xff] }
 0x612   : > { %8416 = vst.msk [vmem:[#allocation3 + $0x24] sm:$0xf] %vm7381_vm9, %v8374_v40  ;;  %v12644_v25 = vld [vmem:[#allocation3 + $0x6c] ss:$52 sps:$4 sm:$0xff]   ;;  %12007 = vmatprep.subr.bf16.mxu0 %v12696_v3  ;;  %v7923_v3 = vrot.slane %v7690_v55, 4 }
 0x613   : > { %v11832_v20 = vpop.f32.mrf.mxu0  ;;  %7932 = vrot.lane.b32.xlu1 %v18178_v53, %s12917_s26  ;;  %7934 = vrot.lane.b32.xlu0 %v18261_v24, %s12917_s26 }
 0x614   : > { %10053 = vmatprep.mubr.bf16.mxu0 %v12644_v25 }
 0x615   : > { %v11833_v30 = vpop.f32.mrf.mxu0  ;;  %10054 = vmatmul.mubr.bf16.gmra.mxu0 %v12642_v50 }
 0x616   : > { %v11834_v5 = vadd.f32 %v11833_v30, %v11832_v20  ;;  %12008 = vmatpush3.bf16.msra.mxu0 %v12697_v42 }
 0x617   : > { %v11835_v35 = vpop.f32.mrf.mxu0  ;;  %8024 = vrot.lane.b32.xlu1 %v18370_v11, %s12917_s26  ;;  %8026 = vrot.lane.b32.xlu0 %v7863_v43, %s12917_s26  ;;  %v12706_v11 = vld [vmem:[%s19504_s5 + $0x1f8] sm:$0xff]  }
 0x618   : > { %v7099_v53 = vadd.f32 %v11834_v5, %v17288_v54  ;;  %12009 = vmatprep.subr.bf16.mxu0 %v12698_v14  ;;  %12047 = vmatprep.subr.bf16.mxu1 %v12706_v11 }
 0x619   : > { %v11836_v24 = vpop.f32.mrf.mxu0 }
 0x61a   : > { %v7252_v59 = vadd.f32 %v17912_v4, %v7099_v53  ;;  %v11837_v33 = vadd.f32 %v11836_v24, %v11835_v35  ;;  %12010 = vmatpush3.bf16.msra.mxu0 %v12699_v22 }
 0x61b   : > { %7806 = vrot.lane.b32.xlu1 %v18440_v15, %s12917_s26  ;;  %7938 = vrot.lane.b32.xlu0 %v18336_v17, %s12917_s26  ;;  %v7867_v17 = vrot.slane %v18468_v19, 4 }
 0x61c   : > { %v7322_v41 = vmax.f32 %v7252_v59, 0.0  ;;  %v7102_v29 = vadd.f32 %v11837_v33, %v20494_v28 }
 0x61e   : > { %v7444_v54 = vpop.permute.xlu1 %7443  ;;  %v18540_v43 = vpack.c.bf16 %v7322_v41, %v7322_v41  ;;  %v7255_v4 = vadd.f32 %v17920_v16, %v7102_v29 }
 0x61f   : > { %7472 = vst.msk [vmem:[#allocation3 + $0x104] sm:$0xf] %vm7466_vm11, %v7444_v54  ;;  %7936 = vrot.lane.b32.xlu1 %v18291_v6, %s12917_s26  ;;  %7942 = vrot.lane.b32.xlu0 %v18446_v9, %s12917_s26  ;;  %v8115_v9 = vrot.slane %v7746_v37, 4 }
 0x620   : > { %7996 = vst.msk [vmem:[#allocation3 + $0x180] sm:$0xf] %vm7381_vm9, %v18540_v43  ;;  %8207 = vst.msk [vmem:[#allocation3 + $0x154] sm:$0xf] %vm7381_vm9, %v18540_v43  ;;  %v7323_v40 = vmax.f32 %v7255_v4, 0.0  ;;  %v7868_v16 = vrot.slane %v18540_v43, 5 }
 0x621   : > { %v7924_v50 = vrot.slane %v18540_v43, 6  ;;  %v8116_v25 = vrot.slane %v18540_v43, 7 }
 0x622   : > { %v7579_v6 = vpop.permute.xlu1 %7578  ;;  %v7446_v42 = vpop.permute.xlu0 %7445  ;;  %v18558_v19 = vpack.c.bf16 %v7323_v40, %v7323_v40  ;;  %v7869_v55 = vsel %vm13120_vm5, %v7867_v17, %v7868_v16  ;;  %v8006_v37 = vrot.slane %v7868_v16, 4  ;;  %v20495_v17 = vld [vmem:[#allocation79_spill] sm:$0xff] }
 0x623   : > { %7606 = vst.msk [vmem:[#allocation3 + $0x108] sm:$0xf] %vm7466_vm11, %v7579_v6  ;;  %7473 = vst.msk [vmem:[#allocation3 + $0x138] sm:$0xf] %vm7466_vm11, %v7446_v42  ;;  %v18566_v20 = vsel %vm13183_vm12, %v7923_v3, %v7924_v50  ;;  %8028 = vrot.lane.b32.xlu1 %v18487_v31, %s12917_s26  ;;  %8030 = vrot.lane.b32.xlu0 %v7869_v55, %s12917_s26  ;;  %v18577_v14 = vsel %vm13261_vm15, %v8115_v9, %v8116_v25  ;;  %v8062_v30 = vrot.slane %v7924_v50, 4 }
 0x624   : > { %7891 = vst.msk [vmem:[#allocation3 + $0x218] sm:$0xf] %vm7381_vm9, %v7869_v55  ;;  %8417 = vst.msk [vmem:[#allocation3 + $0x58] sm:$0xf] %vm7381_vm9, %v7869_v55  ;;  %v8007_v31 = vrot.slane %v18558_v19, 5  ;;  %v8063_v5 = vrot.slane %v18558_v19, 6 }
 0x625   : > { %8091 = vst.msk [vmem:[#allocation3 + $0x150] sm:$0xf] %vm7381_vm9, %v18566_v20  ;;  %7997 = vst.msk [vmem:[#allocation3 + $0x1b4] sm:$0xf] %vm7381_vm9, %v18558_v19  ;;  %v8119_v22 = vrot.slane %v18558_v19, 7  ;;  %v8118_v53 = vrot.slane %v8116_v25, 4 }
 0x626   : > { %8208 = vst.msk [vmem:[#allocation3 + $0x188] sm:$0xf] %vm7381_vm9, %v18558_v19  ;;  %8296 = vst.msk [vmem:[#allocation3 + $0x88] sm:$0xf] %vm7381_vm9, %v18577_v14  ;;  %v7581_v35 = vpop.permute.xlu0 %7580  ;;  %v8008_v24 = vsel %vm13120_vm5, %v8006_v37, %v8007_v31  ;;  %v18593_v59 = vsel %vm13183_vm12, %v8062_v30, %v8063_v5  ;;  %v12645_v28 = vld [vmem:[#allocation3 + $0xd0] ss:$52 sps:$4 sm:$0xff]  }
 0x627   : > { %7607 = vst.msk [vmem:[#allocation3 + $0x13c] sm:$0xf] %vm7466_vm11, %v7581_v35  ;;  %7940 = vrot.lane.b32.xlu1 %v18366_v12, %s12917_s26  ;;  %8130 = vrot.lane.b32.xlu0 %v18265_v47, %s12917_s26  ;;  %v18604_v33 = vsel %vm13261_vm15, %v8118_v53, %v8119_v22  ;;  %v20496_v25 = vld [vmem:[#allocation32_spill] sm:$0xff]  ;;  %v8009_v37 = vrot.slane %v8007_v31, 4  ;;  %v8065_v30 = vrot.slane %v8063_v5, 4  ;;  %v8121_v31 = vrot.slane %v8119_v22, 4 }
 0x628   : > { %8418 = vst.msk [vmem:[#allocation3 + $0x8c] sm:$0xf] %vm7381_vm9, %v8008_v24  ;;  %8092 = vst.msk [vmem:[#allocation3 + $0x184] sm:$0xf] %vm7381_vm9, %v18593_v59 }
 0x629   : > { %8297 = vst.msk [vmem:[#allocation3 + $0xbc] sm:$0xf] %vm7381_vm9, %v18604_v33 }
 0x62a   : > { %v7693_v41 = vpop.permute.xlu0 %7692  ;;  %v12647_v29 = vld [vmem:[#allocation3 + $0xd4] ss:$52 sps:$4 sm:$0xff]  }
 0x62b   : > { %7725 = vst.msk [vmem:[#allocation3 + $0x8] sm:$0xf] %vm7466_vm11, %v7693_v41  ;;  %v11838_v12 = vpop.f32.mrf.mxu0  ;;  %7944 = vrot.lane.b32.xlu1 %v18482_v58, %s12917_s26  ;;  %7946 = vrot.lane.b32.xlu0 %v18566_v20, %s12917_s26 }
 0x62c   : > { %10059 = vmatprep.mubr.bf16.mxu0 %v12647_v29 }
 0x62d   : > { %v11839_v47 = vpop.f32.mrf.mxu0  ;;  %10060 = vmatmul.mubr.bf16.gmra.mxu0 %v12645_v28 }
 0x62e   : > { %v7787_v11 = vpop.permute.xlu0 %7786  ;;  %v11840_v54 = vadd.f32 %v11839_v47, %v11838_v12 }
 0x62f   : > { %7819 = vst.msk [vmem:[#allocation3 + $0xc] sm:$0xf] %vm7466_vm11, %v7787_v11  ;;  %v11841_v4 = vpop.f32.mrf.mxu0  ;;  %8032 = vrot.lane.b32.xlu1 %v8008_v24, %s12917_s26 }
 0x630   : > { %v7107_v3 = vadd.f32 %v11840_v54, %v20495_v17 }
 0x631   : > { %v11842_v40 = vpop.f32.mrf.mxu0 }
 0x632   : > { %v7260_v16 = vadd.f32 %v17926_v48, %v7107_v3  ;;  %v11843_v50 = vadd.f32 %v11842_v40, %v11841_v4 }
 0x633   : > { %8132 = vrot.lane.b32.xlu1 %v18287_v44, %s12917_s26 }
 0x634   : > { %v7324_v58 = vmax.f32 %v7260_v16, 0.0  ;;  %v7110_v6 = vadd.f32 %v11843_v50, %v20496_v25 }
 0x636   : > { %v7448_v42 = vpop.permute.xlu1 %7447  ;;  %v18620_v9 = vpack.c.bf16 %v7324_v58, %v7324_v58  ;;  %v7263_v55 = vadd.f32 %v17935_v7, %v7110_v6 }
 0x637   : > { %7474 = vst.msk [vmem:[#allocation3 + $0x16c] sm:$0xf] %vm7466_vm11, %v7448_v42 }
 0x638   : > { %7998 = vst.msk [vmem:[#allocation3 + $0x1e8] sm:$0xf] %vm7381_vm9, %v18620_v9  ;;  %8209 = vst.msk [vmem:[#allocation3 + $0x1bc] sm:$0xf] %vm7381_vm9, %v18620_v9  ;;  %v7325_v48 = vmax.f32 %v7263_v55, 0.0  ;;  %v8010_v44 = vrot.slane %v18620_v9, 5 }
 0x639   : > { %8517 = vst.msk [vmem:[#allocation3 + $0x28] sm:$0xf] %vm7381_vm9, %v18620_v9  ;;  %v8066_v35 = vrot.slane %v18620_v9, 6  ;;  %v8122_v7 = vrot.slane %v18620_v9, 7 }
 0x63a   : > { %v7583_v53 = vpop.permute.xlu1 %7582  ;;  %v7450_v24 = vpop.permute.xlu0 %7449  ;;  %v18633_v5 = vpack.c.bf16 %v7325_v48, %v7325_v48  ;;  %v8011_v41 = vsel %vm13120_vm5, %v8009_v37, %v8010_v44  ;;  %v8012_v29 = vrot.slane %v8010_v44, 4  ;;  %v12742_v48 = vld [vmem:[%s19504_s5 + $0x278] sm:$0xff]  }
 0x63b   : > { %7608 = vst.msk [vmem:[#allocation3 + $0x170] sm:$0xf] %vm7466_vm11, %v7583_v53  ;;  %7475 = vst.msk [vmem:[#allocation3 + $0x1a0] sm:$0xf] %vm7466_vm11, %v7450_v24  ;;  %v18641_v28 = vsel %vm13183_vm12, %v8065_v30, %v8066_v35  ;;  %8034 = vrot.lane.b32.xlu1 %v8011_v41, %s12917_s26  ;;  %v18649_v22 = vsel %vm13261_vm15, %v8121_v31, %v8122_v7  ;;  %v8068_v11 = vrot.slane %v8066_v35, 4  ;;  %v8124_v17 = vrot.slane %v8122_v7, 4 }
 0x63c   : > { %8419 = vst.msk [vmem:[#allocation3 + $0xc0] sm:$0xf] %vm7381_vm9, %v8011_v41  ;;  %8093 = vst.msk [vmem:[#allocation3 + $0x1b8] sm:$0xf] %vm7381_vm9, %v18641_v28  ;;  %v8013_v12 = vrot.slane %v18633_v5, 5  ;;  %v8069_v47 = vrot.slane %v18633_v5, 6  ;;  %12099 = vmatprep.subr.bf16.mxu0 %v12742_v48 }
 0x63d   : > { %8729 = vst.msk [vmem:[#allocation3 + $0x30] sm:$0xf] %vm7381_vm9, %v18633_v5  ;;  %7999 = vst.msk [vmem:[#allocation3 + $0x21c] sm:$0xf] %vm7381_vm9, %v18633_v5  ;;  %v18662_v54 = vrot.slane %v18633_v5, 7 }
 0x63e   : > { %8210 = vst.msk [vmem:[#allocation3 + $0x1f0] sm:$0xf] %vm7381_vm9, %v18633_v5  ;;  %8518 = vst.msk [vmem:[#allocation3 + $0x5c] sm:$0xf] %vm7381_vm9, %v18633_v5  ;;  %v7695_v4 = vpop.permute.xlu1 %7694  ;;  %v18669_v40 = vsel %vm13120_vm5, %v8012_v29, %v8013_v12  ;;  %v18673_v16 = vsel %vm13183_vm12, %v8068_v11, %v8069_v47  ;;  %v12660_v58 = vld [vmem:[#allocation3 + $0x138] ss:$52 sps:$4 sm:$0xff]  }
 0x63f   : > { %8298 = vst.msk [vmem:[#allocation3 + $0xf0] sm:$0xf] %vm7381_vm9, %v18649_v22  ;;  %v7585_v3 = vpop.permute.xlu0 %7584  ;;  %8134 = vrot.lane.b32.xlu1 %v18350_v63, %s12917_s26  ;;  %8036 = vrot.lane.b32.xlu0 %v18669_v40, %s12917_s26  ;;  %8420 = vst.msk [vmem:[#allocation3 + $0xf4] sm:$0xf] %vm7381_vm9, %v18669_v40  ;;  %v18689_v50 = vsel %vm13261_vm15, %v8124_v17, %v18662_v54  ;;  %v12711_v29 = vld [vmem:[%s19504_s5 + $0x1f0] sm:$0xff]  }
 0x640   : > { %7726 = vst.msk [vmem:[#allocation3 + $0x3c] sm:$0xf] %vm7466_vm11, %v7695_v4  ;;  %7609 = vst.msk [vmem:[#allocation3 + $0x1a4] sm:$0xf] %vm7466_vm11, %v7585_v3  ;;  %v12712_v17 = vld [vmem:[%s19504_s5 + $0x1b0] sm:$0xff]  }
 0x641   : > { %8094 = vst.msk [vmem:[#allocation3 + $0x1ec] sm:$0xf] %vm7381_vm9, %v18673_v16  ;;  %8613 = vst.msk [vmem:[#allocation3 + $0x2c] sm:$0xf] %vm7381_vm9, %v18673_v16 }
 0x642   : > { %8299 = vst.msk [vmem:[#allocation3 + $0x124] sm:$0xf] %vm7381_vm9, %v18689_v50  ;;  %v7789_v63 = vpop.permute.xlu1 %7788  ;;  %v12662_v25 = vld [vmem:[#allocation3 + $0x13c] ss:$52 sps:$4 sm:$0xff]  }
 0x643   : > { %7820 = vst.msk [vmem:[#allocation3 + $0x40] sm:$0xf] %vm7466_vm11, %v7789_v63  ;;  %v7697_v6 = vpop.permute.xlu0 %7696  ;;  %8236 = vrot.lane.b32.xlu1 %v18593_v59, %s12917_s26  ;;  %8136 = vrot.lane.b32.xlu0 %v18380_v56, %s12917_s26  ;;  %v12707_v56 = vld [vmem:[%s19504_s5 + $0x1b8] sm:$0xff]   ;;  %v12715_v63 = vld [vmem:[%s19504_s5 + $0x1e8] sm:$0xff]  }
 0x644   : > { %7727 = vst.msk [vmem:[#allocation3 + $0x70] sm:$0xf] %vm7466_vm11, %v7697_v6  ;;  %v11844_v42 = vpop.f32.mrf.mxu0  ;;  %10065 = vmatprep.mubr.bf16.mxu0 %v12662_v25  ;;  %v8015_v25 = vrot.slane %v8013_v12, 4  ;;  %v8127_v12 = vrot.slane %v18662_v54, 4 }
 0x645   : > { %10066 = vmatmul.mubr.bf16.gmra.mxu0 %v12660_v58  ;;  %v8071_v58 = vrot.slane %v8069_v47, 4  ;;  %v12716_v47 = vld [vmem:[%s19504_s5 + $0x1a8] sm:$0xff]  }
 0x646   : > { %v11845_v55 = vpop.f32.mrf.mxu0 }
 0x647   : > { %v11846_v37 = vadd.f32 %v11845_v55, %v11844_v42  ;;  %v7791_v30 = vpop.permute.xlu0 %7790  ;;  %8138 = vrot.lane.b32.xlu1 %v18460_v0, %s12917_s26  ;;  %v12667_v53 = vld [vmem:[#allocation3 + $0x8] ss:$52 sps:$4 sm:$0xff]  }
 0x648   : > { %7821 = vst.msk [vmem:[#allocation3 + $0x74] sm:$0xf] %vm7466_vm11, %v7791_v30  ;;  %v11847_v44 = vpop.f32.mrf.mxu0  ;;  %v20497_v0 = vld [vmem:[#allocation34_spill] sm:$0xff] }
 0x649   : > { %v7115_v35 = vadd.f32 %v11846_v37, %v17401_v38 }
 0x64a   : > { %v11848_v7 = vpop.f32.mrf.mxu0  ;;  %v12669_v24 = vld [vmem:[#allocation3 + $0xc] ss:$52 sps:$4 sm:$0xff]  }
 0x64b   : > { %v7268_v31 = vadd.f32 %v17952_v45, %v7115_v35  ;;  %v11849_v41 = vadd.f32 %v11848_v7, %v11847_v44  ;;  %8238 = vrot.lane.b32.xlu1 %v18641_v28, %s12917_s26  ;;  %10118 = vmatprep.mubr.bf16.mxu1 %v12669_v24  ;;  %v12717_v35 = vld [vmem:[%s19504_s5 + $0x1e0] sm:$0xff]  }
 0x64c   : > { %10119 = vmatmul.mubr.bf16.vlgmr.msra.gmra.mxu1 %v12667_v53 }
 0x64d   : > { %v7326_v38 = vmax.f32 %v7268_v31, 0.0  ;;  %v7118_v11 = vadd.f32 %v11849_v41, %v20497_v0  ;;  %12048 = vmatpush3.bf16.msra.mxu1 %v12707_v56  ;;  %v12718_v0 = vld [vmem:[%s19504_s5 + $0x1a0] sm:$0xff]  }
 0x64e   : > { %v7452_v4 = vpop.permute.xlu1 %7451  ;;  %12049 = vmatprep.subr.bf16.mxu1 %v12711_v29 }
 0x64f   : > { %v18719_v45 = vpack.c.bf16 %v7326_v38, %v7326_v38  ;;  %v7271_v3 = vadd.f32 %v17977_v10, %v7118_v11  ;;  %7476 = vst.msk [vmem:[#allocation3 + $0x1d4] sm:$0xf] %vm7466_vm11, %v7452_v4  ;;  %8142 = vrot.lane.b32.xlu1 %v18577_v14, %s12917_s26 }
 0x651   : > { %8730 = vst.msk [vmem:[#allocation3 + $0x64] sm:$0xf] %vm7381_vm9, %v18719_v45  ;;  %8211 = vst.msk [vmem:[#allocation3 + $0x224] sm:$0xf] %vm7381_vm9, %v18719_v45  ;;  %v7327_v10 = vmax.f32 %v7271_v3, 0.0  ;;  %v8072_v6 = vrot.slane %v18719_v45, 6  ;;  %12050 = vmatpush3.bf16.msra.mxu1 %v12712_v17 }
 0x652   : > { %8519 = vst.msk [vmem:[#allocation3 + $0x90] sm:$0xf] %vm7381_vm9, %v18719_v45  ;;  %v8016_v42 = vrot.slane %v18719_v45, 5  ;;  %v8128_v55 = vrot.slane %v18719_v45, 7  ;;  %v7587_v37 = vpop.permute.xlu1 %7586  ;;  %v7454_v14 = vpop.permute.xlu0 %7453  ;;  %12051 = vmatprep.subr.bf16.mxu1 %v12715_v63  ;;  %v12722_v3 = vld [vmem:[%s19504_s5 + $0x1d8] sm:$0xff]  }
 0x653   : > { %v18741_v30 = vpack.c.bf16 %v7327_v10, %v7327_v10  ;;  %7610 = vst.msk [vmem:[#allocation3 + $0x1d8] sm:$0xf] %vm7466_vm11, %v7587_v37  ;;  %7477 = vst.msk [vmem:[#allocation3 + $0x208] sm:$0xf] %vm7466_vm11, %v7454_v14  ;;  %v18747_v48 = vsel %vm13183_vm12, %v8071_v58, %v8072_v6  ;;  %v8224_v56 = vrot.slane %v8072_v6, 4  ;;  %v12723_v58 = vld [vmem:[%s19504_s5 + $0x198] sm:$0xff]  }
 0x654   : > { %v18751_v44 = vsel %vm13120_vm5, %v8015_v25, %v8016_v42  ;;  %8242 = vrot.lane.b32.xlu1 %v18747_v48, %s12917_s26  ;;  %8095 = vst.msk [vmem:[#allocation3 + $0x220] sm:$0xf] %vm7381_vm9, %v18747_v48  ;;  %8614 = vst.msk [vmem:[#allocation3 + $0x60] sm:$0xf] %vm7381_vm9, %v18747_v48  ;;  %v18768_v7 = vsel %vm13261_vm15, %v8127_v12, %v8128_v55  ;;  %v8390_v53 = vrot.slane %v8016_v42, 4  ;;  %v8271_v41 = vrot.slane %v8128_v55, 4 }
 0x655   : > { %8038 = vrot.lane.b32.xlu0 %v18751_v44, %s12917_s26  ;;  %8421 = vst.msk [vmem:[#allocation3 + $0x128] sm:$0xf] %vm7381_vm9, %v18751_v44  ;;  %8731 = vst.msk [vmem:[#allocation3 + $0x98] sm:$0xf] %vm7381_vm9, %v18741_v30  ;;  %v8225_v24 = vrot.slane %v18741_v30, 6  ;;  %v8391_v31 = vrot.slane %v18741_v30, 5  ;;  %12052 = vmatpush3.bf16.msra.mxu1 %v12716_v47 }
 0x656   : > { %8520 = vst.msk [vmem:[#allocation3 + $0xc4] sm:$0xf] %vm7381_vm9, %v18741_v30  ;;  %8300 = vst.msk [vmem:[#allocation3 + $0x158] sm:$0xf] %vm7381_vm9, %v18768_v7  ;;  %v8272_v29 = vrot.slane %v18741_v30, 7  ;;  %v7699_v38 = vpop.permute.xlu1 %7698  ;;  %12053 = vmatprep.subr.bf16.mxu1 %v12717_v35  ;;  %v12725_v14 = vld [vmem:[%s19504_s5 + $0x190] sm:$0xff]  }
 0x657   : > { %7728 = vst.msk [vmem:[#allocation3 + $0xa4] sm:$0xf] %vm7466_vm11, %v7699_v38  ;;  %v7701_v11 = vpop.permute.xlu0 %7700  ;;  %v18787_v4 = vsel %vm13183_vm12, %v8224_v56, %v8225_v24  ;;  %v18793_v17 = vsel %vm13120_vm5, %v8390_v53, %v8391_v31  ;;  %v12670_v10 = vld [vmem:[#allocation3 + $0x1a0] ss:$52 sps:$4 sm:$0xff]  }
 0x658   : > { %v18802_v63 = vsel %vm13261_vm15, %v8271_v41, %v8272_v29  ;;  %7729 = vst.msk [vmem:[#allocation3 + $0xd8] sm:$0xf] %vm7466_vm11, %v7701_v11  ;;  %8321 = vrot.lane.b32.xlu1 %v18421_v21, %s12917_s26  ;;  %v12727_v53 = vld [vmem:[%s19504_s5 + $0x188] sm:$0xff]  }
 0x659   : > { %8140 = vrot.lane.b32.xlu0 %v18504_v46, %s12917_s26  ;;  %8615 = vst.msk [vmem:[#allocation3 + $0x94] sm:$0xf] %vm7381_vm9, %v18787_v4  ;;  %8422 = vst.msk [vmem:[#allocation3 + $0x15c] sm:$0xf] %vm7381_vm9, %v18793_v17  ;;  %12054 = vmatpush3.bf16.msra.mxu1 %v12718_v0  ;;  %v12724_v46 = vld [vmem:[%s19504_s5 + $0x1d0] sm:$0xff]  }
 0x65a   : > { %8301 = vst.msk [vmem:[#allocation3 + $0x18c] sm:$0xf] %vm7381_vm9, %v18802_v63  ;;  %v7793_v25 = vpop.permute.xlu1 %7792  ;;  %v12672_v6 = vld [vmem:[#allocation3 + $0x1a4] ss:$52 sps:$4 sm:$0xff]   ;;  %12055 = vmatprep.subr.bf16.mxu1 %v12722_v3 }
 0x65b   : > { %7822 = vst.msk [vmem:[#allocation3 + $0xa8] sm:$0xf] %vm7466_vm11, %v7793_v25  ;;  %v7795_v21 = vpop.permute.xlu0 %7794  ;;  %10071 = vmatprep.mubr.bf16.mxu0 %v12672_v6  ;;  %v12732_v6 = vld [vmem:[%s19504_s5 + $0x180] sm:$0xff]  }
 0x65c   : > { %7823 = vst.msk [vmem:[#allocation3 + $0xdc] sm:$0xf] %vm7466_vm11, %v7795_v21  ;;  %v11850_v42 = vpop.f32.mrf.mxu0  ;;  %8457 = vrot.lane.b32.xlu1 %v18566_v20, %s12917_s26  ;;  %10072 = vmatmul.mubr.bf16.gmra.mxu0 %v12670_v10  ;;  %v12726_v20 = vld [vmem:[%s19504_s5 + $0x1c8] sm:$0xff]  }
 0x65d   : > { %8240 = vrot.lane.b32.xlu0 %v18673_v16, %s12917_s26  ;;  %12056 = vmatpush3.bf16.msra.mxu1 %v12723_v58 }
 0x65e   : > { %v11851_v55 = vpop.f32.mrf.mxu0  ;;  %v7589_v37 = vpop.permute.xlu1 %7588  ;;  %12057 = vmatprep.subr.bf16.mxu1 %v12724_v46  ;;  %v12675_v0 = vld [vmem:[#allocation3 + $0x70] ss:$52 sps:$4 sm:$0xff]  }
 0x65f   : > { %v11852_v12 = vadd.f32 %v11851_v55, %v11850_v42  ;;  %7611 = vst.msk [vmem:[#allocation3 + $0x20c] sm:$0xf] %vm7466_vm11, %v7589_v37  ;;  %v7705_v47 = vpop.permute.xlu0 %7704 }
 0x660   : > { %7731 = vst.msk [vmem:[#allocation3 + $0x140] sm:$0xf] %vm7466_vm11, %v7705_v47  ;;  %v11853_v35 = vpop.f32.mrf.mxu0  ;;  %8148 = vrot.lane.b32.xlu1 %v18689_v50, %s12917_s26 }
 0x661   : > { %8144 = vrot.lane.b32.xlu0 %v18604_v33, %s12917_s26  ;;  %v7123_v56 = vadd.f32 %v11852_v12, %v17461_v27  ;;  %12058 = vmatpush3.bf16.msra.mxu1 %v12725_v14  ;;  %v12731_v27 = vld [vmem:[%s19504_s5 + $0x1c0] sm:$0xff]   ;;  %v8393_v14 = vrot.slane %v8391_v31, 4 }
 0x662   : > { %v11854_v41 = vpop.f32.mrf.mxu0  ;;  %v7703_v38 = vpop.permute.xlu1 %7702  ;;  %v12677_v11 = vld [vmem:[#allocation3 + $0x74] ss:$52 sps:$4 sm:$0xff]   ;;  %12059 = vmatprep.subr.bf16.mxu1 %v12726_v20 }
 0x663   : > { %v7276_v3 = vadd.f32 %v17984_v23, %v7123_v56  ;;  %v11855_v58 = vadd.f32 %v11854_v41, %v11853_v35  ;;  %7730 = vst.msk [vmem:[#allocation3 + $0x10c] sm:$0xf] %vm7466_vm11, %v7703_v38  ;;  %v7799_v50 = vpop.permute.xlu0 %7798  ;;  %10126 = vmatprep.mubr.bf16.mxu1 %v12677_v11 }
 0x664   : > { %7825 = vst.msk [vmem:[#allocation3 + $0x144] sm:$0xf] %vm7466_vm11, %v7799_v50  ;;  %10127 = vmatmul.mubr.bf16.gmra.mxu1 %v12675_v0 }
 0x665   : > { %8244 = vrot.lane.b32.xlu0 %v18787_v4, %s12917_s26  ;;  %v7328_v33 = vmax.f32 %v7276_v3, 0.0  ;;  %v7126_v25 = vadd.f32 %v11855_v58, %v17470_v18  ;;  %12060 = vmatpush3.bf16.msra.mxu1 %v12727_v53  ;;  %v8227_v18 = vrot.slane %v8225_v24, 4  ;;  %v8274_v24 = vrot.slane %v8272_v29, 4 }
 0x666   : > { %v7797_v23 = vpop.permute.xlu1 %7796  ;;  %v8810_v10 = vld [vmem:[#allocation3 + $0x208] sm:$0xff]  ;;  %12061 = vmatprep.subr.bf16.mxu1 %v12731_v27 }
 0x667   : > { %v18855_v21 = vpack.c.bf16 %v7328_v33, %v7328_v33  ;;  %v7279_v46 = vadd.f32 %v17989_v8, %v7126_v25  ;;  %7824 = vst.msk [vmem:[#allocation3 + $0x110] sm:$0xf] %vm7466_vm11, %v7797_v23  ;;  %v7927_v42 = vpop.permute.xlu0 %7926  ;;  %v11264_v55 = vcombine.low %v8810_v10, %v8810_v10  ;;  %v11265_v37 = vcombine.high %v8810_v10, %v8810_v10 }
 0x668   : > { %7959 = vst.msk [vmem:[#allocation3 + $0x10] sm:$0xf] %vm7466_vm11, %v7927_v42 }
 0x669   : > { %8323 = vrot.lane.b32.xlu0 %v18440_v15, %s12917_s26  ;;  %8732 = vst.msk [vmem:[#allocation3 + $0xcc] sm:$0xf] %vm7381_vm9, %v18855_v21  ;;  %8521 = vst.msk [vmem:[#allocation3 + $0xf8] sm:$0xf] %vm7381_vm9, %v18855_v21  ;;  %v7329_v8 = vmax.f32 %v7279_v46, 0.0  ;;  %10078 = vmatprep.mubr.bf16.mxu0 %v11265_v37  ;;  %v8228_v12 = vrot.slane %v18855_v21, 6 }
 0x66a   : > { %v8394_v47 = vrot.slane %v18855_v21, 5  ;;  %v8275_v15 = vrot.slane %v18855_v21, 7  ;;  %v7707_v20 = vpop.permute.xlu1 %7706  ;;  %10079 = vmatmul.mubr.bf16.gmra.mxu0 %v11264_v55  ;;  %12062 = vmatpush3.bf16.msra.mxu1 %v12732_v6  ;;  %v12686_v50 = vld [vmem:[#allocation3 + $0xd8] ss:$52 sps:$4 sm:$0xff]   ;;  %v12775_v55 = vld [vmem:[%s19504_s5 + $0x2f8] sm:$0xff]  }
 0x66b   : > { %v18875_v31 = vpack.c.bf16 %v7329_v8, %v7329_v8  ;;  %7732 = vst.msk [vmem:[#allocation3 + $0x174] sm:$0xf] %vm7466_vm11, %v7707_v20  ;;  %v8019_v35 = vpop.permute.xlu0 %8018  ;;  %v18880_v56 = vsel %vm13183_vm12, %v8227_v18, %v8228_v12  ;;  %v8230_v29 = vrot.slane %v8228_v12, 4  ;;  %12151 = vmatprep.subr.bf16.mxu1 %v12775_v55 }
 0x66c   : > { %v18884_v53 = vsel %vm13120_vm5, %v8393_v14, %v8394_v47  ;;  %8051 = vst.msk [vmem:[#allocation3 + $0x14] sm:$0xf] %vm7466_vm11, %v8019_v35  ;;  %v18895_v41 = vsel %vm13261_vm15, %v8274_v24, %v8275_v15  ;;  %v8396_v38 = vrot.slane %v8394_v47, 4  ;;  %v8277_v11 = vrot.slane %v8275_v15, 4 }
 0x66d   : > { %8146 = vrot.lane.b32.xlu0 %v18649_v22, %s12917_s26  ;;  %8616 = vst.msk [vmem:[#allocation3 + $0xc8] sm:$0xf] %vm7381_vm9, %v18880_v56  ;;  %8423 = vst.msk [vmem:[#allocation3 + $0x190] sm:$0xf] %vm7381_vm9, %v18884_v53  ;;  %v8231_v22 = vrot.slane %v18875_v31, 6  ;;  %v8397_v0 = vrot.slane %v18875_v31, 5 }
 0x66e   : > { %8733 = vst.msk [vmem:[#allocation3 + $0x100] sm:$0xf] %vm7381_vm9, %v18875_v31  ;;  %8522 = vst.msk [vmem:[#allocation3 + $0x12c] sm:$0xf] %vm7381_vm9, %v18875_v31  ;;  %v8278_v3 = vrot.slane %v18875_v31, 7  ;;  %v7801_v58 = vpop.permute.xlu1 %7800 }
 0x66f   : > { %8302 = vst.msk [vmem:[#allocation3 + $0x1c0] sm:$0xf] %vm7381_vm9, %v18895_v41  ;;  %v12688_v27 = vld [vmem:[#allocation3 + $0xdc] ss:$52 sps:$4 sm:$0xff]   ;;  %v7709_v33 = vpop.permute.xlu0 %7708  ;;  %v18909_v25 = vsel %vm13183_vm12, %v8230_v29, %v8231_v22  ;;  %v18913_v23 = vsel %vm13120_vm5, %v8396_v38, %v8397_v0 }
 0x670   : > { %7826 = vst.msk [vmem:[#allocation3 + $0x178] sm:$0xf] %vm7466_vm11, %v7801_v58  ;;  %v18919_v10 = vsel %vm13261_vm15, %v8277_v11, %v8278_v3  ;;  %7733 = vst.msk [vmem:[#allocation3 + $0x1a8] sm:$0xf] %vm7466_vm11, %v7709_v33  ;;  %8248 = vrot.lane.b32.xlu1 %v18909_v25, %s12917_s26  ;;  %10132 = vmatprep.mubr.bf16.mxu1 %v12688_v27  ;;  %v8399_v27 = vrot.slane %v8397_v0, 4  ;;  %v12745_v0 = vld [vmem:[%s19504_s5 + $0x230] sm:$0xff]  }
 0x671   : > { %8617 = vst.msk [vmem:[#allocation3 + $0xfc] sm:$0xf] %vm7381_vm9, %v18909_v25  ;;  %8246 = vrot.lane.b32.xlu0 %v18880_v56, %s12917_s26  ;;  %8424 = vst.msk [vmem:[#allocation3 + $0x1c4] sm:$0xf] %vm7381_vm9, %v18913_v23  ;;  %10133 = vmatmul.mubr.bf16.gmra.mxu1 %v12686_v50  ;;  %v12744_v50 = vld [vmem:[%s19504_s5 + $0x270] sm:$0xff]  }
 0x672   : > { %8303 = vst.msk [vmem:[#allocation3 + $0x1f4] sm:$0xf] %vm7381_vm9, %v18919_v10  ;;  %v7929_v6 = vpop.permute.xlu1 %7928  ;;  %v12693_v14 = vld [vmem:[#allocation3 + $0x140] ss:$52 sps:$4 sm:$0xff]  }
 0x673   : > { %7960 = vst.msk [vmem:[#allocation3 + $0x44] sm:$0xf] %vm7466_vm11, %v7929_v6  ;;  %v7803_v46 = vpop.permute.xlu0 %7802 }
 0x674   : > { %7827 = vst.msk [vmem:[#allocation3 + $0x1ac] sm:$0xf] %vm7466_vm11, %v7803_v46  ;;  %v11856_v42 = vpop.f32.mrf.mxu0  ;;  %8327 = vrot.lane.b32.xlu1 %v18558_v19, %s12917_s26 }
 0x675   : > { %8325 = vrot.lane.b32.xlu0 %v18540_v43, %s12917_s26 }
 0x676   : > { %v11857_v37 = vpop.f32.mrf.mxu0  ;;  %v8021_v18 = vpop.permute.xlu1 %8020 }
 0x677   : > { %v12695_v8 = vld [vmem:[#allocation3 + $0x144] ss:$52 sps:$4 sm:$0xff]   ;;  %v11858_v12 = vadd.f32 %v11857_v37, %v11856_v42  ;;  %8052 = vst.msk [vmem:[#allocation3 + $0x48] sm:$0xf] %vm7466_vm11, %v8021_v18  ;;  %v7931_v47 = vpop.permute.xlu0 %7930 }
 0x678   : > { %7961 = vst.msk [vmem:[#allocation3 + $0x78] sm:$0xf] %vm7466_vm11, %v7931_v47  ;;  %v11859_v15 = vpop.f32.mrf.mxu0  ;;  %8461 = vrot.lane.b32.xlu1 %v18641_v28, %s12917_s26  ;;  %10138 = vmatprep.mubr.bf16.mxu1 %v12695_v8 }
 0x679   : > { %8459 = vrot.lane.b32.xlu0 %v18593_v59, %s12917_s26  ;;  %v7131_v43 = vadd.f32 %v11858_v12, %v17519_v51  ;;  %10139 = vmatmul.mubr.bf16.gmra.mxu1 %v12693_v14  ;;  %v12743_v59 = vld [vmem:[%s19504_s5 + $0x238] sm:$0xff]   ;;  %v12746_v14 = vld [vmem:[%s19504_s5 + $0x268] sm:$0xff]  }
 0x67a   : > { %v11860_v19 = vpop.f32.mrf.mxu0  ;;  %v12700_v38 = vld [vmem:[#allocation3 + $0x10] ss:$52 sps:$4 sm:$0xff]  }
 0x67b   : > { %v7284_v20 = vadd.f32 %v17995_v13, %v7131_v43  ;;  %v11861_v24 = vadd.f32 %v11860_v19, %v11859_v15  ;;  %v8023_v35 = vpop.permute.xlu0 %8022 }
 0x67c   : > { %8053 = vst.msk [vmem:[#allocation3 + $0x7c] sm:$0xf] %vm7466_vm11, %v8023_v35  ;;  %v12747_v35 = vld [vmem:[%s19504_s5 + $0x228] sm:$0xff]  }
 0x67d   : > { %8150 = vrot.lane.b32.xlu0 %v18768_v7, %s12917_s26  ;;  %v7330_v29 = vmax.f32 %v7284_v20, 0.0  ;;  %v7134_v28 = vadd.f32 %v11861_v24, %v17531_v57  ;;  %v7711_v51 = vpop.permute.xlu1 %7710  ;;  %v8233_v57 = vrot.slane %v8231_v22, 4  ;;  %v8280_v22 = vrot.slane %v8278_v3, 4 }
 0x67e   : > { %v12702_v11 = vld [vmem:[#allocation3 + $0x14] ss:$52 sps:$4 sm:$0xff]   ;;  %7734 = vst.msk [vmem:[#allocation3 + $0x1dc] sm:$0xf] %vm7466_vm11, %v7711_v51  ;;  %v12750_v51 = vld [vmem:[%s19504_s5 + $0x260] sm:$0xff]  }
 0x67f   : > { %v18956_v58 = vpack.c.bf16 %v7330_v29, %v7330_v29  ;;  %v7287_v13 = vadd.f32 %v18002_v36, %v7134_v28  ;;  %10191 = vmatprep.mubr.bf16.mxu0 %v12702_v11 }
 0x680   : > { %10192 = vmatmul.mubr.bf16.vlgmr.msra.gmra.mxu0 %v12700_v38  ;;  %v12751_v38 = vld [vmem:[%s19504_s5 + $0x220] sm:$0xff]  }
 0x681   : > { %8329 = vrot.lane.b32.xlu0 %v18620_v9, %s12917_s26  ;;  %8734 = vst.msk [vmem:[#allocation3 + $0x134] sm:$0xf] %vm7381_vm9, %v18956_v58  ;;  %8523 = vst.msk [vmem:[#allocation3 + $0x160] sm:$0xf] %vm7381_vm9, %v18956_v58  ;;  %v7331_v33 = vmax.f32 %v7287_v13, 0.0  ;;  %v8234_v36 = vrot.slane %v18956_v58, 6  ;;  %v7805_v42 = vpop.permute.xlu1 %7804  ;;  %v7713_v55 = vpop.permute.xlu0 %7712  ;;  %12100 = vmatpush3.bf16.msra.mxu0 %v12743_v59 }
 0x682   : > { %v8400_v6 = vrot.slane %v18956_v58, 5  ;;  %v8281_v46 = vrot.slane %v18956_v58, 7  ;;  %7828 = vst.msk [vmem:[#allocation3 + $0x1e0] sm:$0xf] %vm7466_vm11, %v7805_v42  ;;  %7735 = vst.msk [vmem:[#allocation3 + $0x210] sm:$0xf] %vm7466_vm11, %v7713_v55  ;;  %12101 = vmatprep.subr.bf16.mxu0 %v12744_v50 }
 0x683   : > { %v18977_v37 = vpack.c.bf16 %v7331_v33, %v7331_v33  ;;  %8487 = vst.msk [vmem:[#allocation3 + $0x24] sm:$0xf] %vm7466_vm11, %v7713_v55  ;;  %v18984_v18 = vsel %vm13183_vm12, %v8233_v57, %v8234_v36  ;;  %v8454_v8 = vrot.slane %v8234_v36, 4  ;;  %v12753_v36 = vld [vmem:[%s19504_s5 + $0x218] sm:$0xff]   ;;  %v11192_v55 = vrot.slane %v18620_v9, 11 }
 0x684   : > { %v18988_v3 = vsel %vm13120_vm5, %v8399_v27, %v8400_v6  ;;  %8250 = vrot.lane.b32.xlu1 %v18984_v18, %s12917_s26  ;;  %8618 = vst.msk [vmem:[#allocation3 + $0x130] sm:$0xf] %vm7381_vm9, %v18984_v18  ;;  %v8402_v12 = vrot.slane %v8400_v6, 4  ;;  %v19003_v47 = vsel %vm13261_vm15, %v8280_v22, %v8281_v46 }
 0x685   : > { %8463 = vrot.lane.b32.xlu0 %v18673_v16, %s12917_s26  ;;  %8425 = vst.msk [vmem:[#allocation3 + $0x1f8] sm:$0xf] %vm7381_vm9, %v18988_v3  ;;  %8735 = vst.msk [vmem:[#allocation3 + $0x168] sm:$0xf] %vm7381_vm9, %v18977_v37  ;;  %v8455_v15 = vrot.slane %v18977_v37, 6  ;;  %v8403_v43 = vrot.slane %v18977_v37, 5  ;;  %v7933_v20 = vpop.permute.xlu1 %7932  ;;  %v7935_v24 = vpop.permute.xlu0 %7934  ;;  %12102 = vmatpush3.bf16.msra.mxu0 %v12745_v0 }
 0x686   : > { %8524 = vst.msk [vmem:[#allocation3 + $0x194] sm:$0xf] %vm7381_vm9, %v18977_v37  ;;  %8304 = vst.msk [vmem:[#allocation3 + $0x228] sm:$0xf] %vm7381_vm9, %v19003_v47  ;;  %v8643_v16 = vrot.slane %v8281_v46, 4  ;;  %v8644_v19 = vrot.slane %v18977_v37, 7  ;;  %12103 = vmatprep.subr.bf16.mxu0 %v12746_v14 }
 0x687   : > { %7962 = vst.msk [vmem:[#allocation3 + $0xac] sm:$0xf] %vm7466_vm11, %v7933_v20  ;;  %7963 = vst.msk [vmem:[#allocation3 + $0xe0] sm:$0xf] %vm7466_vm11, %v7935_v24  ;;  %v19023_v29 = vsel %vm13183_vm12, %v8454_v8, %v8455_v15  ;;  %v19029_v28 = vsel %vm13120_vm5, %v8402_v12, %v8403_v43  ;;  %v12703_v50 = vld [vmem:[#allocation3 + $0x1a8] ss:$52 sps:$4 sm:$0xff]  }
 0x688   : > { %v19035_v59 = vsel %vm13261_vm15, %v8643_v16, %v8644_v19  ;;  %8331 = vrot.lane.b32.xlu1 %v18633_v5, %s12917_s26  ;;  %8619 = vst.msk [vmem:[#allocation3 + $0x164] sm:$0xf] %vm7381_vm9, %v19023_v29  ;;  %8426 = vst.msk [vmem:[#allocation3 + $0x22c] sm:$0xf] %vm7381_vm9, %v19029_v28  ;;  %v12752_v5 = vld [vmem:[%s19504_s5 + $0x258] sm:$0xff]  }
 0x689   : > { %8333 = vrot.lane.b32.xlu0 %v18719_v45, %s12917_s26  ;;  %v8025_v11 = vpop.permute.xlu1 %8024  ;;  %v8027_v13 = vpop.permute.xlu0 %8026  ;;  %v12705_v57 = vld [vmem:[#allocation3 + $0x1ac] ss:$52 sps:$4 sm:$0xff]   ;;  %12104 = vmatpush3.bf16.msra.mxu0 %v12747_v35 }
 0x68a   : > { %8054 = vst.msk [vmem:[#allocation3 + $0xb0] sm:$0xf] %vm7466_vm11, %v8025_v11  ;;  %8055 = vst.msk [vmem:[#allocation3 + $0xe4] sm:$0xf] %vm7466_vm11, %v8027_v13  ;;  %12105 = vmatprep.subr.bf16.mxu0 %v12750_v51  ;;  %10144 = vmatprep.mubr.bf16.mxu1 %v12705_v57  ;;  %v8646_v13 = vrot.slane %v8644_v19, 4 }
 0x68b   : > { %10145 = vmatmul.mubr.bf16.gmra.mxu1 %v12703_v50 }
 0x68c   : > { %v11862_v45 = vpop.f32.mrf.mxu0  ;;  %8465 = vrot.lane.b32.xlu1 %v18747_v48, %s12917_s26  ;;  %v12757_v48 = vld [vmem:[%s19504_s5 + $0x250] sm:$0xff]  }
 0x68d   : > { %8467 = vrot.lane.b32.xlu0 %v18787_v4, %s12917_s26  ;;  %v7807_v33 = vpop.permute.xlu1 %7806  ;;  %12106 = vmatpush3.bf16.msra.mxu0 %v12751_v38  ;;  %v7939_v46 = vpop.permute.xlu0 %7938 }
 0x68e   : > { %v11863_v27 = vpop.f32.mrf.mxu0  ;;  %7829 = vst.msk [vmem:[#allocation3 + $0x214] sm:$0xf] %vm7466_vm11, %v7807_v33  ;;  %12107 = vmatprep.subr.bf16.mxu0 %v12752_v5  ;;  %7965 = vst.msk [vmem:[#allocation3 + $0x148] sm:$0xf] %vm7466_vm11, %v7939_v46  ;;  %v12708_v14 = vld [vmem:[#allocation3 + $0x78] ss:$52 sps:$4 sm:$0xff]  }
 0x68f   : > { %v11864_v6 = vadd.f32 %v11863_v27, %v11862_v45 }
 0x690   : > { %v11865_v4 = vpop.f32.mrf.mxu0  ;;  %8335 = vrot.lane.b32.xlu1 %v18741_v30, %s12917_s26  ;;  %v8627_v30 = vsel %vm13261_vm15, %v11192_v55, %v18662_v54  ;;  %v12759_v54 = vld [vmem:[%s19504_s5 + $0x248] sm:$0xff]  }
 0x691   : > { %8546 = vrot.lane.b32.xlu0 %v18669_v40, %s12917_s26  ;;  %v7139_v42 = vadd.f32 %v11864_v6, %v17575_v60  ;;  %v7937_v0 = vpop.permute.xlu1 %7936  ;;  %v12710_v8 = vld [vmem:[#allocation3 + $0x7c] ss:$52 sps:$4 sm:$0xff]   ;;  %12108 = vmatpush3.bf16.msra.mxu0 %v12753_v36  ;;  %v7943_v20 = vpop.permute.xlu0 %7942  ;;  %v12758_v60 = vld [vmem:[%s19504_s5 + $0x210] sm:$0xff]  }
 0x692   : > { %v11866_v22 = vpop.f32.mrf.mxu0  ;;  %7964 = vst.msk [vmem:[#allocation3 + $0x114] sm:$0xf] %vm7466_vm11, %v7937_v0  ;;  %12109 = vmatprep.subr.bf16.mxu0 %v12757_v48  ;;  %7967 = vst.msk [vmem:[#allocation3 + $0x1b0] sm:$0xf] %vm7466_vm11, %v7943_v20  ;;  %10199 = vmatprep.mubr.bf16.mxu0 %v12710_v8  ;;  %v12765_v6 = vld [vmem:[%s19504_s5 + $0x200] sm:$0xff]  }
 0x693   : > { %v7292_v12 = vadd.f32 %v18033_v61, %v7139_v42  ;;  %v11867_v16 = vadd.f32 %v11866_v22, %v11865_v4  ;;  %8260 = vst.msk [vmem:[#allocation3 + $0x1c] sm:$0xf] %vm7466_vm11, %v7943_v20  ;;  %10200 = vmatmul.mubr.bf16.gmra.mxu0 %v12708_v14 }
 0x694   : > { %8469 = vrot.lane.b32.xlu1 %v18880_v56, %s12917_s26 }
 0x695   : > { %8658 = vrot.lane.b32.xlu0 %v8627_v30, %s12917_s26  ;;  %v7332_v61 = vmax.f32 %v7292_v12, 0.0  ;;  %v7142_v9 = vadd.f32 %v11867_v16, %v17589_v52  ;;  %v8029_v40 = vpop.permute.xlu1 %8028  ;;  %v8811_v24 = vld [vmem:[#allocation3 + $0x210] sm:$0xff]  ;;  %v8031_v38 = vpop.permute.xlu0 %8030  ;;  %12110 = vmatpush3.bf16.msra.mxu0 %v12758_v60  ;;  %v12760_v52 = vld [vmem:[%s19504_s5 + $0x208] sm:$0xff]  }
 0x696   : > { %8056 = vst.msk [vmem:[#allocation3 + $0x118] sm:$0xf] %vm7466_vm11, %v8029_v40  ;;  %v11266_v56 = vcombine.low %v8811_v24, %v8811_v24  ;;  %v11267_v11 = vcombine.high %v8811_v24, %v8811_v24  ;;  %8057 = vst.msk [vmem:[#allocation3 + $0x14c] sm:$0xf] %vm7466_vm11, %v8031_v38  ;;  %12111 = vmatprep.subr.bf16.mxu0 %v12759_v54 }
 0x697   : > { %v11542_v35 = vpack.c.bf16 %v7332_v61, %v7332_v61  ;;  %v7295_v51 = vadd.f32 %v18067_v32, %v7142_v9  ;;  %v8534_v32 = vrot.slane %v8403_v43, 4  ;;  %v8590_v43 = vrot.slane %v8455_v15, 4 }
 0x698   : > { %8548 = vrot.lane.b32.xlu1 %v18751_v44, %s12917_s26  ;;  %10151 = vmatprep.mubr.bf16.mxu1 %v11267_v11  ;;  %v12764_v44 = vld [vmem:[%s19504_s5 + $0x240] sm:$0xff]  }
 0x699   : > { %8337 = vrot.lane.b32.xlu0 %v18855_v21, %s12917_s26  ;;  %8736 = vst.msk [vmem:[#allocation3 + $0x19c] sm:$0xf] %vm7381_vm9, %v11542_v35  ;;  %8525 = vst.msk [vmem:[#allocation3 + $0x1c8] sm:$0xf] %vm7381_vm9, %v11542_v35  ;;  %v7333_v50 = vmax.f32 %v7295_v51, 0.0  ;;  %v8535_v57 = vrot.slane %v11542_v35, 5  ;;  %v7941_v45 = vpop.permute.xlu1 %7940  ;;  %10152 = vmatmul.mubr.bf16.gmra.mxu1 %v11266_v56  ;;  %v8131_v27 = vpop.permute.xlu0 %8130 }
 0x69a   : > { %v8647_v5 = vrot.slane %v11542_v35, 7  ;;  %v8591_v21 = vrot.slane %v11542_v35, 6  ;;  %7966 = vst.msk [vmem:[#allocation3 + $0x17c] sm:$0xf] %vm7466_vm11, %v7941_v45  ;;  %12112 = vmatpush3.bf16.msra.mxu0 %v12760_v52  ;;  %8163 = vst.msk [vmem:[#allocation3 + $0x18] sm:$0xf] %vm7466_vm11, %v8131_v27 }
 0x69b   : > { %v19112_v19 = vpack.c.bf16 %v7333_v50, %v7333_v50  ;;  %v19117_v33 = vsel %vm13120_vm5, %v8534_v32, %v8535_v57  ;;  %v8537_v37 = vrot.slane %v8535_v57, 4  ;;  %12113 = vmatprep.subr.bf16.mxu0 %v12764_v44  ;;  %v12719_v55 = vld [vmem:[#allocation3 + $0xe0] ss:$52 sps:$4 sm:$0xff]   ;;  %v12777_v52 = vld [vmem:[%s19504_s5 + $0x2f0] sm:$0xff]  }
 0x69c   : > { %v19121_v36 = vsel %vm13261_vm15, %v8646_v13, %v8647_v5  ;;  %8660 = vrot.lane.b32.xlu1 %v18768_v7, %s12917_s26  ;;  %v8592_v15 = vsel %vm13183_vm12, %v8590_v43, %v8591_v21  ;;  %v8649_v48 = vrot.slane %v8647_v5, 4  ;;  %v19142_v7 = vld [vmem:[%s19504_s5 + $0x318] sm:$0xff]   ;;  %v8593_v0 = vrot.slane %v8591_v21, 4  ;;  %v12778_v44 = vld [vmem:[%s19504_s5 + $0x2b0] sm:$0xff]  }
 0x69d   : > { %8471 = vrot.lane.b32.xlu0 %v18909_v25, %s12917_s26  ;;  %8737 = vst.msk [vmem:[#allocation3 + $0x1d0] sm:$0xf] %vm7381_vm9, %v19112_v19  ;;  %8526 = vst.msk [vmem:[#allocation3 + $0x1fc] sm:$0xf] %vm7381_vm9, %v19112_v19  ;;  %v8538_v46 = vrot.slane %v19112_v19, 5  ;;  %v8650_v4 = vrot.slane %v19112_v19, 7  ;;  %v7945_v42 = vpop.permute.xlu1 %7944  ;;  %v7947_v14 = vpop.permute.xlu0 %7946 }
 0x69e   : > { %8620 = vst.msk [vmem:[#allocation3 + $0x198] sm:$0xf] %vm7381_vm9, %v8592_v15  ;;  %v8594_v25 = vrot.slane %v19112_v19, 6  ;;  %v12721_v22 = vld [vmem:[#allocation3 + $0xe4] ss:$52 sps:$4 sm:$0xff]   ;;  %12114 = vmatpush3.bf16.msra.mxu0 %v12765_v6 }
 0x69f   : > { %7968 = vst.msk [vmem:[#allocation3 + $0x1e4] sm:$0xf] %vm7466_vm11, %v7945_v42  ;;  %8261 = vst.msk [vmem:[#allocation3 + $0x50] sm:$0xf] %vm7466_vm11, %v7945_v42  ;;  %v19150_v8 = vsel %vm13120_vm5, %v8537_v37, %v8538_v46  ;;  %v19154_v12 = vsel %vm13261_vm15, %v8649_v48, %v8650_v4  ;;  %10205 = vmatprep.mubr.bf16.mxu0 %v12721_v22  ;;  %12299 = vmatprep.subr.bf16.mxu0 %v19142_v7  ;;  %v12781_v6 = vld [vmem:[%s19504_s5 + $0x2e8] sm:$0xff]   ;;  %v12788_v22 = vld [vmem:[%s19504_s5 + $0x2d8] sm:$0xff]  }
 0x6a0   : > { %7969 = vst.msk [vmem:[#allocation3 + $0x218] sm:$0xf] %vm7466_vm11, %v7947_v14  ;;  %8262 = vst.msk [vmem:[#allocation3 + $0x84] sm:$0xf] %vm7466_vm11, %v7947_v14  ;;  %8339 = vrot.lane.b32.xlu1 %v18875_v31, %s12917_s26  ;;  %v8595_v16 = vsel %vm13183_vm12, %v8593_v0, %v8594_v25  ;;  %10206 = vmatmul.mubr.bf16.gmra.mxu0 %v12719_v55 }
 0x6a1   : > { %8550 = vrot.lane.b32.xlu0 %v18793_v17, %s12917_s26  ;;  %8621 = vst.msk [vmem:[#allocation3 + $0x1cc] sm:$0xf] %vm7381_vm9, %v8595_v16  ;;  %v8033_v20 = vpop.permute.xlu1 %8032  ;;  %v12728_v40 = vld [vmem:[#allocation3 + $0x148] ss:$52 sps:$4 sm:$0xff]  }
 0x6a2   : > { %8058 = vst.msk [vmem:[#allocation3 + $0x180] sm:$0xf] %vm7466_vm11, %v8033_v20 }
 0x6a4   : > { %v11868_v30 = vpop.f32.mrf.mxu0  ;;  %8473 = vrot.lane.b32.xlu1 %v18984_v18, %s12917_s26 }
 0x6a5   : > { %8662 = vrot.lane.b32.xlu0 %v18802_v63, %s12917_s26  ;;  %v8133_v31 = vpop.permute.xlu1 %8132 }
 0x6a6   : > { %v11869_v17 = vpop.f32.mrf.mxu0  ;;  %8164 = vst.msk [vmem:[#allocation3 + $0x4c] sm:$0xf] %vm7466_vm11, %v8133_v31  ;;  %v12736_v42 = vld [vmem:[#allocation3 + $0x1b0] ss:$52 sps:$4 sm:$0xff]  }
 0x6a7   : > { %v11870_v60 = vadd.f32 %v11869_v17, %v11868_v30  ;;  %v12791_v17 = vld [vmem:[%s19504_s5 + $0x2d0] sm:$0xff]  }
 0x6a8   : > { %v11871_v61 = vpop.f32.mrf.mxu0  ;;  %8552 = vrot.lane.b32.xlu1 %v18884_v53, %s12917_s26 }
 0x6a9   : > { %8341 = vrot.lane.b32.xlu0 %v18956_v58, %s12917_s26  ;;  %v7147_v9 = vadd.f32 %v11870_v60, %v17639_v26  ;;  %v12730_v18 = vld [vmem:[#allocation3 + $0x14c] ss:$52 sps:$4 sm:$0xff]   ;;  %v12735_v26 = vld [vmem:[#allocation3 + $0x1c] ss:$52 sps:$4 sm:$0xff]  }
 0x6aa   : > { %v11872_v54 = vpop.f32.mrf.mxu0  ;;  %10211 = vmatprep.mubr.bf16.mxu0 %v12730_v18  ;;  %10264 = vmatprep.mubr.bf16.mxu1 %v12735_v26  ;;  %v12798_v18 = vld [vmem:[%s19504_s5 + $0x2c0] sm:$0xff]  }
 0x6ab   : > { %v7300_v24 = vadd.f32 %v18074_v1, %v7147_v9  ;;  %v11873_v63 = vadd.f32 %v11872_v54, %v11871_v61  ;;  %10212 = vmatmul.mubr.bf16.gmra.mxu0 %v12728_v40  ;;  %v12776_v1 = vld [vmem:[%s19504_s5 + $0x2b8] sm:$0xff]   ;;  %v12796_v61 = vld [vmem:[%s19504_s5 + $0x2c8] sm:$0xff]  }
 0x6ac   : > { %8664 = vrot.lane.b32.xlu1 %v18895_v41, %s12917_s26  ;;  %v8652_v41 = vrot.slane %v8650_v4, 4  ;;  %v12782_v4 = vld [vmem:[%s19504_s5 + $0x2a8] sm:$0xff]  }
 0x6ad   : > { %8554 = vrot.lane.b32.xlu0 %v18913_v23, %s12917_s26  ;;  %v7334_v35 = vmax.f32 %v7300_v24, 0.0  ;;  %v7150_v53 = vadd.f32 %v11873_v63, %v17656_v2  ;;  %v8035_v51 = vpop.permute.xlu1 %8034  ;;  %v12733_v58 = vld [vmem:[#allocation3 + $0x18] ss:$52 sps:$4 sm:$0xff]   ;;  %v8540_v2 = vrot.slane %v8538_v46, 4  ;;  %v12797_v40 = vld [vmem:[%s19504_s5 + $0x288] sm:$0xff]  }
 0x6ae   : > { %8059 = vst.msk [vmem:[#allocation3 + $0x1b4] sm:$0xf] %vm7466_vm11, %v8035_v51  ;;  %10265 = vmatmul.mubr.bf16.vlgmr.msra.gmra.mxu1 %v12733_v58 }
 0x6af   : > { %v11544_v38 = vpack.c.bf16 %v7334_v35, %v7334_v35  ;;  %v7303_v56 = vadd.f32 %v18081_v49, %v7150_v53  ;;  %12152 = vmatpush3.bf16.msra.mxu1 %v12776_v1  ;;  %v12799_v35 = vld [vmem:[%s19504_s5 + $0x280] sm:$0xff]  }
 0x6b0   : > { %8475 = vrot.lane.b32.xlu1 %v19023_v29, %s12917_s26  ;;  %12153 = vmatprep.subr.bf16.mxu1 %v12777_v52 }
 0x6b1   : > { %8666 = vrot.lane.b32.xlu0 %v18919_v10, %s12917_s26  ;;  %8738 = vst.msk [vmem:[#allocation3 + $0x204] sm:$0xf] %vm7381_vm9, %v11544_v38  ;;  %8527 = vst.msk [vmem:[#allocation3 + $0x230] sm:$0xf] %vm7381_vm9, %v11544_v38  ;;  %v7335_v23 = vmax.f32 %v7303_v56, 0.0  ;;  %v8541_v49 = vrot.slane %v11544_v38, 5  ;;  %v8135_v13 = vpop.permute.xlu1 %8134  ;;  %v8037_v29 = vpop.permute.xlu0 %8036 }
 0x6b2   : > { %v8653_v11 = vrot.slane %v11544_v38, 7  ;;  %v8597_v32 = vrot.slane %v11544_v38, 6  ;;  %v8596_v10 = vrot.slane %v8594_v25, 4  ;;  %8165 = vst.msk [vmem:[#allocation3 + $0x80] sm:$0xf] %vm7466_vm11, %v8135_v13 }
 0x6b3   : > { %v11546_v50 = vpack.c.bf16 %v7335_v23, %v7335_v23  ;;  %8060 = vst.msk [vmem:[#allocation3 + $0x1e8] sm:$0xf] %vm7466_vm11, %v8037_v29  ;;  %v19205_v57 = vsel %vm13120_vm5, %v8540_v2, %v8541_v49  ;;  %v8543_v21 = vrot.slane %v8541_v49, 4  ;;  %12154 = vmatpush3.bf16.msra.mxu1 %v12778_v44 }
 0x6b4   : > { %v19209_v5 = vsel %vm13261_vm15, %v8652_v41, %v8653_v11  ;;  %8556 = vrot.lane.b32.xlu1 %v18988_v3, %s12917_s26  ;;  %v8655_v45 = vrot.slane %v8653_v11, 4  ;;  %v8598_v43 = vsel %vm13183_vm12, %v8596_v10, %v8597_v32  ;;  %v8599_v3 = vrot.slane %v8597_v32, 4  ;;  %12155 = vmatprep.subr.bf16.mxu1 %v12781_v6 }
 0x6b5   : > { %8558 = vrot.lane.b32.xlu0 %v19029_v28, %s12917_s26  ;;  %8739 = vst.msk [vmem:[#allocation3 + $0x238] sm:$0xf] %vm7381_vm9, %v11546_v50  ;;  %v8544_v19 = vrot.slane %v11546_v50, 5  ;;  %v8656_v27 = vrot.slane %v11546_v50, 7  ;;  %8622 = vst.msk [vmem:[#allocation3 + $0x200] sm:$0xf] %vm7381_vm9, %v8598_v43  ;;  %v8237_v15 = vpop.permute.xlu1 %8236  ;;  %v8137_v28 = vpop.permute.xlu0 %8136 }
 0x6b6   : > { %v8600_v37 = vrot.slane %v11546_v50, 6  ;;  %8263 = vst.msk [vmem:[#allocation3 + $0xb8] sm:$0xf] %vm7466_vm11, %v8237_v15  ;;  %8166 = vst.msk [vmem:[#allocation3 + $0xb4] sm:$0xf] %vm7466_vm11, %v8137_v28 }
 0x6b7   : > { %v8545_v46 = vsel %vm13120_vm5, %v8543_v21, %v8544_v19  ;;  %v8657_v48 = vsel %vm13261_vm15, %v8655_v45, %v8656_v27  ;;  %12156 = vmatpush3.bf16.msra.mxu1 %v12782_v4  ;;  %v12803_v45 = vld [vmem:[%s19504_s5 + $0x310] sm:$0xff]   ;;  %v12807_v27 = vld [vmem:[%s19504_s5 + $0x308] sm:$0xff]   ;;  %vm9994_vm5 = vcmask 523264  }
 0x6b8   : > { %v8601_v25 = vsel %vm13183_vm12, %v8599_v3, %v8600_v37  ;;  %8668 = vrot.lane.b32.xlu1 %v19003_v47, %s12917_s26  ;;  %v12784_v47 = vld [vmem:[%s19504_s5 + $0x2a0] sm:$0xff]   ;;  %12157 = vmatprep.subr.bf16.mxu1 %v12783_v39 }
 0x6b9   : > { %8670 = vrot.lane.b32.xlu0 %v19035_v59, %s12917_s26  ;;  %8623 = vst.msk [vmem:[#allocation3 + $0x234] sm:$0xf] %vm7381_vm9, %v8601_v25  ;;  %v8139_v62 = vpop.permute.xlu1 %8138 }
 0x6ba   : > { %v12738_v55 = vld [vmem:[#allocation3 + $0x1b4] ss:$52 sps:$4 sm:$0xff]   ;;  %8167 = vst.msk [vmem:[#allocation3 + $0xe8] sm:$0xf] %vm7466_vm11, %v8139_v62 }
 0x6bb   : > { %10217 = vmatprep.mubr.bf16.mxu0 %v12738_v55  ;;  %12158 = vmatpush3.bf16.msra.mxu1 %v12784_v47 }
 0x6bc   : > { %8560 = vrot.lane.b32.xlu1 %v19117_v33, %s12917_s26  ;;  %v11907_v59 = vpop.f32.mrf.mxu0  ;;  %10218 = vmatmul.mubr.bf16.gmra.mxu0 %v12736_v42  ;;  %v12789_v33 = vld [vmem:[%s19504_s5 + $0x298] sm:$0xff]  }
 0x6bd   : > { %8562 = vrot.lane.b32.xlu0 %v19150_v8, %s12917_s26  ;;  %v8239_v0 = vpop.permute.xlu1 %8238  ;;  %v12739_v14 = vld [vmem:[#allocation3 + $0x80] ss:$52 sps:$4 sm:$0xff]   ;;  %v12741_v16 = vld [vmem:[#allocation3 + $0x84] ss:$52 sps:$4 sm:$0xff]   ;;  %12159 = vmatprep.subr.bf16.mxu1 %v12788_v22 }
 0x6be   : > { %8264 = vst.msk [vmem:[#allocation3 + $0xec] sm:$0xf] %vm7466_vm11, %v8239_v0  ;;  %v11908_v20 = vpop.f32.mrf.mxu0  ;;  %10272 = vmatprep.mubr.bf16.mxu1 %v12741_v16 }
 0x6bf   : > { %v19263_v8 = vadd.f32 %v11908_v20, %v11907_v59  ;;  %10273 = vmatmul.mubr.bf16.gmra.mxu1 %v12739_v14 }
 0x6c0   : > { %8672 = vrot.lane.b32.xlu1 %v19121_v36, %s12917_s26  ;;  %v11910_v30 = vpop.f32.mrf.mxu0  ;;  %12160 = vmatpush3.bf16.msra.mxu1 %v12789_v33  ;;  %v12792_v36 = vld [vmem:[%s19504_s5 + $0x290] sm:$0xff]  }
 0x6c1   : > { %8674 = vrot.lane.b32.xlu0 %v19154_v12, %s12917_s26  ;;  %v8143_v31 = vpop.permute.xlu1 %8142  ;;  %12161 = vmatprep.subr.bf16.mxu1 %v12791_v17 }
 0x6c2   : > { %8169 = vst.msk [vmem:[#allocation3 + $0x150] sm:$0xf] %vm7466_vm11, %v8143_v31  ;;  %v11911_v60 = vpop.f32.mrf.mxu0 }
 0x6c3   : > { %v19275_v12 = vadd.f32 %v11911_v60, %v11910_v30 }
 0x6c4   : > { %8564 = vrot.lane.b32.xlu1 %v19205_v57, %s12917_s26  ;;  %12162 = vmatpush3.bf16.msra.mxu1 %v12792_v36 }
 0x6c5   : > { %8566 = vrot.lane.b32.xlu0 %v8545_v46, %s12917_s26  ;;  %12163 = vmatprep.subr.bf16.mxu1 %v12796_v61 }
 0x6c6   : > { %v8243_v9 = vpop.permute.xlu1 %8242 }
 0x6c7   : > { %v8039_v54 = vpop.permute.xlu0 %8038  ;;  %8266 = vst.msk [vmem:[#allocation3 + $0x154] sm:$0xf] %vm7466_vm11, %v8243_v9 }
 0x6c8   : > { %8061 = vst.msk [vmem:[#allocation3 + $0x21c] sm:$0xf] %vm7466_vm11, %v8039_v54  ;;  %8676 = vrot.lane.b32.xlu1 %v19209_v5, %s12917_s26  ;;  %12164 = vmatpush3.bf16.msra.mxu1 %v12797_v40 }
 0x6c9   : > { %12165 = vmatprep.subr.bf16.mxu1 %v12798_v18 }
 0x6ca   : > { %v8322_v24 = vpop.permute.xlu1 %8321 }
 0x6cb   : > { %v8141_v63 = vpop.permute.xlu0 %8140  ;;  %8354 = vst.msk [vmem:[#allocation3 + $0x20] sm:$0xf] %vm7466_vm11, %v8322_v24 }
 0x6cc   : > { %8168 = vst.msk [vmem:[#allocation3 + $0x11c] sm:$0xf] %vm7466_vm11, %v8141_v63  ;;  %8678 = vrot.lane.b32.xlu1 %v8657_v48, %s12917_s26  ;;  %12166 = vmatpush3.bf16.msra.mxu1 %v12799_v35  ;;  %v19336_v63 = vld [vmem:[%s19505_s6] ss:$0 sm:$0xff] }
 0x6ce   : > { %v8458_v53 = vpop.permute.xlu1 %8457 }
 0x6cf   : > { %v8241_v51 = vpop.permute.xlu0 %8240  ;;  %v8812_v58 = vld [vmem:[#allocation3 + $0x218] sm:$0xff]  ;;  %8488 = vst.msk [vmem:[#allocation3 + $0x58] sm:$0xf] %vm7466_vm11, %v8458_v53 }
 0x6d0   : > { %8265 = vst.msk [vmem:[#allocation3 + $0x120] sm:$0xf] %vm7466_vm11, %v8241_v51  ;;  %v11268_v26 = vcombine.low %v8812_v58, %v8812_v58  ;;  %v11269_v38 = vcombine.high %v8812_v58, %v8812_v58 }
 0x6d2   : > { %10224 = vmatprep.mubr.bf16.mxu0 %v11269_v38  ;;  %v8149_v56 = vpop.permute.xlu1 %8148 }
 0x6d3   : > { %v8145_v1 = vpop.permute.xlu0 %8144  ;;  %10225 = vmatmul.mubr.bf16.gmra.mxu0 %v11268_v26  ;;  %8172 = vst.msk [vmem:[#allocation3 + $0x1ec] sm:$0xf] %vm7466_vm11, %v8149_v56  ;;  %v12754_v23 = vld [vmem:[#allocation3 + $0xe8] ss:$52 sps:$4 sm:$0xff]  }
 0x6d4   : > { %8170 = vst.msk [vmem:[#allocation3 + $0x184] sm:$0xf] %vm7466_vm11, %v8145_v1  ;;  %v10048_v1 = vadd.f32 %v19263_v8, %v19336_v63 }
 0x6d5   : > { %v11913_v41 = vpop.f32.mrf.mxu0 }
 0x6d6   : > { %v12768_v21 = vld [vmem:[#allocation3 + $0x24] ss:$52 sps:$4 sm:$0xff]  }
 0x6d7   : > { %v8245_v2 = vpop.permute.xlu0 %8244  ;;  %v12756_v49 = vld [vmem:[#allocation3 + $0xec] ss:$52 sps:$4 sm:$0xff]   ;;  %v11914_v11 = vpop.f32.mrf.mxu0  ;;  %10337 = vmatprep.mubr.bf16.mxu0 %v12768_v21 }
 0x6d8   : > { %8267 = vst.msk [vmem:[#allocation3 + $0x188] sm:$0xf] %vm7466_vm11, %v8245_v2  ;;  %10278 = vmatprep.mubr.bf16.mxu1 %v12756_v49 }
 0x6d9   : > { %10279 = vmatmul.mubr.bf16.gmra.mxu1 %v12754_v23  ;;  %v11916_v32 = vpop.f32.mrf.mxu0 }
 0x6da   : > { %v10051_v32 = vadd.f32 %v19275_v12, %v19336_v63 }
 0x6db   : > { %v8324_v52 = vpop.permute.xlu0 %8323  ;;  %v11917_v13 = vpop.f32.mrf.mxu0  ;;  %v12761_v10 = vld [vmem:[#allocation3 + $0x150] ss:$52 sps:$4 sm:$0xff]  }
 0x6dc   : > { %8355 = vst.msk [vmem:[#allocation3 + $0x54] sm:$0xf] %vm7466_vm11, %v8324_v52 }
 0x6df   : > { %v8147_v29 = vpop.permute.xlu0 %8146  ;;  %v12763_v50 = vld [vmem:[#allocation3 + $0x154] ss:$52 sps:$4 sm:$0xff]  }
 0x6e0   : > { %8171 = vst.msk [vmem:[#allocation3 + $0x1b8] sm:$0xf] %vm7466_vm11, %v8147_v29  ;;  %10284 = vmatprep.mubr.bf16.mxu1 %v12763_v50 }
 0x6e1   : > { %10285 = vmatmul.mubr.bf16.gmra.mxu1 %v12761_v10 }
 0x6e2   : > { %v8249_v57 = vpop.permute.xlu1 %8248 }
 0x6e3   : > { %v8247_v5 = vpop.permute.xlu0 %8246  ;;  %v12766_v44 = vld [vmem:[#allocation3 + $0x20] ss:$52 sps:$4 sm:$0xff]   ;;  %8269 = vst.msk [vmem:[#allocation3 + $0x1f0] sm:$0xf] %vm7466_vm11, %v8249_v57 }
 0x6e4   : > { %8268 = vst.msk [vmem:[#allocation3 + $0x1bc] sm:$0xf] %vm7466_vm11, %v8247_v5  ;;  %10338 = vmatmul.mubr.bf16.vlgmr.msra.gmra.mxu0 %v12766_v44 }
 0x6e5   : > { %12300 = vmatpush3.bf16.msra.mxu0 %v19142_v7  ;;  %v12814_v7 = vld [vmem:[%s19504_s5 + $0x300] sm:$0xff]  }
 0x6e6   : > { %v8328_v43 = vpop.permute.xlu1 %8327  ;;  %12301 = vmatprep.subr.bf16.mxu0 %v12803_v45 }
 0x6e7   : > { %v8326_v19 = vpop.permute.xlu0 %8325  ;;  %8357 = vst.msk [vmem:[#allocation3 + $0xbc] sm:$0xf] %vm7466_vm11, %v8328_v43  ;;  %v12769_v37 = vld [vmem:[#allocation3 + $0x1b8] ss:$52 sps:$4 sm:$0xff]  }
 0x6e8   : > { %8356 = vst.msk [vmem:[#allocation3 + $0x88] sm:$0xf] %vm7466_vm11, %v8326_v19 }
 0x6e9   : > { %12302 = vmatpush3.bf16.msra.mxu0 %v12803_v45 }
 0x6ea   : > { %v8462_v6 = vpop.permute.xlu1 %8461  ;;  %12303 = vmatprep.subr.bf16.mxu0 %v12807_v27 }
 0x6eb   : > { %v8460_v3 = vpop.permute.xlu0 %8459  ;;  %8490 = vst.msk [vmem:[#allocation3 + $0xc0] sm:$0xf] %vm7466_vm11, %v8462_v6  ;;  %v12771_v15 = vld [vmem:[#allocation3 + $0x1bc] ss:$52 sps:$4 sm:$0xff]  }
 0x6ec   : > { %8489 = vst.msk [vmem:[#allocation3 + $0x8c] sm:$0xf] %vm7466_vm11, %v8460_v3  ;;  %10290 = vmatprep.mubr.bf16.mxu1 %v12771_v15 }
 0x6ed   : > { %10291 = vmatmul.mubr.bf16.gmra.mxu1 %v12769_v37  ;;  %v11919_v46 = vpop.f32.mrf.mxu0  ;;  %12304 = vmatpush3.bf16.msra.mxu0 %v12807_v27 }
 0x6ee   : > { %12305 = vmatprep.subr.bf16.mxu0 %v12814_v7 }
 0x6ef   : > { %v8151_v28 = vpop.permute.xlu0 %8150  ;;  %v11920_v48 = vpop.f32.mrf.mxu0  ;;  %v12772_v39 = vld [vmem:[#allocation3 + $0x88] ss:$52 sps:$4 sm:$0xff]  }
 0x6f0   : > { %8173 = vst.msk [vmem:[#allocation3 + $0x220] sm:$0xf] %vm7466_vm11, %v8151_v28 }
 0x6f1   : > { %v11922_v25 = vpop.f32.mrf.mxu0  ;;  %12306 = vmatpush3.bf16.msra.mxu0 %v12814_v7 }
 0x6f3   : > { %v8330_v4 = vpop.permute.xlu0 %8329  ;;  %v12774_v62 = vld [vmem:[#allocation3 + $0x8c] ss:$52 sps:$4 sm:$0xff]   ;;  %v11923_v42 = vpop.f32.mrf.mxu0 }
 0x6f4   : > { %8358 = vst.msk [vmem:[#allocation3 + $0xf0] sm:$0xf] %vm7466_vm11, %v8330_v4  ;;  %10345 = vmatprep.mubr.bf16.mxu0 %v12774_v62 }
 0x6f5   : > { %10346 = vmatmul.mubr.bf16.gmra.mxu0 %v12772_v39 }
 0x6f6   : > { %v8251_v55 = vpop.permute.xlu1 %8250 }
 0x6f7   : > { %v8464_v47 = vpop.permute.xlu0 %8463  ;;  %8270 = vst.msk [vmem:[#allocation3 + $0x224] sm:$0xf] %vm7466_vm11, %v8251_v55 }
 0x6f8   : > { %8491 = vst.msk [vmem:[#allocation3 + $0xf4] sm:$0xf] %vm7466_vm11, %v8464_v47 }
 0x6fa   : > { %v8332_v59 = vpop.permute.xlu1 %8331 }
 0x6fb   : > { %v8334_v22 = vpop.permute.xlu0 %8333  ;;  %8359 = vst.msk [vmem:[#allocation3 + $0x124] sm:$0xf] %vm7466_vm11, %v8332_v59 }
 0x6fc   : > { %8360 = vst.msk [vmem:[#allocation3 + $0x158] sm:$0xf] %vm7466_vm11, %v8334_v22 }
 0x6fe   : > { %v8466_v0 = vpop.permute.xlu1 %8465  ;;  %v8813_v16 = vld [vmem:[#allocation3 + $0x220] sm:$0xff] }
 0x6ff   : > { %v8468_v14 = vpop.permute.xlu0 %8467  ;;  %8492 = vst.msk [vmem:[#allocation3 + $0x128] sm:$0xf] %vm7466_vm11, %v8466_v0  ;;  %v11270_v20 = vcombine.low %v8813_v16, %v8813_v16  ;;  %v11271_v33 = vcombine.high %v8813_v16, %v8813_v16 }
 0x700   : > { %8493 = vst.msk [vmem:[#allocation3 + $0x15c] sm:$0xf] %vm7466_vm11, %v8468_v14 }
 0x701   : > { %10297 = vmatprep.mubr.bf16.mxu1 %v11271_v33 }
 0x702   : > { %v8336_v30 = vpop.permute.xlu1 %8335  ;;  %10298 = vmatmul.mubr.bf16.gmra.mxu1 %v11270_v20  ;;  %v12785_v36 = vld [vmem:[#allocation3 + $0xf0] ss:$52 sps:$4 sm:$0xff]  }
 0x703   : > { %v8547_v17 = vpop.permute.xlu0 %8546  ;;  %8361 = vst.msk [vmem:[#allocation3 + $0x18c] sm:$0xf] %vm7466_vm11, %v8336_v30  ;;  %v12813_v20 = vld [vmem:[#allocation3 + $0x30] ss:$52 sps:$4 sm:$0xff]  }
 0x704   : > { %8579 = vst.msk [vmem:[#allocation3 + $0x28] sm:$0xf] %vm7466_vm11, %v8547_v17 }
 0x705   : > { %v11925_v9 = vpop.f32.mrf.mxu0 }
 0x706   : > { %v8470_v31 = vpop.permute.xlu1 %8469  ;;  %v12787_v61 = vld [vmem:[#allocation3 + $0xf4] ss:$52 sps:$4 sm:$0xff]  }
 0x707   : > { %v8659_v60 = vpop.permute.xlu0 %8658  ;;  %8494 = vst.msk [vmem:[#allocation3 + $0x190] sm:$0xf] %vm7466_vm11, %v8470_v31  ;;  %10351 = vmatprep.mubr.bf16.mxu0 %v12787_v61  ;;  %v11926_v54 = vpop.f32.mrf.mxu0 }
 0x708   : > { %8691 = vst.msk [vmem:[#allocation3 + $0x2c] sm:$0xf] %vm7466_vm11, %v8659_v60  ;;  %10352 = vmatmul.mubr.bf16.gmra.mxu0 %v12785_v36 }
 0x709   : > { %v11928_v24 = vpop.f32.mrf.mxu0 }
 0x70a   : > { %v8549_v40 = vpop.permute.xlu1 %8548  ;;  %v12793_v26 = vld [vmem:[#allocation3 + $0x158] ss:$52 sps:$4 sm:$0xff]  }
 0x70b   : > { %v8338_v18 = vpop.permute.xlu0 %8337  ;;  %8580 = vst.msk [vmem:[#allocation3 + $0x5c] sm:$0xf] %vm7466_vm11, %v8549_v40  ;;  %v11929_v35 = vpop.f32.mrf.mxu0  ;;  %v12818_v24 = vld [vmem:[#allocation3 + $0x98] ss:$52 sps:$4 sm:$0xff]  }
 0x70c   : > { %8362 = vst.msk [vmem:[#allocation3 + $0x1c0] sm:$0xf] %vm7466_vm11, %v8338_v18  ;;  %v11959_v53 = vpop.f32.mrf.mxu1  ;;  %v12819_v35 = vld [vmem:[#allocation3 + $0x100] ss:$52 sps:$4 sm:$0xff]  }
 0x70e   : > { %v8661_v51 = vpop.permute.xlu1 %8660  ;;  %v12795_v38 = vld [vmem:[#allocation3 + $0x15c] ss:$52 sps:$4 sm:$0xff]   ;;  %v11960_v56 = vpop.f32.mrf.mxu1 }
 0x70f   : > { %v8472_v58 = vpop.permute.xlu0 %8471  ;;  %8692 = vst.msk [vmem:[#allocation3 + $0x60] sm:$0xf] %vm7466_vm11, %v8661_v51  ;;  %v11961_v2 = vadd.f32 %v11960_v56, %v11959_v53  ;;  %10357 = vmatprep.mubr.bf16.mxu0 %v12795_v38 }
 0x710   : > { %8495 = vst.msk [vmem:[#allocation3 + $0x1c4] sm:$0xf] %vm7466_vm11, %v8472_v58  ;;  %v11962_v41 = vpop.f32.mrf.mxu1  ;;  %10358 = vmatmul.mubr.bf16.gmra.mxu0 %v12793_v26 }
 0x711   : > { %v19342_v23 = vadd.f32 %v11961_v2, %v10048_v1 }
 0x712   : > { %v8340_v49 = vpop.permute.xlu1 %8339  ;;  %v11963_v52 = vpop.f32.mrf.mxu1  ;;  %v12800_v50 = vld [vmem:[#allocation3 + $0x28] ss:$52 sps:$4 sm:$0xff]  }
 0x713   : > { %v8551_v11 = vpop.permute.xlu0 %8550  ;;  %8363 = vst.msk [vmem:[#allocation3 + $0x1f4] sm:$0xf] %vm7466_vm11, %v8340_v49  ;;  %v11964_v13 = vadd.f32 %v11963_v52, %v11962_v41  ;;  %v12823_v49 = vld [vmem:[#allocation3 + $0x168] ss:$52 sps:$4 sm:$0xff]  }
 0x714   : > { %8581 = vst.msk [vmem:[#allocation3 + $0x90] sm:$0xf] %vm7466_vm11, %v8551_v11  ;;  %v12824_v11 = vld [vmem:[#allocation3 + $0x1d0] ss:$52 sps:$4 sm:$0xff]  }
 0x715   : > { %v19348_v29 = vadd.f32 %v11964_v13, %v10051_v32 }
 0x716   : > { %v8474_v8 = vpop.permute.xlu1 %8473  ;;  %v12802_v57 = vld [vmem:[#allocation3 + $0x2c] ss:$52 sps:$4 sm:$0xff]  }
 0x717   : > { %v8663_v10 = vpop.permute.xlu0 %8662  ;;  %8496 = vst.msk [vmem:[#allocation3 + $0x1f8] sm:$0xf] %vm7466_vm11, %v8474_v8  ;;  %10410 = vmatprep.mubr.bf16.mxu1 %v12802_v57 }
 0x718   : > { %8693 = vst.msk [vmem:[#allocation3 + $0x94] sm:$0xf] %vm7466_vm11, %v8663_v10  ;;  %10411 = vmatmul.mubr.bf16.vlgmr.msra.gmra.mxu1 %v12800_v50 }
 0x71a   : > { %v8553_v5 = vpop.permute.xlu1 %8552  ;;  %v12804_v45 = vld [vmem:[#allocation3 + $0x1c0] ss:$52 sps:$4 sm:$0xff]  }
 0x71b   : > { %v8342_v44 = vpop.permute.xlu0 %8341  ;;  %8582 = vst.msk [vmem:[#allocation3 + $0xc4] sm:$0xf] %vm7466_vm11, %v8553_v5 }
 0x71c   : > { %8364 = vst.msk [vmem:[#allocation3 + $0x228] sm:$0xf] %vm7466_vm11, %v8342_v44  ;;  %v11931_v19 = vpop.f32.mrf.mxu0  ;;  %v12828_v44 = vld [vmem:[#allocation3 + $0x238] ss:$0 sps:$4 sm:$0xff]  }
 0x71e   : > { %v8665_v12 = vpop.permute.xlu1 %8664  ;;  %v12806_v43 = vld [vmem:[#allocation3 + $0x1c4] ss:$52 sps:$4 sm:$0xff]   ;;  %v11932_v27 = vpop.f32.mrf.mxu0 }
 0x71f   : > { %v8555_v21 = vpop.permute.xlu0 %8554  ;;  %8694 = vst.msk [vmem:[#allocation3 + $0xc8] sm:$0xf] %vm7466_vm11, %v8665_v12  ;;  %10363 = vmatprep.mubr.bf16.mxu0 %v12806_v43 }
 0x720   : > { %8583 = vst.msk [vmem:[#allocation3 + $0xf8] sm:$0xf] %vm7466_vm11, %v8555_v21  ;;  %10364 = vmatmul.mubr.bf16.gmra.mxu0 %v12804_v45  ;;  %v11934_v37 = vpop.f32.mrf.mxu0 }
 0x722   : > { %v8476_v6 = vpop.permute.xlu1 %8475  ;;  %v11935_v15 = vpop.f32.mrf.mxu0  ;;  %v12808_v4 = vld [vmem:[#allocation3 + $0x90] ss:$52 sps:$4 sm:$0xff]  }
 0x723   : > { %v8667_v3 = vpop.permute.xlu0 %8666  ;;  %8497 = vst.msk [vmem:[#allocation3 + $0x22c] sm:$0xf] %vm7466_vm11, %v8476_v6  ;;  %v19358_v28 = vadd.f32 %v11935_v15, %v11934_v37 }
 0x724   : > { %8695 = vst.msk [vmem:[#allocation3 + $0xfc] sm:$0xf] %vm7466_vm11, %v8667_v3  ;;  %v11965_v7 = vpop.f32.mrf.mxu1 }
 0x726   : > { %v8557_v46 = vpop.permute.xlu1 %8556  ;;  %v12810_v25 = vld [vmem:[#allocation3 + $0x94] ss:$52 sps:$4 sm:$0xff]   ;;  %v11966_v39 = vpop.f32.mrf.mxu1 }
 0x727   : > { %v8559_v48 = vpop.permute.xlu0 %8558  ;;  %8584 = vst.msk [vmem:[#allocation3 + $0x12c] sm:$0xf] %vm7466_vm11, %v8557_v46  ;;  %10418 = vmatprep.mubr.bf16.mxu1 %v12810_v25 }
 0x728   : > { %8585 = vst.msk [vmem:[#allocation3 + $0x160] sm:$0xf] %vm7466_vm11, %v8559_v48  ;;  %v11968_v62 = vpop.f32.mrf.mxu1  ;;  %10419 = vmatmul.mubr.bf16.gmra.mxu1 %v12808_v4  ;;  %v10076_v48 = vadd.f32 %v19358_v28, %v19336_v63 }
 0x72a   : > { %v8669_v42 = vpop.permute.xlu1 %8668  ;;  %v8814_v47 = vld [vmem:[#allocation3 + $0x228] sm:$0xff]  ;;  %v11937_v59 = vpop.f32.mrf.mxu0 }
 0x72b   : > { %v8671_v55 = vpop.permute.xlu0 %8670  ;;  %8696 = vst.msk [vmem:[#allocation3 + $0x130] sm:$0xf] %vm7466_vm11, %v8669_v42  ;;  %v11969_v22 = vpop.f32.mrf.mxu1  ;;  %v11272_v0 = vcombine.low %v8814_v47, %v8814_v47  ;;  %v11273_v14 = vcombine.high %v8814_v47, %v8814_v47 }
 0x72c   : > { %8697 = vst.msk [vmem:[#allocation3 + $0x164] sm:$0xf] %vm7466_vm11, %v8671_v55  ;;  %v11938_v16 = vpop.f32.mrf.mxu0 }
 0x72d   : > { %10370 = vmatprep.mubr.bf16.mxu0 %v11273_v14  ;;  %v19364_v33 = vadd.f32 %v11938_v16, %v11937_v59 }
 0x72e   : > { %v8561_v30 = vpop.permute.xlu1 %8560  ;;  %10371 = vmatmul.mubr.bf16.gmra.mxu0 %v11272_v0  ;;  %v11940_v31 = vpop.f32.mrf.mxu0  ;;  %v12815_v9 = vld [vmem:[#allocation3 + $0xf8] ss:$52 sps:$4 sm:$0xff]  }
 0x72f   : > { %v8563_v17 = vpop.permute.xlu0 %8562  ;;  %8586 = vst.msk [vmem:[#allocation3 + $0x194] sm:$0xf] %vm7466_vm11, %v8561_v30  ;;  %12307 = vmatprep.mubr.msk.bf16.mxu0 %vm9994_vm5, %v12813_v20 }
 0x730   : > { %8587 = vst.msk [vmem:[#allocation3 + $0x1c8] sm:$0xf] %vm7466_vm11, %v8563_v17  ;;  %v11941_v60 = vpop.f32.mrf.mxu0 }
 0x731   : > { %v11971_v61 = vpop.f32.mrf.mxu1 }
 0x732   : > { %v8673_v36 = vpop.permute.xlu1 %8672  ;;  %v12817_v54 = vld [vmem:[#allocation3 + $0xfc] ss:$52 sps:$4 sm:$0xff]  }
 0x733   : > { %8698 = vst.msk [vmem:[#allocation3 + $0x198] sm:$0xf] %vm7466_vm11, %v8673_v36  ;;  %v8675_v40 = vpop.permute.xlu0 %8674  ;;  %v11972_v18 = vpop.f32.mrf.mxu1  ;;  %10424 = vmatprep.mubr.bf16.mxu1 %v12817_v54 }
 0x734   : > { %8699 = vst.msk [vmem:[#allocation3 + $0x1cc] sm:$0xf] %vm7466_vm11, %v8675_v40  ;;  %10425 = vmatmul.mubr.bf16.gmra.mxu1 %v12815_v9 }
 0x735   : > { %v11974_v51 = vpop.f32.mrf.mxu1 }
 0x736   : > { %v8565_v53 = vpop.permute.xlu1 %8564  ;;  %12308 = vmatmul.mubr.msk.bf16.vlgmr.msra.gmra.mxu0 %vm9994_vm5, %v12818_v24  ;;  %v12820_v1 = vld [vmem:[#allocation3 + $0x160] ss:$52 sps:$4 sm:$0xff]  }
 0x737   : > { %8588 = vst.msk [vmem:[#allocation3 + $0x1fc] sm:$0xf] %vm7466_vm11, %v8565_v53  ;;  %v8567_v58 = vpop.permute.xlu0 %8566  ;;  %12311 = vmatprep.mubr.msk.bf16.mxu0 %vm9994_vm5, %v12819_v35  ;;  %v11975_v26 = vpop.f32.mrf.mxu1 }
 0x738   : > { %8589 = vst.msk [vmem:[#allocation3 + $0x230] sm:$0xf] %vm7466_vm11, %v8567_v58 }
 0x739   : > { %v11977_v56 = vpop.f32.mrf.mxu1 }
 0x73a   : > { %v8677_v38 = vpop.permute.xlu1 %8676  ;;  %v12822_v2 = vld [vmem:[#allocation3 + $0x164] ss:$52 sps:$4 sm:$0xff]  }
 0x73b   : > { %8700 = vst.msk [vmem:[#allocation3 + $0x200] sm:$0xf] %vm7466_vm11, %v8677_v38  ;;  %v11978_v41 = vpop.f32.mrf.mxu1  ;;  %10430 = vmatprep.mubr.bf16.mxu1 %v12822_v2 }
 0x73c   : > { %10431 = vmatmul.mubr.bf16.gmra.mxu1 %v12820_v1 }
 0x73d   : > { %v11980_v32 = vpop.f32.mrf.mxu1 }
 0x73e   : > { %v8679_v52 = vpop.permute.xlu1 %8678  ;;  %12312 = vmatmul.mubr.msk.bf16.gmra.mxu0 %vm9994_vm5, %v12823_v49  ;;  %v12825_v10 = vld [vmem:[#allocation3 + $0x1c8] ss:$52 sps:$4 sm:$0xff]  }
 0x73f   : > { %8701 = vst.msk [vmem:[#allocation3 + $0x234] sm:$0xf] %vm7466_vm11, %v8679_v52  ;;  %12315 = vmatprep.mubr.msk.bf16.mxu0 %vm9994_vm5, %v12824_v11  ;;  %v11981_v13 = vpop.f32.mrf.mxu1 }
 0x740   : > { %v12011_v8 = vpop.f32.mrf.mxu0 }
 0x742   : > { %v12827_v50 = vld [vmem:[#allocation3 + $0x1cc] ss:$52 sps:$4 sm:$0xff]   ;;  %v12012_v57 = vpop.f32.mrf.mxu0 }
 0x743   : > { %v12013_v5 = vadd.f32 %v12012_v57, %v12011_v8  ;;  %10436 = vmatprep.mubr.bf16.mxu1 %v12827_v50 }
 0x744   : > { %v12014_v12 = vpop.f32.mrf.mxu0  ;;  %10437 = vmatmul.mubr.bf16.gmra.mxu1 %v12825_v10 }
 0x745   : > { %v10194_v21 = vadd.f32 %v12013_v5, %v19342_v23 }
 0x746   : > { %12316 = vmatmul.mubr.msk.bf16.gmra.mxu0 %vm9994_vm5, %v12828_v44  ;;  %v8815_v45 = vld [vmem:[#allocation3 + $0x230] sm:$0xff]  ;;  %v12015_v43 = vpop.f32.mrf.mxu0 }
 0x747   : > { %v11275_v19 = vcombine.high %v8815_v45, %v8815_v45  ;;  %v12016_v27 = vadd.f32 %v12015_v43, %v12014_v12  ;;  %v11274_v3 = vcombine.low %v8815_v45, %v8815_v45 }
 0x749   : > { %10443 = vmatprep.mubr.bf16.mxu1 %v11275_v19  ;;  %v10197_v6 = vadd.f32 %v12016_v27, %v19348_v29  ;;  %v10081_v29 = vadd.f32 %v19364_v33, %v19336_v63 }
 0x74b   : > { %v11983_v37 = vpop.f32.mrf.mxu1 }
 0x74c   : > { %10444 = vmatmul.mubr.bf16.gmra.mxu1 %v11274_v3 }
 0x74d   : > { %v11984_v15 = vpop.f32.mrf.mxu1 }
 0x74f   : > { %v11986_v7 = vpop.f32.mrf.mxu1 }
 0x751   : > { %v11987_v46 = vpop.f32.mrf.mxu1 }
 0x752   : > { %v11988_v4 = vadd.f32 %v11987_v46, %v11986_v7 }
 0x753   : > { %v12017_v23 = vpop.f32.mrf.mxu0 }
 0x754   : > { %v10149_v25 = vadd.f32 %v11988_v4, %v10076_v48 }
 0x755   : > { %v12018_v39 = vpop.f32.mrf.mxu0 }
 0x757   : > { %v12020_v42 = vpop.f32.mrf.mxu0 }
 0x759   : > { %v11989_v62 = vpop.f32.mrf.mxu1  ;;  %v12021_v47 = vpop.f32.mrf.mxu0 }
 0x75b   : > { %v11990_v55 = vpop.f32.mrf.mxu1 }
 0x75c   : > { %v11991_v59 = vadd.f32 %v11990_v55, %v11989_v62 }
 0x75d   : > { %v11992_v22 = vpop.f32.mrf.mxu1 }
 0x75e   : > { %v10154_v0 = vadd.f32 %v11991_v59, %v10081_v29 }
 0x75f   : > { %v11993_v14 = vpop.f32.mrf.mxu1 }
 0x760   : > { %v12023_v16 = vpop.f32.mrf.mxu0 }
 0x762   : > { %v12024_v20 = vpop.f32.mrf.mxu0 }
 0x764   : > { %v12026_v30 = vpop.f32.mrf.mxu0 }
 0x766   : > { %v12027_v17 = vpop.f32.mrf.mxu0 }
 0x76b   : > { %v12029_v28 = vpop.f32.mrf.mxu0 }
 0x76d   : > { %v12030_v31 = vpop.f32.mrf.mxu0 }
 0x76e   : > { %v12063_v36 = vpop.f32.mrf.mxu1 }
 0x76f   : > { %v12032_v60 = vpop.f32.mrf.mxu0 }
 0x770   : > { %v12064_v9 = vpop.f32.mrf.mxu1 }
 0x771   : > { %v12033_v61 = vpop.f32.mrf.mxu0  ;;  %v12065_v54 = vadd.f32 %v12064_v9, %v12063_v36 }
 0x772   : > { %v12066_v40 = vpop.f32.mrf.mxu1 }
 0x773   : > { %v10267_v18 = vadd.f32 %v12065_v54, %v10194_v21 }
 0x774   : > { %v12067_v24 = vpop.f32.mrf.mxu1 }
 0x775   : > { %v12068_v35 = vadd.f32 %v12067_v24, %v12066_v40 }
 0x777   : > { %v10270_v63 = vadd.f32 %v12068_v35, %v10197_v6 }
 0x77c   : > { %v12035_v33 = vpop.f32.mrf.mxu0 }
 0x77e   : > { %v12036_v53 = vpop.f32.mrf.mxu0 }
 0x77f   : > { %v12069_v58 = vpop.f32.mrf.mxu1 }
 0x780   : > { %v12038_v51 = vpop.f32.mrf.mxu0 }
 0x781   : > { %v12070_v38 = vpop.f32.mrf.mxu1 }
 0x782   : > { %v12039_v26 = vpop.f32.mrf.mxu0 }
 0x783   : > { %v12040_v56 = vadd.f32 %v12039_v26, %v12038_v51  ;;  %v12072_v1 = vpop.f32.mrf.mxu1 }
 0x785   : > { %v10222_v2 = vadd.f32 %v12040_v56, %v10149_v25  ;;  %v12073_v41 = vpop.f32.mrf.mxu1 }
 0x793   : > { %v12041_v49 = vpop.f32.mrf.mxu0 }
 0x795   : > { %v12042_v11 = vpop.f32.mrf.mxu0 }
 0x796   : > { %v12043_v52 = vadd.f32 %v12042_v11, %v12041_v49 }
 0x797   : > { %v12044_v32 = vpop.f32.mrf.mxu0 }
 0x798   : > { %v10227_v13 = vadd.f32 %v12043_v52, %v10154_v0 }
 0x799   : > { %v12045_v8 = vpop.f32.mrf.mxu0  ;;  %v12075_v10 = vpop.f32.mrf.mxu1 }
 0x79b   : > { %v12076_v50 = vpop.f32.mrf.mxu1 }
 0x79d   : > { %v12078_v57 = vpop.f32.mrf.mxu1 }
 0x79e   : > { %v12831_v57 = vld [vmem:[%s19506_s7 + $0x78] sm:$0xff]  }
 0x79f   : > { %v12079_v5 = vpop.f32.mrf.mxu1  ;;  %12213 = vmatprep.subr.bf16.mxu0 %v12831_v57 }
 0x7a0   : > { %v12832_v5 = vld [vmem:[%s19506_s7 + $0x38] sm:$0xff]  }
 0x7a1   : > { %v12081_v44 = vpop.f32.mrf.mxu1  ;;  %12214 = vmatpush3.bf16.msra.mxu0 %v12832_v5 }
 0x7a2   : > { %v12833_v44 = vld [vmem:[%s19506_s7 + $0x70] sm:$0xff]  }
 0x7a3   : > { %v12082_v12 = vpop.f32.mrf.mxu1  ;;  %12215 = vmatprep.subr.bf16.mxu0 %v12833_v44 }
 0x7a4   : > { %v12115_v45 = vpop.f32.mrf.mxu0 }
 0x7a5   : > { %v12084_v21 = vpop.f32.mrf.mxu1 }
 0x7a6   : > { %v12116_v19 = vpop.f32.mrf.mxu0 }
 0x7a7   : > { %v12085_v43 = vpop.f32.mrf.mxu1  ;;  %v12117_v27 = vadd.f32 %v12116_v19, %v12115_v45 }
 0x7a8   : > { %v12118_v6 = vpop.f32.mrf.mxu0 }
 0x7a9   : > { %v10340_v3 = vadd.f32 %v12117_v27, %v10267_v18  ;;  %v12834_v27 = vld [vmem:[%s19506_s7 + $0x30] sm:$0xff]  }
 0x7aa   : > { %v12119_v37 = vpop.f32.mrf.mxu0  ;;  %12216 = vmatpush3.bf16.msra.mxu0 %v12834_v27 }
 0x7ab   : > { %v12120_v15 = vadd.f32 %v12119_v37, %v12118_v6 }
 0x7ad   : > { %v10343_v7 = vadd.f32 %v12120_v15, %v10270_v63  ;;  %v12087_v46 = vpop.f32.mrf.mxu1  ;;  %v12835_v15 = vld [vmem:[%s19506_s7 + $0x68] sm:$0xff]  }
 0x7ae   : > { %12217 = vmatprep.subr.bf16.mxu0 %v12835_v15 }
 0x7af   : > { %v12088_v48 = vpop.f32.mrf.mxu1 }
 0x7b1   : > { %v12090_v4 = vpop.f32.mrf.mxu1 }
 0x7b3   : > { %v12091_v23 = vpop.f32.mrf.mxu1 }
 0x7b4   : > { %v12092_v25 = vadd.f32 %v12091_v23, %v12090_v4  ;;  %v12836_v23 = vld [vmem:[%s19506_s7 + $0x28] sm:$0xff]  }
 0x7b5   : > { %v12121_v39 = vpop.f32.mrf.mxu0  ;;  %12218 = vmatpush3.bf16.msra.mxu0 %v12836_v23 }
 0x7b6   : > { %v19386_v62 = vadd.f32 %v12092_v25, %v10222_v2 }
 0x7b7   : > { %v12122_v42 = vpop.f32.mrf.mxu0 }
 0x7b8   : > { %v12837_v42 = vld [vmem:[%s19506_s7 + $0x60] sm:$0xff]  }
 0x7b9   : > { %v12124_v55 = vpop.f32.mrf.mxu0  ;;  %12219 = vmatprep.subr.bf16.mxu0 %v12837_v42 }
 0x7bb   : > { %v12125_v47 = vpop.f32.mrf.mxu0 }
 0x7c2   : > { %v12093_v29 = vpop.f32.mrf.mxu1 }
 0x7c4   : > { %v12094_v59 = vpop.f32.mrf.mxu1 }
 0x7c5   : > { %v12095_v22 = vadd.f32 %v12094_v59, %v12093_v29 }
 0x7c6   : > { %v12096_v0 = vpop.f32.mrf.mxu1 }
 0x7c7   : > { %v19388_v14 = vadd.f32 %v12095_v22, %v10227_v13  ;;  %v12838_v0 = vld [vmem:[%s19506_s7 + $0x20] sm:$0xff]  }
 0x7c8   : > { %v12097_v16 = vpop.f32.mrf.mxu1  ;;  %v12127_v20 = vpop.f32.mrf.mxu0  ;;  %12220 = vmatpush3.bf16.msra.mxu0 %v12838_v0 }
 0x7ca   : > { %v12128_v30 = vpop.f32.mrf.mxu0 }
 0x7cb   : > { %v12839_v30 = vld [vmem:[%s19506_s7 + $0x58] sm:$0xff]  }
 0x7cc   : > { %v12130_v17 = vpop.f32.mrf.mxu0  ;;  %12221 = vmatprep.subr.bf16.mxu0 %v12839_v30 }
 0x7ce   : > { %v12131_v28 = vpop.f32.mrf.mxu0 }
 0x7d0   : > { %v12133_v31 = vpop.f32.mrf.mxu0 }
 0x7d2   : > { %v12134_v60 = vpop.f32.mrf.mxu0 }
 0x7d4   : > { %v12136_v36 = vpop.f32.mrf.mxu0 }
 0x7d5   : > { %v12840_v36 = vld [vmem:[%s19506_s7 + $0x18] sm:$0xff]  }
 0x7d6   : > { %v12137_v61 = vpop.f32.mrf.mxu0  ;;  %12222 = vmatpush3.bf16.msra.mxu0 %v12840_v36 }
 0x7d8   : > { %v12167_v9 = vpop.f32.mrf.mxu1 }
 0x7da   : > { %v12168_v54 = vpop.f32.mrf.mxu1 }
 0x7db   : > { %v12169_v2 = vadd.f32 %v12168_v54, %v12167_v9  ;;  %v12841_v9 = vld [vmem:[%s19506_s7 + $0x50] sm:$0xff]  }
 0x7dc   : > { %v12170_v18 = vpop.f32.mrf.mxu1  ;;  %12223 = vmatprep.subr.bf16.mxu0 %v12841_v9 }
 0x7dd   : > { %v10413_v13 = vadd.f32 %v12169_v2, %v10340_v3  ;;  %v12842_v2 = vld [vmem:[%s19506_s7 + $0x10] sm:$0xff]  }
 0x7de   : > { %v12171_v35 = vpop.f32.mrf.mxu1  ;;  %12224 = vmatpush3.bf16.msra.mxu0 %v12842_v2 }
 0x7df   : > { %v12172_v52 = vadd.f32 %v12171_v35, %v12170_v18 }
 0x7e0   : > { %v12139_v40 = vpop.f32.mrf.mxu0 }
 0x7e1   : > { %v10416_v43 = vadd.f32 %v12172_v52, %v10343_v7 }
 0x7e2   : > { %v12140_v24 = vpop.f32.mrf.mxu0 }
 0x7e4   : > { %v12142_v63 = vpop.f32.mrf.mxu0 }
 0x7e6   : > { %v12143_v51 = vpop.f32.mrf.mxu0 }
 0x7e7   : > { %v12144_v31 = vadd.f32 %v12143_v51, %v12142_v63 }
 0x7e8   : > { %v12173_v33 = vpop.f32.mrf.mxu1 }
 0x7e9   : > { %v10368_v18 = vadd.f32 %v12144_v31, %v19386_v62  ;;  %v12843_v62 = vld [vmem:[%s19506_s7 + $0x48] sm:$0xff]  }
 0x7ea   : > { %v12174_v53 = vpop.f32.mrf.mxu1  ;;  %12225 = vmatprep.subr.bf16.mxu0 %v12843_v62 }
 0x7ec   : > { %v12176_v58 = vpop.f32.mrf.mxu1 }
 0x7ee   : > { %v19390_v26 = vpop.f32.mrf.mxu0  ;;  %v12177_v38 = vpop.f32.mrf.mxu1 }
 0x7f0   : > { %v19392_v56 = vpop.f32.mrf.mxu0 }
 0x7f1   : > { %v12147_v24 = vadd.f32 %v19392_v56, %v19390_v26 }
 0x7f2   : > { %v12148_v1 = vpop.f32.mrf.mxu0 }
 0x7f3   : > { %v10373_v58 = vadd.f32 %v12147_v24, %v19388_v14  ;;  %v12845_v14 = vld [vmem:[%s19506_s7 + $0x40] sm:$0xff]  }
 0x7f4   : > { %v12149_v41 = vpop.f32.mrf.mxu0  ;;  %v12179_v49 = vpop.f32.mrf.mxu1 }
 0x7f5   : > { %v12844_v49 = vld [vmem:[%s19506_s7 + $0x8] sm:$0xff]  }
 0x7f6   : > { %v12309_v11 = vpop.f32.mrf.mxu0  ;;  %v12180_v32 = vpop.f32.mrf.mxu1  ;;  %12226 = vmatpush3.bf16.msra.mxu0 %v12844_v49 }
 0x7f7   : > { %12227 = vmatprep.subr.bf16.mxu0 %v12845_v14 }
 0x7f8   : > { %v10485_v8 = vpop.f32.mrf.mxu0  ;;  %v12182_v50 = vpop.f32.mrf.mxu1 }
 0x7f9   : > { %v10486_v10 = vadd.f32 %v10485_v8, %v10413_v13  ;;  %v12846_v8 = vld [vmem:[%s19506_s7] sm:$0xff]  }
 0x7fa   : > { %v12310_v12 = vpop.f32.mrf.mxu0  ;;  %v12183_v45 = vpop.f32.mrf.mxu1  ;;  %12228 = vmatpush3.bf16.msra.mxu0 %v12846_v8 }
 0x7fb   : > { %v10524_v21 = vmax.f32 %v10486_v10, 0.0 }
 0x7fc   : > { %v10488_v19 = vpop.f32.mrf.mxu0  ;;  %v12185_v37 = vpop.f32.mrf.mxu1 }
 0x7fd   : > { %v10528_v6 = vpack.c.bf16 %v10524_v21, %v10524_v21  ;;  %v10489_v3 = vadd.f32 %v10488_v19, %v10416_v43 }
 0x7fe   : > { %v12313_v46 = vpop.f32.mrf.mxu0  ;;  %v12186_v7 = vpop.f32.mrf.mxu1 }
 0x7ff   : > { %10529 = vst.msk [vmem:[#allocation4] sm:$0xf] %vm7381_vm9, %v10528_v6  ;;  %v10525_v48 = vmax.f32 %v10489_v3, 0.0  ;;  %v11385_v47 = vrot.slane %v10528_v6, 10 }
 0x800   : > { %v10499_v4 = vpop.f32.mrf.mxu0  ;;  %v12188_v39 = vpop.f32.mrf.mxu1 }
 0x801   : > { %v11553_v25 = vpack.c.bf16 %v10525_v48, %v10525_v48 }
 0x802   : > { %v12314_v55 = vpop.f32.mrf.mxu0  ;;  %v12189_v59 = vpop.f32.mrf.mxu1 }
 0x803   : > { %v10538_v29 = vrot.slane %v11553_v25, 6 }
 0x804   : > { %v10501_v22 = vpop.f32.mrf.mxu0  ;;  %v12191_v16 = vpop.f32.mrf.mxu1 }
 0x805   : > { %v10539_v20 = vsel %vm13183_vm12, %v11385_v47, %v10538_v29 }
 0x806   : > { %v12317_v17 = vpop.f32.mrf.mxu0  ;;  %10540 = vrot.lane.b32.xlu0 %v10539_v20, %s12917_s26  ;;  %v12192_v28 = vpop.f32.mrf.mxu1 }
 0x808   : > { %v10511_v60 = vpop.f32.mrf.mxu0  ;;  %v12194_v61 = vpop.f32.mrf.mxu1 }
 0x80a   : > { %v12318_v54 = vpop.f32.mrf.mxu0  ;;  %v12195_v40 = vpop.f32.mrf.mxu1 }
 0x80b   : > { %v12196_v35 = vadd.f32 %v12195_v40, %v12194_v61 }
 0x80c   : > { %v12197_v63 = vpop.f32.mrf.mxu1  ;;  %v10513_v53 = vpop.f32.mrf.mxu0 }
 0x80d   : > { %v10441_v33 = vadd.f32 %v12196_v35, %v10368_v18 }
 0x80e   : > { %v12198_v51 = vpop.f32.mrf.mxu1 }
 0x80f   : > { %v10514_v38 = vadd.f32 %v10513_v53, %v10441_v33  ;;  %v12199_v1 = vadd.f32 %v12198_v51, %v12197_v63 }
 0x810   : > { %v12200_v26 = vpop.f32.mrf.mxu1 }
 0x811   : > { %v10526_v56 = vmax.f32 %v10514_v38, 0.0  ;;  %v10446_v41 = vadd.f32 %v12199_v1, %v10373_v58 }
 0x812   : > { %v12201_v11 = vpop.f32.mrf.mxu1 }
 0x813   : > { %v10544_v52 = vpack.c.bf16 %v10526_v56, %v10526_v56  ;;  %v10519_v32 = vadd.f32 %v12317_v17, %v10446_v41 }
 0x815   : > { %10545 = vst.msk [vmem:[#allocation4 + $0x4] sm:$0xf] %vm7381_vm9, %v10544_v52  ;;  %v10527_v13 = vmax.f32 %v10519_v32, 0.0  ;;  %v11388_v50 = vrot.slane %v10544_v52, 10 }
 0x817   : > { %v11555_v10 = vpack.c.bf16 %v10527_v13, %v10527_v13 }
 0x819   : > { %v10554_v57 = vrot.slane %v11555_v10, 6 }
 0x81b   : > { %v10555_v5 = vsel %vm13183_vm12, %v11388_v50, %v10554_v57 }
 0x81c   : > { %10556 = vrot.lane.b32.xlu1 %v10555_v5, %s12917_s26  ;;  %s11407_s26 = sshll.u32 %s12994_s13, 4  ;;  %s12922_s13 = smov [#allocation5]  }
 0x81d   : > { %s19464_s24 = scalar_lea.hbm %s19508_s9, %s11407_s26  ;;  %s12858_s23 = sshll.u32 %s12922_s13, 4  ;;  %s12859_s23 = int_to_ptr.vmem [resolvable:$false] %s12858_s23 }
 0x81e   : > { %s12860_s14 = scalar_lea.vmem %s12859_s23, 32  ;;  %p12861_p0 = scmp.lt.s32.totalorder %s10753_s21, %s12859_s23 }
 0x81f   : > { %p12862_p1 = scmp.lt.s32.totalorder %s12860_s14, %s12854_s25 }
 0x821   : > { %p12863_p2 = por %p12862_p1, %p12861_p0 }
 0x823   : > { %p12864_p3 = pnand %p12863_p2, %p12857_p13 }
 0x878   : > { %v10541_v44 = vpop.permute.xlu0 %10540 }
 0x879   : > { %10543 = vst.msk [vmem:[#allocation4] sm:$0xf] %vm7466_vm11, %v10541_v44 }
 0x88e   : > { %v10557_v12 = vpop.permute.xlu1 %10556 }
 0x88f   : > { %10559 = vst.msk [vmem:[#allocation4 + $0x4] sm:$0xf] %vm7466_vm11, %v10557_v12 }
 0x896   : > { %v10560_v21 = vld [vmem:[#allocation4] sm:$0xff] }
 0x897   : > { %v11389_v45 = vcombine.low %v10560_v21, %v10560_v21  ;;  %v11390_v43 = vcombine.high %v10560_v21, %v10560_v21 }
 0x899   : > { %10728 = vmatprep.mubr.bf16.mxu0 %v11390_v43 }
 0x89a   : > { %10729 = vmatmul.mubr.bf16.vlgmr.msra.gmra.mxu0 %v11389_v45 }
 0x95a   : > { %v12229_v19 = vpop.f32.mrf.mxu0 }
 0x95c   : > { %v12230_v27 = vpop.f32.mrf.mxu0 }
 0x95d   : > { %v12231_v6 = vadd.f32 %v12230_v27, %v12229_v19 }
 0x95e   : > { %v12232_v3 = vpop.f32.mrf.mxu0 }
 0x95f   : > { %v10737_v37 = vadd.f32 %v12231_v6, %v10736_v34 }
 0x960   : > { %v12233_v15 = vpop.f32.mrf.mxu0 }
 0x961   : > { %10738 = vst [vmem:[%s324_s17] sm:$0x1] %v10737_v37 }
 0x962   : > { %12867 = shalt.err (!%p12864_p3)
}
 0x963   : > { %s12868_s16 = scalar_lea.hbm %s19464_s24, 16  ;;  %s12872_s17 = scalar_lea.hbm %s19508_s9, 32 }
 0x964   : > { %p12869_p4 = scmp.ne.s32.totalorder %s19464_s24, %s12868_s16  ;;  %p12873_p9 = scmp.lt.s32.totalorder %s19464_s24, %s19508_s9 }
 0x965   : > { %p12874_p10 = scmp.lt.s32.totalorder %s12872_s17, %s12868_s16 }
 0x966   : > { %p12870_p7 = pnand %p12869_p4, %p13011_p5 }
 0x967   : > { %p12875_p11 = por %p12874_p10, %p12873_p9 }
 0x968   : > { %p12871_p8 = pneg %p12870_p7 }
 0x96a   : > { %p12876_p12 = pnand %p12875_p11, %p12871_p8 }
 0x96c   : > { %12879 = shalt.err (!%p12876_p12)
}
 0x96d   : > { %12320 = dma.vmem_to_hbm [thread:$0]  (%p13011_p5), %s10753_s21, 16, %s19464_s24, %s10740_s27  }
 0x96e PF: > { %p12326_p13 = scmp.ge.s32.totalorder %s12914_s12, 2  ;;  %s10764_s25 = sand.u32 1, %s12902_s30  }
 0x96f   : > { %s10765_s13 = scalar_lea.sflag [#allocation6], %s10764_s25 }
 0x970   : > { %p12323_p0 = pnand %p12326_p13, %p13015_p6 }
 0x972   : > { %p12324_p1 = pneg %p12323_p0 }
 0x974   : > { %12897 = dma.done.wait (%p12324_p1), %s10765_s13, 16  }
 0x975   : > { %12899 = vsyncadd (%p12324_p1), %s10765_s13, 4294967280  ;;  %p19_p2 = scmp.ge.s32.totalorder %s12998_s15, 4   ;;  %s20498_s30 = smov %s12906_s10 }
 0x976   : > { %s20499_s10 = smov %s12910_s11  ;;  %s20500_s11 = smov %s13009_s18 }
 0x977   : > { %s20501_s12 = smov %s12998_s15  ;;  %21 = sbr.rel (!%p19_p2) target bundleno = 3 (0x3), region = 91 }
 0x97c   :  { %10769 = vsyncpa [#allocation6], 1 }
 0x97d   :  { %10771 = vsyncpa [#allocation6 + $0x1], 1 }

</bundles_post_ra>
